<compile_context>
chip_gen: v6e
topology: v6e:2x2x1
jax: 0.10.0
libtpu: 0.0.40
codegen_flags: <defaults>
</compile_context>

<pallas_src>
import functools
import math

import numpy as np
import jax
import jax.numpy as jnp
from jax import lax
from jax.experimental import pallas as pl
from jax.experimental.pallas import tpu as pltpu

NEG_SLOPE = 0.2
ACT_SCALE = math.sqrt(2.0)
# bf16 MXU operands / inter-layer activations (f32 accumulation everywhere).
# Set to jnp.float32 for exact-f32 validation against the PyTorch reference.
MXU_DTYPE = jnp.bfloat16
C0 = 2        # column offset of the interior inside the padded scratch
              # (2 keeps bf16 packed-pair alignment for the interior stores)
RGB_PAD = 8   # small lane pad for to_rgb output channels (>= output_nc)


def _round_up(v, m):
    return ((v + m - 1) // m) * m


# ---------------------------------------------------------------------------
# In-kernel helpers
# ---------------------------------------------------------------------------

def _leaky(v):
    """fused_leaky_relu epilogue (bias already added), f32 on the VPU."""
    return jnp.where(v >= 0.0, v, v * NEG_SLOPE) * ACT_SCALE


def _zero_halo(pad_s, *, H, W, C, Wp):
    """Zero only the 1-pixel halo actually read by the 3x3 taps (cheap, per
    step so it is correct under any grid-axis core sharding)."""
    pad_s[0:1, :, :] = jnp.zeros((1, Wp, C), MXU_DTYPE)                 # top row
    pad_s[H + 1:H + 3, :, :] = jnp.zeros((2, Wp, C), MXU_DTYPE)         # bottom rows
    pad_s[1:H + 1, 0:C0, :] = jnp.zeros((H, C0, C), MXU_DTYPE)          # left cols
    pad_s[1:H + 1, C0 + W:C0 + W + 1, :] = jnp.zeros((H, 1, C), MXU_DTYPE)  # right col


def _accumulate_taps(flat_bf, w_ref, acc_ref, *, Wp, M):
    """acc[h*Wp + w, :] = sum_{kh,kw,ci} pad[h+kh, w+C0-1+kw, ci] * w[kh,kw,ci,:].

    flat_bf is the zero-padded input flattened to ((H+3)*Wp, Cin) bf16: a single
    operand reused by all 9 MXU matmuls (no per-tap input copies).  The tap
    shift is a static slice of the f32 result (sublane shift), accumulated into
    the f32 VMEM scratch `acc_ref` (first tap assigns, so no zero-fill pass)."""
    first = True
    for kh in range(3):
        for kw in range(3):
            s = kh * Wp + (C0 - 1 + kw)
            prod = jnp.dot(flat_bf, w_ref[kh, kw],
                           preferred_element_type=jnp.float32)
            contrib = lax.slice_in_dim(prod, s, s + M, axis=0)
            if first:
                acc_ref[...] = contrib
                first = False
            else:
                acc_ref[...] += contrib


# ---------------------------------------------------------------------------
# Pallas kernels
# ---------------------------------------------------------------------------

def _resblock_kernel(x_ref, w1_ref, b1_ref, w2_ref, b2_ref, o_ref,
                     pad_s, acc_s, *, H, W, C, Wp, inv_sqrt2):
    """Fused ResBlock (downsample=False, identity skip):
       LReLU(conv3x3) -> LReLU(conv3x3) -> (out + x) / sqrt(2)."""
    M = H * Wp
    P = (H + 3) * Wp
    _zero_halo(pad_s, H=H, W=W, C=C, Wp=Wp)

    # conv1: pad -> 3x3 conv -> bias -> leaky*sqrt(2)
    pad_s[1:H + 1, C0:C0 + W, :] = x_ref[0].astype(MXU_DTYPE)
    _accumulate_taps(pad_s[...].reshape(P, C), w1_ref, acc_s, Wp=Wp, M=M)
    a1 = _leaky(acc_s[...] + b1_ref[...]).reshape(H, Wp, C)[:, :W, :]

    # conv2 on a1, re-padded in the same scratch (halo is still zero)
    pad_s[1:H + 1, C0:C0 + W, :] = a1.astype(MXU_DTYPE)
    _accumulate_taps(pad_s[...].reshape(P, C), w2_ref, acc_s, Wp=Wp, M=M)
    a2 = _leaky(acc_s[...] + b2_ref[...]).reshape(H, Wp, C)[:, :W, :]

    # residual combine (skip_gain = 1, identity skip); x re-read only here
    o_ref[0] = ((a2 + x_ref[0].astype(jnp.float32)) * inv_sqrt2).astype(o_ref.dtype)


def _conv3x3_act_kernel(x_ref, w_ref, b_ref, o_ref, pad_s, acc_s,
                        *, H, W, Cin, Cout, Wp):
    """Fused pad(1) + 3x3 conv + bias + leaky*sqrt(2).  Used for the
    phase-decomposed StyledConv(upsample=True): Cout = 4 * real Cout."""
    M = H * Wp
    P = (H + 3) * Wp
    _zero_halo(pad_s, H=H, W=W, C=Cin, Wp=Wp)
    pad_s[1:H + 1, C0:C0 + W, :] = x_ref[0].astype(MXU_DTYPE)
    _accumulate_taps(pad_s[...].reshape(P, Cin), w_ref, acc_s, Wp=Wp, M=M)
    a = _leaky(acc_s[...] + b_ref[...]).reshape(H, Wp, Cout)[:, :W, :]
    o_ref[0] = a.astype(o_ref.dtype)


def _conv1x1_act_kernel(x_ref, w_ref, b_ref, o_ref, *, H, W, Cin, Cout):
    """1x1 conv (single MXU matmul) + bias + leaky*sqrt(2).  With a
    block-diagonal weight it consumes the phase-stacked upsample layout."""
    x = x_ref[0].reshape(H * W, Cin).astype(MXU_DTYPE)
    acc = jnp.dot(x, w_ref[...], preferred_element_type=jnp.float32) + b_ref[...]
    o_ref[0] = _leaky(acc).reshape(H, W, Cout).astype(o_ref.dtype)


# ---------------------------------------------------------------------------
# pallas_call wrappers
# ---------------------------------------------------------------------------

def _cparams(footprint_bytes):
    limit = int(min(100 << 20, max(32 << 20, 2 * footprint_bytes + (4 << 20))))
    return pltpu.CompilerParams(dimension_semantics=("parallel",),
                                vmem_limit_bytes=limit)


def resblock_forward(p, x):
    N, H, W, C = x.shape
    Wp = _round_up(W + C0 + 1, 16)
    bs = jnp.dtype(MXU_DTYPE).itemsize
    foot = (2 * H * W * C * bs + 2 * 9 * C * C * bs + 2 * C * 4
            + (H + 3) * Wp * C * bs + H * Wp * C * 4)
    kern = functools.partial(_resblock_kernel, H=H, W=W, C=C, Wp=Wp,
                             inv_sqrt2=1.0 / math.sqrt(2.0))
    return pl.pallas_call(
        kern,
        out_shape=jax.ShapeDtypeStruct((N, H, W, C), MXU_DTYPE),
        grid=(N,),
        in_specs=[
            pl.BlockSpec((1, H, W, C), lambda n: (n, 0, 0, 0)),
            pl.BlockSpec((3, 3, C, C), lambda n: (0, 0, 0, 0)),
            pl.BlockSpec((1, C), lambda n: (0, 0)),
            pl.BlockSpec((3, 3, C, C), lambda n: (0, 0, 0, 0)),
            pl.BlockSpec((1, C), lambda n: (0, 0)),
        ],
        out_specs=pl.BlockSpec((1, H, W, C), lambda n: (n, 0, 0, 0)),
        scratch_shapes=[pltpu.VMEM((H + 3, Wp, C), MXU_DTYPE),
                        pltpu.VMEM((H * Wp, C), jnp.float32)],
        compiler_params=_cparams(foot),
    )(x, p["w1"], p["b1"], p["w2"], p["b2"])


def styled_conv_up_forward(p, x, interleave):
    """StyledConv(upsample=True): conv_transpose(stride2)+blur+noise(id)+LReLU
    as a 4-phase 3x3 conv at input resolution.  Output stays phase-stacked
    (N,H,W,4*Co) unless `interleave` (i.e. another styled conv follows)."""
    N, H, W, Cin = x.shape
    C4 = p["w"].shape[-1]
    Wp = _round_up(W + C0 + 1, 16)
    bs = jnp.dtype(MXU_DTYPE).itemsize
    foot = (H * W * (Cin + C4) * bs + 9 * Cin * C4 * bs + C4 * 4
            + (H + 3) * Wp * Cin * bs + H * Wp * C4 * 4)
    kern = functools.partial(_conv3x3_act_kernel, H=H, W=W, Cin=Cin, Cout=C4, Wp=Wp)
    out4 = pl.pallas_call(
        kern,
        out_shape=jax.ShapeDtypeStruct((N, H, W, C4), MXU_DTYPE),
        grid=(N,),
        in_specs=[
            pl.BlockSpec((1, H, W, Cin), lambda n: (n, 0, 0, 0)),
            pl.BlockSpec((3, 3, Cin, C4), lambda n: (0, 0, 0, 0)),
            pl.BlockSpec((1, C4), lambda n: (0, 0)),
        ],
        out_specs=pl.BlockSpec((1, H, W, C4), lambda n: (n, 0, 0, 0)),
        scratch_shapes=[pltpu.VMEM((H + 3, Wp, Cin), MXU_DTYPE),
                        pltpu.VMEM((H * Wp, C4), jnp.float32)],
        compiler_params=_cparams(foot),
    )(x, p["w"], p["b"])
    if not interleave:
        return out4                       # fused to_rgb consumes phases directly
    Co = C4 // 4
    out = out4.reshape(N, H, W, 2, 2, Co)
    out = out.transpose(0, 1, 3, 2, 4, 5).reshape(N, 2 * H, 2 * W, Co)
    return out


def to_rgb_forward(p, x, output_nc, phase_stacked):
    N, H, W, Cin = x.shape
    Cout = p["w"].shape[-1]
    bs = jnp.dtype(MXU_DTYPE).itemsize
    foot = H * W * Cin * bs + Cin * Cout * bs + H * W * Cout * 4
    kern = functools.partial(_conv1x1_act_kernel, H=H, W=W, Cin=Cin, Cout=Cout)
    out = pl.pallas_call(
        kern,
        out_shape=jax.ShapeDtypeStruct((N, H, W, Cout), jnp.float32),
        grid=(N,),
        in_specs=[
            pl.BlockSpec((1, H, W, Cin), lambda n: (n, 0, 0, 0)),
            pl.BlockSpec((Cin, Cout), lambda n: (0, 0)),
            pl.BlockSpec((1, Cout), lambda n: (0, 0)),
        ],
        out_specs=pl.BlockSpec((1, H, W, Cout), lambda n: (n, 0, 0, 0)),
        compiler_params=_cparams(foot),
    )(x, p["w"], p["b"])
    if phase_stacked:                      # interleave only the tiny RGB result
        outp = Cout // 4
        out = out.reshape(N, H, W, 2, 2, outp)
        out = out.transpose(0, 1, 3, 2, 4, 5).reshape(N, 2 * H, 2 * W, outp)
    return out[..., :output_nc]


# ---------------------------------------------------------------------------
# Parameter construction (all weight prep folded here, never per-forward)
# ---------------------------------------------------------------------------

def _phase_tap_matrix():
    """A[p, a, ky]: 1-D composition of the stride-2 conv_transpose tap ky with
    the [1,3,3,1] blur (upsample_factor=2, pad=(1,1)), expressed as a 3-tap
    same-resolution conv per output sub-pixel phase p (input row = h_out+a-1)."""
    k1 = np.array([1.0, 3.0, 3.0, 1.0])
    g = k1 / k1.sum() * 2.0                 # make_kernel + *factor, per axis
    A = np.zeros((2, 3, 3), np.float32)
    for p in range(2):
        for a in range(3):
            for ky in range(3):
                ap = p + 4 - 2 * a - ky
                if 0 <= ap < 4:
                    A[p, a, ky] = g[ap]
    return A


def init_conv3(key, cin, cout):
    """EqualConv2d(cin,cout,3,pad=1,bias=False) + FusedLeakyReLU, pre-scaled,
    stored HWIO / bf16."""
    w = jax.random.normal(key, (cout, cin, 3, 3), jnp.float32)
    w = w * (1.0 / math.sqrt(cin * 9))
    w_hwio = jnp.transpose(w, (2, 3, 1, 0)).astype(MXU_DTYPE)
    b = jnp.zeros((1, cout), jnp.float32)
    return w_hwio, b


def init_styled_conv(key, cin, cout):
    """ModulatedConv2d(upsample=True, style=None, demodulate=True) + blur +
    FusedLeakyReLU, pre-composed into a (3,3,cin,4*cout) phase weight."""
    w0 = jax.random.normal(key, (cout, cin, 3, 3), jnp.float32)
    w = w0 * (1.0 / math.sqrt(cin * 9))
    demod = jax.lax.rsqrt(jnp.sum(w * w, axis=(1, 2, 3)) + 1e-8)
    w = w * demod[:, None, None, None]                       # (cout, cin, 3, 3)
    A = jnp.asarray(_phase_tap_matrix())                     # (2, 3, 3)
    wph = jnp.einsum('pak,qbl,oikl->abipqo', A, A, w)        # (3,3,cin,2,2,cout)
    w_all = wph.reshape(3, 3, cin, 4 * cout).astype(MXU_DTYPE)
    bias = jnp.zeros((cout,), jnp.float32)                   # FusedLeakyReLU bias
    b_all = jnp.tile(bias, 4).reshape(1, 4 * cout)
    return {"w": w_all, "b": b_all}


def init_to_rgb(key, cin, output_nc, phase_stacked, outp=RGB_PAD):
    """ConvLayer(cin, output_nc, 1): EqualConv2d(bias=False) + FusedLeakyReLU.
    Output channels padded only to `outp`; block-diagonal over the 4 upsample
    phases when it consumes a phase-stacked input."""
    assert output_nc <= outp
    w0 = jax.random.normal(key, (output_nc, cin), jnp.float32) * (1.0 / math.sqrt(cin))
    w_small = jnp.zeros((cin, outp), jnp.float32).at[:, :output_nc].set(w0.T)
    b_small = jnp.zeros((outp,), jnp.float32)
    if phase_stacked:
        w = jnp.zeros((4 * cin, 4 * outp), jnp.float32)
        for ph in range(4):
            w = w.at[ph * cin:(ph + 1) * cin, ph * outp:(ph + 1) * outp].set(w_small)
        b = jnp.tile(b_small, 4)[None, :]
    else:
        w, b = w_small, b_small[None, :]
    return {"w": w.astype(MXU_DTYPE), "b": b}


def init_decoder(key, output_nc, ngf, n_blocks, size, num_downsampling):
    cm = ngf / 32
    channels = {
        4: min(512, int(round(4096 * cm))), 8: min(512, int(round(2048 * cm))),
        16: min(512, int(round(1024 * cm))), 32: min(512, int(round(512 * cm))),
        64: int(round(256 * cm)), 128: int(round(128 * cm)),
        256: int(round(64 * cm)), 512: int(round(32 * cm)),
        1024: int(round(16 * cm)),
    }
    n_keys = 2 * (n_blocks // 2) + num_downsampling + 1
    keys = iter(jax.random.split(key, max(n_keys, 2)))
    cur_res = 2 ** int(np.rint(np.log2(size))) // (2 ** num_downsampling)
    in_channels, in_res = channels[cur_res], cur_res

    res_blocks = []
    for _ in range(n_blocks // 2):
        c = channels[cur_res]
        w1, b1 = init_conv3(next(keys), c, c)
        w2, b2 = init_conv3(next(keys), c, c)
        res_blocks.append({"w1": w1, "b1": b1, "w2": w2, "b2": b2})

    styled = []
    for _ in range(num_downsampling):
        styled.append(init_styled_conv(next(keys), channels[cur_res],
                                       channels[cur_res * 2]))
        cur_res *= 2

    to_rgb = init_to_rgb(next(keys), channels[cur_res], output_nc,
                         phase_stacked=(num_downsampling > 0))
    params = {"res_blocks": res_blocks, "styled": styled, "to_rgb": to_rgb}
    return params, in_channels, in_res


# ---------------------------------------------------------------------------
# StyleGAN2Decoder forward
# ---------------------------------------------------------------------------

def stylegan2_decoder_forward(params, x_nchw, output_nc=3):
    """StyleGAN2Decoder.forward: ResBlocks -> StyledConv(up) x nd -> ConvLayer(1x1)."""
    x = jnp.transpose(x_nchw, (0, 2, 3, 1)).astype(MXU_DTYPE)     # NCHW -> NHWC bf16
    for bp in params["res_blocks"]:
        x = resblock_forward(bp, x)
    n_styled = len(params["styled"])
    for i, sp in enumerate(params["styled"]):
        # Last upsample stays phase-stacked; the fused 1x1 to_rgb consumes it.
        x = styled_conv_up_forward(sp, x, interleave=(i < n_styled - 1))
    x = to_rgb_forward(params["to_rgb"], x, output_nc,
                       phase_stacked=(n_styled > 0))
    return jnp.transpose(x, (0, 3, 1, 2)).astype(jnp.float32)     # NHWC -> NCHW


if __name__ == "__main__":
    key = jax.random.PRNGKey(0)
    pkey, xkey = jax.random.split(key)

    output_nc = 3
    ngf = 2                  # channel_multiplier = ngf/32 -> small channel counts
    n_blocks = 2             # -> one ResBlock in the decoder
    size = 16                # load_size == crop_size
    num_downsampling = 1     # stylegan2_G_num_downsampling
    batch = 2

    params, cin, cres = init_decoder(pkey, output_nc, ngf, n_blocks, size,
                                     num_downsampling)
    # Decoder input: downsampled feature map (batch, channels[size/2^nd], 8, 8)
    x = jax.random.normal(xkey, (batch, cin, cres, cres), jnp.float32)

    fwd = jax.jit(functools.partial(stylegan2_decoder_forward, output_nc=output_nc))
    out = jax.block_until_ready(fwd(params, x))

    assert out.shape == (batch, output_nc, size, size), out.shape
    assert bool(jnp.all(jnp.isfinite(out)))
    print("KERNEL_OK")
</pallas_src>

<mosaic_0001>
module attributes {stable_mosaic.version = 11 : i64} {
  func.func @_resblock_kernel(%arg0: i32, %arg1: memref<1x8x8x128xbf16, #tpu.memory_space<vmem>>, %arg2: memref<3x3x128x128xbf16, #tpu.memory_space<vmem>>, %arg3: memref<1x128xf32, #tpu.memory_space<vmem>>, %arg4: memref<3x3x128x128xbf16, #tpu.memory_space<vmem>>, %arg5: memref<1x128xf32, #tpu.memory_space<vmem>>, %arg6: memref<1x8x8x128xbf16, #tpu.memory_space<vmem>>, %arg7: memref<11x16x128xbf16, #tpu.memory_space<vmem>>, %arg8: memref<128x128xf32, #tpu.memory_space<vmem>>) attributes {dimension_semantics = [#tpu.dimension_semantics<parallel>], iteration_bounds = array<i64: 2>, scalar_prefetch = 0 : i64, scratch_operands = 2 : i64, tpu.core_type = #tpu.core_type<tc>, window_params = [{transform_indices = @transform_0, window_bounds = array<i64: 1, 8, 8, 128>}, {pipeline_mode = #tpu.pipeline_mode<synchronous>, transform_indices = @transform_1, window_bounds = array<i64: 3, 3, 128, 128>}, {pipeline_mode = #tpu.pipeline_mode<synchronous>, transform_indices = @transform_2, window_bounds = array<i64: 1, 128>}, {pipeline_mode = #tpu.pipeline_mode<synchronous>, transform_indices = @transform_3, window_bounds = array<i64: 3, 3, 128, 128>}, {pipeline_mode = #tpu.pipeline_mode<synchronous>, transform_indices = @transform_4, window_bounds = array<i64: 1, 128>}, {transform_indices = @transform_5, window_bounds = array<i64: 1, 8, 8, 128>}]} {
    %cst = arith.constant 0.000000e+00 : bf16
    %0 = vector.broadcast %cst : bf16 to vector<1x16x128xbf16>
    %c0 = arith.constant 0 : index
    %c0_0 = arith.constant 0 : index
    %c0_1 = arith.constant 0 : index
    %1 = vector.load %arg7[%c0, %c0_0, %c0_1] : memref<11x16x128xbf16, #tpu.memory_space<vmem>>, vector<1x16x128xbf16>
    tpu.vector_store %arg7[%c0, %c0_0, %c0_1], %0 {strides = array<i32>} : memref<11x16x128xbf16, #tpu.memory_space<vmem>>, vector<1x16x128xbf16>,
    %cst_2 = arith.constant 0.000000e+00 : bf16
    %2 = vector.broadcast %cst_2 : bf16 to vector<2x16x128xbf16>
    %c9 = arith.constant 9 : index
    %c0_3 = arith.constant 0 : index
    %c0_4 = arith.constant 0 : index
    %3 = vector.load %arg7[%c9, %c0_3, %c0_4] : memref<11x16x128xbf16, #tpu.memory_space<vmem>>, vector<2x16x128xbf16>
    tpu.vector_store %arg7[%c9, %c0_3, %c0_4], %2 {strides = array<i32>} : memref<11x16x128xbf16, #tpu.memory_space<vmem>>, vector<2x16x128xbf16>,
    %cst_5 = arith.constant 0.000000e+00 : bf16
    %4 = vector.broadcast %cst_5 : bf16 to vector<8x2x128xbf16>
    %c1 = arith.constant 1 : index
    %c0_6 = arith.constant 0 : index
    %c0_7 = arith.constant 0 : index
    %5 = vector.load %arg7[%c1, %c0_6, %c0_7] : memref<11x16x128xbf16, #tpu.memory_space<vmem>>, vector<8x2x128xbf16>
    tpu.vector_store %arg7[%c1, %c0_6, %c0_7], %4 {strides = array<i32>} : memref<11x16x128xbf16, #tpu.memory_space<vmem>>, vector<8x2x128xbf16>,
    %cst_8 = arith.constant 0.000000e+00 : bf16
    %6 = vector.broadcast %cst_8 : bf16 to vector<8x1x128xbf16>
    %c1_9 = arith.constant 1 : index
    %c10 = arith.constant 10 : index
    %c0_10 = arith.constant 0 : index
    %7 = vector.load %arg7[%c1_9, %c10, %c0_10] : memref<11x16x128xbf16, #tpu.memory_space<vmem>>, vector<8x1x128xbf16>
    tpu.vector_store %arg7[%c1_9, %c10, %c0_10], %6 {strides = array<i32>} : memref<11x16x128xbf16, #tpu.memory_space<vmem>>, vector<8x1x128xbf16>,
    %c0_11 = arith.constant 0 : index
    %c0_12 = arith.constant 0 : index
    %c0_13 = arith.constant 0 : index
    %c0_14 = arith.constant 0 : index
    %8 = vector.load %arg1[%c0_11, %c0_12, %c0_13, %c0_14] : memref<1x8x8x128xbf16, #tpu.memory_space<vmem>>, vector<1x8x8x128xbf16>
    %9 = vector.shape_cast %8 : vector<1x8x8x128xbf16> to vector<8x8x128xbf16>
    %c1_15 = arith.constant 1 : index
    %c2 = arith.constant 2 : index
    %c0_16 = arith.constant 0 : index
    %10 = vector.load %arg7[%c1_15, %c2, %c0_16] : memref<11x16x128xbf16, #tpu.memory_space<vmem>>, vector<8x8x128xbf16>
    tpu.vector_store %arg7[%c1_15, %c2, %c0_16], %9 {strides = array<i32>} : memref<11x16x128xbf16, #tpu.memory_space<vmem>>, vector<8x8x128xbf16>,
    %c0_17 = arith.constant 0 : index
    %c0_18 = arith.constant 0 : index
    %c0_19 = arith.constant 0 : index
    %11 = vector.load %arg7[%c0_17, %c0_18, %c0_19] : memref<11x16x128xbf16, #tpu.memory_space<vmem>>, vector<11x16x128xbf16>
    %12 = vector.shape_cast %11 : vector<11x16x128xbf16> to vector<176x128xbf16>
    %c0_20 = arith.constant 0 : index
    %c0_21 = arith.constant 0 : index
    %c0_22 = arith.constant 0 : index
    %c0_23 = arith.constant 0 : index
    %13 = vector.load %arg2[%c0_20, %c0_21, %c0_22, %c0_23] : memref<3x3x128x128xbf16, #tpu.memory_space<vmem>>, vector<1x1x128x128xbf16>
    %14 = vector.shape_cast %13 : vector<1x1x128x128xbf16> to vector<128x128xbf16>
    %cst_24 = arith.constant dense<0.000000e+00> : vector<176x128xf32>
    %15 = tpu.matmul %12, %14, %cst_24 {dimension_numbers = #tpu.dot_dimension_numbers<[1], [0], [0], [1], [0, 0, 1, 1], [], []>} : vector<176x128xbf16>, vector<128x128xbf16>, vector<176x128xf32> -> vector<176x128xf32>
    %16 = vector.extract_strided_slice %15 {offsets = [1, 0], sizes = [128, 128], strides = [1, 1]} : vector<176x128xf32> to vector<128x128xf32>
    %c0_25 = arith.constant 0 : index
    %c0_26 = arith.constant 0 : index
    %17 = vector.load %arg8[%c0_25, %c0_26] : memref<128x128xf32, #tpu.memory_space<vmem>>, vector<128x128xf32>
    tpu.vector_store %arg8[%c0_25, %c0_26], %16 {strides = array<i32>} : memref<128x128xf32, #tpu.memory_space<vmem>>, vector<128x128xf32>,
    %c0_27 = arith.constant 0 : index
    %c1_28 = arith.constant 1 : index
    %c0_29 = arith.constant 0 : index
    %c0_30 = arith.constant 0 : index
    %18 = vector.load %arg2[%c0_27, %c1_28, %c0_29, %c0_30] : memref<3x3x128x128xbf16, #tpu.memory_space<vmem>>, vector<1x1x128x128xbf16>
    %19 = vector.shape_cast %18 : vector<1x1x128x128xbf16> to vector<128x128xbf16>
    %cst_31 = arith.constant dense<0.000000e+00> : vector<176x128xf32>
    %20 = tpu.matmul %12, %19, %cst_31 {dimension_numbers = #tpu.dot_dimension_numbers<[1], [0], [0], [1], [0, 0, 1, 1], [], []>} : vector<176x128xbf16>, vector<128x128xbf16>, vector<176x128xf32> -> vector<176x128xf32>
    %21 = vector.extract_strided_slice %20 {offsets = [2, 0], sizes = [128, 128], strides = [1, 1]} : vector<176x128xf32> to vector<128x128xf32>
    %c0_32 = arith.constant 0 : index
    %c0_33 = arith.constant 0 : index
    %22 = vector.load %arg8[%c0_32, %c0_33] : memref<128x128xf32, #tpu.memory_space<vmem>>, vector<128x128xf32>
    %23 = arith.addf %22, %21 : vector<128x128xf32>
    %c0_34 = arith.constant 0 : index
    %c0_35 = arith.constant 0 : index
    %24 = vector.load %arg8[%c0_34, %c0_35] : memref<128x128xf32, #tpu.memory_space<vmem>>, vector<128x128xf32>
    tpu.vector_store %arg8[%c0_34, %c0_35], %23 {strides = array<i32>} : memref<128x128xf32, #tpu.memory_space<vmem>>, vector<128x128xf32>,
    %c0_36 = arith.constant 0 : index
    %c2_37 = arith.constant 2 : index
    %c0_38 = arith.constant 0 : index
    %c0_39 = arith.constant 0 : index
    %25 = vector.load %arg2[%c0_36, %c2_37, %c0_38, %c0_39] : memref<3x3x128x128xbf16, #tpu.memory_space<vmem>>, vector<1x1x128x128xbf16>
    %26 = vector.shape_cast %25 : vector<1x1x128x128xbf16> to vector<128x128xbf16>
    %cst_40 = arith.constant dense<0.000000e+00> : vector<176x128xf32>
    %27 = tpu.matmul %12, %26, %cst_40 {dimension_numbers = #tpu.dot_dimension_numbers<[1], [0], [0], [1], [0, 0, 1, 1], [], []>} : vector<176x128xbf16>, vector<128x128xbf16>, vector<176x128xf32> -> vector<176x128xf32>
    %28 = vector.extract_strided_slice %27 {offsets = [3, 0], sizes = [128, 128], strides = [1, 1]} : vector<176x128xf32> to vector<128x128xf32>
    %c0_41 = arith.constant 0 : index
    %c0_42 = arith.constant 0 : index
    %29 = vector.load %arg8[%c0_41, %c0_42] : memref<128x128xf32, #tpu.memory_space<vmem>>, vector<128x128xf32>
    %30 = arith.addf %29, %28 : vector<128x128xf32>
    %c0_43 = arith.constant 0 : index
    %c0_44 = arith.constant 0 : index
    %31 = vector.load %arg8[%c0_43, %c0_44] : memref<128x128xf32, #tpu.memory_space<vmem>>, vector<128x128xf32>
    tpu.vector_store %arg8[%c0_43, %c0_44], %30 {strides = array<i32>} : memref<128x128xf32, #tpu.memory_space<vmem>>, vector<128x128xf32>,
    %c1_45 = arith.constant 1 : index
    %c0_46 = arith.constant 0 : index
    %c0_47 = arith.constant 0 : index
    %c0_48 = arith.constant 0 : index
    %32 = vector.load %arg2[%c1_45, %c0_46, %c0_47, %c0_48] : memref<3x3x128x128xbf16, #tpu.memory_space<vmem>>, vector<1x1x128x128xbf16>
    %33 = vector.shape_cast %32 : vector<1x1x128x128xbf16> to vector<128x128xbf16>
    %cst_49 = arith.constant dense<0.000000e+00> : vector<176x128xf32>
    %34 = tpu.matmul %12, %33, %cst_49 {dimension_numbers = #tpu.dot_dimension_numbers<[1], [0], [0], [1], [0, 0, 1, 1], [], []>} : vector<176x128xbf16>, vector<128x128xbf16>, vector<176x128xf32> -> vector<176x128xf32>
    %35 = vector.extract_strided_slice %34 {offsets = [17, 0], sizes = [128, 128], strides = [1, 1]} : vector<176x128xf32> to vector<128x128xf32>
    %c0_50 = arith.constant 0 : index
    %c0_51 = arith.constant 0 : index
    %36 = vector.load %arg8[%c0_50, %c0_51] : memref<128x128xf32, #tpu.memory_space<vmem>>, vector<128x128xf32>
    %37 = arith.addf %36, %35 : vector<128x128xf32>
    %c0_52 = arith.constant 0 : index
    %c0_53 = arith.constant 0 : index
    %38 = vector.load %arg8[%c0_52, %c0_53] : memref<128x128xf32, #tpu.memory_space<vmem>>, vector<128x128xf32>
    tpu.vector_store %arg8[%c0_52, %c0_53], %37 {strides = array<i32>} : memref<128x128xf32, #tpu.memory_space<vmem>>, vector<128x128xf32>,
    %c1_54 = arith.constant 1 : index
    %c1_55 = arith.constant 1 : index
    %c0_56 = arith.constant 0 : index
    %c0_57 = arith.constant 0 : index
    %39 = vector.load %arg2[%c1_54, %c1_55, %c0_56, %c0_57] : memref<3x3x128x128xbf16, #tpu.memory_space<vmem>>, vector<1x1x128x128xbf16>
    %40 = vector.shape_cast %39 : vector<1x1x128x128xbf16> to vector<128x128xbf16>
    %cst_58 = arith.constant dense<0.000000e+00> : vector<176x128xf32>
    %41 = tpu.matmul %12, %40, %cst_58 {dimension_numbers = #tpu.dot_dimension_numbers<[1], [0], [0], [1], [0, 0, 1, 1], [], []>} : vector<176x128xbf16>, vector<128x128xbf16>, vector<176x128xf32> -> vector<176x128xf32>
    %42 = vector.extract_strided_slice %41 {offsets = [18, 0], sizes = [128, 128], strides = [1, 1]} : vector<176x128xf32> to vector<128x128xf32>
    %c0_59 = arith.constant 0 : index
    %c0_60 = arith.constant 0 : index
    %43 = vector.load %arg8[%c0_59, %c0_60] : memref<128x128xf32, #tpu.memory_space<vmem>>, vector<128x128xf32>
    %44 = arith.addf %43, %42 : vector<128x128xf32>
    %c0_61 = arith.constant 0 : index
    %c0_62 = arith.constant 0 : index
    %45 = vector.load %arg8[%c0_61, %c0_62] : memref<128x128xf32, #tpu.memory_space<vmem>>, vector<128x128xf32>
    tpu.vector_store %arg8[%c0_61, %c0_62], %44 {strides = array<i32>} : memref<128x128xf32, #tpu.memory_space<vmem>>, vector<128x128xf32>,
    %c1_63 = arith.constant 1 : index
    %c2_64 = arith.constant 2 : index
    %c0_65 = arith.constant 0 : index
    %c0_66 = arith.constant 0 : index
    %46 = vector.load %arg2[%c1_63, %c2_64, %c0_65, %c0_66] : memref<3x3x128x128xbf16, #tpu.memory_space<vmem>>, vector<1x1x128x128xbf16>
    %47 = vector.shape_cast %46 : vector<1x1x128x128xbf16> to vector<128x128xbf16>
    %cst_67 = arith.constant dense<0.000000e+00> : vector<176x128xf32>
    %48 = tpu.matmul %12, %47, %cst_67 {dimension_numbers = #tpu.dot_dimension_numbers<[1], [0], [0], [1], [0, 0, 1, 1], [], []>} : vector<176x128xbf16>, vector<128x128xbf16>, vector<176x128xf32> -> vector<176x128xf32>
    %49 = vector.extract_strided_slice %48 {offsets = [19, 0], sizes = [128, 128], strides = [1, 1]} : vector<176x128xf32> to vector<128x128xf32>
    %c0_68 = arith.constant 0 : index
    %c0_69 = arith.constant 0 : index
    %50 = vector.load %arg8[%c0_68, %c0_69] : memref<128x128xf32, #tpu.memory_space<vmem>>, vector<128x128xf32>
    %51 = arith.addf %50, %49 : vector<128x128xf32>
    %c0_70 = arith.constant 0 : index
    %c0_71 = arith.constant 0 : index
    %52 = vector.load %arg8[%c0_70, %c0_71] : memref<128x128xf32, #tpu.memory_space<vmem>>, vector<128x128xf32>
    tpu.vector_store %arg8[%c0_70, %c0_71], %51 {strides = array<i32>} : memref<128x128xf32, #tpu.memory_space<vmem>>, vector<128x128xf32>,
    %c2_72 = arith.constant 2 : index
    %c0_73 = arith.constant 0 : index
    %c0_74 = arith.constant 0 : index
    %c0_75 = arith.constant 0 : index
    %53 = vector.load %arg2[%c2_72, %c0_73, %c0_74, %c0_75] : memref<3x3x128x128xbf16, #tpu.memory_space<vmem>>, vector<1x1x128x128xbf16>
    %54 = vector.shape_cast %53 : vector<1x1x128x128xbf16> to vector<128x128xbf16>
    %cst_76 = arith.constant dense<0.000000e+00> : vector<176x128xf32>
    %55 = tpu.matmul %12, %54, %cst_76 {dimension_numbers = #tpu.dot_dimension_numbers<[1], [0], [0], [1], [0, 0, 1, 1], [], []>} : vector<176x128xbf16>, vector<128x128xbf16>, vector<176x128xf32> -> vector<176x128xf32>
    %56 = vector.extract_strided_slice %55 {offsets = [33, 0], sizes = [128, 128], strides = [1, 1]} : vector<176x128xf32> to vector<128x128xf32>
    %c0_77 = arith.constant 0 : index
    %c0_78 = arith.constant 0 : index
    %57 = vector.load %arg8[%c0_77, %c0_78] : memref<128x128xf32, #tpu.memory_space<vmem>>, vector<128x128xf32>
    %58 = arith.addf %57, %56 : vector<128x128xf32>
    %c0_79 = arith.constant 0 : index
    %c0_80 = arith.constant 0 : index
    %59 = vector.load %arg8[%c0_79, %c0_80] : memref<128x128xf32, #tpu.memory_space<vmem>>, vector<128x128xf32>
    tpu.vector_store %arg8[%c0_79, %c0_80], %58 {strides = array<i32>} : memref<128x128xf32, #tpu.memory_space<vmem>>, vector<128x128xf32>,
    %c2_81 = arith.constant 2 : index
    %c1_82 = arith.constant 1 : index
    %c0_83 = arith.constant 0 : index
    %c0_84 = arith.constant 0 : index
    %60 = vector.load %arg2[%c2_81, %c1_82, %c0_83, %c0_84] : memref<3x3x128x128xbf16, #tpu.memory_space<vmem>>, vector<1x1x128x128xbf16>
    %61 = vector.shape_cast %60 : vector<1x1x128x128xbf16> to vector<128x128xbf16>
    %cst_85 = arith.constant dense<0.000000e+00> : vector<176x128xf32>
    %62 = tpu.matmul %12, %61, %cst_85 {dimension_numbers = #tpu.dot_dimension_numbers<[1], [0], [0], [1], [0, 0, 1, 1], [], []>} : vector<176x128xbf16>, vector<128x128xbf16>, vector<176x128xf32> -> vector<176x128xf32>
    %63 = vector.extract_strided_slice %62 {offsets = [34, 0], sizes = [128, 128], strides = [1, 1]} : vector<176x128xf32> to vector<128x128xf32>
    %c0_86 = arith.constant 0 : index
    %c0_87 = arith.constant 0 : index
    %64 = vector.load %arg8[%c0_86, %c0_87] : memref<128x128xf32, #tpu.memory_space<vmem>>, vector<128x128xf32>
    %65 = arith.addf %64, %63 : vector<128x128xf32>
    %c0_88 = arith.constant 0 : index
    %c0_89 = arith.constant 0 : index
    %66 = vector.load %arg8[%c0_88, %c0_89] : memref<128x128xf32, #tpu.memory_space<vmem>>, vector<128x128xf32>
    tpu.vector_store %arg8[%c0_88, %c0_89], %65 {strides = array<i32>} : memref<128x128xf32, #tpu.memory_space<vmem>>, vector<128x128xf32>,
    %c2_90 = arith.constant 2 : index
    %c2_91 = arith.constant 2 : index
    %c0_92 = arith.constant 0 : index
    %c0_93 = arith.constant 0 : index
    %67 = vector.load %arg2[%c2_90, %c2_91, %c0_92, %c0_93] : memref<3x3x128x128xbf16, #tpu.memory_space<vmem>>, vector<1x1x128x128xbf16>
    %68 = vector.shape_cast %67 : vector<1x1x128x128xbf16> to vector<128x128xbf16>
    %cst_94 = arith.constant dense<0.000000e+00> : vector<176x128xf32>
    %69 = tpu.matmul %12, %68, %cst_94 {dimension_numbers = #tpu.dot_dimension_numbers<[1], [0], [0], [1], [0, 0, 1, 1], [], []>} : vector<176x128xbf16>, vector<128x128xbf16>, vector<176x128xf32> -> vector<176x128xf32>
    %70 = vector.extract_strided_slice %69 {offsets = [35, 0], sizes = [128, 128], strides = [1, 1]} : vector<176x128xf32> to vector<128x128xf32>
    %c0_95 = arith.constant 0 : index
    %c0_96 = arith.constant 0 : index
    %71 = vector.load %arg8[%c0_95, %c0_96] : memref<128x128xf32, #tpu.memory_space<vmem>>, vector<128x128xf32>
    %72 = arith.addf %71, %70 : vector<128x128xf32>
    %c0_97 = arith.constant 0 : index
    %c0_98 = arith.constant 0 : index
    %73 = vector.load %arg8[%c0_97, %c0_98] : memref<128x128xf32, #tpu.memory_space<vmem>>, vector<128x128xf32>
    tpu.vector_store %arg8[%c0_97, %c0_98], %72 {strides = array<i32>} : memref<128x128xf32, #tpu.memory_space<vmem>>, vector<128x128xf32>,
    %c0_99 = arith.constant 0 : index
    %c0_100 = arith.constant 0 : index
    %74 = vector.load %arg8[%c0_99, %c0_100] : memref<128x128xf32, #tpu.memory_space<vmem>>, vector<128x128xf32>
    %c0_101 = arith.constant 0 : index
    %c0_102 = arith.constant 0 : index
    %75 = vector.load %arg3[%c0_101, %c0_102] : memref<1x128xf32, #tpu.memory_space<vmem>>, vector<1x128xf32>
    %76 = vector.broadcast %75 : vector<1x128xf32> to vector<128x128xf32>
    %77 = arith.addf %74, %76 : vector<128x128xf32>
    %cst_103 = arith.constant 0.000000e+00 : f32
    %78 = vector.broadcast %cst_103 : f32 to vector<128x128xf32>
    %79 = arith.cmpf oge, %77, %78 : vector<128x128xf32>
    %cst_104 = arith.constant 2.000000e-01 : f32
    %80 = vector.broadcast %cst_104 : f32 to vector<128x128xf32>
    %81 = arith.mulf %77, %80 : vector<128x128xf32>
    %82 = arith.select %79, %77, %81 : vector<128x128xi1>, vector<128x128xf32>
    %cst_105 = arith.constant 1.41421354 : f32
    %83 = vector.broadcast %cst_105 : f32 to vector<128x128xf32>
    %84 = arith.mulf %82, %83 : vector<128x128xf32>
    %85 = vector.shape_cast %84 : vector<128x128xf32> to vector<8x16x128xf32>
    %86 = vector.extract_strided_slice %85 {offsets = [0, 0, 0], sizes = [8, 8, 128], strides = [1, 1, 1]} : vector<8x16x128xf32> to vector<8x8x128xf32>
    %87 = arith.truncf %86 : vector<8x8x128xf32> to vector<8x8x128xbf16>
    %c1_106 = arith.constant 1 : index
    %c2_107 = arith.constant 2 : index
    %c0_108 = arith.constant 0 : index
    %88 = vector.load %arg7[%c1_106, %c2_107, %c0_108] : memref<11x16x128xbf16, #tpu.memory_space<vmem>>, vector<8x8x128xbf16>
    tpu.vector_store %arg7[%c1_106, %c2_107, %c0_108], %87 {strides = array<i32>} : memref<11x16x128xbf16, #tpu.memory_space<vmem>>, vector<8x8x128xbf16>,
    %c0_109 = arith.constant 0 : index
    %c0_110 = arith.constant 0 : index
    %c0_111 = arith.constant 0 : index
    %89 = vector.load %arg7[%c0_109, %c0_110, %c0_111] : memref<11x16x128xbf16, #tpu.memory_space<vmem>>, vector<11x16x128xbf16>
    %90 = vector.shape_cast %89 : vector<11x16x128xbf16> to vector<176x128xbf16>
    %c0_112 = arith.constant 0 : index
    %c0_113 = arith.constant 0 : index
    %c0_114 = arith.constant 0 : index
    %c0_115 = arith.constant 0 : index
    %91 = vector.load %arg4[%c0_112, %c0_113, %c0_114, %c0_115] : memref<3x3x128x128xbf16, #tpu.memory_space<vmem>>, vector<1x1x128x128xbf16>
    %92 = vector.shape_cast %91 : vector<1x1x128x128xbf16> to vector<128x128xbf16>
    %cst_116 = arith.constant dense<0.000000e+00> : vector<176x128xf32>
    %93 = tpu.matmul %90, %92, %cst_116 {dimension_numbers = #tpu.dot_dimension_numbers<[1], [0], [0], [1], [0, 0, 1, 1], [], []>} : vector<176x128xbf16>, vector<128x128xbf16>, vector<176x128xf32> -> vector<176x128xf32>
    %94 = vector.extract_strided_slice %93 {offsets = [1, 0], sizes = [128, 128], strides = [1, 1]} : vector<176x128xf32> to vector<128x128xf32>
    %c0_117 = arith.constant 0 : index
    %c0_118 = arith.constant 0 : index
    %95 = vector.load %arg8[%c0_117, %c0_118] : memref<128x128xf32, #tpu.memory_space<vmem>>, vector<128x128xf32>
    tpu.vector_store %arg8[%c0_117, %c0_118], %94 {strides = array<i32>} : memref<128x128xf32, #tpu.memory_space<vmem>>, vector<128x128xf32>,
    %c0_119 = arith.constant 0 : index
    %c1_120 = arith.constant 1 : index
    %c0_121 = arith.constant 0 : index
    %c0_122 = arith.constant 0 : index
    %96 = vector.load %arg4[%c0_119, %c1_120, %c0_121, %c0_122] : memref<3x3x128x128xbf16, #tpu.memory_space<vmem>>, vector<1x1x128x128xbf16>
    %97 = vector.shape_cast %96 : vector<1x1x128x128xbf16> to vector<128x128xbf16>
    %cst_123 = arith.constant dense<0.000000e+00> : vector<176x128xf32>
    %98 = tpu.matmul %90, %97, %cst_123 {dimension_numbers = #tpu.dot_dimension_numbers<[1], [0], [0], [1], [0, 0, 1, 1], [], []>} : vector<176x128xbf16>, vector<128x128xbf16>, vector<176x128xf32> -> vector<176x128xf32>
    %99 = vector.extract_strided_slice %98 {offsets = [2, 0], sizes = [128, 128], strides = [1, 1]} : vector<176x128xf32> to vector<128x128xf32>
    %c0_124 = arith.constant 0 : index
    %c0_125 = arith.constant 0 : index
    %100 = vector.load %arg8[%c0_124, %c0_125] : memref<128x128xf32, #tpu.memory_space<vmem>>, vector<128x128xf32>
    %101 = arith.addf %100, %99 : vector<128x128xf32>
    %c0_126 = arith.constant 0 : index
    %c0_127 = arith.constant 0 : index
    %102 = vector.load %arg8[%c0_126, %c0_127] : memref<128x128xf32, #tpu.memory_space<vmem>>, vector<128x128xf32>
    tpu.vector_store %arg8[%c0_126, %c0_127], %101 {strides = array<i32>} : memref<128x128xf32, #tpu.memory_space<vmem>>, vector<128x128xf32>,
    %c0_128 = arith.constant 0 : index
    %c2_129 = arith.constant 2 : index
    %c0_130 = arith.constant 0 : index
    %c0_131 = arith.constant 0 : index
    %103 = vector.load %arg4[%c0_128, %c2_129, %c0_130, %c0_131] : memref<3x3x128x128xbf16, #tpu.memory_space<vmem>>, vector<1x1x128x128xbf16>
    %104 = vector.shape_cast %103 : vector<1x1x128x128xbf16> to vector<128x128xbf16>
    %cst_132 = arith.constant dense<0.000000e+00> : vector<176x128xf32>
    %105 = tpu.matmul %90, %104, %cst_132 {dimension_numbers = #tpu.dot_dimension_numbers<[1], [0], [0], [1], [0, 0, 1, 1], [], []>} : vector<176x128xbf16>, vector<128x128xbf16>, vector<176x128xf32> -> vector<176x128xf32>
    %106 = vector.extract_strided_slice %105 {offsets = [3, 0], sizes = [128, 128], strides = [1, 1]} : vector<176x128xf32> to vector<128x128xf32>
    %c0_133 = arith.constant 0 : index
    %c0_134 = arith.constant 0 : index
    %107 = vector.load %arg8[%c0_133, %c0_134] : memref<128x128xf32, #tpu.memory_space<vmem>>, vector<128x128xf32>
    %108 = arith.addf %107, %106 : vector<128x128xf32>
    %c0_135 = arith.constant 0 : index
    %c0_136 = arith.constant 0 : index
    %109 = vector.load %arg8[%c0_135, %c0_136] : memref<128x128xf32, #tpu.memory_space<vmem>>, vector<128x128xf32>
    tpu.vector_store %arg8[%c0_135, %c0_136], %108 {strides = array<i32>} : memref<128x128xf32, #tpu.memory_space<vmem>>, vector<128x128xf32>,
    %c1_137 = arith.constant 1 : index
    %c0_138 = arith.constant 0 : index
    %c0_139 = arith.constant 0 : index
    %c0_140 = arith.constant 0 : index
    %110 = vector.load %arg4[%c1_137, %c0_138, %c0_139, %c0_140] : memref<3x3x128x128xbf16, #tpu.memory_space<vmem>>, vector<1x1x128x128xbf16>
    %111 = vector.shape_cast %110 : vector<1x1x128x128xbf16> to vector<128x128xbf16>
    %cst_141 = arith.constant dense<0.000000e+00> : vector<176x128xf32>
    %112 = tpu.matmul %90, %111, %cst_141 {dimension_numbers = #tpu.dot_dimension_numbers<[1], [0], [0], [1], [0, 0, 1, 1], [], []>} : vector<176x128xbf16>, vector<128x128xbf16>, vector<176x128xf32> -> vector<176x128xf32>
    %113 = vector.extract_strided_slice %112 {offsets = [17, 0], sizes = [128, 128], strides = [1, 1]} : vector<176x128xf32> to vector<128x128xf32>
    %c0_142 = arith.constant 0 : index
    %c0_143 = arith.constant 0 : index
    %114 = vector.load %arg8[%c0_142, %c0_143] : memref<128x128xf32, #tpu.memory_space<vmem>>, vector<128x128xf32>
    %115 = arith.addf %114, %113 : vector<128x128xf32>
    %c0_144 = arith.constant 0 : index
    %c0_145 = arith.constant 0 : index
    %116 = vector.load %arg8[%c0_144, %c0_145] : memref<128x128xf32, #tpu.memory_space<vmem>>, vector<128x128xf32>
    tpu.vector_store %arg8[%c0_144, %c0_145], %115 {strides = array<i32>} : memref<128x128xf32, #tpu.memory_space<vmem>>, vector<128x128xf32>,
    %c1_146 = arith.constant 1 : index
    %c1_147 = arith.constant 1 : index
    %c0_148 = arith.constant 0 : index
    %c0_149 = arith.constant 0 : index
    %117 = vector.load %arg4[%c1_146, %c1_147, %c0_148, %c0_149] : memref<3x3x128x128xbf16, #tpu.memory_space<vmem>>, vector<1x1x128x128xbf16>
    %118 = vector.shape_cast %117 : vector<1x1x128x128xbf16> to vector<128x128xbf16>
    %cst_150 = arith.constant dense<0.000000e+00> : vector<176x128xf32>
    %119 = tpu.matmul %90, %118, %cst_150 {dimension_numbers = #tpu.dot_dimension_numbers<[1], [0], [0], [1], [0, 0, 1, 1], [], []>} : vector<176x128xbf16>, vector<128x128xbf16>, vector<176x128xf32> -> vector<176x128xf32>
    %120 = vector.extract_strided_slice %119 {offsets = [18, 0], sizes = [128, 128], strides = [1, 1]} : vector<176x128xf32> to vector<128x128xf32>
    %c0_151 = arith.constant 0 : index
    %c0_152 = arith.constant 0 : index
    %121 = vector.load %arg8[%c0_151, %c0_152] : memref<128x128xf32, #tpu.memory_space<vmem>>, vector<128x128xf32>
    %122 = arith.addf %121, %120 : vector<128x128xf32>
    %c0_153 = arith.constant 0 : index
    %c0_154 = arith.constant 0 : index
    %123 = vector.load %arg8[%c0_153, %c0_154] : memref<128x128xf32, #tpu.memory_space<vmem>>, vector<128x128xf32>
    tpu.vector_store %arg8[%c0_153, %c0_154], %122 {strides = array<i32>} : memref<128x128xf32, #tpu.memory_space<vmem>>, vector<128x128xf32>,
    %c1_155 = arith.constant 1 : index
    %c2_156 = arith.constant 2 : index
    %c0_157 = arith.constant 0 : index
    %c0_158 = arith.constant 0 : index
    %124 = vector.load %arg4[%c1_155, %c2_156, %c0_157, %c0_158] : memref<3x3x128x128xbf16, #tpu.memory_space<vmem>>, vector<1x1x128x128xbf16>
    %125 = vector.shape_cast %124 : vector<1x1x128x128xbf16> to vector<128x128xbf16>
    %cst_159 = arith.constant dense<0.000000e+00> : vector<176x128xf32>
    %126 = tpu.matmul %90, %125, %cst_159 {dimension_numbers = #tpu.dot_dimension_numbers<[1], [0], [0], [1], [0, 0, 1, 1], [], []>} : vector<176x128xbf16>, vector<128x128xbf16>, vector<176x128xf32> -> vector<176x128xf32>
    %127 = vector.extract_strided_slice %126 {offsets = [19, 0], sizes = [128, 128], strides = [1, 1]} : vector<176x128xf32> to vector<128x128xf32>
    %c0_160 = arith.constant 0 : index
    %c0_161 = arith.constant 0 : index
    %128 = vector.load %arg8[%c0_160, %c0_161] : memref<128x128xf32, #tpu.memory_space<vmem>>, vector<128x128xf32>
    %129 = arith.addf %128, %127 : vector<128x128xf32>
    %c0_162 = arith.constant 0 : index
    %c0_163 = arith.constant 0 : index
    %130 = vector.load %arg8[%c0_162, %c0_163] : memref<128x128xf32, #tpu.memory_space<vmem>>, vector<128x128xf32>
    tpu.vector_store %arg8[%c0_162, %c0_163], %129 {strides = array<i32>} : memref<128x128xf32, #tpu.memory_space<vmem>>, vector<128x128xf32>,
    %c2_164 = arith.constant 2 : index
    %c0_165 = arith.constant 0 : index
    %c0_166 = arith.constant 0 : index
    %c0_167 = arith.constant 0 : index
    %131 = vector.load %arg4[%c2_164, %c0_165, %c0_166, %c0_167] : memref<3x3x128x128xbf16, #tpu.memory_space<vmem>>, vector<1x1x128x128xbf16>
    %132 = vector.shape_cast %131 : vector<1x1x128x128xbf16> to vector<128x128xbf16>
    %cst_168 = arith.constant dense<0.000000e+00> : vector<176x128xf32>
    %133 = tpu.matmul %90, %132, %cst_168 {dimension_numbers = #tpu.dot_dimension_numbers<[1], [0], [0], [1], [0, 0, 1, 1], [], []>} : vector<176x128xbf16>, vector<128x128xbf16>, vector<176x128xf32> -> vector<176x128xf32>
    %134 = vector.extract_strided_slice %133 {offsets = [33, 0], sizes = [128, 128], strides = [1, 1]} : vector<176x128xf32> to vector<128x128xf32>
    %c0_169 = arith.constant 0 : index
    %c0_170 = arith.constant 0 : index
    %135 = vector.load %arg8[%c0_169, %c0_170] : memref<128x128xf32, #tpu.memory_space<vmem>>, vector<128x128xf32>
    %136 = arith.addf %135, %134 : vector<128x128xf32>
    %c0_171 = arith.constant 0 : index
    %c0_172 = arith.constant 0 : index
    %137 = vector.load %arg8[%c0_171, %c0_172] : memref<128x128xf32, #tpu.memory_space<vmem>>, vector<128x128xf32>
    tpu.vector_store %arg8[%c0_171, %c0_172], %136 {strides = array<i32>} : memref<128x128xf32, #tpu.memory_space<vmem>>, vector<128x128xf32>,
    %c2_173 = arith.constant 2 : index
    %c1_174 = arith.constant 1 : index
    %c0_175 = arith.constant 0 : index
    %c0_176 = arith.constant 0 : index
    %138 = vector.load %arg4[%c2_173, %c1_174, %c0_175, %c0_176] : memref<3x3x128x128xbf16, #tpu.memory_space<vmem>>, vector<1x1x128x128xbf16>
    %139 = vector.shape_cast %138 : vector<1x1x128x128xbf16> to vector<128x128xbf16>
    %cst_177 = arith.constant dense<0.000000e+00> : vector<176x128xf32>
    %140 = tpu.matmul %90, %139, %cst_177 {dimension_numbers = #tpu.dot_dimension_numbers<[1], [0], [0], [1], [0, 0, 1, 1], [], []>} : vector<176x128xbf16>, vector<128x128xbf16>, vector<176x128xf32> -> vector<176x128xf32>
    %141 = vector.extract_strided_slice %140 {offsets = [34, 0], sizes = [128, 128], strides = [1, 1]} : vector<176x128xf32> to vector<128x128xf32>
    %c0_178 = arith.constant 0 : index
    %c0_179 = arith.constant 0 : index
    %142 = vector.load %arg8[%c0_178, %c0_179] : memref<128x128xf32, #tpu.memory_space<vmem>>, vector<128x128xf32>
    %143 = arith.addf %142, %141 : vector<128x128xf32>
    %c0_180 = arith.constant 0 : index
    %c0_181 = arith.constant 0 : index
    %144 = vector.load %arg8[%c0_180, %c0_181] : memref<128x128xf32, #tpu.memory_space<vmem>>, vector<128x128xf32>
    tpu.vector_store %arg8[%c0_180, %c0_181], %143 {strides = array<i32>} : memref<128x128xf32, #tpu.memory_space<vmem>>, vector<128x128xf32>,
    %c2_182 = arith.constant 2 : index
    %c2_183 = arith.constant 2 : index
    %c0_184 = arith.constant 0 : index
    %c0_185 = arith.constant 0 : index
    %145 = vector.load %arg4[%c2_182, %c2_183, %c0_184, %c0_185] : memref<3x3x128x128xbf16, #tpu.memory_space<vmem>>, vector<1x1x128x128xbf16>
    %146 = vector.shape_cast %145 : vector<1x1x128x128xbf16> to vector<128x128xbf16>
    %cst_186 = arith.constant dense<0.000000e+00> : vector<176x128xf32>
    %147 = tpu.matmul %90, %146, %cst_186 {dimension_numbers = #tpu.dot_dimension_numbers<[1], [0], [0], [1], [0, 0, 1, 1], [], []>} : vector<176x128xbf16>, vector<128x128xbf16>, vector<176x128xf32> -> vector<176x128xf32>
    %148 = vector.extract_strided_slice %147 {offsets = [35, 0], sizes = [128, 128], strides = [1, 1]} : vector<176x128xf32> to vector<128x128xf32>
    %c0_187 = arith.constant 0 : index
    %c0_188 = arith.constant 0 : index
    %149 = vector.load %arg8[%c0_187, %c0_188] : memref<128x128xf32, #tpu.memory_space<vmem>>, vector<128x128xf32>
    %150 = arith.addf %149, %148 : vector<128x128xf32>
    %c0_189 = arith.constant 0 : index
    %c0_190 = arith.constant 0 : index
    %151 = vector.load %arg8[%c0_189, %c0_190] : memref<128x128xf32, #tpu.memory_space<vmem>>, vector<128x128xf32>
    tpu.vector_store %arg8[%c0_189, %c0_190], %150 {strides = array<i32>} : memref<128x128xf32, #tpu.memory_space<vmem>>, vector<128x128xf32>,
    %c0_191 = arith.constant 0 : index
    %c0_192 = arith.constant 0 : index
    %152 = vector.load %arg8[%c0_191, %c0_192] : memref<128x128xf32, #tpu.memory_space<vmem>>, vector<128x128xf32>
    %c0_193 = arith.constant 0 : index
    %c0_194 = arith.constant 0 : index
    %153 = vector.load %arg5[%c0_193, %c0_194] : memref<1x128xf32, #tpu.memory_space<vmem>>, vector<1x128xf32>
    %154 = vector.broadcast %153 : vector<1x128xf32> to vector<128x128xf32>
    %155 = arith.addf %152, %154 : vector<128x128xf32>
    %cst_195 = arith.constant 0.000000e+00 : f32
    %156 = vector.broadcast %cst_195 : f32 to vector<128x128xf32>
    %157 = arith.cmpf oge, %155, %156 : vector<128x128xf32>
    %cst_196 = arith.constant 2.000000e-01 : f32
    %158 = vector.broadcast %cst_196 : f32 to vector<128x128xf32>
    %159 = arith.mulf %155, %158 : vector<128x128xf32>
    %160 = arith.select %157, %155, %159 : vector<128x128xi1>, vector<128x128xf32>
    %cst_197 = arith.constant 1.41421354 : f32
    %161 = vector.broadcast %cst_197 : f32 to vector<128x128xf32>
    %162 = arith.mulf %160, %161 : vector<128x128xf32>
    %163 = vector.shape_cast %162 : vector<128x128xf32> to vector<8x16x128xf32>
    %164 = vector.extract_strided_slice %163 {offsets = [0, 0, 0], sizes = [8, 8, 128], strides = [1, 1, 1]} : vector<8x16x128xf32> to vector<8x8x128xf32>
    %c0_198 = arith.constant 0 : index
    %c0_199 = arith.constant 0 : index
    %c0_200 = arith.constant 0 : index
    %c0_201 = arith.constant 0 : index
    %165 = vector.load %arg1[%c0_198, %c0_199, %c0_200, %c0_201] : memref<1x8x8x128xbf16, #tpu.memory_space<vmem>>, vector<1x8x8x128xbf16>
    %166 = vector.shape_cast %165 : vector<1x8x8x128xbf16> to vector<8x8x128xbf16>
    %167 = arith.extf %166 : vector<8x8x128xbf16> to vector<8x8x128xf32>
    %168 = arith.addf %164, %167 : vector<8x8x128xf32>
    %cst_202 = arith.constant 0.707106769 : f32
    %169 = vector.broadcast %cst_202 : f32 to vector<8x8x128xf32>
    %170 = arith.mulf %168, %169 : vector<8x8x128xf32>
    %171 = arith.truncf %170 : vector<8x8x128xf32> to vector<8x8x128xbf16>
    %c0_203 = arith.constant 0 : index
    %c0_204 = arith.constant 0 : index
    %c0_205 = arith.constant 0 : index
    %c0_206 = arith.constant 0 : index
    %172 = vector.load %arg6[%c0_203, %c0_204, %c0_205, %c0_206] : memref<1x8x8x128xbf16, #tpu.memory_space<vmem>>, vector<1x8x8x128xbf16>
    %173 = vector.shape_cast %172 : vector<1x8x8x128xbf16> to vector<8x8x128xbf16>
    %174 = vector.shape_cast %171 : vector<8x8x128xbf16> to vector<1x8x8x128xbf16>
    tpu.vector_store %arg6[%c0_203, %c0_204, %c0_205, %c0_206], %174 {strides = array<i32>} : memref<1x8x8x128xbf16, #tpu.memory_space<vmem>>, vector<1x8x8x128xbf16>,
    return
  }
  func.func @transform_0(%arg0: i32) -> (i32, i32, i32, i32) {
    %c0_i32 = arith.constant 0 : i32
    %c0_i32_0 = arith.constant 0 : i32
    %c0_i32_1 = arith.constant 0 : i32
    %c0_i32_2 = arith.constant 0 : i32
    return %arg0, %c0_i32, %c0_i32_0, %c0_i32_1 : i32, i32, i32, i32
  }
  func.func @transform_1(%arg0: i32) -> (i32, i32, i32, i32) {
    %c0_i32 = arith.constant 0 : i32
    %c0_i32_0 = arith.constant 0 : i32
    %c0_i32_1 = arith.constant 0 : i32
    %c0_i32_2 = arith.constant 0 : i32
    %c0_i32_3 = arith.constant 0 : i32
    return %c0_i32, %c0_i32_0, %c0_i32_1, %c0_i32_2 : i32, i32, i32, i32
  }
  func.func @transform_2(%arg0: i32) -> (i32, i32) {
    %c0_i32 = arith.constant 0 : i32
    %c0_i32_0 = arith.constant 0 : i32
    %c0_i32_1 = arith.constant 0 : i32
    return %c0_i32, %c0_i32_0 : i32, i32
  }
  func.func @transform_3(%arg0: i32) -> (i32, i32, i32, i32) {
    %c0_i32 = arith.constant 0 : i32
    %c0_i32_0 = arith.constant 0 : i32
    %c0_i32_1 = arith.constant 0 : i32
    %c0_i32_2 = arith.constant 0 : i32
    %c0_i32_3 = arith.constant 0 : i32
    return %c0_i32, %c0_i32_0, %c0_i32_1, %c0_i32_2 : i32, i32, i32, i32
  }
  func.func @transform_4(%arg0: i32) -> (i32, i32) {
    %c0_i32 = arith.constant 0 : i32
    %c0_i32_0 = arith.constant 0 : i32
    %c0_i32_1 = arith.constant 0 : i32
    return %c0_i32, %c0_i32_0 : i32, i32
  }
  func.func @transform_5(%arg0: i32) -> (i32, i32, i32, i32) {
    %c0_i32 = arith.constant 0 : i32
    %c0_i32_0 = arith.constant 0 : i32
    %c0_i32_1 = arith.constant 0 : i32
    %c0_i32_2 = arith.constant 0 : i32
    return %arg0, %c0_i32, %c0_i32_0, %c0_i32_1 : i32, i32, i32, i32
  }
}

module attributes {stable_mosaic.version = 11 : i64} {
  func.func @_conv3x3_act_kernel(%arg0: i32, %arg1: memref<1x8x8x128xbf16, #tpu.memory_space<vmem>>, %arg2: memref<3x3x128x256xbf16, #tpu.memory_space<vmem>>, %arg3: memref<1x256xf32, #tpu.memory_space<vmem>>, %arg4: memref<1x8x8x256xbf16, #tpu.memory_space<vmem>>, %arg5: memref<11x16x128xbf16, #tpu.memory_space<vmem>>, %arg6: memref<128x256xf32, #tpu.memory_space<vmem>>) attributes {dimension_semantics = [#tpu.dimension_semantics<parallel>], iteration_bounds = array<i64: 2>, scalar_prefetch = 0 : i64, scratch_operands = 2 : i64, tpu.core_type = #tpu.core_type<tc>, window_params = [{transform_indices = @transform_0, window_bounds = array<i64: 1, 8, 8, 128>}, {pipeline_mode = #tpu.pipeline_mode<synchronous>, transform_indices = @transform_1, window_bounds = array<i64: 3, 3, 128, 256>}, {pipeline_mode = #tpu.pipeline_mode<synchronous>, transform_indices = @transform_2, window_bounds = array<i64: 1, 256>}, {transform_indices = @transform_3, window_bounds = array<i64: 1, 8, 8, 256>}]} {
    %cst = arith.constant 0.000000e+00 : bf16
    %0 = vector.broadcast %cst : bf16 to vector<1x16x128xbf16>
    %c0 = arith.constant 0 : index
    %c0_0 = arith.constant 0 : index
    %c0_1 = arith.constant 0 : index
    %1 = vector.load %arg5[%c0, %c0_0, %c0_1] : memref<11x16x128xbf16, #tpu.memory_space<vmem>>, vector<1x16x128xbf16>
    tpu.vector_store %arg5[%c0, %c0_0, %c0_1], %0 {strides = array<i32>} : memref<11x16x128xbf16, #tpu.memory_space<vmem>>, vector<1x16x128xbf16>,
    %cst_2 = arith.constant 0.000000e+00 : bf16
    %2 = vector.broadcast %cst_2 : bf16 to vector<2x16x128xbf16>
    %c9 = arith.constant 9 : index
    %c0_3 = arith.constant 0 : index
    %c0_4 = arith.constant 0 : index
    %3 = vector.load %arg5[%c9, %c0_3, %c0_4] : memref<11x16x128xbf16, #tpu.memory_space<vmem>>, vector<2x16x128xbf16>
    tpu.vector_store %arg5[%c9, %c0_3, %c0_4], %2 {strides = array<i32>} : memref<11x16x128xbf16, #tpu.memory_space<vmem>>, vector<2x16x128xbf16>,
    %cst_5 = arith.constant 0.000000e+00 : bf16
    %4 = vector.broadcast %cst_5 : bf16 to vector<8x2x128xbf16>
    %c1 = arith.constant 1 : index
    %c0_6 = arith.constant 0 : index
    %c0_7 = arith.constant 0 : index
    %5 = vector.load %arg5[%c1, %c0_6, %c0_7] : memref<11x16x128xbf16, #tpu.memory_space<vmem>>, vector<8x2x128xbf16>
    tpu.vector_store %arg5[%c1, %c0_6, %c0_7], %4 {strides = array<i32>} : memref<11x16x128xbf16, #tpu.memory_space<vmem>>, vector<8x2x128xbf16>,
    %cst_8 = arith.constant 0.000000e+00 : bf16
    %6 = vector.broadcast %cst_8 : bf16 to vector<8x1x128xbf16>
    %c1_9 = arith.constant 1 : index
    %c10 = arith.constant 10 : index
    %c0_10 = arith.constant 0 : index
    %7 = vector.load %arg5[%c1_9, %c10, %c0_10] : memref<11x16x128xbf16, #tpu.memory_space<vmem>>, vector<8x1x128xbf16>
    tpu.vector_store %arg5[%c1_9, %c10, %c0_10], %6 {strides = array<i32>} : memref<11x16x128xbf16, #tpu.memory_space<vmem>>, vector<8x1x128xbf16>,
    %c0_11 = arith.constant 0 : index
    %c0_12 = arith.constant 0 : index
    %c0_13 = arith.constant 0 : index
    %c0_14 = arith.constant 0 : index
    %8 = vector.load %arg1[%c0_11, %c0_12, %c0_13, %c0_14] : memref<1x8x8x128xbf16, #tpu.memory_space<vmem>>, vector<1x8x8x128xbf16>
    %9 = vector.shape_cast %8 : vector<1x8x8x128xbf16> to vector<8x8x128xbf16>
    %c1_15 = arith.constant 1 : index
    %c2 = arith.constant 2 : index
    %c0_16 = arith.constant 0 : index
    %10 = vector.load %arg5[%c1_15, %c2, %c0_16] : memref<11x16x128xbf16, #tpu.memory_space<vmem>>, vector<8x8x128xbf16>
    tpu.vector_store %arg5[%c1_15, %c2, %c0_16], %9 {strides = array<i32>} : memref<11x16x128xbf16, #tpu.memory_space<vmem>>, vector<8x8x128xbf16>,
    %c0_17 = arith.constant 0 : index
    %c0_18 = arith.constant 0 : index
    %c0_19 = arith.constant 0 : index
    %11 = vector.load %arg5[%c0_17, %c0_18, %c0_19] : memref<11x16x128xbf16, #tpu.memory_space<vmem>>, vector<11x16x128xbf16>
    %12 = vector.shape_cast %11 : vector<11x16x128xbf16> to vector<176x128xbf16>
    %c0_20 = arith.constant 0 : index
    %c0_21 = arith.constant 0 : index
    %c0_22 = arith.constant 0 : index
    %c0_23 = arith.constant 0 : index
    %13 = vector.load %arg2[%c0_20, %c0_21, %c0_22, %c0_23] : memref<3x3x128x256xbf16, #tpu.memory_space<vmem>>, vector<1x1x128x256xbf16>
    %14 = vector.shape_cast %13 : vector<1x1x128x256xbf16> to vector<128x256xbf16>
    %cst_24 = arith.constant dense<0.000000e+00> : vector<176x256xf32>
    %15 = tpu.matmul %12, %14, %cst_24 {dimension_numbers = #tpu.dot_dimension_numbers<[1], [0], [0], [1], [0, 0, 1, 1], [], []>} : vector<176x128xbf16>, vector<128x256xbf16>, vector<176x256xf32> -> vector<176x256xf32>
    %16 = vector.extract_strided_slice %15 {offsets = [1, 0], sizes = [128, 256], strides = [1, 1]} : vector<176x256xf32> to vector<128x256xf32>
    %c0_25 = arith.constant 0 : index
    %c0_26 = arith.constant 0 : index
    %17 = vector.load %arg6[%c0_25, %c0_26] : memref<128x256xf32, #tpu.memory_space<vmem>>, vector<128x256xf32>
    tpu.vector_store %arg6[%c0_25, %c0_26], %16 {strides = array<i32>} : memref<128x256xf32, #tpu.memory_space<vmem>>, vector<128x256xf32>,
    %c0_27 = arith.constant 0 : index
    %c1_28 = arith.constant 1 : index
    %c0_29 = arith.constant 0 : index
    %c0_30 = arith.constant 0 : index
    %18 = vector.load %arg2[%c0_27, %c1_28, %c0_29, %c0_30] : memref<3x3x128x256xbf16, #tpu.memory_space<vmem>>, vector<1x1x128x256xbf16>
    %19 = vector.shape_cast %18 : vector<1x1x128x256xbf16> to vector<128x256xbf16>
    %cst_31 = arith.constant dense<0.000000e+00> : vector<176x256xf32>
    %20 = tpu.matmul %12, %19, %cst_31 {dimension_numbers = #tpu.dot_dimension_numbers<[1], [0], [0], [1], [0, 0, 1, 1], [], []>} : vector<176x128xbf16>, vector<128x256xbf16>, vector<176x256xf32> -> vector<176x256xf32>
    %21 = vector.extract_strided_slice %20 {offsets = [2, 0], sizes = [128, 256], strides = [1, 1]} : vector<176x256xf32> to vector<128x256xf32>
    %c0_32 = arith.constant 0 : index
    %c0_33 = arith.constant 0 : index
    %22 = vector.load %arg6[%c0_32, %c0_33] : memref<128x256xf32, #tpu.memory_space<vmem>>, vector<128x256xf32>
    %23 = arith.addf %22, %21 : vector<128x256xf32>
    %c0_34 = arith.constant 0 : index
    %c0_35 = arith.constant 0 : index
    %24 = vector.load %arg6[%c0_34, %c0_35] : memref<128x256xf32, #tpu.memory_space<vmem>>, vector<128x256xf32>
    tpu.vector_store %arg6[%c0_34, %c0_35], %23 {strides = array<i32>} : memref<128x256xf32, #tpu.memory_space<vmem>>, vector<128x256xf32>,
    %c0_36 = arith.constant 0 : index
    %c2_37 = arith.constant 2 : index
    %c0_38 = arith.constant 0 : index
    %c0_39 = arith.constant 0 : index
    %25 = vector.load %arg2[%c0_36, %c2_37, %c0_38, %c0_39] : memref<3x3x128x256xbf16, #tpu.memory_space<vmem>>, vector<1x1x128x256xbf16>
    %26 = vector.shape_cast %25 : vector<1x1x128x256xbf16> to vector<128x256xbf16>
    %cst_40 = arith.constant dense<0.000000e+00> : vector<176x256xf32>
    %27 = tpu.matmul %12, %26, %cst_40 {dimension_numbers = #tpu.dot_dimension_numbers<[1], [0], [0], [1], [0, 0, 1, 1], [], []>} : vector<176x128xbf16>, vector<128x256xbf16>, vector<176x256xf32> -> vector<176x256xf32>
    %28 = vector.extract_strided_slice %27 {offsets = [3, 0], sizes = [128, 256], strides = [1, 1]} : vector<176x256xf32> to vector<128x256xf32>
    %c0_41 = arith.constant 0 : index
    %c0_42 = arith.constant 0 : index
    %29 = vector.load %arg6[%c0_41, %c0_42] : memref<128x256xf32, #tpu.memory_space<vmem>>, vector<128x256xf32>
    %30 = arith.addf %29, %28 : vector<128x256xf32>
    %c0_43 = arith.constant 0 : index
    %c0_44 = arith.constant 0 : index
    %31 = vector.load %arg6[%c0_43, %c0_44] : memref<128x256xf32, #tpu.memory_space<vmem>>, vector<128x256xf32>
    tpu.vector_store %arg6[%c0_43, %c0_44], %30 {strides = array<i32>} : memref<128x256xf32, #tpu.memory_space<vmem>>, vector<128x256xf32>,
    %c1_45 = arith.constant 1 : index
    %c0_46 = arith.constant 0 : index
    %c0_47 = arith.constant 0 : index
    %c0_48 = arith.constant 0 : index
    %32 = vector.load %arg2[%c1_45, %c0_46, %c0_47, %c0_48] : memref<3x3x128x256xbf16, #tpu.memory_space<vmem>>, vector<1x1x128x256xbf16>
    %33 = vector.shape_cast %32 : vector<1x1x128x256xbf16> to vector<128x256xbf16>
    %cst_49 = arith.constant dense<0.000000e+00> : vector<176x256xf32>
    %34 = tpu.matmul %12, %33, %cst_49 {dimension_numbers = #tpu.dot_dimension_numbers<[1], [0], [0], [1], [0, 0, 1, 1], [], []>} : vector<176x128xbf16>, vector<128x256xbf16>, vector<176x256xf32> -> vector<176x256xf32>
    %35 = vector.extract_strided_slice %34 {offsets = [17, 0], sizes = [128, 256], strides = [1, 1]} : vector<176x256xf32> to vector<128x256xf32>
    %c0_50 = arith.constant 0 : index
    %c0_51 = arith.constant 0 : index
    %36 = vector.load %arg6[%c0_50, %c0_51] : memref<128x256xf32, #tpu.memory_space<vmem>>, vector<128x256xf32>
    %37 = arith.addf %36, %35 : vector<128x256xf32>
    %c0_52 = arith.constant 0 : index
    %c0_53 = arith.constant 0 : index
    %38 = vector.load %arg6[%c0_52, %c0_53] : memref<128x256xf32, #tpu.memory_space<vmem>>, vector<128x256xf32>
    tpu.vector_store %arg6[%c0_52, %c0_53], %37 {strides = array<i32>} : memref<128x256xf32, #tpu.memory_space<vmem>>, vector<128x256xf32>,
    %c1_54 = arith.constant 1 : index
    %c1_55 = arith.constant 1 : index
    %c0_56 = arith.constant 0 : index
    %c0_57 = arith.constant 0 : index
    %39 = vector.load %arg2[%c1_54, %c1_55, %c0_56, %c0_57] : memref<3x3x128x256xbf16, #tpu.memory_space<vmem>>, vector<1x1x128x256xbf16>
    %40 = vector.shape_cast %39 : vector<1x1x128x256xbf16> to vector<128x256xbf16>
    %cst_58 = arith.constant dense<0.000000e+00> : vector<176x256xf32>
    %41 = tpu.matmul %12, %40, %cst_58 {dimension_numbers = #tpu.dot_dimension_numbers<[1], [0], [0], [1], [0, 0, 1, 1], [], []>} : vector<176x128xbf16>, vector<128x256xbf16>, vector<176x256xf32> -> vector<176x256xf32>
    %42 = vector.extract_strided_slice %41 {offsets = [18, 0], sizes = [128, 256], strides = [1, 1]} : vector<176x256xf32> to vector<128x256xf32>
    %c0_59 = arith.constant 0 : index
    %c0_60 = arith.constant 0 : index
    %43 = vector.load %arg6[%c0_59, %c0_60] : memref<128x256xf32, #tpu.memory_space<vmem>>, vector<128x256xf32>
    %44 = arith.addf %43, %42 : vector<128x256xf32>
    %c0_61 = arith.constant 0 : index
    %c0_62 = arith.constant 0 : index
    %45 = vector.load %arg6[%c0_61, %c0_62] : memref<128x256xf32, #tpu.memory_space<vmem>>, vector<128x256xf32>
    tpu.vector_store %arg6[%c0_61, %c0_62], %44 {strides = array<i32>} : memref<128x256xf32, #tpu.memory_space<vmem>>, vector<128x256xf32>,
    %c1_63 = arith.constant 1 : index
    %c2_64 = arith.constant 2 : index
    %c0_65 = arith.constant 0 : index
    %c0_66 = arith.constant 0 : index
    %46 = vector.load %arg2[%c1_63, %c2_64, %c0_65, %c0_66] : memref<3x3x128x256xbf16, #tpu.memory_space<vmem>>, vector<1x1x128x256xbf16>
    %47 = vector.shape_cast %46 : vector<1x1x128x256xbf16> to vector<128x256xbf16>
    %cst_67 = arith.constant dense<0.000000e+00> : vector<176x256xf32>
    %48 = tpu.matmul %12, %47, %cst_67 {dimension_numbers = #tpu.dot_dimension_numbers<[1], [0], [0], [1], [0, 0, 1, 1], [], []>} : vector<176x128xbf16>, vector<128x256xbf16>, vector<176x256xf32> -> vector<176x256xf32>
    %49 = vector.extract_strided_slice %48 {offsets = [19, 0], sizes = [128, 256], strides = [1, 1]} : vector<176x256xf32> to vector<128x256xf32>
    %c0_68 = arith.constant 0 : index
    %c0_69 = arith.constant 0 : index
    %50 = vector.load %arg6[%c0_68, %c0_69] : memref<128x256xf32, #tpu.memory_space<vmem>>, vector<128x256xf32>
    %51 = arith.addf %50, %49 : vector<128x256xf32>
    %c0_70 = arith.constant 0 : index
    %c0_71 = arith.constant 0 : index
    %52 = vector.load %arg6[%c0_70, %c0_71] : memref<128x256xf32, #tpu.memory_space<vmem>>, vector<128x256xf32>
    tpu.vector_store %arg6[%c0_70, %c0_71], %51 {strides = array<i32>} : memref<128x256xf32, #tpu.memory_space<vmem>>, vector<128x256xf32>,
    %c2_72 = arith.constant 2 : index
    %c0_73 = arith.constant 0 : index
    %c0_74 = arith.constant 0 : index
    %c0_75 = arith.constant 0 : index
    %53 = vector.load %arg2[%c2_72, %c0_73, %c0_74, %c0_75] : memref<3x3x128x256xbf16, #tpu.memory_space<vmem>>, vector<1x1x128x256xbf16>
    %54 = vector.shape_cast %53 : vector<1x1x128x256xbf16> to vector<128x256xbf16>
    %cst_76 = arith.constant dense<0.000000e+00> : vector<176x256xf32>
    %55 = tpu.matmul %12, %54, %cst_76 {dimension_numbers = #tpu.dot_dimension_numbers<[1], [0], [0], [1], [0, 0, 1, 1], [], []>} : vector<176x128xbf16>, vector<128x256xbf16>, vector<176x256xf32> -> vector<176x256xf32>
    %56 = vector.extract_strided_slice %55 {offsets = [33, 0], sizes = [128, 256], strides = [1, 1]} : vector<176x256xf32> to vector<128x256xf32>
    %c0_77 = arith.constant 0 : index
    %c0_78 = arith.constant 0 : index
    %57 = vector.load %arg6[%c0_77, %c0_78] : memref<128x256xf32, #tpu.memory_space<vmem>>, vector<128x256xf32>
    %58 = arith.addf %57, %56 : vector<128x256xf32>
    %c0_79 = arith.constant 0 : index
    %c0_80 = arith.constant 0 : index
    %59 = vector.load %arg6[%c0_79, %c0_80] : memref<128x256xf32, #tpu.memory_space<vmem>>, vector<128x256xf32>
    tpu.vector_store %arg6[%c0_79, %c0_80], %58 {strides = array<i32>} : memref<128x256xf32, #tpu.memory_space<vmem>>, vector<128x256xf32>,
    %c2_81 = arith.constant 2 : index
    %c1_82 = arith.constant 1 : index
    %c0_83 = arith.constant 0 : index
    %c0_84 = arith.constant 0 : index
    %60 = vector.load %arg2[%c2_81, %c1_82, %c0_83, %c0_84] : memref<3x3x128x256xbf16, #tpu.memory_space<vmem>>, vector<1x1x128x256xbf16>
    %61 = vector.shape_cast %60 : vector<1x1x128x256xbf16> to vector<128x256xbf16>
    %cst_85 = arith.constant dense<0.000000e+00> : vector<176x256xf32>
    %62 = tpu.matmul %12, %61, %cst_85 {dimension_numbers = #tpu.dot_dimension_numbers<[1], [0], [0], [1], [0, 0, 1, 1], [], []>} : vector<176x128xbf16>, vector<128x256xbf16>, vector<176x256xf32> -> vector<176x256xf32>
    %63 = vector.extract_strided_slice %62 {offsets = [34, 0], sizes = [128, 256], strides = [1, 1]} : vector<176x256xf32> to vector<128x256xf32>
    %c0_86 = arith.constant 0 : index
    %c0_87 = arith.constant 0 : index
    %64 = vector.load %arg6[%c0_86, %c0_87] : memref<128x256xf32, #tpu.memory_space<vmem>>, vector<128x256xf32>
    %65 = arith.addf %64, %63 : vector<128x256xf32>
    %c0_88 = arith.constant 0 : index
    %c0_89 = arith.constant 0 : index
    %66 = vector.load %arg6[%c0_88, %c0_89] : memref<128x256xf32, #tpu.memory_space<vmem>>, vector<128x256xf32>
    tpu.vector_store %arg6[%c0_88, %c0_89], %65 {strides = array<i32>} : memref<128x256xf32, #tpu.memory_space<vmem>>, vector<128x256xf32>,
    %c2_90 = arith.constant 2 : index
    %c2_91 = arith.constant 2 : index
    %c0_92 = arith.constant 0 : index
    %c0_93 = arith.constant 0 : index
    %67 = vector.load %arg2[%c2_90, %c2_91, %c0_92, %c0_93] : memref<3x3x128x256xbf16, #tpu.memory_space<vmem>>, vector<1x1x128x256xbf16>
    %68 = vector.shape_cast %67 : vector<1x1x128x256xbf16> to vector<128x256xbf16>
    %cst_94 = arith.constant dense<0.000000e+00> : vector<176x256xf32>
    %69 = tpu.matmul %12, %68, %cst_94 {dimension_numbers = #tpu.dot_dimension_numbers<[1], [0], [0], [1], [0, 0, 1, 1], [], []>} : vector<176x128xbf16>, vector<128x256xbf16>, vector<176x256xf32> -> vector<176x256xf32>
    %70 = vector.extract_strided_slice %69 {offsets = [35, 0], sizes = [128, 256], strides = [1, 1]} : vector<176x256xf32> to vector<128x256xf32>
    %c0_95 = arith.constant 0 : index
    %c0_96 = arith.constant 0 : index
    %71 = vector.load %arg6[%c0_95, %c0_96] : memref<128x256xf32, #tpu.memory_space<vmem>>, vector<128x256xf32>
    %72 = arith.addf %71, %70 : vector<128x256xf32>
    %c0_97 = arith.constant 0 : index
    %c0_98 = arith.constant 0 : index
    %73 = vector.load %arg6[%c0_97, %c0_98] : memref<128x256xf32, #tpu.memory_space<vmem>>, vector<128x256xf32>
    tpu.vector_store %arg6[%c0_97, %c0_98], %72 {strides = array<i32>} : memref<128x256xf32, #tpu.memory_space<vmem>>, vector<128x256xf32>,
    %c0_99 = arith.constant 0 : index
    %c0_100 = arith.constant 0 : index
    %74 = vector.load %arg6[%c0_99, %c0_100] : memref<128x256xf32, #tpu.memory_space<vmem>>, vector<128x256xf32>
    %c0_101 = arith.constant 0 : index
    %c0_102 = arith.constant 0 : index
    %75 = vector.load %arg3[%c0_101, %c0_102] : memref<1x256xf32, #tpu.memory_space<vmem>>, vector<1x256xf32>
    %76 = vector.broadcast %75 : vector<1x256xf32> to vector<128x256xf32>
    %77 = arith.addf %74, %76 : vector<128x256xf32>
    %cst_103 = arith.constant 0.000000e+00 : f32
    %78 = vector.broadcast %cst_103 : f32 to vector<128x256xf32>
    %79 = arith.cmpf oge, %77, %78 : vector<128x256xf32>
    %cst_104 = arith.constant 2.000000e-01 : f32
    %80 = vector.broadcast %cst_104 : f32 to vector<128x256xf32>
    %81 = arith.mulf %77, %80 : vector<128x256xf32>
    %82 = arith.select %79, %77, %81 : vector<128x256xi1>, vector<128x256xf32>
    %cst_105 = arith.constant 1.41421354 : f32
    %83 = vector.broadcast %cst_105 : f32 to vector<128x256xf32>
    %84 = arith.mulf %82, %83 : vector<128x256xf32>
    %85 = vector.shape_cast %84 : vector<128x256xf32> to vector<8x16x256xf32>
    %86 = vector.extract_strided_slice %85 {offsets = [0, 0, 0], sizes = [8, 8, 256], strides = [1, 1, 1]} : vector<8x16x256xf32> to vector<8x8x256xf32>
    %87 = arith.truncf %86 : vector<8x8x256xf32> to vector<8x8x256xbf16>
    %c0_106 = arith.constant 0 : index
    %c0_107 = arith.constant 0 : index
    %c0_108 = arith.constant 0 : index
    %c0_109 = arith.constant 0 : index
    %88 = vector.load %arg4[%c0_106, %c0_107, %c0_108, %c0_109] : memref<1x8x8x256xbf16, #tpu.memory_space<vmem>>, vector<1x8x8x256xbf16>
    %89 = vector.shape_cast %88 : vector<1x8x8x256xbf16> to vector<8x8x256xbf16>
    %90 = vector.shape_cast %87 : vector<8x8x256xbf16> to vector<1x8x8x256xbf16>
    tpu.vector_store %arg4[%c0_106, %c0_107, %c0_108, %c0_109], %90 {strides = array<i32>} : memref<1x8x8x256xbf16, #tpu.memory_space<vmem>>, vector<1x8x8x256xbf16>,
    return
  }
  func.func @transform_0(%arg0: i32) -> (i32, i32, i32, i32) {
    %c0_i32 = arith.constant 0 : i32
    %c0_i32_0 = arith.constant 0 : i32
    %c0_i32_1 = arith.constant 0 : i32
    %c0_i32_2 = arith.constant 0 : i32
    return %arg0, %c0_i32, %c0_i32_0, %c0_i32_1 : i32, i32, i32, i32
  }
  func.func @transform_1(%arg0: i32) -> (i32, i32, i32, i32) {
    %c0_i32 = arith.constant 0 : i32
    %c0_i32_0 = arith.constant 0 : i32
    %c0_i32_1 = arith.constant 0 : i32
    %c0_i32_2 = arith.constant 0 : i32
    %c0_i32_3 = arith.constant 0 : i32
    return %c0_i32, %c0_i32_0, %c0_i32_1, %c0_i32_2 : i32, i32, i32, i32
  }
  func.func @transform_2(%arg0: i32) -> (i32, i32) {
    %c0_i32 = arith.constant 0 : i32
    %c0_i32_0 = arith.constant 0 : i32
    %c0_i32_1 = arith.constant 0 : i32
    return %c0_i32, %c0_i32_0 : i32, i32
  }
  func.func @transform_3(%arg0: i32) -> (i32, i32, i32, i32) {
    %c0_i32 = arith.constant 0 : i32
    %c0_i32_0 = arith.constant 0 : i32
    %c0_i32_1 = arith.constant 0 : i32
    %c0_i32_2 = arith.constant 0 : i32
    return %arg0, %c0_i32, %c0_i32_0, %c0_i32_1 : i32, i32, i32, i32
  }
}

module attributes {stable_mosaic.version = 11 : i64} {
  func.func @_conv1x1_act_kernel(%arg0: i32, %arg1: memref<1x8x8x256xbf16, #tpu.memory_space<vmem>>, %arg2: memref<256x32xbf16, #tpu.memory_space<vmem>>, %arg3: memref<1x32xf32, #tpu.memory_space<vmem>>, %arg4: memref<1x8x8x32xf32, #tpu.memory_space<vmem>>) attributes {dimension_semantics = [#tpu.dimension_semantics<parallel>], iteration_bounds = array<i64: 2>, scalar_prefetch = 0 : i64, scratch_operands = 0 : i64, tpu.core_type = #tpu.core_type<tc>, window_params = [{transform_indices = @transform_0, window_bounds = array<i64: 1, 8, 8, 256>}, {pipeline_mode = #tpu.pipeline_mode<synchronous>, transform_indices = @transform_1, window_bounds = array<i64: 256, 32>}, {pipeline_mode = #tpu.pipeline_mode<synchronous>, transform_indices = @transform_2, window_bounds = array<i64: 1, 32>}, {transform_indices = @transform_3, window_bounds = array<i64: 1, 8, 8, 32>}]} {
    %c0 = arith.constant 0 : index
    %c0_0 = arith.constant 0 : index
    %c0_1 = arith.constant 0 : index
    %c0_2 = arith.constant 0 : index
    %0 = vector.load %arg1[%c0, %c0_0, %c0_1, %c0_2] : memref<1x8x8x256xbf16, #tpu.memory_space<vmem>>, vector<1x8x8x256xbf16>
    %1 = vector.shape_cast %0 : vector<1x8x8x256xbf16> to vector<8x8x256xbf16>
    %2 = vector.shape_cast %1 : vector<8x8x256xbf16> to vector<64x256xbf16>
    %c0_3 = arith.constant 0 : index
    %c0_4 = arith.constant 0 : index
    %3 = vector.load %arg2[%c0_3, %c0_4] : memref<256x32xbf16, #tpu.memory_space<vmem>>, vector<256x32xbf16>
    %cst = arith.constant dense<0.000000e+00> : vector<64x32xf32>
    %4 = tpu.matmul %2, %3, %cst {dimension_numbers = #tpu.dot_dimension_numbers<[1], [0], [0], [1], [0, 0, 1, 1], [], []>} : vector<64x256xbf16>, vector<256x32xbf16>, vector<64x32xf32> -> vector<64x32xf32>
    %c0_5 = arith.constant 0 : index
    %c0_6 = arith.constant 0 : index
    %5 = vector.load %arg3[%c0_5, %c0_6] : memref<1x32xf32, #tpu.memory_space<vmem>>, vector<1x32xf32>
    %6 = vector.broadcast %5 : vector<1x32xf32> to vector<64x32xf32>
    %7 = arith.addf %4, %6 : vector<64x32xf32>
    %cst_7 = arith.constant 0.000000e+00 : f32
    %8 = vector.broadcast %cst_7 : f32 to vector<64x32xf32>
    %9 = arith.cmpf oge, %7, %8 : vector<64x32xf32>
    %cst_8 = arith.constant 2.000000e-01 : f32
    %10 = vector.broadcast %cst_8 : f32 to vector<64x32xf32>
    %11 = arith.mulf %7, %10 : vector<64x32xf32>
    %12 = arith.select %9, %7, %11 : vector<64x32xi1>, vector<64x32xf32>
    %cst_9 = arith.constant 1.41421354 : f32
    %13 = vector.broadcast %cst_9 : f32 to vector<64x32xf32>
    %14 = arith.mulf %12, %13 : vector<64x32xf32>
    %15 = vector.shape_cast %14 : vector<64x32xf32> to vector<8x8x32xf32>
    %c0_10 = arith.constant 0 : index
    %c0_11 = arith.constant 0 : index
    %c0_12 = arith.constant 0 : index
    %c0_13 = arith.constant 0 : index
    %16 = vector.load %arg4[%c0_10, %c0_11, %c0_12, %c0_13] : memref<1x8x8x32xf32, #tpu.memory_space<vmem>>, vector<1x8x8x32xf32>
    %17 = vector.shape_cast %16 : vector<1x8x8x32xf32> to vector<8x8x32xf32>
    %18 = vector.shape_cast %15 : vector<8x8x32xf32> to vector<1x8x8x32xf32>
    tpu.vector_store %arg4[%c0_10, %c0_11, %c0_12, %c0_13], %18 {strides = array<i32>} : memref<1x8x8x32xf32, #tpu.memory_space<vmem>>, vector<1x8x8x32xf32>,
    return
  }
  func.func @transform_0(%arg0: i32) -> (i32, i32, i32, i32) {
    %c0_i32 = arith.constant 0 : i32
    %c0_i32_0 = arith.constant 0 : i32
    %c0_i32_1 = arith.constant 0 : i32
    %c0_i32_2 = arith.constant 0 : i32
    return %arg0, %c0_i32, %c0_i32_0, %c0_i32_1 : i32, i32, i32, i32
  }
  func.func @transform_1(%arg0: i32) -> (i32, i32) {
    %c0_i32 = arith.constant 0 : i32
    %c0_i32_0 = arith.constant 0 : i32
    %c0_i32_1 = arith.constant 0 : i32
    return %c0_i32, %c0_i32_0 : i32, i32
  }
  func.func @transform_2(%arg0: i32) -> (i32, i32) {
    %c0_i32 = arith.constant 0 : i32
    %c0_i32_0 = arith.constant 0 : i32
    %c0_i32_1 = arith.constant 0 : i32
    return %c0_i32, %c0_i32_0 : i32, i32
  }
  func.func @transform_3(%arg0: i32) -> (i32, i32, i32, i32) {
    %c0_i32 = arith.constant 0 : i32
    %c0_i32_0 = arith.constant 0 : i32
    %c0_i32_1 = arith.constant 0 : i32
    %c0_i32_2 = arith.constant 0 : i32
    return %arg0, %c0_i32, %c0_i32_0, %c0_i32_1 : i32, i32, i32, i32
  }
}

</mosaic_0001>

<bundles_post_ra>
// kernel: stylegan2_decoder_forward.5
= control target key start
LH: loop header
LB: loop body
LE: loop exit
PB: predicated region body
PF: predicated region fallthrough
CT: control target
= control target key end

     0   :  { %s674_s12 = smov 0   ;;  %s777_s0 = inlined_call_operand.vmem [shape: bf16[2,8,8,256], index: 0, kind: input, shape index: {}]   ;;  %s778_s1 = inlined_call_operand.vmem [shape: bf16[256,32], index: 1, kind: input, shape index: {}]   ;;  %s779_s2 = inlined_call_operand.vmem [shape: f32[1,32], index: 2, kind: input, shape index: {}]   ;;  %s780_s3 = inlined_call_operand.vmem [shape: f32[2,8,8,32], index: 3, kind: output, shape index: {}]  }
   0x1 LB: > { %s516_s13 = sadd.s32 4294967295, %s652_s12   ;;  %p520_p0 = scmp.ge.s32.totalorder %s652_s12, 1  ;;  %s652_s12 = sphi %s674_s12, %s13_s12  }
   0x2   : > { %p137_p1 = scmp.lt.s32.totalorder %s652_s12, 3 }
   0x4   : > { %p138_p2 = pnand %p520_p0, %p137_p1 }
   0x5   : > { %p161_p3 = scmp.lt.s32.totalorder (!%p138_p2), %s516_s13, 1 }
   0x6   : > { %141 = sbr.rel (%p138_p2) target bundleno = 263 (0x107), region = 32 }
   0xb   : > { %v618_v0 = vld [vmem:[%s778_s1 + $0x78] sm:$0xff]   ;;  %v620_v2 = vld [vmem:[%s778_s1 + $0x70] sm:$0xff]   ;;  %v622_v4 = vld [vmem:[%s778_s1 + $0x68] sm:$0xff]   ;;  %s782_s13 = smov (!%p161_p3, %s516_s13), 1  ;;  %vm452_vm2 = vcmask 261120  }
   0xc   : > { %v619_v1 = vld [vmem:[%s778_s1 + $0x38] sm:$0xff]   ;;  %554 = vmatprep.subr.bf16.mxu0 %v618_v0  ;;  %594 = vmatprep.subr.bf16.mxu1 %v618_v0  ;;  %v621_v3 = vld [vmem:[%s778_s1 + $0x30] sm:$0xff]   ;;  %v623_v5 = vld [vmem:[%s778_s1 + $0x28] sm:$0xff]   ;;  %s552_s30 = sshll.u32 %s782_s13, 6 }
   0xd   : > { %555 = vmatpush3.bf16.msra.mxu0 %v619_v1  ;;  %602 = vmatpush3.bf16.msra.mxu1 %v619_v1  ;;  %v624_v6 = vld [vmem:[%s778_s1 + $0x60] sm:$0xff]   ;;  %v626_v8 = vld [vmem:[%s778_s1 + $0x58] sm:$0xff]   ;;  %s717_s8 = scalar_lea.vmem %s777_s0, %s552_s30  ;;  %v628_v10 = vld [vmem:[%s778_s1 + $0x50] sm:$0xff]   ;;  %s756_s29 = scalar_lea.vmem %s780_s3, %s552_s30 }
   0xe   : > { %556 = vmatprep.subr.bf16.mxu0 %v620_v2  ;;  %595 = vmatprep.subr.bf16.mxu1 %v620_v2  ;;  %v625_v7 = vld [vmem:[%s778_s1 + $0x20] sm:$0xff]   ;;  %v627_v9 = vld [vmem:[%s778_s1 + $0x18] sm:$0xff]   ;;  %v629_v13 = vld [vmem:[%s778_s1 + $0x10] sm:$0xff]  }
   0xf   : > { %v636_v11 = vld [vmem:[%s717_s8 + $0x4] ss:$8 sps:$4 sm:$0xff]   ;;  %v634_v18 = vld [vmem:[%s717_s8] ss:$8 sps:$4 sm:$0xff]   ;;  %v640_v20 = vld [vmem:[%s717_s8 + $0x14] ss:$8 sps:$4 sm:$0xff]  }
  0x10   : > { %v639_v12 = vld [vmem:[%s717_s8 + $0x24] ss:$8 sps:$4 sm:$0xff]   ;;  %387 = vmatprep.mubr.bf16.mxu0 %v636_v11  ;;  %v637_v19 = vld [vmem:[%s717_s8 + $0x20] ss:$8 sps:$4 sm:$0xff]   ;;  %v642_v21 = vld [vmem:[%s717_s8 + $0x34] ss:$8 sps:$4 sm:$0xff]  }
  0x11   : > { %557 = vmatpush3.bf16.msra.mxu0 %v621_v3  ;;  %603 = vmatpush3.bf16.msra.mxu1 %v621_v3  ;;  %v630_v14 = vld [vmem:[%s778_s1 + $0x48] sm:$0xff]   ;;  %v632_v16 = vld [vmem:[%s778_s1 + $0x40] sm:$0xff]   ;;  %v644_v22 = vld [vmem:[%s717_s8 + $0x10] ss:$8 sps:$4 sm:$0xff]  }
  0x12   : > { %558 = vmatprep.subr.bf16.mxu0 %v622_v4  ;;  %596 = vmatprep.subr.bf16.mxu1 %v622_v4  ;;  %v631_v15 = vld [vmem:[%s778_s1 + $0x8] sm:$0xff]   ;;  %v633_v17 = vld [vmem:[%s778_s1] sm:$0xff]   ;;  %v645_v23 = vld [vmem:[%s717_s8 + $0x30] ss:$8 sps:$4 sm:$0xff]  }
  0x13   : > { %403 = vmatprep.mubr.bf16.mxu1 %v639_v12  ;;  %v525_v26 = vld [vmem:[%s779_s2] ss:$0 sm:$0xff] }
  0x15   : > { %559 = vmatpush3.bf16.msra.mxu0 %v623_v5  ;;  %604 = vmatpush3.bf16.msra.mxu1 %v623_v5 }
  0x16   : > { %560 = vmatprep.subr.bf16.mxu0 %v624_v6  ;;  %597 = vmatprep.subr.bf16.mxu1 %v624_v6 }
  0x19   : > { %561 = vmatpush3.bf16.msra.mxu0 %v625_v7  ;;  %605 = vmatpush3.bf16.msra.mxu1 %v625_v7 }
  0x1a   : > { %562 = vmatprep.subr.bf16.mxu0 %v626_v8  ;;  %598 = vmatprep.subr.bf16.mxu1 %v626_v8 }
  0x1d   : > { %563 = vmatpush3.bf16.msra.mxu0 %v627_v9  ;;  %606 = vmatpush3.bf16.msra.mxu1 %v627_v9 }
  0x1e   : > { %564 = vmatprep.subr.bf16.mxu0 %v628_v10  ;;  %599 = vmatprep.subr.bf16.mxu1 %v628_v10 }
  0x21   : > { %565 = vmatpush3.bf16.msra.mxu0 %v629_v13  ;;  %607 = vmatpush3.bf16.msra.mxu1 %v629_v13 }
  0x22   : > { %566 = vmatprep.subr.bf16.mxu0 %v630_v14  ;;  %600 = vmatprep.subr.bf16.mxu1 %v630_v14 }
  0x25   : > { %567 = vmatpush3.bf16.msra.mxu0 %v631_v15  ;;  %608 = vmatpush3.bf16.msra.mxu1 %v631_v15 }
  0x26   : > { %568 = vmatprep.subr.bf16.mxu0 %v632_v16  ;;  %601 = vmatprep.subr.bf16.mxu1 %v632_v16 }
  0x29   : > { %569 = vmatpush3.bf16.msra.mxu0 %v633_v17  ;;  %609 = vmatpush3.bf16.msra.mxu1 %v633_v17 }
  0x2c   : > { %388 = vmatmul.mubr.bf16.vlgmr.msra.gmra.mxu0 %v634_v18  ;;  %404 = vmatmul.mubr.bf16.vlgmr.msra.gmra.mxu1 %v637_v19 }
  0x2d   : > { %395 = vmatprep.mubr.bf16.mxu0 %v640_v20  ;;  %411 = vmatprep.mubr.bf16.mxu1 %v642_v21 }
  0x34   : > { %396 = vmatmul.mubr.bf16.gmra.mxu0 %v644_v22  ;;  %412 = vmatmul.mubr.bf16.gmra.mxu1 %v645_v23 }
  0xec   : > { %v570_v24 = vpop.f32.mrf.mxu0  ;;  %v582_v25 = vpop.f32.mrf.mxu1 }
  0xee   : > { %v571_v27 = vpop.f32.mrf.mxu0  ;;  %v583_v28 = vpop.f32.mrf.mxu1 }
  0xef   : > { %v572_v29 = vadd.f32 %v571_v27, %v570_v24  ;;  %v584_v30 = vadd.f32 %v583_v28, %v582_v25 }
  0xf0   : > { %v573_v31 = vpop.f32.mrf.mxu0  ;;  %v585_v32 = vpop.f32.mrf.mxu1 }
  0xf1   : > { %v390_v33 = vadd.f32 %v572_v29, %v525_v26  ;;  %v406_v34 = vadd.f32 %v584_v30, %v525_v26 }
  0xf2   : > { %v574_v35 = vpop.f32.mrf.mxu0  ;;  %v586_v36 = vpop.f32.mrf.mxu1 }
  0xf3   : > { %vm420_vm0 = vcmp.ge.f32.partialorder %v390_v33, 0.0  ;;  %v428_v37 = vmul.f32 0.2, %v390_v33  ;;  %vm424_vm1 = vcmp.ge.f32.partialorder %v406_v34, 0.0  ;;  %v432_v38 = vmul.f32 0.2, %v406_v34 }
  0xf4   : > { %v575_v39 = vadd.f32 %v574_v35, %v573_v31  ;;  %v587_v40 = vadd.f32 %v586_v36, %v585_v32  ;;  %v576_v41 = vpop.f32.mrf.mxu0  ;;  %v588_v42 = vpop.f32.mrf.mxu1 }
  0xf5   : > { %v436_v43 = vsel %vm420_vm0, %v390_v33, %v428_v37  ;;  %v440_v44 = vsel %vm424_vm1, %v406_v34, %v432_v38 }
  0xf6   : > { %v444_v45 = vmul.f32 1.4142135, %v436_v43  ;;  %v448_v46 = vmul.f32 1.4142135, %v440_v44  ;;  %v393_v47 = vadd.f32 %v575_v39, %v525_v26  ;;  %v409_v48 = vadd.f32 %v587_v40, %v525_v26  ;;  %v577_v49 = vpop.f32.mrf.mxu0  ;;  %v589_v50 = vpop.f32.mrf.mxu1 }
  0xf7   : > { %v578_v51 = vadd.f32 %v577_v49, %v576_v41  ;;  %v590_v52 = vadd.f32 %v589_v50, %v588_v42 }
  0xf8   : > { %453 = vst.msk [vmem:[%s756_s29] sm:$0xff] %vm452_vm2, %v444_v45  ;;  %457 = vst.msk [vmem:[%s756_s29 + $0x20] sm:$0xff] %vm452_vm2, %v448_v46  ;;  %vm421_vm3 = vcmp.ge.f32.partialorder %v393_v47, 0.0  ;;  %v429_v53 = vmul.f32 0.2, %v393_v47  ;;  %vm425_vm4 = vcmp.ge.f32.partialorder %v409_v48, 0.0  ;;  %v579_v55 = vpop.f32.mrf.mxu0  ;;  %v591_v56 = vpop.f32.mrf.mxu1 }
  0xf9   : > { %v433_v54 = vmul.f32 0.2, %v409_v48  ;;  %v398_v57 = vadd.f32 %v578_v51, %v525_v26  ;;  %v414_v58 = vadd.f32 %v590_v52, %v525_v26 }
  0xfa   : > { %v437_v59 = vsel %vm421_vm3, %v393_v47, %v429_v53  ;;  %v580_v61 = vpop.f32.mrf.mxu0  ;;  %v592_v62 = vpop.f32.mrf.mxu1 }
  0xfb   : > { %v441_v60 = vsel %vm425_vm4, %v409_v48, %v433_v54  ;;  %v445_v63 = vmul.f32 1.4142135, %v437_v59  ;;  %vm422_vm5 = vcmp.ge.f32.partialorder %v398_v57, 0.0  ;;  %vm426_vm6 = vcmp.ge.f32.partialorder %v414_v58, 0.0 }
  0xfc   : > { %v449_v0 = vmul.f32 1.4142135, %v441_v60  ;;  %v430_v1 = vmul.f32 0.2, %v398_v57  ;;  %v434_v2 = vmul.f32 0.2, %v414_v58  ;;  %v581_v3 = vadd.f32 %v580_v61, %v579_v55 }
  0xfd   : > { %v593_v4 = vadd.f32 %v592_v62, %v591_v56  ;;  %454 = vst.msk [vmem:[%s756_s29 + $0x8] sm:$0xff] %vm452_vm2, %v445_v63 }
  0xfe   : > { %458 = vst.msk [vmem:[%s756_s29 + $0x28] sm:$0xff] %vm452_vm2, %v449_v0  ;;  %v438_v5 = vsel %vm422_vm5, %v398_v57, %v430_v1  ;;  %v442_v6 = vsel %vm426_vm6, %v414_v58, %v434_v2  ;;  %v401_v7 = vadd.f32 %v581_v3, %v525_v26 }
  0xff   : > { %v417_v8 = vadd.f32 %v593_v4, %v525_v26  ;;  %v446_v9 = vmul.f32 1.4142135, %v438_v5  ;;  %v450_v10 = vmul.f32 1.4142135, %v442_v6 }
 0x100   : > { %vm423_vm7 = vcmp.ge.f32.partialorder %v401_v7, 0.0  ;;  %v431_v11 = vmul.f32 0.2, %v401_v7 }
 0x101   : > { %vm427_vm8 = vcmp.ge.f32.partialorder %v417_v8, 0.0  ;;  %v435_v12 = vmul.f32 0.2, %v417_v8  ;;  %455 = vst.msk [vmem:[%s756_s29 + $0x10] sm:$0xff] %vm452_vm2, %v446_v9  ;;  %459 = vst.msk [vmem:[%s756_s29 + $0x30] sm:$0xff] %vm452_vm2, %v450_v10 }
 0x102   : > { %v439_v13 = vsel %vm423_vm7, %v401_v7, %v431_v11 }
 0x103   : > { %v443_v14 = vsel %vm427_vm8, %v417_v8, %v435_v12  ;;  %v447_v15 = vmul.f32 1.4142135, %v439_v13 }
 0x104   : > { %v451_v16 = vmul.f32 1.4142135, %v443_v14 }
 0x105   : > { %456 = vst.msk [vmem:[%s756_s29 + $0x18] sm:$0xff] %vm452_vm2, %v447_v15 }
 0x106   : > { %460 = vst.msk [vmem:[%s756_s29 + $0x38] sm:$0xff] %vm452_vm2, %v451_v16 }
 0x107 PF: > { %s13_s12 = sadd.s32 1, %s652_s12  }
 0x108   : > { %p10_p4 = scmp.ge.s32.totalorder %s13_s12, 4  }
 0x10a   :  { %12 = sbr.rel (!%p10_p4) target bundleno = 1 (0x1), region = 62 }

// kernel: stylegan2_decoder_forward.4
= control target key start
LH: loop header
LB: loop body
LE: loop exit
PB: predicated region body
PF: predicated region fallthrough
CT: control target
= control target key end

     0   :  { %s5266_s12 = smov 0   ;;  %s6380_s0 = inlined_call_operand.vmem [shape: bf16[2,8,8,128], index: 0, kind: input, shape index: {}]   ;;  %s6381_s1 = inlined_call_operand.vmem [shape: bf16[3,3,128,256], index: 1, kind: input, shape index: {}]   ;;  %s6382_s2 = inlined_call_operand.vmem [shape: f32[1,256], index: 2, kind: input, shape index: {}]   ;;  %s6383_s3 = inlined_call_operand.vmem [shape: bf16[2,8,8,256], index: 3, kind: output, shape index: {}]  }
   0x1 LB: > { %s4662_s13 = sadd.s32 4294967295, %s5243_s12   ;;  %p4666_p0 = scmp.ge.s32.totalorder %s5243_s12, 1  ;;  %s5243_s12 = sphi %s5266_s12, %s13_s12  }
   0x2   : > { %p137_p1 = scmp.lt.s32.totalorder %s5243_s12, 3 }
   0x4   : > { %p138_p2 = pnand %p4666_p0, %p137_p1 }
   0x5   : > { %p5277_p3 = scmp.lt.s32.totalorder (!%p138_p2), %s4662_s13, 1 }
   0x6   : > { %141 = sbr.rel (%p138_p2) target bundleno = 643 (0x283), region = 32 }
   0xb   : > { %v4999_v0 = vld [vmem:[%s6381_s1 + $0x74] ss:$8 sps:$4 sm:$0xff]   ;;  %v5001_v1 = vld [vmem:[%s6381_s1 + $0x70] ss:$8 sps:$4 sm:$0xff]   ;;  %v5245_v2 = vmov 0   ;;  %s6388_s13 = smov (!%p5277_p3, %s4662_s13), 1 }
   0xc   : > { %495 = vmatprep.mubr.bf16.mxu0 %v5245_v2  ;;  %172 = vst [vmem:[#allocation2] sm:$0xf] %v5245_v2  ;;  %173 = vst [vmem:[#allocation2 + $0x4] sm:$0xf] %v5245_v2  ;;  %555 = vmatprep.mubr.bf16.mxu1 %v5245_v2  ;;  %v5002_v3 = vld [vmem:[%s6381_s1 + $0x64] ss:$8 sps:$4 sm:$0xff]  }
   0xd   : > { %175 = vst [vmem:[#allocation2 + $0x48] sm:$0xf] %v5245_v2  ;;  %176 = vst [vmem:[#allocation2 + $0x4c] sm:$0xf] %v5245_v2  ;;  %463 = vmatprep.subr.bf16.mxu0 %v4999_v0  ;;  %4974 = vmatprep.subr.bf16.mxu1 %v4999_v0  ;;  %v5004_v4 = vld [vmem:[%s6381_s1 + $0x60] ss:$8 sps:$4 sm:$0xff]  }
   0xe   : > { %177 = vst [vmem:[#allocation2 + $0x50] sm:$0xf] %v5245_v2  ;;  %178 = vst [vmem:[#allocation2 + $0x54] sm:$0xf] %v5245_v2  ;;  %464 = vmatpush1.bf16.msra.mxu0 %v5001_v1  ;;  %4982 = vmatpush1.bf16.msra.mxu1 %v5001_v1  ;;  %v5005_v5 = vld [vmem:[%s6381_s1 + $0x54] ss:$8 sps:$4 sm:$0xff]  }
   0xf   : > { %180 = vst [vmem:[#allocation2 + $0x8] sm:$0x1] %v5245_v2  ;;  %181 = vst [vmem:[#allocation2 + $0x10] sm:$0x1] %v5245_v2  ;;  %465 = vmatprep.subr.bf16.mxu0 %v5002_v3  ;;  %4975 = vmatprep.subr.bf16.mxu1 %v5002_v3  ;;  %s4964_s25 = sshll.u32 %s6388_s13, 5  ;;  %vm188_vm0 = vcmask 1041409  }
  0x10   : > { %182 = vst [vmem:[#allocation2 + $0x18] sm:$0x1] %v5245_v2  ;;  %183 = vst [vmem:[#allocation2 + $0x20] sm:$0x1] %v5245_v2  ;;  %v5007_v6 = vld [vmem:[%s6381_s1 + $0x50] ss:$8 sps:$4 sm:$0xff]   ;;  %s5323_s5 = scalar_lea.vmem %s6380_s0, %s4964_s25 }
  0x11   : > { %184 = vst [vmem:[#allocation2 + $0x28] sm:$0x1] %v5245_v2  ;;  %185 = vst [vmem:[#allocation2 + $0x30] sm:$0x1] %v5245_v2  ;;  %v5008_v7 = vld [vmem:[%s6381_s1 + $0x44] ss:$8 sps:$4 sm:$0xff]  }
  0x12   : > { %186 = vst [vmem:[#allocation2 + $0x38] sm:$0x1] %v5245_v2  ;;  %187 = vst [vmem:[#allocation2 + $0x40] sm:$0x1] %v5245_v2  ;;  %466 = vmatpush1.bf16.msra.mxu0 %v5004_v4  ;;  %4983 = vmatpush1.bf16.msra.mxu1 %v5004_v4  ;;  %vm189_vm1 = vsmask.f32 1280 }
  0x13   : > { %467 = vmatprep.subr.bf16.mxu0 %v5005_v5  ;;  %4976 = vmatprep.subr.bf16.mxu1 %v5005_v5  ;;  %v5010_v8 = vld [vmem:[%s6381_s1 + $0x40] ss:$8 sps:$4 sm:$0xff]   ;;  %v5011_v9 = vld [vmem:[%s6381_s1 + $0x34] ss:$8 sps:$4 sm:$0xff]   ;;  %vm5331_vm2 = vmand %vm188_vm0, %vm189_vm1  ;;  %vm630_vm3 = vcmask 1046528   ;;  %vm1057_vm4 = vcmask 1045504  }
  0x14   : > { %v206_v11 = vld [vmem:[#allocation2 + $0x34] sm:$0x2]  ;;  %v5013_v15 = vld [vmem:[%s6381_s1 + $0x30] ss:$8 sps:$4 sm:$0xff]   ;;  %v5014_v17 = vld [vmem:[%s6381_s1 + $0x24] ss:$8 sps:$4 sm:$0xff]  }
  0x15   : > { %v220_v12 = vld [vmem:[%s5323_s5 + $0x14] sm:$0xf]  ;;  %v207_v13 = vsel %vm5331_vm2, 0, %v206_v11  ;;  %v191_v18 = vld [vmem:[#allocation2 + $0xc] sm:$0x2]  ;;  %v5380_v48 = vld [vmem:[#allocation2] sm:$0xff]  }
  0x16   : > { %468 = vmatpush1.bf16.msra.mxu0 %v5007_v6  ;;  %4984 = vmatpush1.bf16.msra.mxu1 %v5007_v6  ;;  %v241_v14 = vrot.slane %v220_v12, 7  ;;  %208 = vst [vmem:[#allocation2 + $0x34] sm:$0x2] %v207_v13  ;;  %v192_v19 = vsel %vm5331_vm2, 0, %v191_v18  ;;  %v215_v20 = vld [vmem:[%s5323_s5] sm:$0xf] }
  0x17   : > { %469 = vmatprep.subr.bf16.mxu0 %v5008_v7  ;;  %4977 = vmatprep.subr.bf16.mxu1 %v5008_v7  ;;  %v209_v21 = vld [vmem:[#allocation2 + $0x3c] sm:$0x2]  ;;  %193 = vst [vmem:[#allocation2 + $0xc] sm:$0x2] %v192_v19  ;;  %v231_v22 = vrot.slane %v215_v20, 7  ;;  %vm1516_vm5 = vcmask 1044480  }
  0x18   : > { %v242_v16 = vrot.slane %v241_v14, 4  ;;  %273 = vst [vmem:[#allocation2 + $0x30] sm:$0xe] %v241_v14  ;;  %v210_v23 = vsel %vm5331_vm2, 0, %v209_v21  ;;  %v221_v24 = vld [vmem:[%s5323_s5 + $0x18] sm:$0xf] }
  0x19   : > { %v5016_v25 = vld [vmem:[%s6381_s1 + $0x20] ss:$8 sps:$4 sm:$0xff]   ;;  %211 = vst [vmem:[#allocation2 + $0x3c] sm:$0x2] %v210_v23  ;;  %v243_v26 = vrot.slane %v221_v24, 7  ;;  %v232_v28 = vrot.slane %v231_v22, 4 }
  0x1a   : > { %470 = vmatpush1.bf16.msra.mxu0 %v5010_v8  ;;  %4985 = vmatpush1.bf16.msra.mxu1 %v5010_v8  ;;  %274 = vst [vmem:[#allocation2 + $0x34] sm:$0x1] %v242_v16  ;;  %v5017_v27 = vld [vmem:[%s6381_s1 + $0x14] ss:$8 sps:$4 sm:$0xff]   ;;  %263 = vst [vmem:[#allocation2 + $0x8] sm:$0xe] %v231_v22 }
  0x1b   : > { %471 = vmatprep.subr.bf16.mxu0 %v5011_v9  ;;  %4978 = vmatprep.subr.bf16.mxu1 %v5011_v9  ;;  %v5019_v29 = vld [vmem:[%s6381_s1 + $0x10] ss:$8 sps:$4 sm:$0xff]   ;;  %v244_v30 = vrot.slane %v243_v26, 4  ;;  %275 = vst [vmem:[#allocation2 + $0x38] sm:$0xe] %v243_v26  ;;  %s4965_s9 = sshll.u32 %s6388_s13, 6 }
  0x1c   : > { %v194_v31 = vld [vmem:[#allocation2 + $0x14] sm:$0x2]  ;;  %v216_v32 = vld [vmem:[%s5323_s5 + $0x4] sm:$0xf]  ;;  %264 = vst [vmem:[#allocation2 + $0xc] sm:$0x1] %v232_v28  ;;  %s6316_s14 = scalar_lea.vmem %s6383_s3, %s4965_s9 }
  0x1d   : > { %v195_v33 = vsel %vm5331_vm2, 0, %v194_v31  ;;  %v233_v34 = vrot.slane %v216_v32, 7  ;;  %v212_v35 = vld [vmem:[#allocation2 + $0x44] sm:$0x2]  ;;  %276 = vst [vmem:[#allocation2 + $0x3c] sm:$0x1] %v244_v30 }
  0x1e   : > { %472 = vmatpush1.bf16.msra.mxu0 %v5013_v15  ;;  %4986 = vmatpush1.bf16.msra.mxu1 %v5013_v15  ;;  %v5020_v36 = vld [vmem:[%s6381_s1 + $0x4] ss:$8 sps:$4 sm:$0xff]   ;;  %196 = vst [vmem:[#allocation2 + $0x14] sm:$0x2] %v195_v33  ;;  %v213_v37 = vsel %vm5331_vm2, 0, %v212_v35  ;;  %v5502_v33 = vld [vmem:[#allocation2 + $0x50] sm:$0xff]  }
  0x1f   : > { %473 = vmatprep.subr.bf16.mxu0 %v5014_v17  ;;  %4979 = vmatprep.subr.bf16.mxu1 %v5014_v17  ;;  %v222_v38 = vld [vmem:[%s5323_s5 + $0x1c] sm:$0xf]  ;;  %v234_v39 = vrot.slane %v233_v34, 4  ;;  %265 = vst [vmem:[#allocation2 + $0x10] sm:$0xe] %v233_v34 }
  0x20   : > { %214 = vst [vmem:[#allocation2 + $0x44] sm:$0x2] %v213_v37  ;;  %v245_v40 = vrot.slane %v222_v38, 7  ;;  %v5022_v41 = vld [vmem:[%s6381_s1] ss:$8 sps:$4 sm:$0xff]  }
  0x21   : > { %v5027_v42 = vld [vmem:[%s6381_s1 + $0x174] ss:$8 sps:$4 sm:$0xff]   ;;  %266 = vst [vmem:[#allocation2 + $0x14] sm:$0x1] %v234_v39  ;;  %v217_v47 = vld [vmem:[%s5323_s5 + $0x8] sm:$0xf] }
  0x22   : > { %474 = vmatpush1.bf16.msra.mxu0 %v5016_v25  ;;  %4987 = vmatpush1.bf16.msra.mxu1 %v5016_v25  ;;  %v246_v43 = vrot.slane %v245_v40, 4  ;;  %277 = vst [vmem:[#allocation2 + $0x40] sm:$0xe] %v245_v40  ;;  %v5030_v44 = vld [vmem:[%s6381_s1 + $0xf4] ss:$8 sps:$4 sm:$0xff]   ;;  %v235_v50 = vrot.slane %v217_v47, 7 }
  0x23   : > { %475 = vmatprep.subr.bf16.mxu0 %v5017_v27  ;;  %4980 = vmatprep.subr.bf16.mxu1 %v5017_v27  ;;  %v197_v45 = vld [vmem:[#allocation2 + $0x1c] sm:$0x2]  ;;  %v5025_v49 = vld [vmem:[%s6381_s1 + $0x170] ss:$8 sps:$4 sm:$0xff]   ;;  %v5033_v53 = vld [vmem:[%s6381_s1 + $0x164] ss:$8 sps:$4 sm:$0xff]  }
  0x24   : > { %278 = vst [vmem:[#allocation2 + $0x44] sm:$0x1] %v246_v43  ;;  %v198_v46 = vsel %vm5331_vm2, 0, %v197_v45  ;;  %v5385_v51 = vld [vmem:[#allocation2 + $0x30] sm:$0xff]   ;;  %v236_v52 = vrot.slane %v235_v50, 4  ;;  %v5409_v59 = vld [vmem:[#allocation2 + $0x8] sm:$0xff]  }
  0x25   : > { %199 = vst [vmem:[#allocation2 + $0x1c] sm:$0x2] %v198_v46  ;;  %267 = vst [vmem:[#allocation2 + $0x18] sm:$0xe] %v235_v50  ;;  %v5028_v54 = vld [vmem:[%s6381_s1 + $0xf0] ss:$8 sps:$4 sm:$0xff]  }
  0x26   : > { %476 = vmatpush1.bf16.msra.mxu0 %v5019_v29  ;;  %4988 = vmatpush1.bf16.msra.mxu1 %v5019_v29  ;;  %268 = vst [vmem:[#allocation2 + $0x1c] sm:$0x1] %v236_v52  ;;  %v5038_v55 = vld [vmem:[%s6381_s1 + $0xe4] ss:$8 sps:$4 sm:$0xff]   ;;  %v5031_v56 = vld [vmem:[%s6381_s1 + $0x160] ss:$8 sps:$4 sm:$0xff]  }
  0x27   : > { %477 = vmatprep.subr.bf16.mxu0 %v5020_v36  ;;  %4981 = vmatprep.subr.bf16.mxu1 %v5020_v36  ;;  %v5036_v57 = vld [vmem:[%s6381_s1 + $0xe0] ss:$8 sps:$4 sm:$0xff]   ;;  %v5041_v58 = vld [vmem:[%s6381_s1 + $0x154] ss:$8 sps:$4 sm:$0xff]   ;;  %v5039_v60 = vld [vmem:[%s6381_s1 + $0x150] ss:$8 sps:$4 sm:$0xff]  }
  0x28   : > { %v5414_v61 = vld [vmem:[#allocation2 + $0x38] sm:$0xff]   ;;  %v200_v63 = vld [vmem:[#allocation2 + $0x24] sm:$0x2]  ;;  %v218_v3 = vld [vmem:[%s5323_s5 + $0xc] sm:$0xf] }
  0x29   : > { %v5046_v62 = vld [vmem:[%s6381_s1 + $0xd4] ss:$8 sps:$4 sm:$0xff]   ;;  %v5044_v0 = vld [vmem:[%s6381_s1 + $0xd0] ss:$8 sps:$4 sm:$0xff]   ;;  %v201_v1 = vsel %vm5331_vm2, 0, %v200_v63  ;;  %v237_v4 = vrot.slane %v218_v3, 7 }
  0x2a   : > { %478 = vmatpush1.bf16.msra.mxu0 %v5022_v41  ;;  %4989 = vmatpush1.bf16.msra.mxu1 %v5022_v41  ;;  %202 = vst [vmem:[#allocation2 + $0x24] sm:$0x2] %v201_v1  ;;  %v5049_v5 = vld [vmem:[%s6381_s1 + $0x144] ss:$8 sps:$4 sm:$0xff]   ;;  %v5047_v8 = vld [vmem:[%s6381_s1 + $0x140] ss:$8 sps:$4 sm:$0xff]  }
  0x2b   : > { %1317 = vmatprep.subr.bf16.mxu0 %v5027_v42  ;;  %858 = vmatprep.subr.bf16.mxu1 %v5030_v44  ;;  %v5052_v6 = vld [vmem:[%s6381_s1 + $0xc4] ss:$8 sps:$4 sm:$0xff]   ;;  %v238_v7 = vrot.slane %v237_v4, 4  ;;  %269 = vst [vmem:[#allocation2 + $0x20] sm:$0xe] %v237_v4  ;;  %v5441_v11 = vld [vmem:[#allocation2 + $0x10] sm:$0xff]  }
  0x2c   : > { %v5050_v9 = vld [vmem:[%s6381_s1 + $0xc0] ss:$8 sps:$4 sm:$0xff]   ;;  %v5060_v12 = vld [vmem:[%s6381_s1 + $0x134] ss:$8 sps:$4 sm:$0xff]   ;;  %v203_v13 = vld [vmem:[#allocation2 + $0x2c] sm:$0x2] }
  0x2d   : > { %496 = vmatmul.mubr.bf16.vlgmr.msra.gmra.mxu0 %v5380_v48  ;;  %556 = vmatmul.mubr.bf16.vlgmr.msra.gmra.mxu1 %v5385_v51  ;;  %270 = vst [vmem:[#allocation2 + $0x24] sm:$0x1] %v238_v7  ;;  %v219_v14 = vld [vmem:[%s5323_s5 + $0x10] sm:$0xf]  ;;  %v5447_v15 = vld [vmem:[#allocation2 + $0x40] sm:$0xff]   ;;  %v204_v16 = vsel %vm5331_vm2, 0, %v203_v13 }
  0x2e   : > { %1318 = vmatpush1.bf16.msra.mxu0 %v5025_v49  ;;  %505 = vmatprep.mubr.bf16.mxu0 %v5245_v2  ;;  %v239_v17 = vrot.slane %v219_v14, 7  ;;  %v5057_v18 = vld [vmem:[%s6381_s1 + $0xb4] ss:$8 sps:$4 sm:$0xff]   ;;  %205 = vst [vmem:[#allocation2 + $0x2c] sm:$0x2] %v204_v16  ;;  %v5481_v27 = vld [vmem:[#allocation2 + $0x48] sm:$0xff]  }
  0x2f   : > { %1319 = vmatprep.subr.bf16.mxu0 %v5033_v53  ;;  %565 = vmatprep.mubr.bf16.mxu1 %v5245_v2  ;;  %v5058_v19 = vld [vmem:[%s6381_s1 + $0x130] ss:$8 sps:$4 sm:$0xff]   ;;  %v5066_v21 = vld [vmem:[%s6381_s1 + $0x124] ss:$8 sps:$4 sm:$0xff]   ;;  %v5061_v23 = vld [vmem:[%s6381_s1 + $0xa0] ss:$8 sps:$4 sm:$0xff]  }
  0x30   : > { %859 = vmatpush1.bf16.msra.mxu1 %v5028_v54  ;;  %v240_v20 = vrot.slane %v239_v17, 4  ;;  %271 = vst [vmem:[#allocation2 + $0x28] sm:$0xe] %v239_v17  ;;  %v5055_v10 = vld [vmem:[%s6381_s1 + $0xb0] ss:$8 sps:$4 sm:$0xff]  }
  0x31   : > { %860 = vmatprep.subr.bf16.mxu1 %v5038_v55  ;;  %v5063_v22 = vld [vmem:[%s6381_s1 + $0xa4] ss:$8 sps:$4 sm:$0xff]   ;;  %v5064_v24 = vld [vmem:[%s6381_s1 + $0x120] ss:$8 sps:$4 sm:$0xff]   ;;  %v5077_v25 = vld [vmem:[%s6381_s1 + $0x114] ss:$8 sps:$4 sm:$0xff]  }
  0x32   : > { %1320 = vmatpush1.bf16.msra.mxu0 %v5031_v56  ;;  %272 = vst [vmem:[#allocation2 + $0x2c] sm:$0x1] %v240_v20  ;;  %v5479_v26 = vld [vmem:[#allocation2 + $0x18] sm:$0xff]   ;;  %v5081_v31 = vld [vmem:[%s6381_s1 + $0x104] ss:$8 sps:$4 sm:$0xff]  }
  0x33   : > { %1321 = vmatprep.subr.bf16.mxu0 %v5041_v58  ;;  %v5071_v28 = vld [vmem:[%s6381_s1 + $0x94] ss:$8 sps:$4 sm:$0xff]   ;;  %v5075_v29 = vld [vmem:[%s6381_s1 + $0x110] ss:$8 sps:$4 sm:$0xff]   ;;  %v5074_v32 = vld [vmem:[%s6381_s1 + $0x84] ss:$8 sps:$4 sm:$0xff]  }
  0x34   : > { %861 = vmatpush1.bf16.msra.mxu1 %v5036_v57  ;;  %v5069_v30 = vld [vmem:[%s6381_s1 + $0x90] ss:$8 sps:$4 sm:$0xff]   ;;  %v5072_v34 = vld [vmem:[%s6381_s1 + $0x80] ss:$8 sps:$4 sm:$0xff]   ;;  %v5087_v36 = vld [vmem:[%s6381_s1 + $0x274] ss:$8 sps:$4 sm:$0xff]  }
  0x35   : > { %506 = vmatmul.mubr.bf16.gmra.mxu0 %v5409_v59  ;;  %566 = vmatmul.mubr.bf16.gmra.mxu1 %v5414_v61  ;;  %v5079_v35 = vld [vmem:[%s6381_s1 + $0x100] ss:$8 sps:$4 sm:$0xff]   ;;  %v5084_v38 = vld [vmem:[%s6381_s1 + $0x1f4] ss:$8 sps:$4 sm:$0xff]   ;;  %v5082_v40 = vld [vmem:[%s6381_s1 + $0x1f0] ss:$8 sps:$4 sm:$0xff]  }
  0x36   : > { %1322 = vmatpush1.bf16.msra.mxu0 %v5039_v60  ;;  %515 = vmatprep.mubr.bf16.mxu0 %v5245_v2  ;;  %v5513_v37 = vld [vmem:[#allocation2 + $0x20] sm:$0xff]   ;;  %v5096_v43 = vld [vmem:[%s6381_s1 + $0x1d4] ss:$8 sps:$4 sm:$0xff]   ;;  %v5085_v44 = vld [vmem:[%s6381_s1 + $0x270] ss:$8 sps:$4 sm:$0xff]  }
  0x37   : > { %575 = vmatprep.mubr.bf16.mxu1 %v5245_v2  ;;  %862 = vmatprep.subr.bf16.mxu1 %v5046_v62  ;;  %v5090_v41 = vld [vmem:[%s6381_s1 + $0x1e4] ss:$8 sps:$4 sm:$0xff]   ;;  %v5088_v42 = vld [vmem:[%s6381_s1 + $0x1e0] ss:$8 sps:$4 sm:$0xff]   ;;  %v5094_v46 = vld [vmem:[%s6381_s1 + $0x1d0] ss:$8 sps:$4 sm:$0xff]  }
  0x38   : > { %863 = vmatpush1.bf16.msra.mxu1 %v5044_v0  ;;  %1323 = vmatprep.subr.bf16.mxu0 %v5049_v5  ;;  %v5093_v45 = vld [vmem:[%s6381_s1 + $0x264] ss:$8 sps:$4 sm:$0xff]   ;;  %v5091_v47 = vld [vmem:[%s6381_s1 + $0x260] ss:$8 sps:$4 sm:$0xff]   ;;  %v5099_v50 = vld [vmem:[%s6381_s1 + $0x254] ss:$8 sps:$4 sm:$0xff]  }
  0x39   : > { %864 = vmatprep.subr.bf16.mxu1 %v5052_v6  ;;  %v5522_v39 = vld [vmem:[#allocation2 + $0x28] sm:$0xff]   ;;  %v5097_v53 = vld [vmem:[%s6381_s1 + $0x250] ss:$8 sps:$4 sm:$0xff]   ;;  %v5108_v54 = vld [vmem:[%s6381_s1 + $0x1b4] ss:$8 sps:$4 sm:$0xff]  }
  0x3a   : > { %1324 = vmatpush1.bf16.msra.mxu0 %v5047_v8  ;;  %v5102_v49 = vld [vmem:[%s6381_s1 + $0x1c4] ss:$8 sps:$4 sm:$0xff]   ;;  %v5100_v52 = vld [vmem:[%s6381_s1 + $0x1c0] ss:$8 sps:$4 sm:$0xff]   ;;  %v5106_v56 = vld [vmem:[%s6381_s1 + $0x1b0] ss:$8 sps:$4 sm:$0xff]  }
  0x3b   : > { %1325 = vmatprep.subr.bf16.mxu0 %v5060_v12  ;;  %v5105_v55 = vld [vmem:[%s6381_s1 + $0x244] ss:$8 sps:$4 sm:$0xff]   ;;  %v5103_v57 = vld [vmem:[%s6381_s1 + $0x240] ss:$8 sps:$4 sm:$0xff]   ;;  %v5111_v60 = vld [vmem:[%s6381_s1 + $0x234] ss:$8 sps:$4 sm:$0xff]  }
  0x3c   : > { %865 = vmatpush1.bf16.msra.mxu1 %v5050_v9  ;;  %v5114_v58 = vld [vmem:[%s6381_s1 + $0x1a4] ss:$8 sps:$4 sm:$0xff]   ;;  %v5112_v62 = vld [vmem:[%s6381_s1 + $0x1a0] ss:$8 sps:$4 sm:$0xff]   ;;  %v5109_v63 = vld [vmem:[%s6381_s1 + $0x230] ss:$8 sps:$4 sm:$0xff]  }
  0x3d   : > { %516 = vmatmul.mubr.bf16.gmra.mxu0 %v5441_v11  ;;  %576 = vmatmul.mubr.bf16.gmra.mxu1 %v5447_v15  ;;  %v5120_v0 = vld [vmem:[%s6381_s1 + $0x194] ss:$8 sps:$4 sm:$0xff]   ;;  %v5117_v1 = vld [vmem:[%s6381_s1 + $0x224] ss:$8 sps:$4 sm:$0xff]   ;;  %v5118_v3 = vld [vmem:[%s6381_s1 + $0x190] ss:$8 sps:$4 sm:$0xff]  }
  0x3e   : > { %525 = vmatprep.mubr.bf16.mxu0 %v5245_v2  ;;  %583 = vmatprep.mubr.bf16.mxu1 %v5245_v2  ;;  %v5126_v4 = vld [vmem:[%s6381_s1 + $0x184] ss:$8 sps:$4 sm:$0xff]   ;;  %v5115_v5 = vld [vmem:[%s6381_s1 + $0x220] ss:$8 sps:$4 sm:$0xff]   ;;  %v5123_v6 = vld [vmem:[%s6381_s1 + $0x214] ss:$8 sps:$4 sm:$0xff]  }
  0x3f   : > { %866 = vmatprep.subr.bf16.mxu1 %v5057_v18  ;;  %1326 = vmatpush1.bf16.msra.mxu0 %v5058_v19  ;;  %v5124_v7 = vld [vmem:[%s6381_s1 + $0x180] ss:$8 sps:$4 sm:$0xff]   ;;  %v5121_v8 = vld [vmem:[%s6381_s1 + $0x210] ss:$8 sps:$4 sm:$0xff]   ;;  %v5132_v9 = vld [vmem:[%s6381_s1 + $0x2f4] ss:$8 sps:$4 sm:$0xff]  }
  0x40   : > { %867 = vmatpush1.bf16.msra.mxu1 %v5055_v10  ;;  %1327 = vmatprep.subr.bf16.mxu0 %v5066_v21  ;;  %v5129_v12 = vld [vmem:[%s6381_s1 + $0x204] ss:$8 sps:$4 sm:$0xff]   ;;  %v5127_v13 = vld [vmem:[%s6381_s1 + $0x200] ss:$8 sps:$4 sm:$0xff]   ;;  %v5135_v14 = vld [vmem:[%s6381_s1 + $0x374] ss:$8 sps:$4 sm:$0xff]  }
  0x41   : > { %868 = vmatprep.subr.bf16.mxu1 %v5063_v22  ;;  %v5130_v16 = vld [vmem:[%s6381_s1 + $0x2f0] ss:$8 sps:$4 sm:$0xff]   ;;  %v5138_v17 = vld [vmem:[%s6381_s1 + $0x2e4] ss:$8 sps:$4 sm:$0xff]   ;;  %v5136_v18 = vld [vmem:[%s6381_s1 + $0x2e0] ss:$8 sps:$4 sm:$0xff]  }
  0x42   : > { %v5144_v19 = vld [vmem:[%s6381_s1 + $0x2d4] ss:$8 sps:$4 sm:$0xff]   ;;  %v5133_v20 = vld [vmem:[%s6381_s1 + $0x370] ss:$8 sps:$4 sm:$0xff]   ;;  %v5141_v10 = vld [vmem:[%s6381_s1 + $0x364] ss:$8 sps:$4 sm:$0xff]  }
  0x43   : > { %1328 = vmatpush1.bf16.msra.mxu0 %v5064_v24  ;;  %v5142_v21 = vld [vmem:[%s6381_s1 + $0x2d0] ss:$8 sps:$4 sm:$0xff]   ;;  %v5150_v22 = vld [vmem:[%s6381_s1 + $0x2c4] ss:$8 sps:$4 sm:$0xff]   ;;  %v5147_v24 = vld [vmem:[%s6381_s1 + $0x354] ss:$8 sps:$4 sm:$0xff]  }
  0x44   : > { %869 = vmatpush1.bf16.msra.mxu1 %v5061_v23  ;;  %1329 = vmatprep.subr.bf16.mxu0 %v5077_v25  ;;  %v5139_v23 = vld [vmem:[%s6381_s1 + $0x360] ss:$8 sps:$4 sm:$0xff]   ;;  %v5145_v25 = vld [vmem:[%s6381_s1 + $0x350] ss:$8 sps:$4 sm:$0xff]  }
  0x45   : > { %526 = vmatmul.mubr.bf16.gmra.mxu0 %v5479_v26  ;;  %584 = vmatmul.mubr.bf16.gmra.mxu1 %v5481_v27 }
  0x46   : > { %535 = vmatprep.mubr.bf16.mxu0 %v5245_v2  ;;  %589 = vmatprep.mubr.bf16.mxu1 %v5245_v2 }
  0x47   : > { %870 = vmatprep.subr.bf16.mxu1 %v5071_v28  ;;  %1330 = vmatpush1.bf16.msra.mxu0 %v5075_v29  ;;  %v5156_v28 = vld [vmem:[%s6381_s1 + $0x2b4] ss:$8 sps:$4 sm:$0xff]   ;;  %v5153_v29 = vld [vmem:[%s6381_s1 + $0x344] ss:$8 sps:$4 sm:$0xff]  }
  0x48   : > { %871 = vmatpush1.bf16.msra.mxu1 %v5069_v30  ;;  %1331 = vmatprep.subr.bf16.mxu0 %v5081_v31  ;;  %v5154_v30 = vld [vmem:[%s6381_s1 + $0x2b0] ss:$8 sps:$4 sm:$0xff]   ;;  %v5162_v31 = vld [vmem:[%s6381_s1 + $0x2a4] ss:$8 sps:$4 sm:$0xff]  }
  0x49   : > { %872 = vmatprep.subr.bf16.mxu1 %v5074_v32  ;;  %v5151_v32 = vld [vmem:[%s6381_s1 + $0x340] ss:$8 sps:$4 sm:$0xff]  }
  0x4b   : > { %1332 = vmatpush1.bf16.msra.mxu0 %v5079_v35  ;;  %v5160_v35 = vld [vmem:[%s6381_s1 + $0x2a0] ss:$8 sps:$4 sm:$0xff]  }
  0x4c   : > { %873 = vmatpush1.bf16.msra.mxu1 %v5072_v34  ;;  %2234 = vmatprep.subr.bf16.mxu0 %v5087_v36  ;;  %v5159_v34 = vld [vmem:[%s6381_s1 + $0x334] ss:$8 sps:$4 sm:$0xff]   ;;  %v5157_v36 = vld [vmem:[%s6381_s1 + $0x330] ss:$8 sps:$4 sm:$0xff]  }
  0x4d   : > { %536 = vmatmul.mubr.bf16.gmra.mxu0 %v5513_v37  ;;  %590 = vmatmul.mubr.bf16.gmra.mxu1 %v5502_v33 }
  0x4e   : > { %545 = vmatprep.mubr.bf16.mxu0 %v5245_v2  ;;  %890 = vmatprep.mubr.bf16.mxu1 %v5245_v2 }
  0x4f   : > { %1776 = vmatprep.subr.bf16.mxu1 %v5084_v38  ;;  %v5168_v38 = vld [vmem:[%s6381_s1 + $0x294] ss:$8 sps:$4 sm:$0xff]  }
  0x55   : > { %546 = vmatmul.mubr.bf16.gmra.mxu0 %v5522_v39  ;;  %891 = vmatmul.mubr.bf16.vlgmr.msra.gmra.mxu1 %v5380_v48 }
  0x56   : > { %900 = vmatprep.mubr.bf16.mxu1 %v5245_v2  ;;  %1349 = vmatprep.mubr.bf16.mxu0 %v5245_v2 }
  0x57   : > { %1777 = vmatpush1.bf16.msra.mxu1 %v5082_v40  ;;  %v5165_v40 = vld [vmem:[%s6381_s1 + $0x324] ss:$8 sps:$4 sm:$0xff]  }
  0x58   : > { %1778 = vmatprep.subr.bf16.mxu1 %v5090_v41  ;;  %v5166_v41 = vld [vmem:[%s6381_s1 + $0x290] ss:$8 sps:$4 sm:$0xff]  }
  0x5b   : > { %1779 = vmatpush1.bf16.msra.mxu1 %v5088_v42  ;;  %v5174_v42 = vld [vmem:[%s6381_s1 + $0x284] ss:$8 sps:$4 sm:$0xff]  }
  0x5c   : > { %1780 = vmatprep.subr.bf16.mxu1 %v5096_v43  ;;  %v5163_v43 = vld [vmem:[%s6381_s1 + $0x320] ss:$8 sps:$4 sm:$0xff]  }
  0x5d   : > { %901 = vmatmul.mubr.bf16.gmra.mxu1 %v5409_v59  ;;  %1350 = vmatmul.mubr.bf16.vlgmr.msra.gmra.mxu0 %v5380_v48 }
  0x5e   : > { %2235 = vmatpush1.bf16.msra.mxu0 %v5085_v44  ;;  %910 = vmatprep.mubr.bf16.mxu1 %v5245_v2  ;;  %v5171_v44 = vld [vmem:[%s6381_s1 + $0x314] ss:$8 sps:$4 sm:$0xff]  }
  0x5f   : > { %1359 = vmatprep.mubr.bf16.mxu0 %v5245_v2  ;;  %2236 = vmatprep.subr.bf16.mxu0 %v5093_v45  ;;  %v5172_v45 = vld [vmem:[%s6381_s1 + $0x280] ss:$8 sps:$4 sm:$0xff]  }
  0x60   : > { %1781 = vmatpush1.bf16.msra.mxu1 %v5094_v46  ;;  %v5169_v46 = vld [vmem:[%s6381_s1 + $0x310] ss:$8 sps:$4 sm:$0xff]  }
  0x61   : > { %1782 = vmatprep.subr.bf16.mxu1 %v5102_v49  ;;  %v5177_v49 = vld [vmem:[%s6381_s1 + $0x304] ss:$8 sps:$4 sm:$0xff]  }
  0x62   : > { %2237 = vmatpush1.bf16.msra.mxu0 %v5091_v47  ;;  %v5180_v47 = vld [vmem:[%s6381_s1 + $0x3f4] ss:$8 sps:$4 sm:$0xff]  }
  0x63   : > { %2238 = vmatprep.subr.bf16.mxu0 %v5099_v50  ;;  %v5175_v50 = vld [vmem:[%s6381_s1 + $0x300] ss:$8 sps:$4 sm:$0xff]  }
  0x64   : > { %1783 = vmatpush1.bf16.msra.mxu1 %v5100_v52  ;;  %v5183_v52 = vld [vmem:[%s6381_s1 + $0x474] ss:$8 sps:$4 sm:$0xff]  }
  0x65   : > { %911 = vmatmul.mubr.bf16.gmra.mxu1 %v5441_v11  ;;  %1360 = vmatmul.mubr.bf16.gmra.mxu0 %v5409_v59 }
  0x66   : > { %920 = vmatprep.mubr.bf16.mxu1 %v5245_v2  ;;  %1369 = vmatprep.mubr.bf16.mxu0 %v5245_v2 }
  0x67   : > { %2239 = vmatpush1.bf16.msra.mxu0 %v5097_v53  ;;  %1784 = vmatprep.subr.bf16.mxu1 %v5108_v54 }
  0x68   : > { %2240 = vmatprep.subr.bf16.mxu0 %v5105_v55  ;;  %1785 = vmatpush1.bf16.msra.mxu1 %v5106_v56 }
  0x69   : > { %1786 = vmatprep.subr.bf16.mxu1 %v5114_v58 }
  0x6b   : > { %2241 = vmatpush1.bf16.msra.mxu0 %v5103_v57 }
  0x6c   : > { %2242 = vmatprep.subr.bf16.mxu0 %v5111_v60  ;;  %1787 = vmatpush1.bf16.msra.mxu1 %v5112_v62 }
  0x6d   : > { %921 = vmatmul.mubr.bf16.gmra.mxu1 %v5479_v26  ;;  %1370 = vmatmul.mubr.bf16.gmra.mxu0 %v5441_v11 }
  0x6e   : > { %930 = vmatprep.mubr.bf16.mxu1 %v5245_v2  ;;  %1379 = vmatprep.mubr.bf16.mxu0 %v5245_v2 }
  0x6f   : > { %2243 = vmatpush1.bf16.msra.mxu0 %v5109_v63  ;;  %1788 = vmatprep.subr.bf16.mxu1 %v5120_v0 }
  0x70   : > { %2244 = vmatprep.subr.bf16.mxu0 %v5117_v1  ;;  %1789 = vmatpush1.bf16.msra.mxu1 %v5118_v3 }
  0x71   : > { %1790 = vmatprep.subr.bf16.mxu1 %v5126_v4 }
  0x73   : > { %2245 = vmatpush1.bf16.msra.mxu0 %v5115_v5 }
  0x74   : > { %2246 = vmatprep.subr.bf16.mxu0 %v5123_v6  ;;  %1791 = vmatpush1.bf16.msra.mxu1 %v5124_v7 }
  0x75   : > { %931 = vmatmul.mubr.bf16.gmra.mxu1 %v5513_v37  ;;  %1380 = vmatmul.mubr.bf16.gmra.mxu0 %v5479_v26 }
  0x76   : > { %940 = vmatprep.mubr.bf16.mxu1 %v5245_v2  ;;  %1389 = vmatprep.mubr.bf16.mxu0 %v5245_v2 }
  0x77   : > { %2247 = vmatpush1.bf16.msra.mxu0 %v5121_v8  ;;  %2692 = vmatprep.subr.bf16.mxu1 %v5132_v9 }
  0x78   : > { %2248 = vmatprep.subr.bf16.mxu0 %v5129_v12 }
  0x7b   : > { %2249 = vmatpush1.bf16.msra.mxu0 %v5127_v13 }
  0x7c   : > { %3150 = vmatprep.subr.bf16.mxu0 %v5135_v14 }
  0x7d   : > { %941 = vmatmul.mubr.bf16.gmra.mxu1 %v5522_v39  ;;  %1390 = vmatmul.mubr.bf16.gmra.mxu0 %v5513_v37 }
  0x7e   : > { %950 = vmatprep.mubr.bf16.mxu1 %v5245_v2  ;;  %1399 = vmatprep.mubr.bf16.mxu0 %v5245_v2 }
  0x85   : > { %951 = vmatmul.mubr.bf16.gmra.mxu1 %v5385_v51  ;;  %1400 = vmatmul.mubr.bf16.gmra.mxu0 %v5522_v39 }
  0x86   : > { %960 = vmatprep.mubr.bf16.mxu1 %v5245_v2  ;;  %1409 = vmatprep.mubr.bf16.mxu0 %v5245_v2 }
  0x8d   : > { %961 = vmatmul.mubr.bf16.gmra.mxu1 %v5414_v61  ;;  %1410 = vmatmul.mubr.bf16.gmra.mxu0 %v5385_v51 }
  0x8e   : > { %970 = vmatprep.mubr.bf16.mxu1 %v5245_v2  ;;  %1419 = vmatprep.mubr.bf16.mxu0 %v5245_v2 }
  0x95   : > { %971 = vmatmul.mubr.bf16.gmra.mxu1 %v5447_v15  ;;  %1420 = vmatmul.mubr.bf16.gmra.mxu0 %v5414_v61 }
  0x96   : > { %978 = vmatprep.mubr.bf16.mxu1 %v5245_v2  ;;  %1429 = vmatprep.mubr.bf16.mxu0 %v5245_v2 }
  0x9d   : > { %979 = vmatmul.mubr.bf16.gmra.mxu1 %v5481_v27  ;;  %1430 = vmatmul.mubr.bf16.gmra.mxu0 %v5447_v15 }
  0x9e   : > { %984 = vmatprep.mubr.bf16.mxu1 %v5245_v2  ;;  %1437 = vmatprep.mubr.bf16.mxu0 %v5245_v2 }
  0xa5   : > { %985 = vmatmul.mubr.bf16.gmra.mxu1 %v5502_v33  ;;  %1438 = vmatmul.mubr.bf16.gmra.mxu0 %v5481_v27 }
  0xa6   : > { %1443 = vmatprep.mubr.bf16.mxu0 %v5245_v2  ;;  %1808 = vmatprep.mubr.bf16.mxu1 %v5245_v2 }
  0xad   : > { %1444 = vmatmul.mubr.bf16.gmra.mxu0 %v5502_v33  ;;  %1809 = vmatmul.mubr.bf16.vlgmr.msra.gmra.mxu1 %v5380_v48 }
  0xae   : > { %1814 = vmatprep.mubr.bf16.mxu1 %v5245_v2  ;;  %2266 = vmatprep.mubr.bf16.mxu0 %v5245_v2 }
  0xaf   : > { %2693 = vmatpush1.bf16.msra.mxu1 %v5130_v16 }
  0xb0   : > { %2694 = vmatprep.subr.bf16.mxu1 %v5138_v17 }
  0xb3   : > { %2695 = vmatpush1.bf16.msra.mxu1 %v5136_v18 }
  0xb4   : > { %2696 = vmatprep.subr.bf16.mxu1 %v5144_v19 }
  0xb5   : > { %1815 = vmatmul.mubr.bf16.gmra.mxu1 %v5409_v59  ;;  %2267 = vmatmul.mubr.bf16.vlgmr.msra.gmra.mxu0 %v5380_v48  ;;  %v5148_v48 = vld [vmem:[%s6381_s1 + $0x2c0] ss:$8 sps:$4 sm:$0xff]  }
  0xb6   : > { %3151 = vmatpush1.bf16.msra.mxu0 %v5133_v20  ;;  %1824 = vmatprep.mubr.bf16.mxu1 %v5245_v2 }
  0xb7   : > { %2272 = vmatprep.mubr.bf16.mxu0 %v5245_v2  ;;  %3152 = vmatprep.subr.bf16.mxu0 %v5141_v10 }
  0xb8   : > { %2697 = vmatpush1.bf16.msra.mxu1 %v5142_v21 }
  0xb9   : > { %2698 = vmatprep.subr.bf16.mxu1 %v5150_v22 }
  0xba   : > { %3153 = vmatpush1.bf16.msra.mxu0 %v5139_v23 }
  0xbb   : > { %3154 = vmatprep.subr.bf16.mxu0 %v5147_v24 }
  0xbc   : > { %2699 = vmatpush1.bf16.msra.mxu1 %v5148_v48 }
  0xbd   : > { %1825 = vmatmul.mubr.bf16.gmra.mxu1 %v5441_v11  ;;  %2273 = vmatmul.mubr.bf16.gmra.mxu0 %v5409_v59 }
  0xbe   : > { %1834 = vmatprep.mubr.bf16.mxu1 %v5245_v2  ;;  %2282 = vmatprep.mubr.bf16.mxu0 %v5245_v2 }
  0xbf   : > { %3155 = vmatpush1.bf16.msra.mxu0 %v5145_v25  ;;  %2700 = vmatprep.subr.bf16.mxu1 %v5156_v28 }
  0xc0   : > { %3156 = vmatprep.subr.bf16.mxu0 %v5153_v29  ;;  %2701 = vmatpush1.bf16.msra.mxu1 %v5154_v30 }
  0xc1   : > { %2702 = vmatprep.subr.bf16.mxu1 %v5162_v31 }
  0xc3   : > { %3157 = vmatpush1.bf16.msra.mxu0 %v5151_v32 }
  0xc4   : > { %3158 = vmatprep.subr.bf16.mxu0 %v5159_v34  ;;  %2703 = vmatpush1.bf16.msra.mxu1 %v5160_v35 }
  0xc5   : > { %1835 = vmatmul.mubr.bf16.gmra.mxu1 %v5479_v26  ;;  %2283 = vmatmul.mubr.bf16.gmra.mxu0 %v5441_v11 }
  0xc6   : > { %1844 = vmatprep.mubr.bf16.mxu1 %v5245_v2  ;;  %2292 = vmatprep.mubr.bf16.mxu0 %v5245_v2 }
  0xc7   : > { %3159 = vmatpush1.bf16.msra.mxu0 %v5157_v36  ;;  %2704 = vmatprep.subr.bf16.mxu1 %v5168_v38 }
  0xc8   : > { %3160 = vmatprep.subr.bf16.mxu0 %v5165_v40  ;;  %2705 = vmatpush1.bf16.msra.mxu1 %v5166_v41 }
  0xc9   : > { %2706 = vmatprep.subr.bf16.mxu1 %v5174_v42 }
  0xcb   : > { %3161 = vmatpush1.bf16.msra.mxu0 %v5163_v43 }
  0xcc   : > { %3162 = vmatprep.subr.bf16.mxu0 %v5171_v44  ;;  %2707 = vmatpush1.bf16.msra.mxu1 %v5172_v45 }
  0xcd   : > { %1845 = vmatmul.mubr.bf16.gmra.mxu1 %v5513_v37  ;;  %2293 = vmatmul.mubr.bf16.gmra.mxu0 %v5479_v26 }
  0xce   : > { %1854 = vmatprep.mubr.bf16.mxu1 %v5245_v2  ;;  %2302 = vmatprep.mubr.bf16.mxu0 %v5245_v2 }
  0xcf   : > { %3163 = vmatpush1.bf16.msra.mxu0 %v5169_v46  ;;  %3608 = vmatprep.subr.bf16.mxu1 %v5180_v47  ;;  %v5186_v47 = vld [vmem:[%s6381_s1 + $0x3e4] ss:$8 sps:$4 sm:$0xff]  }
  0xd0   : > { %3164 = vmatprep.subr.bf16.mxu0 %v5177_v49 }
  0xd3   : > { %3165 = vmatpush1.bf16.msra.mxu0 %v5175_v50 }
  0xd4   : > { %4066 = vmatprep.subr.bf16.mxu0 %v5183_v52  ;;  %v5838_v52 = vld [vmem:[#allocation2] sm:$0xff]  }
  0xd5   : > { %1855 = vmatmul.mubr.bf16.gmra.mxu1 %v5522_v39  ;;  %2303 = vmatmul.mubr.bf16.gmra.mxu0 %v5513_v37 }
  0xd6   : > { %1864 = vmatprep.mubr.bf16.mxu1 %v5245_v2  ;;  %2312 = vmatprep.mubr.bf16.mxu0 %v5245_v2 }
  0xdd   : > { %1865 = vmatmul.mubr.bf16.gmra.mxu1 %v5385_v51  ;;  %2313 = vmatmul.mubr.bf16.gmra.mxu0 %v5522_v39 }
  0xde   : > { %1874 = vmatprep.mubr.bf16.mxu1 %v5245_v2  ;;  %2322 = vmatprep.mubr.bf16.mxu0 %v5245_v2 }
  0xe5   : > { %1875 = vmatmul.mubr.bf16.gmra.mxu1 %v5414_v61  ;;  %2323 = vmatmul.mubr.bf16.gmra.mxu0 %v5385_v51 }
  0xe6   : > { %1884 = vmatprep.mubr.bf16.mxu1 %v5245_v2  ;;  %2332 = vmatprep.mubr.bf16.mxu0 %v5245_v2 }
  0xed   : > { %v497_v53 = vpop.f32.mrf.mxu0  ;;  %v557_v54 = vpop.f32.mrf.mxu1  ;;  %1885 = vmatmul.mubr.bf16.gmra.mxu1 %v5447_v15  ;;  %2333 = vmatmul.mubr.bf16.gmra.mxu0 %v5414_v61 }
  0xee   : > { %1894 = vmatprep.mubr.bf16.mxu1 %v5245_v2  ;;  %2342 = vmatprep.mubr.bf16.mxu0 %v5245_v2  ;;  %v677_v56 = vrot.slane %v557_v54, 1  ;;  %v631_v58 = vrot.slane %v497_v53, 1 }
  0xef   : > { %v499_v39 = vpop.f32.mrf.mxu0  ;;  %v559_v55 = vpop.f32.mrf.mxu1 }
  0xf0   : > { %v679_v60 = vrot.slane %v559_v55, 1  ;;  %v634_v0 = vrot.slane %v499_v39, 1  ;;  %v5184_v55 = vld [vmem:[%s6381_s1 + $0x3e0] ss:$8 sps:$4 sm:$0xff]  }
  0xf1   : > { %v501_v57 = vpop.f32.mrf.mxu0  ;;  %v561_v51 = vpop.f32.mrf.mxu1 }
  0xf2   : > { %v632_v62 = vrot.slane %v501_v57, 1  ;;  %v681_v63 = vrot.slane %v561_v51, 1 }
  0xf3   : > { %v503_v1 = vpop.f32.mrf.mxu0  ;;  %v563_v3 = vpop.f32.mrf.mxu1 }
  0xf4   : > { %v5797_v4 = vsel %vm630_vm3, %v631_v58, %v632_v62  ;;  %v5800_v61 = vsel %vm630_vm3, %v677_v56, %v681_v63  ;;  %v635_v5 = vrot.slane %v503_v1, 1  ;;  %v683_v6 = vrot.slane %v563_v3, 1 }
  0xf5   : > { %v507_v7 = vpop.f32.mrf.mxu0  ;;  %v567_v8 = vpop.f32.mrf.mxu1  ;;  %1895 = vmatmul.mubr.bf16.gmra.mxu1 %v5481_v27  ;;  %2343 = vmatmul.mubr.bf16.gmra.mxu0 %v5447_v15 }
  0xf6   : > { %v5805_v9 = vsel %vm630_vm3, %v634_v0, %v635_v5  ;;  %v5808_v12 = vsel %vm630_vm3, %v679_v60, %v683_v6  ;;  %1902 = vmatprep.mubr.bf16.mxu1 %v5245_v2  ;;  %2352 = vmatprep.mubr.bf16.mxu0 %v5245_v2  ;;  %v685_v16 = vrot.slane %v567_v8, 1  ;;  %v637_v19 = vrot.slane %v507_v7, 1  ;;  %v5181_v60 = vld [vmem:[%s6381_s1 + $0x470] ss:$8 sps:$4 sm:$0xff]   ;;  %v5189_v0 = vld [vmem:[%s6381_s1 + $0x464] ss:$8 sps:$4 sm:$0xff]  }
  0xf7   : > { %v509_v13 = vpop.f32.mrf.mxu0  ;;  %v569_v14 = vpop.f32.mrf.mxu1  ;;  %v5190_v6 = vld [vmem:[%s6381_s1 + $0x3d0] ss:$8 sps:$4 sm:$0xff]  }
  0xf8   : > { %v687_v20 = vrot.slane %v569_v14, 1  ;;  %v639_v15 = vrot.slane %v509_v13, 1  ;;  %v5198_v13 = vld [vmem:[%s6381_s1 + $0x3c4] ss:$8 sps:$4 sm:$0xff]  }
  0xf9   : > { %v511_v17 = vpop.f32.mrf.mxu0  ;;  %v571_v18 = vpop.f32.mrf.mxu1 }
  0xfa   : > { %v641_v10 = vrot.slane %v511_v17, 1  ;;  %v689_v21 = vrot.slane %v571_v18, 1 }
  0xfb   : > { %v513_v22 = vpop.f32.mrf.mxu0  ;;  %v573_v23 = vpop.f32.mrf.mxu1 }
  0xfc   : > { %v5813_v24 = vsel %vm630_vm3, %v637_v19, %v641_v10  ;;  %v5816_v48 = vsel %vm630_vm3, %v685_v16, %v689_v21  ;;  %v643_v25 = vrot.slane %v513_v22, 1  ;;  %v691_v28 = vrot.slane %v573_v23, 1  ;;  %v5187_v16 = vld [vmem:[%s6381_s1 + $0x460] ss:$8 sps:$4 sm:$0xff]  }
  0xfd   : > { %v517_v29 = vpop.f32.mrf.mxu0  ;;  %v577_v30 = vpop.f32.mrf.mxu1  ;;  %1903 = vmatmul.mubr.bf16.gmra.mxu1 %v5502_v33  ;;  %2353 = vmatmul.mubr.bf16.gmra.mxu0 %v5481_v27  ;;  %v5178_v27 = vld [vmem:[%s6381_s1 + $0x3f0] ss:$8 sps:$4 sm:$0xff]   ;;  %v5196_v19 = vld [vmem:[%s6381_s1 + $0x3c0] ss:$8 sps:$4 sm:$0xff]  }
  0xfe   : > { %v5821_v31 = vsel %vm630_vm3, %v639_v15, %v643_v25  ;;  %v5824_v32 = vsel %vm630_vm3, %v687_v20, %v691_v28  ;;  %2360 = vmatprep.mubr.bf16.mxu0 %v5245_v2  ;;  %2724 = vmatprep.mubr.bf16.mxu1 %v5245_v2  ;;  %v645_v40 = vrot.slane %v517_v29, 1  ;;  %v5193_v25 = vld [vmem:[%s6381_s1 + $0x450] ss:$8 sps:$4 sm:$0xff]   ;;  %v5204_v28 = vld [vmem:[%s6381_s1 + $0x3b4] ss:$8 sps:$4 sm:$0xff]  }
  0xff   : > { %v519_v34 = vpop.f32.mrf.mxu0  ;;  %v579_v35 = vpop.f32.mrf.mxu1 }
 0x100   : > { %v647_v44 = vrot.slane %v519_v34, 1  ;;  %v5201_v35 = vld [vmem:[%s6381_s1 + $0x444] ss:$8 sps:$4 sm:$0xff]  }
 0x101   : > { %v521_v36 = vpop.f32.mrf.mxu0  ;;  %v581_v38 = vpop.f32.mrf.mxu1 }
 0x102   : > { %v649_v41 = vrot.slane %v521_v36, 1  ;;  %v5202_v36 = vld [vmem:[%s6381_s1 + $0x3b0] ss:$8 sps:$4 sm:$0xff]  }
 0x103   : > { %v523_v42 = vpop.f32.mrf.mxu0  ;;  %v582_v43 = vpop.f32.mrf.mxu1 }
 0x104   : > { %v5832_v45 = vsel %vm630_vm3, %v645_v40, %v649_v41  ;;  %v651_v46 = vrot.slane %v523_v42, 1  ;;  %v5899_v41 = vld [vmem:[#allocation2 + $0x8] sm:$0xff]  }
 0x105   : > { %v527_v49 = vpop.f32.mrf.mxu0  ;;  %v585_v50 = vpop.f32.mrf.mxu1  ;;  %2361 = vmatmul.mubr.bf16.gmra.mxu0 %v5502_v33  ;;  %2725 = vmatmul.mubr.bf16.vlgmr.msra.gmra.mxu1 %v5838_v52  ;;  %v5192_v33 = vld [vmem:[%s6381_s1 + $0x3d4] ss:$8 sps:$4 sm:$0xff]   ;;  %v5210_v42 = vld [vmem:[%s6381_s1 + $0x3a4] ss:$8 sps:$4 sm:$0xff]  }
 0x106   : > { %v5842_v53 = vsel %vm630_vm3, %v647_v44, %v651_v46  ;;  %2730 = vmatprep.mubr.bf16.mxu1 %v5245_v2  ;;  %3182 = vmatprep.mubr.bf16.mxu0 %v5245_v2  ;;  %v653_v51 = vrot.slane %v527_v49, 1  ;;  %v5208_v49 = vld [vmem:[%s6381_s1 + $0x3a0] ss:$8 sps:$4 sm:$0xff]  }
 0x107   : > { %v529_v54 = vpop.f32.mrf.mxu0  ;;  %v586_v39 = vpop.f32.mrf.mxu1  ;;  %3609 = vmatpush1.bf16.msra.mxu1 %v5178_v27 }
 0x108   : > { %3610 = vmatprep.subr.bf16.mxu1 %v5186_v47  ;;  %v655_v1 = vrot.slane %v529_v54, 1  ;;  %v5207_v47 = vld [vmem:[%s6381_s1 + $0x434] ss:$8 sps:$4 sm:$0xff]  }
 0x109   : > { %v531_v56 = vpop.f32.mrf.mxu0  ;;  %v587_v57 = vpop.f32.mrf.mxu1 }
 0x10a   : > { %v657_v58 = vrot.slane %v531_v56, 1 }
 0x10b   : > { %v533_v62 = vpop.f32.mrf.mxu0  ;;  %v588_v63 = vpop.f32.mrf.mxu1  ;;  %3611 = vmatpush1.bf16.msra.mxu1 %v5184_v55 }
 0x10c   : > { %v5859_v3 = vsel %vm630_vm3, %v653_v51, %v657_v58  ;;  %v659_v5 = vrot.slane %v533_v62, 1  ;;  %3612 = vmatprep.subr.bf16.mxu1 %v5192_v33  ;;  %v5216_v62 = vld [vmem:[%s6381_s1 + $0x394] ss:$8 sps:$4 sm:$0xff]  }
 0x10d   : > { %v537_v7 = vpop.f32.mrf.mxu0  ;;  %v591_v8 = vpop.f32.mrf.mxu1  ;;  %2731 = vmatmul.mubr.bf16.gmra.mxu1 %v5409_v59  ;;  %3183 = vmatmul.mubr.bf16.vlgmr.msra.gmra.mxu0 %v5838_v52  ;;  %v5195_v59 = vld [vmem:[%s6381_s1 + $0x454] ss:$8 sps:$4 sm:$0xff]  }
 0x10e   : > { %v5870_v14 = vsel %vm630_vm3, %v655_v1, %v659_v5  ;;  %4067 = vmatpush1.bf16.msra.mxu0 %v5181_v60  ;;  %2740 = vmatprep.mubr.bf16.mxu1 %v5245_v2  ;;  %v661_v21 = vrot.slane %v537_v7, 1  ;;  %v5205_v60 = vld [vmem:[%s6381_s1 + $0x430] ss:$8 sps:$4 sm:$0xff]  }
 0x10f   : > { %v539_v17 = vpop.f32.mrf.mxu0  ;;  %v592_v18 = vpop.f32.mrf.mxu1  ;;  %3188 = vmatprep.mubr.bf16.mxu0 %v5245_v2  ;;  %4068 = vmatprep.subr.bf16.mxu0 %v5189_v0  ;;  %v5214_v7 = vld [vmem:[%s6381_s1 + $0x390] ss:$8 sps:$4 sm:$0xff]  }
 0x110   : > { %3613 = vmatpush1.bf16.msra.mxu1 %v5190_v6  ;;  %v663_v29 = vrot.slane %v539_v17, 1  ;;  %v5213_v6 = vld [vmem:[%s6381_s1 + $0x424] ss:$8 sps:$4 sm:$0xff]   ;;  %v5937_v17 = vld [vmem:[#allocation2 + $0x10] sm:$0xff]  }
 0x111   : > { %v541_v20 = vpop.f32.mrf.mxu0  ;;  %v593_v10 = vpop.f32.mrf.mxu1  ;;  %3614 = vmatprep.subr.bf16.mxu1 %v5198_v13  ;;  %v5222_v18 = vld [vmem:[%s6381_s1 + $0x384] ss:$8 sps:$4 sm:$0xff]  }
 0x112   : > { %v665_v15 = vrot.slane %v541_v20, 1  ;;  %4069 = vmatpush1.bf16.msra.mxu0 %v5187_v16  ;;  %v5211_v10 = vld [vmem:[%s6381_s1 + $0x420] ss:$8 sps:$4 sm:$0xff]  }
 0x113   : > { %v543_v22 = vpop.f32.mrf.mxu0  ;;  %v594_v23 = vpop.f32.mrf.mxu1  ;;  %4070 = vmatprep.subr.bf16.mxu0 %v5195_v59 }
 0x114   : > { %v5890_v30 = vsel %vm630_vm3, %v661_v21, %v665_v15  ;;  %v667_v34 = vrot.slane %v543_v22, 1  ;;  %3615 = vmatpush1.bf16.msra.mxu1 %v5196_v19  ;;  %v5219_v15 = vld [vmem:[%s6381_s1 + $0x414] ss:$8 sps:$4 sm:$0xff]   ;;  %v5220_v22 = vld [vmem:[%s6381_s1 + $0x380] ss:$8 sps:$4 sm:$0xff]  }
 0x115   : > { %v547_v38 = vpop.f32.mrf.mxu0  ;;  %v892_v40 = vpop.f32.mrf.mxu1  ;;  %2741 = vmatmul.mubr.bf16.gmra.mxu1 %v5441_v11  ;;  %3189 = vmatmul.mubr.bf16.gmra.mxu0 %v5899_v41  ;;  %v5199_v11 = vld [vmem:[%s6381_s1 + $0x440] ss:$8 sps:$4 sm:$0xff]  }
 0x116   : > { %v5906_v43 = vsel %vm630_vm3, %v663_v29, %v667_v34  ;;  %2750 = vmatprep.mubr.bf16.mxu1 %v5245_v2  ;;  %3194 = vmatprep.mubr.bf16.mxu0 %v5245_v2  ;;  %v1058_v46 = vrot.slane %v892_v40, 2  ;;  %v669_v39 = vrot.slane %v547_v38, 1  ;;  %v5217_v40 = vld [vmem:[%s6381_s1 + $0x410] ss:$8 sps:$4 sm:$0xff]  }
 0x117   : > { %v549_v27 = vpop.f32.mrf.mxu0  ;;  %v894_v44 = vpop.f32.mrf.mxu1  ;;  %4071 = vmatpush1.bf16.msra.mxu0 %v5193_v25  ;;  %3616 = vmatprep.subr.bf16.mxu1 %v5204_v28 }
 0x118   : > { %4072 = vmatprep.subr.bf16.mxu0 %v5201_v35  ;;  %3617 = vmatpush1.bf16.msra.mxu1 %v5202_v36  ;;  %v1061_v55 = vrot.slane %v894_v44, 2  ;;  %v671_v57 = vrot.slane %v549_v27, 1 }
 0x119   : > { %v551_v50 = vpop.f32.mrf.mxu0  ;;  %v896_v54 = vpop.f32.mrf.mxu1  ;;  %3618 = vmatprep.subr.bf16.mxu1 %v5210_v42 }
 0x11a   : > { %v673_v33 = vrot.slane %v551_v50, 1  ;;  %v1059_v56 = vrot.slane %v896_v54, 2 }
 0x11b   : > { %v553_v51 = vpop.f32.mrf.mxu0  ;;  %v898_v58 = vpop.f32.mrf.mxu1  ;;  %4073 = vmatpush1.bf16.msra.mxu0 %v5199_v11 }
 0x11c   : > { %v5926_v63 = vsel %vm630_vm3, %v669_v39, %v673_v33  ;;  %v1060_v0 = vsel %vm1057_vm4, %v1058_v46, %v1059_v56  ;;  %v675_v1 = vrot.slane %v553_v51, 1  ;;  %v1062_v5 = vrot.slane %v898_v58, 2  ;;  %4074 = vmatprep.subr.bf16.mxu0 %v5207_v47  ;;  %3619 = vmatpush1.bf16.msra.mxu1 %v5208_v49  ;;  %v5225_v46 = vld [vmem:[%s6381_s1 + $0x404] ss:$8 sps:$4 sm:$0xff]   ;;  %v5971_v39 = vld [vmem:[#allocation2 + $0x18] sm:$0xff]  }
 0x11d   : > { %v1156_v8 = vadd.f32 %v1060_v0, %v5797_v4  ;;  %v902_v13 = vpop.f32.mrf.mxu1  ;;  %v1351_v16 = vpop.f32.mrf.mxu0  ;;  %2751 = vmatmul.mubr.bf16.gmra.mxu1 %v5479_v26  ;;  %3195 = vmatmul.mubr.bf16.gmra.mxu0 %v5937_v17 }
 0x11e   : > { %v5944_v59 = vsel %vm630_vm3, %v671_v57, %v675_v1  ;;  %v1063_v19 = vsel %vm1057_vm4, %v1061_v55, %v1062_v5  ;;  %2760 = vmatprep.mubr.bf16.mxu1 %v5245_v2  ;;  %3204 = vmatprep.mubr.bf16.mxu0 %v5245_v2  ;;  %v1064_v21 = vrot.slane %v902_v13, 2  ;;  %v1517_v25 = vrot.slane %v1351_v16, 3 }
 0x11f   : > { %v1157_v4 = vadd.f32 %v1063_v19, %v5805_v9  ;;  %v904_v26 = vpop.f32.mrf.mxu1  ;;  %v1353_v20 = vpop.f32.mrf.mxu0  ;;  %4075 = vmatpush1.bf16.msra.mxu0 %v5205_v60  ;;  %3620 = vmatprep.subr.bf16.mxu1 %v5216_v62 }
 0x120   : > { %4076 = vmatprep.subr.bf16.mxu0 %v5213_v6  ;;  %3621 = vmatpush1.bf16.msra.mxu1 %v5214_v7  ;;  %v1066_v28 = vrot.slane %v904_v26, 2  ;;  %v1520_v35 = vrot.slane %v1353_v20, 3 }
 0x121   : > { %v906_v9 = vpop.f32.mrf.mxu1  ;;  %v1355_v23 = vpop.f32.mrf.mxu0  ;;  %3622 = vmatprep.subr.bf16.mxu1 %v5222_v18 }
 0x122   : > { %v1068_v29 = vrot.slane %v906_v9, 2  ;;  %v1518_v34 = vrot.slane %v1355_v23, 3 }
 0x123   : > { %v908_v36 = vpop.f32.mrf.mxu1  ;;  %v1357_v38 = vpop.f32.mrf.mxu0  ;;  %4077 = vmatpush1.bf16.msra.mxu0 %v5211_v10 }
 0x124   : > { %v1069_v42 = vsel %vm1057_vm4, %v1064_v21, %v1068_v29  ;;  %v1519_v27 = vsel %vm1516_vm5, %v1517_v25, %v1518_v34  ;;  %v1070_v44 = vrot.slane %v908_v36, 2  ;;  %v1521_v11 = vrot.slane %v1357_v38, 3  ;;  %4078 = vmatprep.subr.bf16.mxu0 %v5219_v15  ;;  %3623 = vmatpush1.bf16.msra.mxu1 %v5220_v22  ;;  %v5989_v21 = vld [vmem:[#allocation2 + $0x28] sm:$0xff]   ;;  %v5992_v15 = vld [vmem:[#allocation2 + $0x20] sm:$0xff]  }
 0x125   : > { %v1160_v47 = vadd.f32 %v1069_v42, %v5813_v24  ;;  %v5968_v49 = vadd.f32 %v1519_v27, %v1156_v8  ;;  %v912_v50 = vpop.f32.mrf.mxu1  ;;  %v1361_v54 = vpop.f32.mrf.mxu0  ;;  %2761 = vmatmul.mubr.bf16.gmra.mxu1 %v5513_v37  ;;  %3205 = vmatmul.mubr.bf16.gmra.mxu0 %v5971_v39  ;;  %v5223_v37 = vld [vmem:[%s6381_s1 + $0x400] ss:$8 sps:$4 sm:$0xff]  }
 0x126   : > { %v1071_v55 = vsel %vm1057_vm4, %v1066_v28, %v1070_v44  ;;  %v1522_v33 = vsel %vm1516_vm5, %v1520_v35, %v1521_v11  ;;  %2770 = vmatprep.mubr.bf16.mxu1 %v5245_v2  ;;  %3214 = vmatprep.mubr.bf16.mxu0 %v5245_v2  ;;  %v1072_v58 = vrot.slane %v912_v50, 2  ;;  %v1523_v0 = vrot.slane %v1361_v54, 3 }
 0x127   : > { %v1161_v24 = vadd.f32 %v1071_v55, %v5821_v31  ;;  %v5979_v56 = vadd.f32 %v1522_v33, %v1157_v4  ;;  %v914_v57 = vpop.f32.mrf.mxu1  ;;  %v1363_v51 = vpop.f32.mrf.mxu0  ;;  %4079 = vmatpush1.bf16.msra.mxu0 %v5217_v40 }
 0x128   : > { %4080 = vmatprep.subr.bf16.mxu0 %v5225_v46  ;;  %v1074_v1 = vrot.slane %v914_v57, 2  ;;  %v1525_v7 = vrot.slane %v1363_v51, 3  ;;  %v6007_v57 = vld [vmem:[#allocation2 + $0x30] sm:$0xff]  }
 0x129   : > { %v916_v60 = vpop.f32.mrf.mxu1  ;;  %v1365_v62 = vpop.f32.mrf.mxu0 }
 0x12a   : > { %v1076_v5 = vrot.slane %v916_v60, 2  ;;  %v1527_v6 = vrot.slane %v1365_v62, 3 }
 0x12b   : > { %v918_v8 = vpop.f32.mrf.mxu1  ;;  %v1367_v31 = vpop.f32.mrf.mxu0  ;;  %4081 = vmatpush1.bf16.msra.mxu0 %v5223_v37 }
 0x12c   : > { %v1077_v13 = vsel %vm1057_vm4, %v1072_v58, %v1076_v5  ;;  %v1528_v16 = vsel %vm1516_vm5, %v1523_v0, %v1527_v6  ;;  %v1078_v18 = vrot.slane %v918_v8, 2  ;;  %v1529_v19 = vrot.slane %v1367_v31, 3 }
 0x12d   : > { %v1164_v4 = vadd.f32 %v1077_v13, %v5832_v45  ;;  %v5987_v26 = vadd.f32 %v1528_v16, %v1160_v47  ;;  %v922_v20 = vpop.f32.mrf.mxu1  ;;  %v1371_v10 = vpop.f32.mrf.mxu0  ;;  %2771 = vmatmul.mubr.bf16.gmra.mxu1 %v5989_v21  ;;  %3215 = vmatmul.mubr.bf16.gmra.mxu0 %v5992_v15 }
 0x12e   : > { %v1079_v22 = vsel %vm1057_vm4, %v1074_v1, %v1078_v18  ;;  %v1530_v9 = vsel %vm1516_vm5, %v1525_v7, %v1529_v19  ;;  %2780 = vmatprep.mubr.bf16.mxu1 %v5245_v2  ;;  %3224 = vmatprep.mubr.bf16.mxu0 %v5245_v2  ;;  %v1080_v29 = vrot.slane %v922_v20, 2  ;;  %v1531_v36 = vrot.slane %v1371_v10, 3 }
 0x12f   : > { %v1165_v45 = vadd.f32 %v1079_v22, %v5842_v53  ;;  %v6000_v23 = vadd.f32 %v1530_v9, %v1161_v24  ;;  %v924_v25 = vpop.f32.mrf.mxu1  ;;  %v1373_v28 = vpop.f32.mrf.mxu0 }
 0x130   : > { %v1082_v38 = vrot.slane %v924_v25, 2  ;;  %v1533_v27 = vrot.slane %v1373_v28, 3  ;;  %v6023_v25 = vld [vmem:[#allocation2 + $0x38] sm:$0xff]  }
 0x131   : > { %v926_v34 = vpop.f32.mrf.mxu1  ;;  %v1375_v35 = vpop.f32.mrf.mxu0 }
 0x132   : > { %v1084_v40 = vrot.slane %v926_v34, 2  ;;  %v1535_v42 = vrot.slane %v1375_v35, 3 }
 0x133   : > { %v928_v44 = vpop.f32.mrf.mxu1  ;;  %v1377_v11 = vpop.f32.mrf.mxu0 }
 0x134   : > { %v1085_v46 = vsel %vm1057_vm4, %v1080_v29, %v1084_v40  ;;  %v1536_v47 = vsel %vm1516_vm5, %v1531_v36, %v1535_v42  ;;  %v1086_v50 = vrot.slane %v928_v44, 2  ;;  %v1537_v53 = vrot.slane %v1377_v11, 3 }
 0x135   : > { %v1168_v54 = vadd.f32 %v1085_v46, %v5859_v3  ;;  %v6005_v55 = vadd.f32 %v1536_v47, %v1164_v4  ;;  %v932_v33 = vpop.f32.mrf.mxu1  ;;  %v1381_v24 = vpop.f32.mrf.mxu0  ;;  %2781 = vmatmul.mubr.bf16.gmra.mxu1 %v6007_v57  ;;  %3225 = vmatmul.mubr.bf16.gmra.mxu0 %v5989_v21 }
 0x136   : > { %v1087_v51 = vsel %vm1057_vm4, %v1082_v38, %v1086_v50  ;;  %v1538_v37 = vsel %vm1516_vm5, %v1533_v27, %v1537_v53  ;;  %2790 = vmatprep.mubr.bf16.mxu1 %v5245_v2  ;;  %3234 = vmatprep.mubr.bf16.mxu0 %v5245_v2  ;;  %v1088_v0 = vrot.slane %v932_v33, 2  ;;  %v1539_v6 = vrot.slane %v1381_v24, 3 }
 0x137   : > { %v1169_v3 = vadd.f32 %v1087_v51, %v5870_v14  ;;  %v6016_v58 = vadd.f32 %v1538_v37, %v1165_v45  ;;  %v934_v60 = vpop.f32.mrf.mxu1  ;;  %v1383_v62 = vpop.f32.mrf.mxu0 }
 0x138   : > { %v1090_v7 = vrot.slane %v934_v60, 2  ;;  %v1541_v13 = vrot.slane %v1383_v62, 3  ;;  %v6039_v62 = vld [vmem:[#allocation2 + $0x40] sm:$0xff]  }
 0x139   : > { %v936_v1 = vpop.f32.mrf.mxu1  ;;  %v1385_v5 = vpop.f32.mrf.mxu0 }
 0x13a   : > { %v1092_v8 = vrot.slane %v936_v1, 2  ;;  %v1543_v31 = vrot.slane %v1385_v5, 3 }
 0x13b   : > { %v938_v16 = vpop.f32.mrf.mxu1  ;;  %v1387_v18 = vpop.f32.mrf.mxu0 }
 0x13c   : > { %v1093_v19 = vsel %vm1057_vm4, %v1088_v0, %v1092_v8  ;;  %v1544_v4 = vsel %vm1516_vm5, %v1539_v6, %v1543_v31  ;;  %v1094_v20 = vrot.slane %v938_v16, 2  ;;  %v1545_v14 = vrot.slane %v1387_v18, 3 }
 0x13d   : > { %v1172_v10 = vadd.f32 %v1093_v19, %v5890_v30  ;;  %v6021_v22 = vadd.f32 %v1544_v4, %v1168_v54  ;;  %v942_v9 = vpop.f32.mrf.mxu1  ;;  %v1391_v45 = vpop.f32.mrf.mxu0  ;;  %2791 = vmatmul.mubr.bf16.gmra.mxu1 %v6023_v25  ;;  %3235 = vmatmul.mubr.bf16.gmra.mxu0 %v6007_v57 }
 0x13e   : > { %v1095_v28 = vsel %vm1057_vm4, %v1090_v7, %v1094_v20  ;;  %v1546_v29 = vsel %vm1516_vm5, %v1541_v13, %v1545_v14  ;;  %2800 = vmatprep.mubr.bf16.mxu1 %v5245_v2  ;;  %3244 = vmatprep.mubr.bf16.mxu0 %v5245_v2  ;;  %v1096_v38 = vrot.slane %v942_v9, 2  ;;  %v1547_v27 = vrot.slane %v1391_v45, 3 }
 0x13f   : > { %v1173_v30 = vadd.f32 %v1095_v28, %v5906_v43  ;;  %v6032_v34 = vadd.f32 %v1546_v29, %v1169_v3  ;;  %v944_v35 = vpop.f32.mrf.mxu1  ;;  %v1393_v36 = vpop.f32.mrf.mxu0 }
 0x140   : > { %v1098_v44 = vrot.slane %v944_v35, 2  ;;  %v1549_v47 = vrot.slane %v1393_v36, 3 }
 0x141   : > { %v946_v40 = vpop.f32.mrf.mxu1  ;;  %v1395_v42 = vpop.f32.mrf.mxu0 }
 0x142   : > { %v1100_v11 = vrot.slane %v946_v40, 2  ;;  %v1551_v46 = vrot.slane %v1395_v42, 3 }
 0x143   : > { %v948_v50 = vpop.f32.mrf.mxu1  ;;  %v1397_v53 = vpop.f32.mrf.mxu0 }
 0x144   : > { %v1101_v54 = vsel %vm1057_vm4, %v1096_v38, %v1100_v11  ;;  %v1552_v33 = vsel %vm1516_vm5, %v1547_v27, %v1551_v46  ;;  %v1102_v24 = vrot.slane %v948_v50, 2  ;;  %v1553_v43 = vrot.slane %v1397_v53, 3  ;;  %v6055_v38 = vld [vmem:[#allocation2 + $0x48] sm:$0xff]  }
 0x145   : > { %v1176_v51 = vadd.f32 %v1101_v54, %v5926_v63  ;;  %v6037_v37 = vadd.f32 %v1552_v33, %v1172_v10  ;;  %v952_v3 = vpop.f32.mrf.mxu1  ;;  %v1401_v60 = vpop.f32.mrf.mxu0  ;;  %2801 = vmatmul.mubr.bf16.gmra.mxu1 %v6039_v62  ;;  %3245 = vmatmul.mubr.bf16.gmra.mxu0 %v6023_v25 }
 0x146   : > { %v1103_v0 = vsel %vm1057_vm4, %v1098_v44, %v1102_v24  ;;  %v1554_v1 = vsel %vm1516_vm5, %v1549_v47, %v1553_v43  ;;  %2810 = vmatprep.mubr.bf16.mxu1 %v5245_v2  ;;  %3254 = vmatprep.mubr.bf16.mxu0 %v5245_v2  ;;  %v1104_v8 = vrot.slane %v952_v3, 2  ;;  %v1555_v16 = vrot.slane %v1401_v60, 3 }
 0x147   : > { %v1177_v63 = vadd.f32 %v1103_v0, %v5944_v59  ;;  %v6048_v5 = vadd.f32 %v1554_v1, %v1173_v30  ;;  %v954_v6 = vpop.f32.mrf.mxu1  ;;  %v1403_v7 = vpop.f32.mrf.mxu0 }
 0x148   : > { %v1106_v18 = vrot.slane %v954_v6, 2  ;;  %v1557_v20 = vrot.slane %v1403_v7, 3 }
 0x149   : > { %v956_v31 = vpop.f32.mrf.mxu1  ;;  %v1405_v13 = vpop.f32.mrf.mxu0 }
 0x14a   : > { %v1108_v19 = vrot.slane %v956_v31, 2  ;;  %v1559_v4 = vrot.slane %v1405_v13, 3  ;;  %v6071_v31 = vld [vmem:[#allocation2 + $0x50] sm:$0xff]  }
 0x14b   : > { %v958_v14 = vpop.f32.mrf.mxu1  ;;  %v1407_v10 = vpop.f32.mrf.mxu0 }
 0x14c   : > { %v1109_v9 = vsel %vm1057_vm4, %v1104_v8, %v1108_v19  ;;  %v1560_v45 = vsel %vm1516_vm5, %v1555_v16, %v1559_v4  ;;  %v1110_v28 = vrot.slane %v958_v14, 2  ;;  %v1561_v59 = vrot.slane %v1407_v10, 3 }
 0x14d   : > { %v1180_v29 = vadd.f32 %v1109_v9, %v5800_v61  ;;  %v6053_v30 = vadd.f32 %v1560_v45, %v1176_v51  ;;  %v962_v35 = vpop.f32.mrf.mxu1  ;;  %v1411_v36 = vpop.f32.mrf.mxu0  ;;  %2811 = vmatmul.mubr.bf16.gmra.mxu1 %v6055_v38  ;;  %3255 = vmatmul.mubr.bf16.gmra.mxu0 %v6039_v62 }
 0x14e   : > { %v1111_v40 = vsel %vm1057_vm4, %v1106_v18, %v1110_v28  ;;  %v1562_v42 = vsel %vm1516_vm5, %v1557_v20, %v1561_v59  ;;  %2818 = vmatprep.mubr.bf16.mxu1 %v5245_v2  ;;  %3264 = vmatprep.mubr.bf16.mxu0 %v5245_v2  ;;  %v1112_v46 = vrot.slane %v962_v35, 2  ;;  %v1563_v53 = vrot.slane %v1411_v36, 3 }
 0x14f   : > { %v1181_v61 = vadd.f32 %v1111_v40, %v5808_v12  ;;  %v6064_v27 = vadd.f32 %v1562_v42, %v1177_v63  ;;  %v964_v44 = vpop.f32.mrf.mxu1  ;;  %v1413_v11 = vpop.f32.mrf.mxu0 }
 0x150   : > { %v1114_v54 = vrot.slane %v964_v44, 2  ;;  %v1565_v43 = vrot.slane %v1413_v11, 3 }
 0x151   : > { %v966_v47 = vpop.f32.mrf.mxu1  ;;  %v1415_v50 = vpop.f32.mrf.mxu0 }
 0x152   : > { %v1116_v33 = vrot.slane %v966_v47, 2  ;;  %v1567_v24 = vrot.slane %v1415_v50, 3 }
 0x153   : > { %v968_v51 = vpop.f32.mrf.mxu1  ;;  %v1417_v3 = vpop.f32.mrf.mxu0 }
 0x154   : > { %v1117_v60 = vsel %vm1057_vm4, %v1112_v46, %v1116_v33  ;;  %v1568_v0 = vsel %vm1516_vm5, %v1563_v53, %v1567_v24  ;;  %v1118_v1 = vrot.slane %v968_v51, 2  ;;  %v1569_v12 = vrot.slane %v1417_v3, 3 }
 0x155   : > { %v1184_v63 = vadd.f32 %v1117_v60, %v5816_v48  ;;  %v6069_v6 = vadd.f32 %v1568_v0, %v1180_v29  ;;  %v972_v7 = vpop.f32.mrf.mxu1  ;;  %v1421_v8 = vpop.f32.mrf.mxu0  ;;  %2819 = vmatmul.mubr.bf16.gmra.mxu1 %v6071_v31  ;;  %3265 = vmatmul.mubr.bf16.gmra.mxu0 %v6055_v38 }
 0x156   : > { %v1119_v13 = vsel %vm1057_vm4, %v1114_v54, %v1118_v1  ;;  %v1570_v16 = vsel %vm1516_vm5, %v1565_v43, %v1569_v12  ;;  %3274 = vmatprep.mubr.bf16.mxu0 %v5245_v2  ;;  %3640 = vmatprep.mubr.bf16.mxu1 %v5245_v2  ;;  %v1571_v10 = vrot.slane %v1421_v8, 3 }
 0x157   : > { %v1185_v48 = vadd.f32 %v1119_v13, %v5824_v32  ;;  %v6080_v18 = vadd.f32 %v1570_v16, %v1181_v61  ;;  %v974_v19 = vpop.f32.mrf.mxu1  ;;  %v1423_v4 = vpop.f32.mrf.mxu0 }
 0x158   : > { %v1573_v59 = vrot.slane %v1423_v4, 3 }
 0x159   : > { %v976_v20 = vpop.f32.mrf.mxu1  ;;  %v1425_v14 = vpop.f32.mrf.mxu0 }
 0x15a   : > { %v1575_v9 = vrot.slane %v1425_v14, 3 }
 0x15b   : > { %v977_v45 = vpop.f32.mrf.mxu1  ;;  %v1427_v28 = vpop.f32.mrf.mxu0 }
 0x15c   : > { %v1576_v29 = vsel %vm1516_vm5, %v1571_v10, %v1575_v9  ;;  %v1577_v35 = vrot.slane %v1427_v28, 3 }
 0x15d   : > { %v6083_v36 = vadd.f32 %v1576_v29, %v1184_v63  ;;  %v980_v40 = vpop.f32.mrf.mxu1  ;;  %v1431_v42 = vpop.f32.mrf.mxu0  ;;  %3275 = vmatmul.mubr.bf16.gmra.mxu0 %v6071_v31  ;;  %3641 = vmatmul.mubr.bf16.vlgmr.msra.gmra.mxu1 %v5838_v52 }
 0x15e   : > { %v1578_v32 = vsel %vm1516_vm5, %v1573_v59, %v1577_v35  ;;  %3646 = vmatprep.mubr.bf16.mxu1 %v5245_v2  ;;  %4098 = vmatprep.mubr.bf16.mxu0 %v5245_v2 }
 0x15f   : > { %v6090_v61 = vadd.f32 %v1578_v32, %v1185_v48  ;;  %v981_v44 = vpop.f32.mrf.mxu1  ;;  %v1433_v11 = vpop.f32.mrf.mxu0 }
 0x161   : > { %v982_v46 = vpop.f32.mrf.mxu1  ;;  %v1435_v47 = vpop.f32.mrf.mxu0 }
 0x163   : > { %v983_v50 = vpop.f32.mrf.mxu1  ;;  %v1436_v53 = vpop.f32.mrf.mxu0 }
 0x165   : > { %v986_v54 = vpop.f32.mrf.mxu1  ;;  %v1439_v33 = vpop.f32.mrf.mxu0  ;;  %3647 = vmatmul.mubr.bf16.gmra.mxu1 %v5899_v41  ;;  %4099 = vmatmul.mubr.bf16.vlgmr.msra.gmra.mxu0 %v5838_v52 }
 0x166   : > { %3652 = vmatprep.mubr.bf16.mxu1 %v5245_v2  ;;  %4104 = vmatprep.mubr.bf16.mxu0 %v5245_v2 }
 0x167   : > { %v987_v24 = vpop.f32.mrf.mxu1  ;;  %v1440_v43 = vpop.f32.mrf.mxu0 }
 0x169   : > { %v988_v51 = vpop.f32.mrf.mxu1  ;;  %v1441_v3 = vpop.f32.mrf.mxu0 }
 0x16b   : > { %v989_v60 = vpop.f32.mrf.mxu1  ;;  %v1442_v0 = vpop.f32.mrf.mxu0 }
 0x16d   : > { %v1445_v1 = vpop.f32.mrf.mxu0  ;;  %v1810_v12 = vpop.f32.mrf.mxu1  ;;  %3653 = vmatmul.mubr.bf16.gmra.mxu1 %v5937_v17  ;;  %4105 = vmatmul.mubr.bf16.gmra.mxu0 %v5899_v41 }
 0x16e   : > { %3662 = vmatprep.mubr.bf16.mxu1 %v5245_v2  ;;  %4110 = vmatprep.mubr.bf16.mxu0 %v5245_v2 }
 0x16f   : > { %v1446_v52 = vpop.f32.mrf.mxu0  ;;  %v1811_v63 = vpop.f32.mrf.mxu1 }
 0x171   : > { %v1447_v7 = vpop.f32.mrf.mxu0  ;;  %v1812_v8 = vpop.f32.mrf.mxu1 }
 0x173   : > { %v1448_v13 = vpop.f32.mrf.mxu0  ;;  %v1813_v16 = vpop.f32.mrf.mxu1 }
 0x175   : > { %v1816_v48 = vpop.f32.mrf.mxu1  ;;  %v2268_v19 = vpop.f32.mrf.mxu0  ;;  %3663 = vmatmul.mubr.bf16.gmra.mxu1 %v5971_v39  ;;  %4111 = vmatmul.mubr.bf16.gmra.mxu0 %v5937_v17 }
 0x176   : > { %3672 = vmatprep.mubr.bf16.mxu1 %v5245_v2  ;;  %4120 = vmatprep.mubr.bf16.mxu0 %v5245_v2  ;;  %v1975_v20 = vrot.slane %v1816_v48, 1 }
 0x177   : > { %v1818_v41 = vpop.f32.mrf.mxu1  ;;  %v2269_v4 = vpop.f32.mrf.mxu0 }
 0x178   : > { %v1978_v9 = vrot.slane %v1818_v41, 1 }
 0x179   : > { %v1820_v14 = vpop.f32.mrf.mxu1  ;;  %v2270_v10 = vpop.f32.mrf.mxu0 }
 0x17a   : > { %v1976_v45 = vrot.slane %v1820_v14, 1 }
 0x17b   : > { %v1822_v28 = vpop.f32.mrf.mxu1  ;;  %v2271_v59 = vpop.f32.mrf.mxu0 }
 0x17c   : > { %v1977_v29 = vsel %vm630_vm3, %v1975_v20, %v1976_v45  ;;  %v1979_v35 = vrot.slane %v1822_v28, 1 }
 0x17d   : > { %v2073_v40 = vadd.f32 %v1977_v29, %v5968_v49  ;;  %v1826_v42 = vpop.f32.mrf.mxu1  ;;  %v2274_v17 = vpop.f32.mrf.mxu0  ;;  %3673 = vmatmul.mubr.bf16.gmra.mxu1 %v5992_v15  ;;  %4121 = vmatmul.mubr.bf16.gmra.mxu0 %v5971_v39 }
 0x17e   : > { %v1980_v32 = vsel %vm630_vm3, %v1978_v9, %v1979_v35  ;;  %3682 = vmatprep.mubr.bf16.mxu1 %v5245_v2  ;;  %4130 = vmatprep.mubr.bf16.mxu0 %v5245_v2  ;;  %v1981_v47 = vrot.slane %v1826_v42, 1  ;;  %v2433_v49 = vrot.slane %v2274_v17, 2 }
 0x17f   : > { %v2074_v44 = vadd.f32 %v1980_v32, %v5979_v56  ;;  %v1828_v11 = vpop.f32.mrf.mxu1  ;;  %v2276_v46 = vpop.f32.mrf.mxu0 }
 0x180   : > { %v1983_v54 = vrot.slane %v1828_v11, 1  ;;  %v2436_v43 = vrot.slane %v2276_v46, 2 }
 0x181   : > { %v1830_v50 = vpop.f32.mrf.mxu1  ;;  %v2278_v53 = vpop.f32.mrf.mxu0 }
 0x182   : > { %v1985_v33 = vrot.slane %v1830_v50, 1  ;;  %v2434_v24 = vrot.slane %v2278_v53, 2 }
 0x183   : > { %v1832_v51 = vpop.f32.mrf.mxu1  ;;  %v2280_v39 = vpop.f32.mrf.mxu0 }
 0x184   : > { %v1986_v3 = vsel %vm630_vm3, %v1981_v47, %v1985_v33  ;;  %v2435_v60 = vsel %vm1057_vm4, %v2433_v49, %v2434_v24  ;;  %v1987_v0 = vrot.slane %v1832_v51, 1  ;;  %v2437_v1 = vrot.slane %v2280_v39, 2 }
 0x185   : > { %v2077_v56 = vadd.f32 %v1986_v3, %v5987_v26  ;;  %v6115_v12 = vadd.f32 %v2435_v60, %v2073_v40  ;;  %v1836_v52 = vpop.f32.mrf.mxu1  ;;  %v2284_v63 = vpop.f32.mrf.mxu0  ;;  %3683 = vmatmul.mubr.bf16.gmra.mxu1 %v5989_v21  ;;  %4131 = vmatmul.mubr.bf16.gmra.mxu0 %v5992_v15 }
 0x186   : > { %v1988_v7 = vsel %vm630_vm3, %v1983_v54, %v1987_v0  ;;  %v2438_v8 = vsel %vm1057_vm4, %v2436_v43, %v2437_v1  ;;  %3692 = vmatprep.mubr.bf16.mxu1 %v5245_v2  ;;  %4140 = vmatprep.mubr.bf16.mxu0 %v5245_v2  ;;  %v1989_v19 = vrot.slane %v1836_v52, 1  ;;  %v2439_v20 = vrot.slane %v2284_v63, 2 }
 0x187   : > { %v2078_v13 = vadd.f32 %v1988_v7, %v6000_v23  ;;  %v6124_v16 = vadd.f32 %v2438_v8, %v2074_v44  ;;  %v1838_v26 = vpop.f32.mrf.mxu1  ;;  %v2286_v48 = vpop.f32.mrf.mxu0 }
 0x188   : > { %v1991_v14 = vrot.slane %v1838_v26, 1  ;;  %v2441_v9 = vrot.slane %v2286_v48, 2 }
 0x189   : > { %v1840_v41 = vpop.f32.mrf.mxu1  ;;  %v2288_v4 = vpop.f32.mrf.mxu0 }
 0x18a   : > { %v1993_v15 = vrot.slane %v1840_v41, 1  ;;  %v2443_v10 = vrot.slane %v2288_v4, 2 }
 0x18b   : > { %v1842_v45 = vpop.f32.mrf.mxu1  ;;  %v2290_v28 = vpop.f32.mrf.mxu0 }
 0x18c   : > { %v1994_v59 = vsel %vm630_vm3, %v1989_v19, %v1993_v15  ;;  %v2444_v29 = vsel %vm1057_vm4, %v2439_v20, %v2443_v10  ;;  %v1995_v35 = vrot.slane %v1842_v45, 1  ;;  %v2445_v23 = vrot.slane %v2290_v28, 2 }
 0x18d   : > { %v2081_v40 = vadd.f32 %v1994_v59, %v6005_v55  ;;  %v6129_v42 = vadd.f32 %v2444_v29, %v2077_v56  ;;  %v1846_v17 = vpop.f32.mrf.mxu1  ;;  %v2294_v32 = vpop.f32.mrf.mxu0  ;;  %3693 = vmatmul.mubr.bf16.gmra.mxu1 %v6007_v57  ;;  %4141 = vmatmul.mubr.bf16.gmra.mxu0 %v5989_v21 }
 0x18e   : > { %v1996_v44 = vsel %vm630_vm3, %v1991_v14, %v1995_v35  ;;  %v2446_v11 = vsel %vm1057_vm4, %v2441_v9, %v2445_v23  ;;  %3702 = vmatprep.mubr.bf16.mxu1 %v5245_v2  ;;  %4150 = vmatprep.mubr.bf16.mxu0 %v5245_v2  ;;  %v1997_v53 = vrot.slane %v1846_v17, 1  ;;  %v2447_v33 = vrot.slane %v2294_v32, 2 }
 0x18f   : > { %v2082_v46 = vadd.f32 %v1996_v44, %v6016_v58  ;;  %v6138_v47 = vadd.f32 %v2446_v11, %v2078_v13  ;;  %v1848_v55 = vpop.f32.mrf.mxu1  ;;  %v2296_v50 = vpop.f32.mrf.mxu0 }
 0x190   : > { %v1999_v24 = vrot.slane %v1848_v55, 1  ;;  %v2449_v51 = vrot.slane %v2296_v50, 2 }
 0x191   : > { %v1850_v49 = vpop.f32.mrf.mxu1  ;;  %v2298_v54 = vpop.f32.mrf.mxu0 }
 0x192   : > { %v2001_v21 = vrot.slane %v1850_v49, 1  ;;  %v2451_v43 = vrot.slane %v2298_v54, 2 }
 0x193   : > { %v1852_v39 = vpop.f32.mrf.mxu1  ;;  %v2300_v3 = vpop.f32.mrf.mxu0 }
 0x194   : > { %v2002_v60 = vsel %vm630_vm3, %v1997_v53, %v2001_v21  ;;  %v2452_v0 = vsel %vm1057_vm4, %v2447_v33, %v2451_v43  ;;  %v2003_v1 = vrot.slane %v1852_v39, 1  ;;  %v2453_v58 = vrot.slane %v2300_v3, 2 }
 0x195   : > { %v2085_v56 = vadd.f32 %v2002_v60, %v6021_v22  ;;  %v6143_v52 = vadd.f32 %v2452_v0, %v2081_v40  ;;  %v1856_v63 = vpop.f32.mrf.mxu1  ;;  %v2304_v7 = vpop.f32.mrf.mxu0  ;;  %3703 = vmatmul.mubr.bf16.gmra.mxu1 %v6023_v25  ;;  %4151 = vmatmul.mubr.bf16.gmra.mxu0 %v6007_v57 }
 0x196   : > { %v2004_v8 = vsel %vm630_vm3, %v1999_v24, %v2003_v1  ;;  %v2454_v13 = vsel %vm1057_vm4, %v2449_v51, %v2453_v58  ;;  %3712 = vmatprep.mubr.bf16.mxu1 %v5245_v2  ;;  %4160 = vmatprep.mubr.bf16.mxu0 %v5245_v2  ;;  %v2005_v41 = vrot.slane %v1856_v63, 1  ;;  %v2455_v14 = vrot.slane %v2304_v7, 2 }
 0x197   : > { %v2086_v26 = vadd.f32 %v2004_v8, %v6032_v34  ;;  %v6152_v48 = vadd.f32 %v2454_v13, %v2082_v46  ;;  %v1858_v22 = vpop.f32.mrf.mxu1  ;;  %v2306_v19 = vpop.f32.mrf.mxu0 }
 0x198   : > { %v2007_v15 = vrot.slane %v1858_v22, 1  ;;  %v2457_v9 = vrot.slane %v2306_v19, 2 }
 0x199   : > { %v1860_v4 = vpop.f32.mrf.mxu1  ;;  %v2308_v20 = vpop.f32.mrf.mxu0 }
 0x19a   : > { %v2009_v57 = vrot.slane %v1860_v4, 1  ;;  %v2459_v10 = vrot.slane %v2308_v20, 2 }
 0x19b   : > { %v1862_v45 = vpop.f32.mrf.mxu1  ;;  %v2310_v28 = vpop.f32.mrf.mxu0 }
 0x19c   : > { %v2010_v59 = vsel %vm630_vm3, %v2005_v41, %v2009_v57  ;;  %v2460_v29 = vsel %vm1057_vm4, %v2455_v14, %v2459_v10  ;;  %v2011_v35 = vrot.slane %v1862_v45, 1  ;;  %v2461_v34 = vrot.slane %v2310_v28, 2 }
 0x19d   : > { %v2089_v23 = vadd.f32 %v2010_v59, %v6037_v37  ;;  %v6157_v40 = vadd.f32 %v2460_v29, %v2085_v56  ;;  %v1866_v17 = vpop.f32.mrf.mxu1  ;;  %v2314_v32 = vpop.f32.mrf.mxu0  ;;  %3713 = vmatmul.mubr.bf16.gmra.mxu1 %v6039_v62  ;;  %4161 = vmatmul.mubr.bf16.gmra.mxu0 %v6023_v25 }
 0x19e   : > { %v2012_v44 = vsel %vm630_vm3, %v2007_v15, %v2011_v35  ;;  %v2462_v11 = vsel %vm1057_vm4, %v2457_v9, %v2461_v34  ;;  %3722 = vmatprep.mubr.bf16.mxu1 %v5245_v2  ;;  %4170 = vmatprep.mubr.bf16.mxu0 %v5245_v2  ;;  %v2013_v53 = vrot.slane %v1866_v17, 1  ;;  %v2463_v33 = vrot.slane %v2314_v32, 2 }
 0x19f   : > { %v2090_v46 = vadd.f32 %v2012_v44, %v6048_v5  ;;  %v6166_v55 = vadd.f32 %v2462_v11, %v2086_v26  ;;  %v1868_v37 = vpop.f32.mrf.mxu1  ;;  %v2316_v50 = vpop.f32.mrf.mxu0 }
 0x1a0   : > { %v2015_v24 = vrot.slane %v1868_v37, 1  ;;  %v2465_v43 = vrot.slane %v2316_v50, 2 }
 0x1a1   : > { %v1870_v49 = vpop.f32.mrf.mxu1  ;;  %v2318_v54 = vpop.f32.mrf.mxu0 }
 0x1a2   : > { %v2017_v25 = vrot.slane %v1870_v49, 1  ;;  %v2467_v21 = vrot.slane %v2318_v54, 2 }
 0x1a3   : > { %v1872_v51 = vpop.f32.mrf.mxu1  ;;  %v2320_v39 = vpop.f32.mrf.mxu0 }
 0x1a4   : > { %v2018_v3 = vsel %vm630_vm3, %v2013_v53, %v2017_v25  ;;  %v2468_v60 = vsel %vm1057_vm4, %v2463_v33, %v2467_v21  ;;  %v2019_v0 = vrot.slane %v1872_v51, 1  ;;  %v2469_v5 = vrot.slane %v2320_v39, 2 }
 0x1a5   : > { %v2093_v1 = vadd.f32 %v2018_v3, %v6053_v30  ;;  %v6171_v58 = vadd.f32 %v2468_v60, %v2089_v23  ;;  %v1876_v56 = vpop.f32.mrf.mxu1  ;;  %v2324_v63 = vpop.f32.mrf.mxu0  ;;  %3723 = vmatmul.mubr.bf16.gmra.mxu1 %v6055_v38  ;;  %4171 = vmatmul.mubr.bf16.gmra.mxu0 %v6039_v62 }
 0x1a6   : > { %v2020_v7 = vsel %vm630_vm3, %v2015_v24, %v2019_v0  ;;  %v2470_v8 = vsel %vm1057_vm4, %v2465_v43, %v2469_v5  ;;  %4180 = vmatprep.mubr.bf16.mxu0 %v5245_v2  ;;  %3732 = vmatprep.mubr.bf16.mxu1 %v5245_v2  ;;  %v2021_v19 = vrot.slane %v1876_v56, 1  ;;  %v2471_v20 = vrot.slane %v2324_v63, 2 }
 0x1a7   : > { %v2094_v13 = vadd.f32 %v2020_v7, %v6064_v27  ;;  %v6180_v26 = vadd.f32 %v2470_v8, %v2090_v46  ;;  %v1878_v30 = vpop.f32.mrf.mxu1  ;;  %v2326_v22 = vpop.f32.mrf.mxu0 }
 0x1a8   : > { %v2023_v14 = vrot.slane %v1878_v30, 1  ;;  %v2473_v57 = vrot.slane %v2326_v22, 2 }
 0x1a9   : > { %v1880_v41 = vpop.f32.mrf.mxu1  ;;  %v2328_v4 = vpop.f32.mrf.mxu0 }
 0x1aa   : > { %v2025_v62 = vrot.slane %v1880_v41, 1  ;;  %v2475_v15 = vrot.slane %v2328_v4, 2 }
 0x1ab   : > { %v1882_v10 = vpop.f32.mrf.mxu1  ;;  %v2330_v9 = vpop.f32.mrf.mxu0 }
 0x1ac   : > { %v2026_v45 = vsel %vm630_vm3, %v2021_v19, %v2025_v62  ;;  %v2476_v28 = vsel %vm1057_vm4, %v2471_v20, %v2475_v15  ;;  %v2027_v59 = vrot.slane %v1882_v10, 1  ;;  %v2477_v27 = vrot.slane %v2330_v9, 2 }
 0x1ad   : > { %v2097_v29 = vadd.f32 %v2026_v45, %v6069_v6  ;;  %v6185_v35 = vadd.f32 %v2476_v28, %v2093_v1  ;;  %v1886_v34 = vpop.f32.mrf.mxu1  ;;  %v2334_v23 = vpop.f32.mrf.mxu0  ;;  %4181 = vmatmul.mubr.bf16.gmra.mxu0 %v6055_v38  ;;  %3733 = vmatmul.mubr.bf16.gmra.mxu1 %v6071_v31 }
 0x1ae   : > { %v2028_v17 = vsel %vm630_vm3, %v2023_v14, %v2027_v59  ;;  %v2478_v32 = vsel %vm1057_vm4, %v2473_v57, %v2477_v27  ;;  %4190 = vmatprep.mubr.bf16.mxu0 %v5245_v2  ;;  %v2029_v37 = vrot.slane %v1886_v34, 1  ;;  %v2479_v49 = vrot.slane %v2334_v23, 2 }
 0x1af   : > { %v2098_v44 = vadd.f32 %v2028_v17, %v6080_v18  ;;  %v6193_v11 = vadd.f32 %v2478_v32, %v2094_v13  ;;  %v1888_v46 = vpop.f32.mrf.mxu1  ;;  %v2336_v6 = vpop.f32.mrf.mxu0 }
 0x1b0   : > { %v2031_v54 = vrot.slane %v1888_v46, 1  ;;  %v2481_v24 = vrot.slane %v2336_v6, 2 }
 0x1b1   : > { %v1890_v50 = vpop.f32.mrf.mxu1  ;;  %v2338_v53 = vpop.f32.mrf.mxu0 }
 0x1b2   : > { %v2033_v38 = vrot.slane %v1890_v50, 1  ;;  %v2483_v33 = vrot.slane %v2338_v53, 2 }
 0x1b3   : > { %v1892_v25 = vpop.f32.mrf.mxu1  ;;  %v2340_v21 = vpop.f32.mrf.mxu0 }
 0x1b4   : > { %v2034_v43 = vsel %vm630_vm3, %v2029_v37, %v2033_v38  ;;  %v2484_v2 = vsel %vm1057_vm4, %v2479_v49, %v2483_v33  ;;  %v2035_v51 = vrot.slane %v1892_v25, 1  ;;  %v2485_v18 = vrot.slane %v2340_v21, 2 }
 0x1b5   : > { %v2101_v39 = vadd.f32 %v2034_v43, %v6083_v36  ;;  %v6198_v3 = vadd.f32 %v2484_v2, %v2097_v29  ;;  %v1896_v60 = vpop.f32.mrf.mxu1  ;;  %v2344_v0 = vpop.f32.mrf.mxu0  ;;  %4191 = vmatmul.mubr.bf16.gmra.mxu0 %v6071_v31 }
 0x1b6   : > { %v2036_v5 = vsel %vm630_vm3, %v2031_v54, %v2035_v51  ;;  %v2486_v1 = vsel %vm1057_vm4, %v2481_v24, %v2485_v18  ;;  %v2487_v22 = vrot.slane %v2344_v0, 2 }
 0x1b7   : > { %v2102_v56 = vadd.f32 %v2036_v5, %v6090_v61  ;;  %v6204_v63 = vadd.f32 %v2486_v1, %v2098_v44  ;;  %v1898_v7 = vpop.f32.mrf.mxu1  ;;  %v2346_v8 = vpop.f32.mrf.mxu0 }
 0x1b8   : > { %v2489_v4 = vrot.slane %v2346_v8, 2 }
 0x1b9   : > { %v1900_v13 = vpop.f32.mrf.mxu1  ;;  %v2348_v30 = vpop.f32.mrf.mxu0 }
 0x1ba   : > { %v2491_v36 = vrot.slane %v2348_v30, 2 }
 0x1bb   : > { %v1901_v19 = vpop.f32.mrf.mxu1  ;;  %v2350_v41 = vpop.f32.mrf.mxu0 }
 0x1bc   : > { %v2492_v20 = vsel %vm1057_vm4, %v2487_v22, %v2491_v36  ;;  %v2493_v31 = vrot.slane %v2350_v41, 2 }
 0x1bd   : > { %v6207_v14 = vadd.f32 %v2492_v20, %v2101_v39  ;;  %v1904_v62 = vpop.f32.mrf.mxu1  ;;  %v2354_v15 = vpop.f32.mrf.mxu0 }
 0x1be   : > { %v2494_v61 = vsel %vm1057_vm4, %v2489_v4, %v2493_v31 }
 0x1bf   : > { %v6210_v57 = vadd.f32 %v2494_v61, %v2102_v56  ;;  %v1905_v10 = vpop.f32.mrf.mxu1  ;;  %v2356_v9 = vpop.f32.mrf.mxu0 }
 0x1c1   : > { %v1906_v45 = vpop.f32.mrf.mxu1  ;;  %v2358_v28 = vpop.f32.mrf.mxu0 }
 0x1c3   : > { %v1907_v59 = vpop.f32.mrf.mxu1  ;;  %v2359_v27 = vpop.f32.mrf.mxu0 }
 0x1c5   : > { %v2362_v29 = vpop.f32.mrf.mxu0  ;;  %v2726_v34 = vpop.f32.mrf.mxu1 }
 0x1c7   : > { %v2363_v23 = vpop.f32.mrf.mxu0  ;;  %v2727_v17 = vpop.f32.mrf.mxu1 }
 0x1c9   : > { %v2364_v32 = vpop.f32.mrf.mxu0  ;;  %v2728_v44 = vpop.f32.mrf.mxu1 }
 0x1cb   : > { %v2365_v46 = vpop.f32.mrf.mxu0  ;;  %v2729_v6 = vpop.f32.mrf.mxu1 }
 0x1cd   : > { %v2732_v37 = vpop.f32.mrf.mxu1  ;;  %v3184_v50 = vpop.f32.mrf.mxu0 }
 0x1ce   : > { %v2891_v54 = vrot.slane %v2732_v37, 3 }
 0x1cf   : > { %v2734_v53 = vpop.f32.mrf.mxu1  ;;  %v3185_v49 = vpop.f32.mrf.mxu0 }
 0x1d0   : > { %v2894_v24 = vrot.slane %v2734_v53, 3 }
 0x1d1   : > { %v2736_v38 = vpop.f32.mrf.mxu1  ;;  %v3186_v33 = vpop.f32.mrf.mxu0 }
 0x1d2   : > { %v2892_v25 = vrot.slane %v2736_v38, 3 }
 0x1d3   : > { %v2738_v21 = vpop.f32.mrf.mxu1  ;;  %v3187_v43 = vpop.f32.mrf.mxu0 }
 0x1d4   : > { %v2893_v2 = vsel %vm1516_vm5, %v2891_v54, %v2892_v25  ;;  %v2895_v51 = vrot.slane %v2738_v21, 3 }
 0x1d5   : > { %v2989_v18 = vadd.f32 %v2893_v2, %v6115_v12  ;;  %v2742_v39 = vpop.f32.mrf.mxu1  ;;  %v3190_v60 = vpop.f32.mrf.mxu0 }
 0x1d6   : > { %v2896_v0 = vsel %vm1516_vm5, %v2894_v24, %v2895_v51  ;;  %v2897_v7 = vrot.slane %v2742_v39, 3 }
 0x1d7   : > { %v2990_v5 = vadd.f32 %v2896_v0, %v6124_v16  ;;  %v2744_v1 = vpop.f32.mrf.mxu1  ;;  %v3191_v56 = vpop.f32.mrf.mxu0 }
 0x1d8   : > { %v2899_v30 = vrot.slane %v2744_v1, 3 }
 0x1d9   : > { %v2746_v8 = vpop.f32.mrf.mxu1  ;;  %v3192_v13 = vpop.f32.mrf.mxu0 }
 0x1da   : > { %v2901_v22 = vrot.slane %v2746_v8, 3 }
 0x1db   : > { %v2748_v36 = vpop.f32.mrf.mxu1  ;;  %v3193_v19 = vpop.f32.mrf.mxu0 }
 0x1dc   : > { %v2902_v41 = vsel %vm1516_vm5, %v2897_v7, %v2901_v22  ;;  %v2903_v4 = vrot.slane %v2748_v36, 3 }
 0x1dd   : > { %v2993_v12 = vadd.f32 %v2902_v41, %v6129_v42  ;;  %v2752_v20 = vpop.f32.mrf.mxu1  ;;  %v3196_v31 = vpop.f32.mrf.mxu0 }
 0x1de   : > { %v2904_v62 = vsel %vm1516_vm5, %v2899_v30, %v2903_v4  ;;  %v2905_v10 = vrot.slane %v2752_v20, 3  ;;  %v3349_v28 = vrot.slane %v3196_v31, 1 }
 0x1df   : > { %v2994_v16 = vadd.f32 %v2904_v62, %v6138_v47  ;;  %v2754_v15 = vpop.f32.mrf.mxu1  ;;  %v3198_v61 = vpop.f32.mrf.mxu0 }
 0x1e0   : > { %v2907_v59 = vrot.slane %v2754_v15, 3  ;;  %v3352_v34 = vrot.slane %v3198_v61, 1 }
 0x1e1   : > { %v2756_v9 = vpop.f32.mrf.mxu1  ;;  %v3200_v45 = vpop.f32.mrf.mxu0 }
 0x1e2   : > { %v2909_v27 = vrot.slane %v2756_v9, 3  ;;  %v3350_v29 = vrot.slane %v3200_v45, 1 }
 0x1e3   : > { %v2758_v23 = vpop.f32.mrf.mxu1  ;;  %v3202_v17 = vpop.f32.mrf.mxu0 }
 0x1e4   : > { %v2910_v42 = vsel %vm1516_vm5, %v2905_v10, %v2909_v27  ;;  %v3351_v32 = vsel %vm630_vm3, %v3349_v28, %v3350_v29  ;;  %v2911_v44 = vrot.slane %v2758_v23, 3  ;;  %v3353_v46 = vrot.slane %v3202_v17, 1 }
 0x1e5   : > { %v2997_v47 = vadd.f32 %v2910_v42, %v6143_v52  ;;  %v6223_v6 = vadd.f32 %v3351_v32, %v2989_v18  ;;  %v2762_v37 = vpop.f32.mrf.mxu1  ;;  %v3206_v50 = vpop.f32.mrf.mxu0 }
 0x1e6   : > { %v2912_v53 = vsel %vm1516_vm5, %v2907_v59, %v2911_v44  ;;  %v3354_v49 = vsel %vm630_vm3, %v3352_v34, %v3353_v46  ;;  %v2913_v25 = vrot.slane %v2762_v37, 3  ;;  %v3355_v2 = vrot.slane %v3206_v50, 1 }
 0x1e7   : > { %v2998_v54 = vadd.f32 %v2912_v53, %v6152_v48  ;;  %v6228_v38 = vadd.f32 %v3354_v49, %v2990_v5  ;;  %v2764_v33 = vpop.f32.mrf.mxu1  ;;  %v3208_v24 = vpop.f32.mrf.mxu0 }
 0x1e8   : > { %v2915_v51 = vrot.slane %v2764_v33, 3  ;;  %v3357_v39 = vrot.slane %v3208_v24, 1 }
 0x1e9   : > { %v2766_v21 = vpop.f32.mrf.mxu1  ;;  %v3210_v43 = vpop.f32.mrf.mxu0 }
 0x1ea   : > { %v2917_v52 = vrot.slane %v2766_v21, 3  ;;  %v3359_v18 = vrot.slane %v3210_v43, 1 }
 0x1eb   : > { %v2768_v60 = vpop.f32.mrf.mxu1  ;;  %v3212_v0 = vpop.f32.mrf.mxu0 }
 0x1ec   : > { %v2918_v1 = vsel %vm1516_vm5, %v2913_v25, %v2917_v52  ;;  %v3360_v56 = vsel %vm630_vm3, %v3355_v2, %v3359_v18  ;;  %v2919_v7 = vrot.slane %v2768_v60, 3  ;;  %v3361_v48 = vrot.slane %v3212_v0, 1 }
 0x1ed   : > { %v3001_v5 = vadd.f32 %v2918_v1, %v6157_v40  ;;  %v6233_v8 = vadd.f32 %v3360_v56, %v2993_v12  ;;  %v2772_v13 = vpop.f32.mrf.mxu1  ;;  %v3216_v30 = vpop.f32.mrf.mxu0 }
 0x1ee   : > { %v2920_v22 = vsel %vm1516_vm5, %v2915_v51, %v2919_v7  ;;  %v3362_v36 = vsel %vm630_vm3, %v3357_v39, %v3361_v48  ;;  %v2921_v31 = vrot.slane %v2772_v13, 3  ;;  %v3363_v61 = vrot.slane %v3216_v30, 1 }
 0x1ef   : > { %v3002_v19 = vadd.f32 %v2920_v22, %v6166_v55  ;;  %v6238_v41 = vadd.f32 %v3362_v36, %v2994_v16  ;;  %v2774_v4 = vpop.f32.mrf.mxu1  ;;  %v3218_v20 = vpop.f32.mrf.mxu0 }
 0x1f0   : > { %v2923_v10 = vrot.slane %v2774_v4, 3  ;;  %v3365_v9 = vrot.slane %v3218_v20, 1 }
 0x1f1   : > { %v2776_v62 = vpop.f32.mrf.mxu1  ;;  %v3220_v15 = vpop.f32.mrf.mxu0 }
 0x1f2   : > { %v2925_v40 = vrot.slane %v2776_v62, 3  ;;  %v3367_v12 = vrot.slane %v3220_v15, 1 }
 0x1f3   : > { %v2778_v45 = vpop.f32.mrf.mxu1  ;;  %v3222_v28 = vpop.f32.mrf.mxu0 }
 0x1f4   : > { %v2926_v59 = vsel %vm1516_vm5, %v2921_v31, %v2925_v40  ;;  %v3368_v27 = vsel %vm630_vm3, %v3363_v61, %v3367_v12  ;;  %v2927_v29 = vrot.slane %v2778_v45, 3  ;;  %v3369_v55 = vrot.slane %v3222_v28, 1 }
 0x1f5   : > { %v3005_v16 = vadd.f32 %v2926_v59, %v6171_v58  ;;  %v6243_v34 = vadd.f32 %v3368_v27, %v2997_v47  ;;  %v2782_v23 = vpop.f32.mrf.mxu1  ;;  %v3226_v17 = vpop.f32.mrf.mxu0 }
 0x1f6   : > { %v2928_v42 = vsel %vm1516_vm5, %v2923_v10, %v2927_v29  ;;  %v3370_v32 = vsel %vm630_vm3, %v3365_v9, %v3369_v55  ;;  %v2929_v53 = vrot.slane %v2782_v23, 3  ;;  %v3371_v24 = vrot.slane %v3226_v17, 1 }
 0x1f7   : > { %v3006_v44 = vadd.f32 %v2928_v42, %v6180_v26  ;;  %v6248_v46 = vadd.f32 %v3370_v32, %v2998_v54  ;;  %v2784_v37 = vpop.f32.mrf.mxu1  ;;  %v3228_v50 = vpop.f32.mrf.mxu0 }
 0x1f8   : > { %v2931_v25 = vrot.slane %v2784_v37, 3  ;;  %v3373_v21 = vrot.slane %v3228_v50, 1 }
 0x1f9   : > { %v2786_v49 = vpop.f32.mrf.mxu1  ;;  %v3230_v33 = vpop.f32.mrf.mxu0 }
 0x1fa   : > { %v2933_v58 = vrot.slane %v2786_v49, 3  ;;  %v3375_v47 = vrot.slane %v3230_v33, 1 }
 0x1fb   : > { %v2788_v43 = vpop.f32.mrf.mxu1  ;;  %v3232_v2 = vpop.f32.mrf.mxu0 }
 0x1fc   : > { %v2934_v51 = vsel %vm1516_vm5, %v2929_v53, %v2933_v58  ;;  %v3376_v52 = vsel %vm630_vm3, %v3371_v24, %v3375_v47  ;;  %v2935_v18 = vrot.slane %v2788_v43, 3  ;;  %v3377_v26 = vrot.slane %v3232_v2, 1 }
 0x1fd   : > { %v3009_v54 = vadd.f32 %v2934_v51, %v6185_v35  ;;  %v6253_v39 = vadd.f32 %v3376_v52, %v3001_v5  ;;  %v2792_v60 = vpop.f32.mrf.mxu1  ;;  %v3236_v0 = vpop.f32.mrf.mxu0 }
 0x1fe   : > { %v2936_v1 = vsel %vm1516_vm5, %v2931_v25, %v2935_v18  ;;  %v3378_v56 = vsel %vm630_vm3, %v3373_v21, %v3377_v26  ;;  %v2937_v22 = vrot.slane %v2792_v60, 3  ;;  %v3379_v20 = vrot.slane %v3236_v0, 1 }
 0x1ff   : > { %v3010_v7 = vadd.f32 %v2936_v1, %v6193_v11  ;;  %v6258_v48 = vadd.f32 %v3378_v56, %v3002_v19  ;;  %v2794_v13 = vpop.f32.mrf.mxu1  ;;  %v3238_v30 = vpop.f32.mrf.mxu0 }
 0x200   : > { %v2939_v31 = vrot.slane %v2794_v13, 3  ;;  %v3381_v62 = vrot.slane %v3238_v30, 1 }
 0x201   : > { %v2796_v36 = vpop.f32.mrf.mxu1  ;;  %v3240_v4 = vpop.f32.mrf.mxu0 }
 0x202   : > { %v2941_v35 = vrot.slane %v2796_v36, 3  ;;  %v3383_v5 = vrot.slane %v3240_v4, 1 }
 0x203   : > { %v2798_v15 = vpop.f32.mrf.mxu1  ;;  %v3242_v61 = vpop.f32.mrf.mxu0 }
 0x204   : > { %v2942_v10 = vsel %vm1516_vm5, %v2937_v22, %v2941_v35  ;;  %v3384_v40 = vsel %vm630_vm3, %v3379_v20, %v3383_v5  ;;  %v2943_v12 = vrot.slane %v2798_v15, 3  ;;  %v3385_v11 = vrot.slane %v3242_v61, 1 }
 0x205   : > { %v3013_v19 = vadd.f32 %v2942_v10, %v6198_v3  ;;  %v6263_v9 = vadd.f32 %v3384_v40, %v3005_v16  ;;  %v2802_v45 = vpop.f32.mrf.mxu1  ;;  %v3246_v28 = vpop.f32.mrf.mxu0 }
 0x206   : > { %v2944_v59 = vsel %vm1516_vm5, %v2939_v31, %v2943_v12  ;;  %v3386_v27 = vsel %vm630_vm3, %v3381_v62, %v3385_v11  ;;  %v2945_v42 = vrot.slane %v2802_v45, 3  ;;  %v3387_v50 = vrot.slane %v3246_v28, 1 }
 0x207   : > { %v3014_v29 = vadd.f32 %v2944_v59, %v6204_v63  ;;  %v6268_v55 = vadd.f32 %v3386_v27, %v3006_v44  ;;  %v2804_v23 = vpop.f32.mrf.mxu1  ;;  %v3248_v17 = vpop.f32.mrf.mxu0 }
 0x208   : > { %v2947_v53 = vrot.slane %v2804_v23, 3  ;;  %v3389_v49 = vrot.slane %v3248_v17, 1 }
 0x209   : > { %v2806_v32 = vpop.f32.mrf.mxu1  ;;  %v3250_v37 = vpop.f32.mrf.mxu0 }
 0x20a   : > { %v2949_v3 = vrot.slane %v2806_v32, 3  ;;  %v3391_v16 = vrot.slane %v3250_v37, 1 }
 0x20b   : > { %v2808_v33 = vpop.f32.mrf.mxu1  ;;  %v3252_v24 = vpop.f32.mrf.mxu0 }
 0x20c   : > { %v2950_v25 = vsel %vm1516_vm5, %v2945_v42, %v2949_v3  ;;  %v3392_v58 = vsel %vm630_vm3, %v3387_v50, %v3391_v16  ;;  %v2951_v47 = vrot.slane %v2808_v33, 3  ;;  %v3393_v63 = vrot.slane %v3252_v24, 1 }
 0x20d   : > { %v3017_v44 = vadd.f32 %v2950_v25, %v6207_v14  ;;  %v6273_v21 = vadd.f32 %v3392_v58, %v3009_v54  ;;  %v2812_v43 = vpop.f32.mrf.mxu1  ;;  %v3256_v2 = vpop.f32.mrf.mxu0 }
 0x20e   : > { %v2952_v51 = vsel %vm1516_vm5, %v2947_v53, %v2951_v47  ;;  %v3394_v52 = vsel %vm630_vm3, %v3389_v49, %v3393_v63  ;;  %v3395_v13 = vrot.slane %v3256_v2, 1 }
 0x20f   : > { %v3018_v18 = vadd.f32 %v2952_v51, %v6210_v57  ;;  %v6278_v26 = vadd.f32 %v3394_v52, %v3010_v7  ;;  %v2814_v60 = vpop.f32.mrf.mxu1  ;;  %v3258_v0 = vpop.f32.mrf.mxu0  ;;  %v4445_v52 = vlaneseq }
 0x210   : > { %v3397_v54 = vrot.slane %v3258_v0, 1 }
 0x211   : > { %v2816_v1 = vpop.f32.mrf.mxu1  ;;  %v3260_v56 = vpop.f32.mrf.mxu0 }
 0x212   : > { %v3399_v30 = vrot.slane %v3260_v56, 1  ;;  %v4446_v56 = vshrl.u32 %v4445_v52, 7 }
 0x213   : > { %v2817_v22 = vpop.f32.mrf.mxu1  ;;  %v3262_v14 = vpop.f32.mrf.mxu0 }
 0x214   : > { %v3400_v36 = vsel %vm630_vm3, %v3395_v13, %v3399_v30  ;;  %v3401_v4 = vrot.slane %v3262_v14, 1 }
 0x215   : > { %v6281_v20 = vadd.f32 %v3400_v36, %v3013_v19  ;;  %v2820_v31 = vpop.f32.mrf.mxu1  ;;  %v3266_v35 = vpop.f32.mrf.mxu0 }
 0x216   : > { %v3402_v57 = vsel %vm630_vm3, %v3397_v54, %v3401_v4  ;;  %v3403_v10 = vrot.slane %v3266_v35, 1  ;;  %v4447_v35 = vsub.s32 0, %v4446_v56 }
 0x217   : > { %v6284_v7 = vadd.f32 %v3402_v57, %v3014_v29  ;;  %v2821_v5 = vpop.f32.mrf.mxu1  ;;  %v3268_v62 = vpop.f32.mrf.mxu0 }
 0x218   : > { %v3405_v45 = vrot.slane %v3268_v62, 1  ;;  %v4443_v5 = vld [vmem:[%s6382_s2] sm:$0x3] }
 0x219   : > { %v2822_v15 = vpop.f32.mrf.mxu1  ;;  %v3270_v61 = vpop.f32.mrf.mxu0 }
 0x21a   : > { %v3407_v40 = vrot.slane %v3270_v61, 1  ;;  %v4451_v61 = vsub.s32 1, %v4446_v56 }
 0x21b   : > { %v2823_v12 = vpop.f32.mrf.mxu1  ;;  %v3272_v11 = vpop.f32.mrf.mxu0 }
 0x21c   : > { %v3408_v28 = vsel %vm630_vm3, %v3403_v10, %v3407_v40  ;;  %v3409_v59 = vrot.slane %v3272_v11, 1 }
 0x21d   : > { %v6287_v19 = vadd.f32 %v3408_v28, %v3017_v44  ;;  %v3276_v27 = vpop.f32.mrf.mxu0  ;;  %v3642_v23 = vpop.f32.mrf.mxu1 }
 0x21e   : > { %v3410_v17 = vsel %vm630_vm3, %v3405_v45, %v3409_v59  ;;  %v6298_v59 = vrot.slane %v4443_v5, %v4447_v35 }
 0x21f   : > { %v6290_v29 = vadd.f32 %v3410_v17, %v3018_v18  ;;  %v3278_v42 = vpop.f32.mrf.mxu0  ;;  %v3643_v32 = vpop.f32.mrf.mxu1 }
 0x221   : > { %v3280_v37 = vpop.f32.mrf.mxu0  ;;  %v3644_v50 = vpop.f32.mrf.mxu1 }
 0x223   : > { %v3281_v53 = vpop.f32.mrf.mxu0  ;;  %v3645_v3 = vpop.f32.mrf.mxu1 }
 0x224   : > { %v6302_v53 = vrot.slane %v4443_v5, %v4451_v61 }
 0x225   : > { %v3648_v16 = vpop.f32.mrf.mxu1  ;;  %v4100_v49 = vpop.f32.mrf.mxu0 }
 0x227   : > { %v3649_v33 = vpop.f32.mrf.mxu1  ;;  %v4101_v24 = vpop.f32.mrf.mxu0 }
 0x229   : > { %v3650_v25 = vpop.f32.mrf.mxu1  ;;  %v4102_v58 = vpop.f32.mrf.mxu0 }
 0x22b   : > { %v3651_v47 = vpop.f32.mrf.mxu1  ;;  %v4103_v63 = vpop.f32.mrf.mxu0 }
 0x22d   : > { %v3654_v44 = vpop.f32.mrf.mxu1  ;;  %v4106_v43 = vpop.f32.mrf.mxu0 }
 0x22e   : > { %v3807_v13 = vrot.slane %v3654_v44, 2 }
 0x22f   : > { %v3656_v2 = vpop.f32.mrf.mxu1  ;;  %v4107_v51 = vpop.f32.mrf.mxu0 }
 0x230   : > { %v3810_v54 = vrot.slane %v3656_v2, 2 }
 0x231   : > { %v3658_v18 = vpop.f32.mrf.mxu1  ;;  %v4108_v60 = vpop.f32.mrf.mxu0 }
 0x232   : > { %v3808_v30 = vrot.slane %v3658_v18, 2 }
 0x233   : > { %v3660_v0 = vpop.f32.mrf.mxu1  ;;  %v4109_v1 = vpop.f32.mrf.mxu0 }
 0x234   : > { %v3811_v36 = vrot.slane %v3660_v0, 2  ;;  %v3809_v57 = vsel %vm1057_vm4, %v3807_v13, %v3808_v30 }
 0x235   : > { %v3664_v22 = vpop.f32.mrf.mxu1  ;;  %v4112_v14 = vpop.f32.mrf.mxu0  ;;  %v3905_v11 = vadd.f32 %v3809_v57, %v6223_v6 }
 0x236   : > { %v3812_v10 = vsel %vm1057_vm4, %v3810_v54, %v3811_v36  ;;  %v4265_v40 = vrot.slane %v4112_v14, 3  ;;  %v3813_v45 = vrot.slane %v3664_v22, 2 }
 0x237   : > { %v3666_v4 = vpop.f32.mrf.mxu1  ;;  %v4114_v31 = vpop.f32.mrf.mxu0  ;;  %v3906_v37 = vadd.f32 %v3812_v10, %v6228_v38 }
 0x238   : > { %v4268_v17 = vrot.slane %v4114_v31, 3  ;;  %v3815_v49 = vrot.slane %v3666_v4, 2 }
 0x239   : > { %v3668_v62 = vpop.f32.mrf.mxu1  ;;  %v4116_v15 = vpop.f32.mrf.mxu0 }
 0x23a   : > { %v4266_v12 = vrot.slane %v4116_v15, 3  ;;  %v3817_v28 = vrot.slane %v3668_v62, 2 }
 0x23b   : > { %v3670_v27 = vpop.f32.mrf.mxu1  ;;  %v4118_v23 = vpop.f32.mrf.mxu0 }
 0x23c   : > { %v4267_v42 = vsel %vm1516_vm5, %v4265_v40, %v4266_v12  ;;  %v4269_v32 = vrot.slane %v4118_v23, 3  ;;  %v3818_v33 = vsel %vm1057_vm4, %v3813_v45, %v3817_v28  ;;  %v3819_v25 = vrot.slane %v3670_v27, 2 }
 0x23d   : > { %v4363_v50 = vadd.f32 %v4267_v42, %v3905_v11  ;;  %v3674_v3 = vpop.f32.mrf.mxu1  ;;  %v4122_v16 = vpop.f32.mrf.mxu0  ;;  %v3909_v51 = vadd.f32 %v3818_v33, %v6233_v8 }
 0x23e   : > { %v4270_v6 = vsel %vm1516_vm5, %v4268_v17, %v4269_v32  ;;  %v4271_v52 = vrot.slane %v4122_v16, 3  ;;  %v3820_v0 = vsel %vm1057_vm4, %v3815_v49, %v3819_v25  ;;  %v3821_v30 = vrot.slane %v3674_v3, 2 }
 0x23f   : > { %v4455_v24 = vadd.f32 %v6298_v59, %v4363_v50  ;;  %v4364_v58 = vadd.f32 %v4270_v6, %v3906_v37  ;;  %v3676_v47 = vpop.f32.mrf.mxu1  ;;  %v4124_v63 = vpop.f32.mrf.mxu0  ;;  %v3910_v5 = vadd.f32 %v3820_v0, %v6238_v41 }
 0x240   : > { %v4273_v36 = vrot.slane %v4124_v63, 3  ;;  %v3823_v15 = vrot.slane %v3676_v47, 2 }
 0x241   : > { %vm4471_vm6 = vcmp.ge.f32.partialorder %v4455_v24, 0.0  ;;  %v4487_v44 = vmul.f32 0.2, %v4455_v24  ;;  %v4456_v38 = vadd.f32 %v6302_v53, %v4364_v58  ;;  %v3678_v43 = vpop.f32.mrf.mxu1  ;;  %v4126_v2 = vpop.f32.mrf.mxu0 }
 0x242   : > { %v4275_v18 = vrot.slane %v4126_v2, 3  ;;  %v3825_v22 = vrot.slane %v3678_v43, 2 }
 0x243   : > { %v4503_v60 = vsel %vm4471_vm6, %v4455_v24, %v4487_v44  ;;  %vm4472_vm7 = vcmp.ge.f32.partialorder %v4456_v38, 0.0  ;;  %v4488_v1 = vmul.f32 0.2, %v4456_v38  ;;  %v3680_v56 = vpop.f32.mrf.mxu1  ;;  %v4128_v13 = vpop.f32.mrf.mxu0 }
 0x244   : > { %v4276_v14 = vsel %vm1516_vm5, %v4271_v52, %v4275_v18  ;;  %v4277_v31 = vrot.slane %v4128_v13, 3  ;;  %v4519_v57 = vmul.f32 1.4142135, %v4503_v60  ;;  %v3827_v10 = vrot.slane %v3680_v56, 2 }
 0x245   : > { %v4504_v54 = vsel %vm4472_vm7, %v4456_v38, %v4488_v1  ;;  %v4367_v4 = vadd.f32 %v4276_v14, %v3909_v51  ;;  %v3684_v35 = vpop.f32.mrf.mxu1  ;;  %v4132_v8 = vpop.f32.mrf.mxu0  ;;  %v3826_v28 = vsel %vm1057_vm4, %v3821_v30, %v3825_v22 }
 0x246   : > { %v4520_v62 = vmul.f32 1.4142135, %v4504_v54  ;;  %v4278_v40 = vsel %vm1516_vm5, %v4273_v36, %v4277_v31  ;;  %v3913_v37 = vadd.f32 %v3826_v28, %v6243_v34  ;;  %v3828_v50 = vsel %vm1057_vm4, %v3823_v15, %v3827_v10 }
 0x247   : > { %v4457_v61 = vadd.f32 %v6298_v59, %v4367_v4  ;;  %v3686_v12 = vpop.f32.mrf.mxu1  ;;  %v4134_v11 = vpop.f32.mrf.mxu0  ;;  %v4368_v27 = vadd.f32 %v4278_v40, %v3910_v5  ;;  %v3829_v3 = vrot.slane %v3684_v35, 2  ;;  %v4279_v16 = vrot.slane %v4132_v8, 3 }
 0x248   : > { %v4966_v45 = vpack.c.bf16 %v4520_v62, %v4519_v57  ;;  %v4281_v58 = vrot.slane %v4134_v11, 3  ;;  %v3914_v43 = vadd.f32 %v3828_v50, %v6248_v46  ;;  %v3831_v18 = vrot.slane %v3686_v12, 2 }
 0x249   : > { %vm4473_vm8 = vcmp.ge.f32.partialorder %v4457_v61, 0.0  ;;  %v4489_v41 = vmul.f32 0.2, %v4457_v61  ;;  %v3688_v23 = vpop.f32.mrf.mxu1  ;;  %v4136_v17 = vpop.f32.mrf.mxu0  ;;  %v4458_v42 = vadd.f32 %v6302_v53, %v4368_v27 }
 0x24a   : > { %4599 = vst [vmem:[%s6316_s14] sm:$0xff] %v4966_v45  ;;  %v4283_v32 = vrot.slane %v4136_v17, 3  ;;  %v3833_v25 = vrot.slane %v3688_v23, 2 }
 0x24b   : > { %v3690_v49 = vpop.f32.mrf.mxu1  ;;  %v4138_v6 = vpop.f32.mrf.mxu0  ;;  %v4505_v33 = vsel %vm4473_vm8, %v4457_v61, %v4489_v41  ;;  %vm4474_vm9 = vcmp.ge.f32.partialorder %v4458_v42, 0.0  ;;  %v4490_v24 = vmul.f32 0.2, %v4458_v42 }
 0x24c   : > { %v4284_v47 = vsel %vm1516_vm5, %v4279_v16, %v4283_v32  ;;  %v4285_v63 = vrot.slane %v4138_v6, 3  ;;  %v4521_v51 = vmul.f32 1.4142135, %v4505_v33  ;;  %v3834_v56 = vsel %vm1057_vm4, %v3829_v3, %v3833_v25 }
 0x24d   : > { %v3694_v44 = vpop.f32.mrf.mxu1  ;;  %v4142_v38 = vpop.f32.mrf.mxu0  ;;  %v4506_v2 = vsel %vm4474_vm9, %v4458_v42, %v4490_v24  ;;  %v4371_v34 = vadd.f32 %v4284_v47, %v3913_v37  ;;  %v3835_v30 = vrot.slane %v3690_v49, 2  ;;  %v3917_v31 = vadd.f32 %v3834_v56, %v6253_v39 }
 0x24e   : > { %v4522_v52 = vmul.f32 1.4142135, %v4506_v2  ;;  %v4286_v60 = vsel %vm1516_vm5, %v4281_v58, %v4285_v63  ;;  %v4287_v35 = vrot.slane %v4142_v38, 3  ;;  %v3837_v10 = vrot.slane %v3694_v44, 2 }
 0x24f   : > { %v3696_v0 = vpop.f32.mrf.mxu1  ;;  %v4144_v1 = vpop.f32.mrf.mxu0  ;;  %v4459_v13 = vadd.f32 %v6298_v59, %v4371_v34  ;;  %v4372_v22 = vadd.f32 %v4286_v60, %v3914_v43  ;;  %v3836_v15 = vsel %vm1057_vm4, %v3831_v18, %v3835_v30 }
 0x250   : > { %v4967_v14 = vpack.c.bf16 %v4522_v52, %v4521_v51  ;;  %v4289_v27 = vrot.slane %v4144_v1, 3  ;;  %v3918_v17 = vadd.f32 %v3836_v15, %v6258_v48  ;;  %v3839_v50 = vrot.slane %v3696_v0, 2 }
 0x251   : > { %v3698_v54 = vpop.f32.mrf.mxu1  ;;  %v4146_v36 = vpop.f32.mrf.mxu0  ;;  %vm4475_vm10 = vcmp.ge.f32.partialorder %v4459_v13, 0.0  ;;  %v4491_v46 = vmul.f32 0.2, %v4459_v13  ;;  %v4460_v4 = vadd.f32 %v6302_v53, %v4372_v22 }
 0x252   : > { %4600 = vst [vmem:[%s6316_s14 + $0x8] sm:$0xff] %v4967_v14  ;;  %v4291_v8 = vrot.slane %v4146_v36, 3  ;;  %v3841_v40 = vrot.slane %v3698_v54, 2 }
 0x253   : > { %v3700_v57 = vpop.f32.mrf.mxu1  ;;  %v4148_v5 = vpop.f32.mrf.mxu0  ;;  %v4507_v62 = vsel %vm4475_vm10, %v4459_v13, %v4491_v46  ;;  %vm4476_vm11 = vcmp.ge.f32.partialorder %v4460_v4, 0.0  ;;  %v4492_v61 = vmul.f32 0.2, %v4460_v4 }
 0x254   : > { %v4292_v12 = vsel %vm1516_vm5, %v4287_v35, %v4291_v8  ;;  %v4293_v23 = vrot.slane %v4148_v5, 3  ;;  %v4523_v39 = vmul.f32 1.4142135, %v4507_v62  ;;  %v3843_v16 = vrot.slane %v3700_v57, 2 }
 0x255   : > { %v3704_v11 = vpop.f32.mrf.mxu1  ;;  %v4152_v45 = vpop.f32.mrf.mxu0  ;;  %v4508_v28 = vsel %vm4476_vm11, %v4460_v4, %v4492_v61  ;;  %v4375_v41 = vadd.f32 %v4292_v12, %v3917_v31  ;;  %v3842_v33 = vsel %vm1057_vm4, %v3837_v10, %v3841_v40 }
 0x256   : > { %v4524_v42 = vmul.f32 1.4142135, %v4508_v28  ;;  %v4294_v49 = vsel %vm1516_vm5, %v4289_v27, %v4293_v23  ;;  %v4295_v63 = vrot.slane %v4152_v45, 3  ;;  %v3845_v38 = vrot.slane %v3704_v11, 2 }
 0x257   : > { %v3706_v32 = vpop.f32.mrf.mxu1  ;;  %v4154_v37 = vpop.f32.mrf.mxu0  ;;  %v4461_v3 = vadd.f32 %v6298_v59, %v4375_v41  ;;  %v4376_v24 = vadd.f32 %v4294_v49, %v3918_v17  ;;  %v3921_v51 = vadd.f32 %v3842_v33, %v6263_v9  ;;  %v3844_v52 = vsel %vm1057_vm4, %v3839_v50, %v3843_v16 }
 0x258   : > { %v4968_v6 = vpack.c.bf16 %v4524_v42, %v4523_v39  ;;  %v3847_v18 = vrot.slane %v3706_v32, 2  ;;  %v4297_v22 = vrot.slane %v4154_v37, 3  ;;  %v3922_v36 = vadd.f32 %v3844_v52, %v6268_v55 }
 0x259   : > { %v3708_v25 = vpop.f32.mrf.mxu1  ;;  %v4156_v58 = vpop.f32.mrf.mxu0  ;;  %vm4477_vm12 = vcmp.ge.f32.partialorder %v4461_v3, 0.0  ;;  %v4493_v47 = vmul.f32 0.2, %v4461_v3  ;;  %v4462_v44 = vadd.f32 %v6302_v53, %v4376_v24 }
 0x25a   : > { %v4299_v48 = vrot.slane %v4156_v58, 3  ;;  %4601 = vst [vmem:[%s6316_s14 + $0x10] sm:$0xff] %v4968_v6  ;;  %v3849_v43 = vrot.slane %v3708_v25, 2 }
 0x25b   : > { %v3710_v2 = vpop.f32.mrf.mxu1  ;;  %v4158_v34 = vpop.f32.mrf.mxu0  ;;  %v4509_v0 = vsel %vm4477_vm12, %v4461_v3, %v4493_v47  ;;  %vm4478_vm13 = vcmp.ge.f32.partialorder %v4462_v44, 0.0  ;;  %v4494_v1 = vmul.f32 0.2, %v4462_v44 }
 0x25c   : > { %v4300_v60 = vsel %vm1516_vm5, %v4295_v63, %v4299_v48  ;;  %v3851_v56 = vrot.slane %v3710_v2, 2  ;;  %v4301_v54 = vrot.slane %v4158_v34, 3  ;;  %v3850_v4 = vsel %vm1057_vm4, %v3845_v38, %v3849_v43 }
 0x25d   : > { %v3714_v13 = vpop.f32.mrf.mxu1  ;;  %v4162_v30 = vpop.f32.mrf.mxu0  ;;  %v4379_v14 = vadd.f32 %v4300_v60, %v3921_v51  ;;  %v4510_v46 = vsel %vm4478_vm13, %v4462_v44, %v4494_v1  ;;  %v4525_v35 = vmul.f32 1.4142135, %v4509_v0  ;;  %v3925_v45 = vadd.f32 %v3850_v4, %v6273_v21 }
 0x25e   : > { %v4526_v8 = vmul.f32 1.4142135, %v4510_v46  ;;  %v4302_v5 = vsel %vm1516_vm5, %v4297_v22, %v4301_v54  ;;  %v3852_v62 = vsel %vm1057_vm4, %v3847_v18, %v3851_v56  ;;  %v3853_v61 = vrot.slane %v3714_v13, 2 }
 0x25f   : > { %v3716_v9 = vpop.f32.mrf.mxu1  ;;  %v4164_v31 = vpop.f32.mrf.mxu0  ;;  %v4463_v57 = vadd.f32 %v6298_v59, %v4379_v14  ;;  %v4380_v15 = vadd.f32 %v4302_v5, %v3922_v36  ;;  %v4303_v17 = vrot.slane %v4162_v30, 3  ;;  %v3926_v3 = vadd.f32 %v3852_v62, %v6278_v26 }
 0x260   : > { %v4969_v12 = vpack.c.bf16 %v4526_v8, %v4525_v35  ;;  %v3855_v27 = vrot.slane %v3716_v9, 2  ;;  %v4305_v42 = vrot.slane %v4164_v31, 3 }
 0x261   : > { %v3718_v10 = vpop.f32.mrf.mxu1  ;;  %v4166_v40 = vpop.f32.mrf.mxu0  ;;  %vm4479_vm14 = vcmp.ge.f32.partialorder %v4463_v57, 0.0  ;;  %v4495_v55 = vmul.f32 0.2, %v4463_v57  ;;  %v4464_v28 = vadd.f32 %v6302_v53, %v4380_v15 }
 0x262   : > { %v3857_v11 = vrot.slane %v3718_v10, 2  ;;  %v4307_v41 = vrot.slane %v4166_v40, 3  ;;  %4602 = vst [vmem:[%s6316_s14 + $0x18] sm:$0xff] %v4969_v12 }
 0x263   : > { %v3720_v23 = vpop.f32.mrf.mxu1  ;;  %v4168_v39 = vpop.f32.mrf.mxu0  ;;  %v4511_v50 = vsel %vm4479_vm14, %v4463_v57, %v4495_v55  ;;  %vm4480_vm15 = vcmp.ge.f32.partialorder %v4464_v28, 0.0  ;;  %v4496_v16 = vmul.f32 0.2, %v4464_v28 }
 0x264   : > { %v3859_v32 = vrot.slane %v3720_v23, 2  ;;  %v4309_v37 = vrot.slane %v4168_v39, 3  ;;  %v3858_v21 = vsel %vm1057_vm4, %v3853_v61, %v3857_v11  ;;  %v4308_v33 = vsel %vm1516_vm5, %v4303_v17, %v4307_v41 }
 0x265   : > { %v3724_v49 = vpop.f32.mrf.mxu1  ;;  %v4172_v6 = vpop.f32.mrf.mxu0  ;;  %v4512_v25 = vsel %vm4480_vm15, %v4464_v28, %v4496_v16  ;;  %v4383_v58 = vadd.f32 %v4308_v33, %v3925_v45  ;;  %v4527_v38 = vmul.f32 1.4142135, %v4511_v50  ;;  %v3929_v26 = vadd.f32 %v3858_v21, %v6281_v20 }
 0x266   : > { %v4310_v24 = vsel %vm1516_vm5, %v4305_v42, %v4309_v37  ;;  %v3860_v47 = vsel %vm1057_vm4, %v3855_v27, %v3859_v32  ;;  %v4528_v43 = vmul.f32 1.4142135, %v4512_v25  ;;  %v3861_v51 = vrot.slane %v3724_v49, 2 }
 0x267   : > { %v4384_v63 = vadd.f32 %v4310_v24, %v3926_v3  ;;  %v3726_v48 = vpop.f32.mrf.mxu1  ;;  %v4174_v44 = vpop.f32.mrf.mxu0  ;;  %v4465_v2 = vadd.f32 %v6298_v59, %v4383_v58  ;;  %v3930_v0 = vadd.f32 %v3860_v47, %v6284_v7  ;;  %v4311_v1 = vrot.slane %v4172_v6, 3 }
 0x268   : > { %v4970_v60 = vpack.c.bf16 %v4528_v43, %v4527_v38  ;;  %v4313_v20 = vrot.slane %v4174_v44, 3  ;;  %v3863_v31 = vrot.slane %v3726_v48, 2 }
 0x269   : > { %v4466_v34 = vadd.f32 %v6302_v53, %v4384_v63  ;;  %v3728_v52 = vpop.f32.mrf.mxu1  ;;  %v4176_v18 = vpop.f32.mrf.mxu0  ;;  %vm4481_vm0 = vcmp.ge.f32.partialorder %v4465_v2, 0.0  ;;  %v4497_v13 = vmul.f32 0.2, %v4465_v2 }
 0x26a   : > { %v4315_v56 = vrot.slane %v4176_v18, 3  ;;  %4603 = vst [vmem:[%s6316_s14 + $0x20] sm:$0xff] %v4970_v60  ;;  %v3865_v54 = vrot.slane %v3728_v52, 2 }
 0x26b   : > { %vm4482_vm1 = vcmp.ge.f32.partialorder %v4466_v34, 0.0  ;;  %v4498_v30 = vmul.f32 0.2, %v4466_v34  ;;  %v3730_v22 = vpop.f32.mrf.mxu1  ;;  %v4178_v14 = vpop.f32.mrf.mxu0  ;;  %v4513_v4 = vsel %vm4481_vm0, %v4465_v2, %v4497_v13 }
 0x26c   : > { %v4316_v36 = vsel %vm1516_vm5, %v4311_v1, %v4315_v56  ;;  %v4317_v46 = vrot.slane %v4178_v14, 3  ;;  %v4529_v57 = vmul.f32 1.4142135, %v4513_v4  ;;  %v3867_v62 = vrot.slane %v3730_v22, 2 }
 0x26d   : > { %v4514_v9 = vsel %vm4482_vm1, %v4466_v34, %v4498_v30  ;;  %v4387_v35 = vadd.f32 %v4316_v36, %v3929_v26  ;;  %v4182_v8 = vpop.f32.mrf.mxu0  ;;  %v3734_v7 = vpop.f32.mrf.mxu1  ;;  %v3866_v11 = vsel %vm1057_vm4, %v3861_v51, %v3865_v54 }
 0x26e   : > { %v4530_v5 = vmul.f32 1.4142135, %v4514_v9  ;;  %v4318_v15 = vsel %vm1516_vm5, %v4313_v20, %v4317_v46  ;;  %v3868_v23 = vsel %vm1057_vm4, %v3863_v31, %v3867_v62  ;;  %v4319_v39 = vrot.slane %v4182_v8, 3 }
 0x26f   : > { %v4467_v61 = vadd.f32 %v6298_v59, %v4387_v35  ;;  %v4388_v10 = vadd.f32 %v4318_v15, %v3930_v0  ;;  %v4184_v40 = vpop.f32.mrf.mxu0  ;;  %v3736_v12 = vpop.f32.mrf.mxu1  ;;  %v3933_v42 = vadd.f32 %v3866_v11, %v6287_v19  ;;  %v3934_v21 = vadd.f32 %v3868_v23, %v6290_v29 }
 0x270   : > { %v4971_v55 = vpack.c.bf16 %v4530_v5, %v4529_v57  ;;  %v4321_v16 = vrot.slane %v4184_v40, 3 }
 0x271   : > { %vm4483_vm2 = vcmp.ge.f32.partialorder %v4467_v61, 0.0  ;;  %v4499_v45 = vmul.f32 0.2, %v4467_v61  ;;  %v4468_v28 = vadd.f32 %v6302_v53, %v4388_v10  ;;  %v4186_v27 = vpop.f32.mrf.mxu0  ;;  %v3738_v41 = vpop.f32.mrf.mxu1 }
 0x272   : > { %4604 = vst [vmem:[%s6316_s14 + $0x28] sm:$0xff] %v4971_v55  ;;  %v4323_v17 = vrot.slane %v4186_v27, 3 }
 0x273   : > { %v4515_v32 = vsel %vm4483_vm2, %v4467_v61, %v4499_v45  ;;  %vm4484_vm3 = vcmp.ge.f32.partialorder %v4468_v28, 0.0  ;;  %v4500_v37 = vmul.f32 0.2, %v4468_v28  ;;  %v4188_v50 = vpop.f32.mrf.mxu0  ;;  %v3739_v3 = vpop.f32.mrf.mxu1 }
 0x274   : > { %v4324_v49 = vsel %vm1516_vm5, %v4319_v39, %v4323_v17  ;;  %v4325_v6 = vrot.slane %v4188_v50, 3  ;;  %v4531_v58 = vmul.f32 1.4142135, %v4515_v32 }
 0x275   : > { %v4516_v33 = vsel %vm4484_vm3, %v4468_v28, %v4500_v37  ;;  %v4391_v24 = vadd.f32 %v4324_v49, %v3933_v42  ;;  %v4192_v25 = vpop.f32.mrf.mxu0 }
 0x276   : > { %v4532_v47 = vmul.f32 1.4142135, %v4516_v33  ;;  %v4326_v63 = vsel %vm1516_vm5, %v4321_v16, %v4325_v6 }
 0x277   : > { %v4469_v19 = vadd.f32 %v6298_v59, %v4391_v24  ;;  %v4392_v48 = vadd.f32 %v4326_v63, %v3934_v21  ;;  %v4194_v44 = vpop.f32.mrf.mxu0 }
 0x278   : > { %v4972_v38 = vpack.c.bf16 %v4532_v47, %v4531_v58 }
 0x279   : > { %vm4485_vm4 = vcmp.ge.f32.partialorder %v4469_v19, 0.0  ;;  %v4501_v43 = vmul.f32 0.2, %v4469_v19  ;;  %v4470_v26 = vadd.f32 %v6302_v53, %v4392_v48  ;;  %v4196_v2 = vpop.f32.mrf.mxu0 }
 0x27a   : > { %4605 = vst [vmem:[%s6316_s14 + $0x30] sm:$0xff] %v4972_v38 }
 0x27b   : > { %v4517_v29 = vsel %vm4485_vm4, %v4469_v19, %v4501_v43  ;;  %vm4486_vm6 = vcmp.ge.f32.partialorder %v4470_v26, 0.0  ;;  %v4502_v34 = vmul.f32 0.2, %v4470_v26  ;;  %v4197_v51 = vpop.f32.mrf.mxu0 }
 0x27c   : > { %v4533_v18 = vmul.f32 1.4142135, %v4517_v29 }
 0x27d   : > { %v4518_v52 = vsel %vm4486_vm6, %v4470_v26, %v4502_v34 }
 0x27e   : > { %v4534_v60 = vmul.f32 1.4142135, %v4518_v52 }
 0x280   : > { %v4973_v0 = vpack.c.bf16 %v4534_v60, %v4533_v18 }
 0x282   : > { %4606 = vst [vmem:[%s6316_s14 + $0x38] sm:$0xff] %v4973_v0 }
 0x283 PF: > { %s13_s12 = sadd.s32 1, %s5243_s12  }
 0x284   : > { %p10_p4 = scmp.ge.s32.totalorder %s13_s12, 4  }
 0x286   :  { %12 = sbr.rel (!%p10_p4) target bundleno = 1 (0x1), region = 72 }

// kernel: stylegan2_decoder_forward.3
= control target key start
LH: loop header
LB: loop body
LE: loop exit
PB: predicated region body
PF: predicated region fallthrough
CT: control target
= control target key end

     0   :  { %10 = vsyncpa [#allocation5], 0  ;;  %s9703_s0 = inlined_call_operand.vmem [shape: bf16[2,8,8,128], index: 0, kind: input, shape index: {}]   ;;  %s9704_s1 = inlined_call_operand.hbm [shape: bf16[3,3,128,128], index: 1, kind: input, shape index: {}]   ;;  %s9705_s2 = inlined_call_operand.hbm [shape: f32[1,128], index: 2, kind: input, shape index: {}]   ;;  %s9706_s3 = inlined_call_operand.hbm [shape: bf16[3,3,128,128], index: 3, kind: input, shape index: {}]   ;;  %s9707_s4 = inlined_call_operand.hbm [shape: f32[1,128], index: 4, kind: input, shape index: {}]   ;;  %s9708_s5 = inlined_call_operand.vmem [shape: bf16[2,8,8,128], index: 5, kind: output, shape index: {}]  }
   0x1   :  { %11 = vsyncpa [#allocation7], 0 }
   0x2   :  { %12 = vsyncpa [#allocation10], 0  ;;  %s8090_s18 = smov 0  }
   0x3 LB: > { %s8051_s19 = smov [#allocation6]   ;;  %s8096_s21 = sadd.s32 4294967295, %s8049_s18   ;;  %s8049_s18 = sphi %s8090_s18, %s18_s18  }
   0x4   : > { %s185_s20 = sshll.u32 %s8051_s19, 4  ;;  %p6017_p0 = scmp.ge.s32.totalorder %s8049_s18, 1  ;;  %s186_s20 = int_to_ptr.vmem [resolvable:$true] %s185_s20 }
   0x5   : > { %p159_p1 = scmp.lt.s32.totalorder %s8049_s18, 3  ;;  %p7713_p2 = scmp.eq.s32.totalorder %s8096_s21, 0 }
   0x6   : > { %s8052_s23 = smov [#allocation4]   ;;  %s8053_s26 = smov [#allocation8]  }
   0x7   : > { %p8101_p3 = pnand %p6017_p0, %p159_p1  ;;  %s171_s24 = sshll.u32 %s8052_s23, 4  ;;  %s8107_s24 = int_to_ptr.vmem [resolvable:$true] %s171_s24 }
   0x8   : > { %s195_s27 = sshll.u32 %s8053_s26, 4  ;;  %s8054_s28 = smov [#allocation9]   ;;  %s8115_s27 = int_to_ptr.vmem [resolvable:$true] %s195_s27 }
   0x9   : > { %p7700_p4 = pneg %p8101_p3  ;;  %s8117_s29 = sshll.u32 %s8054_s28, 4  ;;  %s210_s29 = int_to_ptr.vmem [resolvable:$true] %s8117_s29 }
   0xa   : > { %s7938_s30 = scalar_lea.vmem %s186_s20, 16  ;;  %s7945_s6 = scalar_lea.vmem %s186_s20, 32 }
   0xb   : > { %p8111_p5 = pnand %p7713_p2, %p7700_p4  ;;  %p7939_p7 = scmp.ne.s32.totalorder %s186_s20, %s7938_s30 }
   0xc   : > { %p7946_p10 = scmp.lt.s32.totalorder %s186_s20, %s186_s20  ;;  %p7947_p11 = scmp.lt.s32.totalorder %s7945_s6, %s7938_s30 }
   0xd   : > { %p7929_p6 = pneg %p8111_p5 }
   0xe   : > { %p7948_p12 = por %p7947_p11, %p7946_p10 }
   0xf   : > { %p7941_p8 = pnand %p7939_p7, %p7929_p6 }
  0x11   : > { %p7942_p9 = pneg %p7941_p8 }
  0x13   : > { %p7949_p13 = pnand %p7948_p12, %p7942_p9 }
  0x15   : > { %7952 = shalt.err (!%p7949_p13)
}
  0x16   : > { %7706 = dma.hbm_to_vmem [thread:$0]  (!%p8111_p5), %s9705_s2, 16, %s186_s20, [#allocation7]  }
  0x17   : > { %s7964_s9 = scalar_lea.vmem %s8107_s24, 9216  ;;  %p7972_p7 = scmp.lt.s32.totalorder %s8107_s24, %s8107_s24 }
  0x18   : > { %p7965_p0 = scmp.ne.s32.totalorder %s8107_s24, %s7964_s9  ;;  %p7973_p8 = scmp.lt.s32.totalorder %s7964_s9, %s7964_s9 }
  0x1a   : > { %p7967_p1 = pnand %p7965_p0, %p7929_p6  ;;  %p7974_p9 = por %p7973_p8, %p7972_p7 }
  0x1c   : > { %p7968_p4 = pneg %p7967_p1 }
  0x1e   : > { %p7975_p10 = pnand %p7974_p9, %p7968_p4 }
  0x20   : > { %7978 = shalt.err (!%p7975_p10)
}
  0x21   : > { %s8055_s10 = smov 64   ;;  %s8056_s11 = smov 4  }
  0x22   : > { %7703 = dma.hbm_to_vmem [thread:$0]  (!%p8111_p5), %s9704_s1, 9216, %s8107_s24, [#allocation5], %s8055_s10, %s8055_s10, %s8056_s11  }
  0x23   : > { %s7990_s14 = scalar_lea.vmem %s8115_s27, 9216  ;;  %p7998_p0 = scmp.lt.s32.totalorder %s8115_s27, %s8115_s27 }
  0x24   : > { %p7991_p11 = scmp.ne.s32.totalorder %s8115_s27, %s7990_s14  ;;  %p7999_p1 = scmp.lt.s32.totalorder %s7990_s14, %s7990_s14 }
  0x26   : > { %p7993_p12 = pnand %p7991_p11, %p7929_p6  ;;  %p8000_p4 = por %p7999_p1, %p7998_p0 }
  0x28   : > { %p7994_p13 = pneg %p7993_p12 }
  0x2a   : > { %p8001_p7 = pnand %p8000_p4, %p7994_p13 }
  0x2c   : > { %8004 = shalt.err (!%p8001_p7)
}
  0x2d   : > { %7709 = dma.hbm_to_vmem [thread:$0]  (!%p8111_p5), %s9706_s3, 9216, %s8115_s27, [#allocation7], %s8055_s10, %s8055_s10, %s8056_s11  }
  0x2e   : > { %s8016_s17 = scalar_lea.vmem %s210_s29, 16  ;;  %s8023_s19 = scalar_lea.vmem %s210_s29, 32 }
  0x2f   : > { %p8017_p8 = scmp.ne.s32.totalorder %s210_s29, %s8016_s17  ;;  %p8024_p11 = scmp.lt.s32.totalorder %s210_s29, %s210_s29 }
  0x30   : > { %p8025_p12 = scmp.lt.s32.totalorder %s8023_s19, %s8016_s17 }
  0x31   : > { %p8019_p9 = pnand %p8017_p8, %p7929_p6 }
  0x32   : > { %p8026_p13 = por %p8025_p12, %p8024_p11 }
  0x33   : > { %p8020_p10 = pneg %p8019_p9 }
  0x35   : > { %p8027_p0 = pnand %p8026_p13, %p8020_p10 }
  0x37   : > { %8030 = shalt.err (!%p8027_p0)
}
  0x38   : > { %7712 = dma.hbm_to_vmem [thread:$0]  (!%p8111_p5), %s9707_s4, 16, %s210_s29, [#allocation10]  }
  0x39   : > { %230 = sbr.rel (%p8101_p3) target bundleno = 1324 (0x52c), region = 40 }
  0x3e   : > { %8036 = dma.done.wait (%p7713_p2), [#allocation5], 9216  }
  0x3f   : > { %8038 = vsyncadd (%p7713_p2), [#allocation5], 4294958080 }
  0x40   : > { %8040 = dma.done.wait (%p7713_p2), [#allocation7], 9232  }
  0x41   : > { %8042 = vsyncadd (%p7713_p2), [#allocation7], 4294958064 }
  0x42   : > { %8044 = dma.done.wait (%p7713_p2), [#allocation10], 16  }
  0x43   : > { %8046 = vsyncadd (%p7713_p2), [#allocation10], 4294967280  ;;  %v8057_v0 = vmov 0.0   ;;  %v8058_v1 = vmov 0   ;;  %vm8059_vm0 = vmmov 0   ;;  %v7738_v2 = vld [vmem:[#allocation4 + $0x38] sm:$0xff]  }
  0x44   : > { %6604 = vmatprep.subr.bf16.mxu0 %v8057_v0  ;;  %6664 = vmatprep.subr.bf16.mxu1 %v8057_v0  ;;  %281 = vst [vmem:[#allocation2] sm:$0xf] %v8058_v1  ;;  %282 = vst [vmem:[#allocation2 + $0x4] sm:$0xf] %v8058_v1  ;;  %v7739_v3 = vld [vmem:[#allocation4 + $0x78] sm:$0xff]   ;;  %v7740_v4 = vld [vmem:[#allocation4 + $0x30] sm:$0xff]  }
  0x45   : > { %284 = vst [vmem:[#allocation2 + $0x48] sm:$0xf] %v8058_v1  ;;  %285 = vst [vmem:[#allocation2 + $0x4c] sm:$0xf] %v8058_v1  ;;  %6620 = vmatprep.mubr.msk.bf16.mxu0 %vm8059_vm0, %v8057_v0  ;;  %6680 = vmatprep.mubr.msk.bf16.mxu1 %vm8059_vm0, %v8057_v0  ;;  %v7741_v5 = vld [vmem:[#allocation4 + $0x70] sm:$0xff]   ;;  %p270_p2 = scmp.lt.s32.totalorder %s8096_s21, 1 }
  0x46   : > { %286 = vst [vmem:[#allocation2 + $0x50] sm:$0xf] %v8058_v1  ;;  %287 = vst [vmem:[#allocation2 + $0x54] sm:$0xf] %v8058_v1  ;;  %6605 = vmatpush3.bf16.msra.mxu0 %v7738_v2  ;;  %6665 = vmatpush3.bf16.msra.mxu1 %v7739_v3  ;;  %v7742_v6 = vld [vmem:[#allocation4 + $0x28] sm:$0xff]   ;;  %v7744_v8 = vld [vmem:[#allocation4 + $0x20] sm:$0xff]  }
  0x47   : > { %289 = vst [vmem:[#allocation2 + $0x8] sm:$0x1] %v8058_v1  ;;  %290 = vst [vmem:[#allocation2 + $0x10] sm:$0x1] %v8058_v1  ;;  %6606 = vmatprep.subr.bf16.mxu0 %v8057_v0  ;;  %6666 = vmatprep.subr.bf16.mxu1 %v8057_v0  ;;  %v7743_v7 = vld [vmem:[#allocation4 + $0x68] sm:$0xff]   ;;  %s9714_s21 = smov (!%p270_p2, %s8096_s21), 1 }
  0x48   : > { %291 = vst [vmem:[#allocation2 + $0x18] sm:$0x1] %v8058_v1  ;;  %292 = vst [vmem:[#allocation2 + $0x20] sm:$0x1] %v8058_v1  ;;  %v7745_v9 = vld [vmem:[#allocation4 + $0x60] sm:$0xff]   ;;  %s6210_s22 = sshll.u32 %s9714_s21, 5 }
  0x49   : > { %293 = vst [vmem:[#allocation2 + $0x28] sm:$0x1] %v8058_v1  ;;  %294 = vst [vmem:[#allocation2 + $0x30] sm:$0x1] %v8058_v1  ;;  %vm297_vm1 = vcmask 1041409   ;;  %v7746_v10 = vld [vmem:[#allocation4 + $0x18] sm:$0xff]   ;;  %s8201_s26 = scalar_lea.vmem %s9703_s0, %s6210_s22  ;;  %s9665_s29 = scalar_lea.vmem %s9708_s5, %s6210_s22 }
  0x4a   : > { %295 = vst [vmem:[#allocation2 + $0x38] sm:$0x1] %v8058_v1  ;;  %296 = vst [vmem:[#allocation2 + $0x40] sm:$0x1] %v8058_v1  ;;  %6607 = vmatpush3.bf16.msra.mxu0 %v7740_v4  ;;  %6667 = vmatpush3.bf16.msra.mxu1 %v7741_v5  ;;  %vm298_vm2 = vsmask.f32 1280 }
  0x4b   : > { %6608 = vmatprep.subr.bf16.mxu0 %v8057_v0  ;;  %6668 = vmatprep.subr.bf16.mxu1 %v8057_v0  ;;  %v7747_v11 = vld [vmem:[#allocation4 + $0x58] sm:$0xff]   ;;  %vm8204_vm3 = vmand %vm297_vm1, %vm298_vm2  ;;  %v7748_v13 = vld [vmem:[#allocation4 + $0x10] sm:$0xff]   ;;  %vm887_vm4 = vcmask 1045504   ;;  %vm1183_vm5 = vcmask 1044480   ;;  %vm1479_vm6 = vcmask 1046528  }
  0x4c   : > { %v300_v14 = vld [vmem:[#allocation2 + $0xc] sm:$0x2]  ;;  %v324_v15 = vld [vmem:[%s8201_s26] sm:$0xf]  ;;  %v303_v20 = vld [vmem:[#allocation2 + $0x14] sm:$0x2] }
  0x4d   : > { %v7749_v16 = vld [vmem:[#allocation4 + $0x50] sm:$0xff]   ;;  %v301_v17 = vsel %vm8204_vm3, 0, %v300_v14  ;;  %v340_v18 = vrot.slane %v324_v15, 7  ;;  %v7750_v19 = vld [vmem:[#allocation4 + $0x8] sm:$0xff]   ;;  %v304_v24 = vsel %vm8204_vm3, 0, %v303_v20  ;;  %v7752_v35 = vld [vmem:[#allocation4] sm:$0xff]  }
  0x4e   : > { %6609 = vmatpush3.bf16.msra.mxu0 %v7742_v6  ;;  %6669 = vmatpush3.bf16.msra.mxu1 %v7743_v7  ;;  %302 = vst [vmem:[#allocation2 + $0xc] sm:$0x2] %v301_v17  ;;  %v325_v21 = vld [vmem:[%s8201_s26 + $0x4] sm:$0xf]  ;;  %305 = vst [vmem:[#allocation2 + $0x14] sm:$0x2] %v304_v24 }
  0x4f   : > { %6610 = vmatprep.subr.bf16.mxu0 %v8057_v0  ;;  %6670 = vmatprep.subr.bf16.mxu1 %v8057_v0  ;;  %v7751_v22 = vld [vmem:[#allocation4 + $0x48] sm:$0xff]   ;;  %v341_v23 = vrot.slane %v340_v18, 4  ;;  %372 = vst [vmem:[#allocation2 + $0x8] sm:$0xe] %v340_v18  ;;  %v342_v25 = vrot.slane %v325_v21, 7  ;;  %v7753_v39 = vld [vmem:[#allocation4 + $0x40] sm:$0xff]  }
  0x50   : > { %v306_v26 = vld [vmem:[#allocation2 + $0x1c] sm:$0x2]  ;;  %v326_v27 = vld [vmem:[%s8201_s26 + $0x8] sm:$0xf]  ;;  %v309_v28 = vld [vmem:[#allocation2 + $0x24] sm:$0x2] }
  0x51   : > { %373 = vst [vmem:[#allocation2 + $0xc] sm:$0x1] %v341_v23  ;;  %v343_v29 = vrot.slane %v342_v25, 4  ;;  %374 = vst [vmem:[#allocation2 + $0x10] sm:$0xe] %v342_v25  ;;  %v307_v30 = vsel %vm8204_vm3, 0, %v306_v26 }
  0x52   : > { %6611 = vmatpush3.bf16.msra.mxu0 %v7744_v8  ;;  %6671 = vmatpush3.bf16.msra.mxu1 %v7745_v9  ;;  %v344_v31 = vrot.slane %v326_v27, 7  ;;  %v310_v32 = vsel %vm8204_vm3, 0, %v309_v28  ;;  %v327_v33 = vld [vmem:[%s8201_s26 + $0xc] sm:$0xf]  ;;  %308 = vst [vmem:[#allocation2 + $0x1c] sm:$0x2] %v307_v30 }
  0x53   : > { %6612 = vmatprep.subr.bf16.mxu0 %v8057_v0  ;;  %6672 = vmatprep.subr.bf16.mxu1 %v8057_v0  ;;  %311 = vst [vmem:[#allocation2 + $0x24] sm:$0x2] %v310_v32  ;;  %v346_v34 = vrot.slane %v327_v33, 7  ;;  %375 = vst [vmem:[#allocation2 + $0x14] sm:$0x1] %v343_v29  ;;  %v8230_v45 = vld [vmem:[#allocation2] sm:$0xff]  }
  0x54   : > { %v345_v36 = vrot.slane %v344_v31, 4  ;;  %376 = vst [vmem:[#allocation2 + $0x18] sm:$0xe] %v344_v31  ;;  %v312_v37 = vld [vmem:[#allocation2 + $0x2c] sm:$0x2]  ;;  %v7755_v51 = vld [vmem:[#allocation4 + $0xb8] sm:$0xff]  }
  0x55   : > { %v328_v38 = vld [vmem:[%s8201_s26 + $0x10] sm:$0xf]  ;;  %v347_v40 = vrot.slane %v346_v34, 4  ;;  %378 = vst [vmem:[#allocation2 + $0x20] sm:$0xe] %v346_v34  ;;  %v313_v41 = vsel %vm8204_vm3, 0, %v312_v37 }
  0x56   : > { %6613 = vmatpush3.bf16.msra.mxu0 %v7746_v10  ;;  %6673 = vmatpush3.bf16.msra.mxu1 %v7747_v11  ;;  %v348_v42 = vrot.slane %v328_v38, 7  ;;  %377 = vst [vmem:[#allocation2 + $0x1c] sm:$0x1] %v345_v36  ;;  %314 = vst [vmem:[#allocation2 + $0x2c] sm:$0x2] %v313_v41  ;;  %v7768_v55 = vld [vmem:[#allocation4 + $0xf8] sm:$0xff]  }
  0x57   : > { %6614 = vmatprep.subr.bf16.mxu0 %v8057_v0  ;;  %6674 = vmatprep.subr.bf16.mxu1 %v8057_v0  ;;  %v315_v43 = vld [vmem:[#allocation2 + $0x34] sm:$0x2]  ;;  %379 = vst [vmem:[#allocation2 + $0x24] sm:$0x1] %v347_v40  ;;  %v318_v49 = vld [vmem:[#allocation2 + $0x3c] sm:$0x2] }
  0x58   : > { %v329_v44 = vld [vmem:[%s8201_s26 + $0x14] sm:$0xf]  ;;  %v349_v46 = vrot.slane %v348_v42, 4  ;;  %380 = vst [vmem:[#allocation2 + $0x28] sm:$0xe] %v348_v42  ;;  %v316_v47 = vsel %vm8204_vm3, 0, %v315_v43 }
  0x59   : > { %v350_v48 = vrot.slane %v329_v44, 7  ;;  %317 = vst [vmem:[#allocation2 + $0x34] sm:$0x2] %v316_v47  ;;  %v330_v50 = vld [vmem:[%s8201_s26 + $0x18] sm:$0xf]  ;;  %v319_v53 = vsel %vm8204_vm3, 0, %v318_v49 }
  0x5a   : > { %6615 = vmatpush3.bf16.msra.mxu0 %v7748_v13  ;;  %6675 = vmatpush3.bf16.msra.mxu1 %v7749_v16  ;;  %381 = vst [vmem:[#allocation2 + $0x2c] sm:$0x1] %v349_v46  ;;  %v352_v54 = vrot.slane %v330_v50, 7  ;;  %320 = vst [vmem:[#allocation2 + $0x3c] sm:$0x2] %v319_v53  ;;  %v7757_v57 = vld [vmem:[#allocation4 + $0xb0] sm:$0xff]  }
  0x5b   : > { %6616 = vmatprep.subr.bf16.mxu0 %v8057_v0  ;;  %6676 = vmatprep.subr.bf16.mxu1 %v8057_v0  ;;  %v351_v52 = vrot.slane %v350_v48, 4  ;;  %382 = vst [vmem:[#allocation2 + $0x30] sm:$0xe] %v350_v48  ;;  %v7769_v58 = vld [vmem:[#allocation4 + $0xf0] sm:$0xff]   ;;  %v321_v59 = vld [vmem:[#allocation2 + $0x44] sm:$0x2] }
  0x5c   : > { %v353_v56 = vrot.slane %v352_v54, 4  ;;  %384 = vst [vmem:[#allocation2 + $0x38] sm:$0xe] %v352_v54  ;;  %v331_v60 = vld [vmem:[%s8201_s26 + $0x1c] sm:$0xf]  ;;  %v8247_v61 = vld [vmem:[#allocation2 + $0x8] sm:$0xff]  }
  0x5d   : > { %383 = vst [vmem:[#allocation2 + $0x34] sm:$0x1] %v351_v52  ;;  %v322_v62 = vsel %vm8204_vm3, 0, %v321_v59  ;;  %v354_v63 = vrot.slane %v331_v60, 7  ;;  %v7759_v1 = vld [vmem:[#allocation4 + $0xa8] sm:$0xff]   ;;  %v7762_v4 = vld [vmem:[#allocation4 + $0xa0] sm:$0xff]  }
  0x5e   : > { %6617 = vmatpush3.bf16.msra.mxu0 %v7750_v19  ;;  %6677 = vmatpush3.bf16.msra.mxu1 %v7751_v22  ;;  %385 = vst [vmem:[#allocation2 + $0x3c] sm:$0x1] %v353_v56  ;;  %323 = vst [vmem:[#allocation2 + $0x44] sm:$0x2] %v322_v62  ;;  %v7772_v3 = vld [vmem:[#allocation4 + $0xe8] sm:$0xff]   ;;  %v7773_v5 = vld [vmem:[#allocation4 + $0xe0] sm:$0xff]  }
  0x5f   : > { %6618 = vmatprep.subr.bf16.mxu0 %v8057_v0  ;;  %6678 = vmatprep.subr.bf16.mxu1 %v8057_v0  ;;  %v355_v2 = vrot.slane %v354_v63, 4  ;;  %386 = vst [vmem:[#allocation2 + $0x40] sm:$0xe] %v354_v63  ;;  %v8261_v6 = vld [vmem:[#allocation2 + $0x10] sm:$0xff]   ;;  %v7767_v9 = vld [vmem:[#allocation4 + $0x90] sm:$0xff]   ;;  %v8273_v11 = vld [vmem:[#allocation2 + $0x18] sm:$0xff]  }
  0x60   : > { %v7764_v7 = vld [vmem:[#allocation4 + $0x98] sm:$0xff]   ;;  %v7777_v10 = vld [vmem:[#allocation4 + $0xd0] sm:$0xff]   ;;  %v7771_v12 = vld [vmem:[#allocation4 + $0x88] sm:$0xff]  }
  0x61   : > { %387 = vst [vmem:[#allocation2 + $0x44] sm:$0x1] %v355_v2  ;;  %v7775_v8 = vld [vmem:[#allocation4 + $0xd8] sm:$0xff]   ;;  %v7779_v13 = vld [vmem:[#allocation4 + $0xc8] sm:$0xff]   ;;  %v7776_v15 = vld [vmem:[#allocation4 + $0x80] sm:$0xff]  }
  0x62   : > { %6619 = vmatpush3.bf16.msra.mxu0 %v7752_v35  ;;  %6679 = vmatpush3.bf16.msra.mxu1 %v7753_v39  ;;  %v8282_v14 = vld [vmem:[#allocation2 + $0x20] sm:$0xff]   ;;  %v7780_v16 = vld [vmem:[#allocation4 + $0xc0] sm:$0xff]   ;;  %v8294_v17 = vld [vmem:[#allocation2 + $0x28] sm:$0xff]  }
  0x63   : > { %6724 = vmatprep.subr.bf16.mxu0 %v8057_v0  ;;  %6784 = vmatprep.subr.bf16.mxu1 %v8057_v0  ;;  %v8326_v21 = vld [vmem:[#allocation2 + $0x48] sm:$0xff]   ;;  %v8336_v22 = vld [vmem:[#allocation2 + $0x50] sm:$0xff]   ;;  %v7783_v27 = vld [vmem:[#allocation4 + $0x128] sm:$0xff]  }
  0x64   : > { %v8302_v18 = vld [vmem:[#allocation2 + $0x30] sm:$0xff]   ;;  %v7782_v25 = vld [vmem:[#allocation4 + $0x130] sm:$0xff]   ;;  %v7790_v28 = vld [vmem:[#allocation4 + $0x168] sm:$0xff]  }
  0x65   : > { %6621 = vmatmul.mubr.bf16.vlgmr.msra.gmra.mxu0 %v8230_v45  ;;  %6681 = vmatmul.mubr.bf16.vlgmr.msra.gmra.mxu1 %v8230_v45  ;;  %v8310_v19 = vld [vmem:[#allocation2 + $0x38] sm:$0xff]   ;;  %v7781_v23 = vld [vmem:[#allocation4 + $0x138] sm:$0xff]   ;;  %v7789_v26 = vld [vmem:[#allocation4 + $0x170] sm:$0xff]  }
  0x66   : > { %6725 = vmatpush3.bf16.msra.mxu0 %v7755_v51  ;;  %6624 = vmatprep.mubr.msk.bf16.mxu0 %vm8059_vm0, %v8057_v0  ;;  %v7788_v24 = vld [vmem:[#allocation4 + $0x178] sm:$0xff]   ;;  %v7784_v29 = vld [vmem:[#allocation4 + $0x120] sm:$0xff]   ;;  %v7786_v33 = vld [vmem:[#allocation4 + $0x110] sm:$0xff]  }
  0x67   : > { %6684 = vmatprep.mubr.msk.bf16.mxu1 %vm8059_vm0, %v8057_v0  ;;  %6726 = vmatprep.subr.bf16.mxu0 %v8057_v0  ;;  %v7792_v30 = vld [vmem:[#allocation4 + $0x160] sm:$0xff]   ;;  %v7785_v31 = vld [vmem:[#allocation4 + $0x118] sm:$0xff]   ;;  %v7794_v34 = vld [vmem:[#allocation4 + $0x150] sm:$0xff]  }
  0x68   : > { %6785 = vmatpush3.bf16.msra.mxu1 %v7768_v55  ;;  %v8318_v20 = vld [vmem:[#allocation2 + $0x40] sm:$0xff]   ;;  %v7793_v32 = vld [vmem:[#allocation4 + $0x158] sm:$0xff]   ;;  %v7791_v37 = vld [vmem:[#allocation4 + $0x100] sm:$0xff]  }
  0x69   : > { %6786 = vmatprep.subr.bf16.mxu1 %v8057_v0  ;;  %v7787_v35 = vld [vmem:[#allocation4 + $0x108] sm:$0xff]   ;;  %v7797_v38 = vld [vmem:[#allocation4 + $0x140] sm:$0xff]   ;;  %v7795_v39 = vld [vmem:[#allocation4 + $0x1b8] sm:$0xff]  }
  0x6a   : > { %6727 = vmatpush3.bf16.msra.mxu0 %v7757_v57  ;;  %v7796_v36 = vld [vmem:[#allocation4 + $0x148] sm:$0xff]   ;;  %v7804_v40 = vld [vmem:[#allocation4 + $0x1f8] sm:$0xff]   ;;  %v7798_v41 = vld [vmem:[#allocation4 + $0x1b0] sm:$0xff]  }
  0x6b   : > { %6728 = vmatprep.subr.bf16.mxu0 %v8057_v0  ;;  %v7805_v42 = vld [vmem:[#allocation4 + $0x1f0] sm:$0xff]   ;;  %v7799_v43 = vld [vmem:[#allocation4 + $0x1a8] sm:$0xff]   ;;  %v7808_v46 = vld [vmem:[#allocation4 + $0x1e0] sm:$0xff]  }
  0x6c   : > { %6787 = vmatpush3.bf16.msra.mxu1 %v7769_v58  ;;  %v7806_v44 = vld [vmem:[#allocation4 + $0x1e8] sm:$0xff]   ;;  %v7801_v47 = vld [vmem:[#allocation4 + $0x198] sm:$0xff]   ;;  %v7802_v51 = vld [vmem:[#allocation4 + $0x190] sm:$0xff]  }
  0x6d   : > { %6625 = vmatmul.mubr.bf16.gmra.mxu0 %v8247_v61  ;;  %6788 = vmatprep.subr.bf16.mxu1 %v8057_v0  ;;  %v7809_v48 = vld [vmem:[#allocation4 + $0x1d8] sm:$0xff]   ;;  %v7810_v54 = vld [vmem:[#allocation4 + $0x1d0] sm:$0xff]   ;;  %v7803_v58 = vld [vmem:[#allocation4 + $0x188] sm:$0xff]  }
  0x6e   : > { %6685 = vmatmul.mubr.bf16.gmra.mxu1 %v8247_v61  ;;  %6628 = vmatprep.mubr.msk.bf16.mxu0 %vm8059_vm0, %v8057_v0  ;;  %v7812_v62 = vld [vmem:[#allocation4 + $0x1c8] sm:$0xff]  }
  0x6f   : > { %6688 = vmatprep.mubr.msk.bf16.mxu1 %vm8059_vm0, %v8057_v0  ;;  %6729 = vmatpush3.bf16.msra.mxu0 %v7759_v1 }
  0x70   : > { %6730 = vmatprep.subr.bf16.mxu0 %v8057_v0  ;;  %6789 = vmatpush3.bf16.msra.mxu1 %v7772_v3  ;;  %v7807_v3 = vld [vmem:[#allocation4 + $0x180] sm:$0xff]  }
  0x71   : > { %6790 = vmatprep.subr.bf16.mxu1 %v8057_v0 }
  0x73   : > { %6731 = vmatpush3.bf16.msra.mxu0 %v7762_v4 }
  0x74   : > { %6732 = vmatprep.subr.bf16.mxu0 %v8057_v0  ;;  %6791 = vmatpush3.bf16.msra.mxu1 %v7773_v5 }
  0x75   : > { %6629 = vmatmul.mubr.bf16.gmra.mxu0 %v8261_v6  ;;  %6792 = vmatprep.subr.bf16.mxu1 %v8057_v0 }
  0x76   : > { %6689 = vmatmul.mubr.bf16.gmra.mxu1 %v8261_v6  ;;  %6632 = vmatprep.mubr.msk.bf16.mxu0 %vm8059_vm0, %v8057_v0 }
  0x77   : > { %6692 = vmatprep.mubr.msk.bf16.mxu1 %vm8059_vm0, %v8057_v0  ;;  %6733 = vmatpush3.bf16.msra.mxu0 %v7764_v7  ;;  %v7813_v7 = vld [vmem:[#allocation4 + $0x1c0] sm:$0xff]  }
  0x78   : > { %6734 = vmatprep.subr.bf16.mxu0 %v8057_v0  ;;  %6793 = vmatpush3.bf16.msra.mxu1 %v7775_v8 }
  0x79   : > { %6794 = vmatprep.subr.bf16.mxu1 %v8057_v0 }
  0x7b   : > { %6735 = vmatpush3.bf16.msra.mxu0 %v7767_v9 }
  0x7c   : > { %6736 = vmatprep.subr.bf16.mxu0 %v8057_v0  ;;  %6795 = vmatpush3.bf16.msra.mxu1 %v7777_v10 }
  0x7d   : > { %6633 = vmatmul.mubr.bf16.gmra.mxu0 %v8273_v11  ;;  %6796 = vmatprep.subr.bf16.mxu1 %v8057_v0 }
  0x7e   : > { %6693 = vmatmul.mubr.bf16.gmra.mxu1 %v8273_v11  ;;  %6636 = vmatprep.mubr.msk.bf16.mxu0 %vm8059_vm0, %v8057_v0 }
  0x7f   : > { %6696 = vmatprep.mubr.msk.bf16.mxu1 %vm8059_vm0, %v8057_v0  ;;  %6737 = vmatpush3.bf16.msra.mxu0 %v7771_v12 }
  0x80   : > { %6738 = vmatprep.subr.bf16.mxu0 %v8057_v0  ;;  %6797 = vmatpush3.bf16.msra.mxu1 %v7779_v13 }
  0x81   : > { %6798 = vmatprep.subr.bf16.mxu1 %v8057_v0 }
  0x83   : > { %6739 = vmatpush3.bf16.msra.mxu0 %v7776_v15 }
  0x84   : > { %6799 = vmatpush3.bf16.msra.mxu1 %v7780_v16  ;;  %6844 = vmatprep.subr.bf16.mxu0 %v8057_v0 }
  0x85   : > { %6637 = vmatmul.mubr.bf16.gmra.mxu0 %v8282_v14  ;;  %6904 = vmatprep.subr.bf16.mxu1 %v8057_v0 }
  0x86   : > { %6697 = vmatmul.mubr.bf16.gmra.mxu1 %v8282_v14  ;;  %6640 = vmatprep.mubr.msk.bf16.mxu0 %vm8059_vm0, %v8057_v0 }
  0x87   : > { %6700 = vmatprep.mubr.msk.bf16.mxu1 %vm8059_vm0, %v8057_v0 }
  0x8d   : > { %6641 = vmatmul.mubr.bf16.gmra.mxu0 %v8294_v17 }
  0x8e   : > { %6701 = vmatmul.mubr.bf16.gmra.mxu1 %v8294_v17  ;;  %6644 = vmatprep.mubr.msk.bf16.mxu0 %vm8059_vm0, %v8057_v0 }
  0x8f   : > { %6704 = vmatprep.mubr.msk.bf16.mxu1 %vm8059_vm0, %v8057_v0 }
  0x95   : > { %6645 = vmatmul.mubr.bf16.gmra.mxu0 %v8302_v18 }
  0x96   : > { %6705 = vmatmul.mubr.bf16.gmra.mxu1 %v8302_v18  ;;  %6648 = vmatprep.mubr.msk.bf16.mxu0 %vm8059_vm0, %v8057_v0 }
  0x97   : > { %6708 = vmatprep.mubr.msk.bf16.mxu1 %vm8059_vm0, %v8057_v0 }
  0x9d   : > { %6649 = vmatmul.mubr.bf16.gmra.mxu0 %v8310_v19 }
  0x9e   : > { %6709 = vmatmul.mubr.bf16.gmra.mxu1 %v8310_v19  ;;  %6652 = vmatprep.mubr.msk.bf16.mxu0 %vm8059_vm0, %v8057_v0 }
  0x9f   : > { %6712 = vmatprep.mubr.msk.bf16.mxu1 %vm8059_vm0, %v8057_v0 }
  0xa5   : > { %6653 = vmatmul.mubr.bf16.gmra.mxu0 %v8318_v20 }
  0xa6   : > { %6713 = vmatmul.mubr.bf16.gmra.mxu1 %v8318_v20  ;;  %6656 = vmatprep.mubr.msk.bf16.mxu0 %vm8059_vm0, %v8057_v0 }
  0xa7   : > { %6716 = vmatprep.mubr.msk.bf16.mxu1 %vm8059_vm0, %v8057_v0 }
  0xad   : > { %6657 = vmatmul.mubr.bf16.gmra.mxu0 %v8326_v21 }
  0xae   : > { %6717 = vmatmul.mubr.bf16.gmra.mxu1 %v8326_v21  ;;  %6660 = vmatprep.mubr.msk.bf16.mxu0 %vm8059_vm0, %v8057_v0 }
  0xaf   : > { %6720 = vmatprep.mubr.msk.bf16.mxu1 %vm8059_vm0, %v8057_v0 }
  0xb5   : > { %6661 = vmatmul.mubr.bf16.gmra.mxu0 %v8336_v22 }
  0xb6   : > { %6721 = vmatmul.mubr.bf16.gmra.mxu1 %v8336_v22  ;;  %6740 = vmatprep.mubr.msk.bf16.mxu0 %vm8059_vm0, %v8057_v0 }
  0xb7   : > { %6800 = vmatprep.mubr.msk.bf16.mxu1 %vm8059_vm0, %v8057_v0 }
  0xbd   : > { %6741 = vmatmul.mubr.bf16.vlgmr.msra.gmra.mxu0 %v8230_v45 }
  0xbe   : > { %6845 = vmatpush3.bf16.msra.mxu0 %v7781_v23  ;;  %6801 = vmatmul.mubr.bf16.vlgmr.msra.gmra.mxu1 %v8230_v45 }
  0xbf   : > { %6744 = vmatprep.mubr.msk.bf16.mxu0 %vm8059_vm0, %v8057_v0  ;;  %6804 = vmatprep.mubr.msk.bf16.mxu1 %vm8059_vm0, %v8057_v0 }
  0xc0   : > { %6846 = vmatprep.subr.bf16.mxu0 %v8057_v0  ;;  %6905 = vmatpush3.bf16.msra.mxu1 %v7788_v24 }
  0xc1   : > { %6906 = vmatprep.subr.bf16.mxu1 %v8057_v0 }
  0xc2   : > { %6847 = vmatpush3.bf16.msra.mxu0 %v7782_v25 }
  0xc3   : > { %6848 = vmatprep.subr.bf16.mxu0 %v8057_v0 }
  0xc4   : > { %6907 = vmatpush3.bf16.msra.mxu1 %v7789_v26 }
  0xc5   : > { %6745 = vmatmul.mubr.bf16.gmra.mxu0 %v8247_v61  ;;  %6908 = vmatprep.subr.bf16.mxu1 %v8057_v0 }
  0xc6   : > { %6805 = vmatmul.mubr.bf16.gmra.mxu1 %v8247_v61  ;;  %6748 = vmatprep.mubr.msk.bf16.mxu0 %vm8059_vm0, %v8057_v0 }
  0xc7   : > { %6808 = vmatprep.mubr.msk.bf16.mxu1 %vm8059_vm0, %v8057_v0  ;;  %6849 = vmatpush3.bf16.msra.mxu0 %v7783_v27 }
  0xc8   : > { %6850 = vmatprep.subr.bf16.mxu0 %v8057_v0  ;;  %6909 = vmatpush3.bf16.msra.mxu1 %v7790_v28 }
  0xc9   : > { %6910 = vmatprep.subr.bf16.mxu1 %v8057_v0 }
  0xcb   : > { %6851 = vmatpush3.bf16.msra.mxu0 %v7784_v29 }
  0xcc   : > { %6852 = vmatprep.subr.bf16.mxu0 %v8057_v0  ;;  %6911 = vmatpush3.bf16.msra.mxu1 %v7792_v30 }
  0xcd   : > { %6749 = vmatmul.mubr.bf16.gmra.mxu0 %v8261_v6  ;;  %6912 = vmatprep.subr.bf16.mxu1 %v8057_v0 }
  0xce   : > { %6809 = vmatmul.mubr.bf16.gmra.mxu1 %v8261_v6  ;;  %6752 = vmatprep.mubr.msk.bf16.mxu0 %vm8059_vm0, %v8057_v0 }
  0xcf   : > { %6812 = vmatprep.mubr.msk.bf16.mxu1 %vm8059_vm0, %v8057_v0  ;;  %6853 = vmatpush3.bf16.msra.mxu0 %v7785_v31 }
  0xd0   : > { %6854 = vmatprep.subr.bf16.mxu0 %v8057_v0  ;;  %6913 = vmatpush3.bf16.msra.mxu1 %v7793_v32 }
  0xd1   : > { %6914 = vmatprep.subr.bf16.mxu1 %v8057_v0 }
  0xd3   : > { %6855 = vmatpush3.bf16.msra.mxu0 %v7786_v33 }
  0xd4   : > { %6856 = vmatprep.subr.bf16.mxu0 %v8057_v0  ;;  %6915 = vmatpush3.bf16.msra.mxu1 %v7794_v34 }
  0xd5   : > { %6753 = vmatmul.mubr.bf16.gmra.mxu0 %v8273_v11  ;;  %6916 = vmatprep.subr.bf16.mxu1 %v8057_v0 }
  0xd6   : > { %6813 = vmatmul.mubr.bf16.gmra.mxu1 %v8273_v11  ;;  %6756 = vmatprep.mubr.msk.bf16.mxu0 %vm8059_vm0, %v8057_v0 }
  0xd7   : > { %6816 = vmatprep.mubr.msk.bf16.mxu1 %vm8059_vm0, %v8057_v0  ;;  %6857 = vmatpush3.bf16.msra.mxu0 %v7787_v35 }
  0xd8   : > { %6858 = vmatprep.subr.bf16.mxu0 %v8057_v0  ;;  %6917 = vmatpush3.bf16.msra.mxu1 %v7796_v36 }
  0xd9   : > { %6918 = vmatprep.subr.bf16.mxu1 %v8057_v0 }
  0xdb   : > { %6859 = vmatpush3.bf16.msra.mxu0 %v7791_v37 }
  0xdc   : > { %6964 = vmatprep.subr.bf16.mxu0 %v8057_v0  ;;  %6919 = vmatpush3.bf16.msra.mxu1 %v7797_v38 }
  0xdd   : > { %6757 = vmatmul.mubr.bf16.gmra.mxu0 %v8282_v14  ;;  %7024 = vmatprep.subr.bf16.mxu1 %v8057_v0 }
  0xde   : > { %6817 = vmatmul.mubr.bf16.gmra.mxu1 %v8282_v14  ;;  %6760 = vmatprep.mubr.msk.bf16.mxu0 %vm8059_vm0, %v8057_v0 }
  0xdf   : > { %6820 = vmatprep.mubr.msk.bf16.mxu1 %vm8059_vm0, %v8057_v0 }
  0xe5   : > { %6761 = vmatmul.mubr.bf16.gmra.mxu0 %v8294_v17 }
  0xe6   : > { %6821 = vmatmul.mubr.bf16.gmra.mxu1 %v8294_v17  ;;  %6764 = vmatprep.mubr.msk.bf16.mxu0 %vm8059_vm0, %v8057_v0 }
  0xe7   : > { %6824 = vmatprep.mubr.msk.bf16.mxu1 %vm8059_vm0, %v8057_v0 }
  0xed   : > { %6765 = vmatmul.mubr.bf16.gmra.mxu0 %v8302_v18 }
  0xee   : > { %6825 = vmatmul.mubr.bf16.gmra.mxu1 %v8302_v18  ;;  %6768 = vmatprep.mubr.msk.bf16.mxu0 %vm8059_vm0, %v8057_v0 }
  0xef   : > { %6828 = vmatprep.mubr.msk.bf16.mxu1 %vm8059_vm0, %v8057_v0 }
  0xf5   : > { %6769 = vmatmul.mubr.bf16.gmra.mxu0 %v8310_v19 }
  0xf6   : > { %6829 = vmatmul.mubr.bf16.gmra.mxu1 %v8310_v19  ;;  %6772 = vmatprep.mubr.msk.bf16.mxu0 %vm8059_vm0, %v8057_v0 }
  0xf7   : > { %6832 = vmatprep.mubr.msk.bf16.mxu1 %vm8059_vm0, %v8057_v0 }
  0xfd   : > { %6773 = vmatmul.mubr.bf16.gmra.mxu0 %v8318_v20 }
  0xfe   : > { %6833 = vmatmul.mubr.bf16.gmra.mxu1 %v8318_v20  ;;  %6776 = vmatprep.mubr.msk.bf16.mxu0 %vm8059_vm0, %v8057_v0 }
  0xff   : > { %6836 = vmatprep.mubr.msk.bf16.mxu1 %vm8059_vm0, %v8057_v0 }
 0x105   : > { %6777 = vmatmul.mubr.bf16.gmra.mxu0 %v8326_v21 }
 0x106   : > { %6837 = vmatmul.mubr.bf16.gmra.mxu1 %v8326_v21  ;;  %6780 = vmatprep.mubr.msk.bf16.mxu0 %vm8059_vm0, %v8057_v0 }
 0x107   : > { %6840 = vmatprep.mubr.msk.bf16.mxu1 %vm8059_vm0, %v8057_v0 }
 0x10d   : > { %6781 = vmatmul.mubr.bf16.gmra.mxu0 %v8336_v22 }
 0x10e   : > { %6860 = vmatprep.mubr.msk.bf16.mxu0 %vm8059_vm0, %v8057_v0  ;;  %6841 = vmatmul.mubr.bf16.gmra.mxu1 %v8336_v22 }
 0x10f   : > { %6920 = vmatprep.mubr.msk.bf16.mxu1 %vm8059_vm0, %v8057_v0 }
 0x115   : > { %6861 = vmatmul.mubr.bf16.vlgmr.msra.gmra.mxu0 %v8230_v45 }
 0x116   : > { %6965 = vmatpush3.bf16.msra.mxu0 %v7795_v39  ;;  %6864 = vmatprep.mubr.msk.bf16.mxu0 %vm8059_vm0, %v8057_v0 }
 0x117   : > { %6921 = vmatmul.mubr.bf16.vlgmr.msra.gmra.mxu1 %v8230_v45  ;;  %6966 = vmatprep.subr.bf16.mxu0 %v8057_v0  ;;  %v7800_v45 = vld [vmem:[#allocation4 + $0x1a0] sm:$0xff]  }
 0x118   : > { %6924 = vmatprep.mubr.msk.bf16.mxu1 %vm8059_vm0, %v8057_v0  ;;  %7025 = vmatpush3.bf16.msra.mxu1 %v7804_v40 }
 0x119   : > { %7026 = vmatprep.subr.bf16.mxu1 %v8057_v0 }
 0x11a   : > { %6967 = vmatpush3.bf16.msra.mxu0 %v7798_v41 }
 0x11b   : > { %6968 = vmatprep.subr.bf16.mxu0 %v8057_v0 }
 0x11c   : > { %7027 = vmatpush3.bf16.msra.mxu1 %v7805_v42 }
 0x11d   : > { %6865 = vmatmul.mubr.bf16.gmra.mxu0 %v8247_v61  ;;  %7028 = vmatprep.subr.bf16.mxu1 %v8057_v0 }
 0x11e   : > { %6868 = vmatprep.mubr.msk.bf16.mxu0 %vm8059_vm0, %v8057_v0  ;;  %6969 = vmatpush3.bf16.msra.mxu0 %v7799_v43 }
 0x11f   : > { %6925 = vmatmul.mubr.bf16.gmra.mxu1 %v8247_v61  ;;  %6970 = vmatprep.subr.bf16.mxu0 %v8057_v0 }
 0x120   : > { %6928 = vmatprep.mubr.msk.bf16.mxu1 %vm8059_vm0, %v8057_v0  ;;  %7029 = vmatpush3.bf16.msra.mxu1 %v7806_v44 }
 0x121   : > { %7030 = vmatprep.subr.bf16.mxu1 %v8057_v0 }
 0x122   : > { %6971 = vmatpush3.bf16.msra.mxu0 %v7800_v45 }
 0x123   : > { %6972 = vmatprep.subr.bf16.mxu0 %v8057_v0 }
 0x124   : > { %7031 = vmatpush3.bf16.msra.mxu1 %v7808_v46 }
 0x125   : > { %v574_v49 = vpop.f32.mrf.mxu0  ;;  %6869 = vmatmul.mubr.bf16.gmra.mxu0 %v8261_v6  ;;  %7032 = vmatprep.subr.bf16.mxu1 %v8057_v0  ;;  %v772_v50 = vpop.f32.mrf.mxu1 }
 0x126   : > { %656 = vst [vmem:[#allocation3 - $0x1] sm:$0xfe] %v574_v49  ;;  %6872 = vmatprep.mubr.msk.bf16.mxu0 %vm8059_vm0, %v8057_v0  ;;  %6973 = vmatpush3.bf16.msra.mxu0 %v7801_v47  ;;  %v888_v55 = vrot.slane %v772_v50, 2 }
 0x127   : > { %v6622_v52 = vpop.f32.mrf.mxu0  ;;  %6929 = vmatmul.mubr.bf16.gmra.mxu1 %v8261_v6  ;;  %6974 = vmatprep.subr.bf16.mxu0 %v8057_v0  ;;  %v6682_v53 = vpop.f32.mrf.mxu1 }
 0x128   : > { %6932 = vmatprep.mubr.msk.bf16.mxu1 %vm8059_vm0, %v8057_v0  ;;  %7033 = vmatpush3.bf16.msra.mxu1 %v7809_v48 }
 0x129   : > { %v577_v56 = vpop.f32.mrf.mxu0  ;;  %7034 = vmatprep.subr.bf16.mxu1 %v8057_v0  ;;  %v775_v57 = vpop.f32.mrf.mxu1 }
 0x12a   : > { %657 = vst [vmem:[#allocation3 + $0x7] sm:$0xff] %v577_v56  ;;  %6975 = vmatpush3.bf16.msra.mxu0 %v7802_v51  ;;  %v889_v60 = vrot.slane %v775_v57, 2 }
 0x12b   : > { %v6623_v59 = vpop.f32.mrf.mxu0  ;;  %6976 = vmatprep.subr.bf16.mxu0 %v8057_v0  ;;  %v6683_v61 = vpop.f32.mrf.mxu1 }
 0x12c   : > { %7035 = vmatpush3.bf16.msra.mxu1 %v7810_v54  ;;  %v8456_v63 = vsel %vm887_vm4, %v888_v55, %v889_v60 }
 0x12d   : > { %v582_v1 = vpop.f32.mrf.mxu0  ;;  %6873 = vmatmul.mubr.bf16.gmra.mxu0 %v8273_v11  ;;  %7036 = vmatprep.subr.bf16.mxu1 %v8057_v0 }
 0x12e   : > { %658 = vst [vmem:[#allocation3 + $0xf] sm:$0xff] %v582_v1  ;;  %v780_v2 = vpop.f32.mrf.mxu1  ;;  %6876 = vmatprep.mubr.msk.bf16.mxu0 %vm8059_vm0, %v8057_v0  ;;  %6977 = vmatpush3.bf16.msra.mxu0 %v7803_v58 }
 0x12f   : > { %v6626_v4 = vpop.f32.mrf.mxu0  ;;  %v891_v5 = vrot.slane %v780_v2, 2  ;;  %6933 = vmatmul.mubr.bf16.gmra.mxu1 %v8273_v11  ;;  %6978 = vmatprep.subr.bf16.mxu0 %v8057_v0 }
 0x130   : > { %v6686_v6 = vpop.f32.mrf.mxu1  ;;  %6936 = vmatprep.mubr.msk.bf16.mxu1 %vm8059_vm0, %v8057_v0  ;;  %7037 = vmatpush3.bf16.msra.mxu1 %v7812_v62 }
 0x131   : > { %v8467_v8 = vsel %vm887_vm4, %v889_v60, %v891_v5  ;;  %v585_v9 = vpop.f32.mrf.mxu0  ;;  %7038 = vmatprep.subr.bf16.mxu1 %v8057_v0 }
 0x132   : > { %659 = vst [vmem:[#allocation3 + $0x17] sm:$0xff] %v585_v9  ;;  %v783_v10 = vpop.f32.mrf.mxu1  ;;  %6979 = vmatpush3.bf16.msra.mxu0 %v7807_v3 }
 0x133   : > { %v6627_v12 = vpop.f32.mrf.mxu0  ;;  %v893_v13 = vrot.slane %v783_v10, 2  ;;  %7084 = vmatprep.subr.bf16.mxu0 %v8057_v0 }
 0x134   : > { %v6687_v11 = vpop.f32.mrf.mxu1  ;;  %7039 = vmatpush3.bf16.msra.mxu1 %v7813_v7 }
 0x135   : > { %v8472_v15 = vsel %vm887_vm4, %v891_v5, %v893_v13  ;;  %v590_v16 = vpop.f32.mrf.mxu0  ;;  %6877 = vmatmul.mubr.bf16.gmra.mxu0 %v8282_v14  ;;  %7144 = vmatprep.subr.bf16.mxu1 %v8057_v0 }
 0x136   : > { %660 = vst [vmem:[#allocation3 + $0x1f] sm:$0xff] %v590_v16  ;;  %v788_v23 = vpop.f32.mrf.mxu1  ;;  %6880 = vmatprep.mubr.msk.bf16.mxu0 %vm8059_vm0, %v8057_v0 }
 0x137   : > { %v6630_v24 = vpop.f32.mrf.mxu0  ;;  %v895_v25 = vrot.slane %v788_v23, 2  ;;  %6937 = vmatmul.mubr.bf16.gmra.mxu1 %v8282_v14 }
 0x138   : > { %v6690_v26 = vpop.f32.mrf.mxu1  ;;  %6940 = vmatprep.mubr.msk.bf16.mxu1 %vm8059_vm0, %v8057_v0 }
 0x139   : > { %v8482_v27 = vsel %vm887_vm4, %v893_v13, %v895_v25  ;;  %v593_v28 = vpop.f32.mrf.mxu0 }
 0x13a   : > { %661 = vst [vmem:[#allocation3 + $0x27] sm:$0xff] %v593_v28  ;;  %v791_v29 = vpop.f32.mrf.mxu1 }
 0x13b   : > { %v6631_v30 = vpop.f32.mrf.mxu0  ;;  %v897_v31 = vrot.slane %v791_v29, 2 }
 0x13c   : > { %v6691_v32 = vpop.f32.mrf.mxu1 }
 0x13d   : > { %v8485_v33 = vsel %vm887_vm4, %v895_v25, %v897_v31  ;;  %v598_v34 = vpop.f32.mrf.mxu0  ;;  %6881 = vmatmul.mubr.bf16.gmra.mxu0 %v8294_v17 }
 0x13e   : > { %662 = vst [vmem:[#allocation3 + $0x2f] sm:$0xff] %v598_v34  ;;  %v796_v14 = vpop.f32.mrf.mxu1  ;;  %6884 = vmatprep.mubr.msk.bf16.mxu0 %vm8059_vm0, %v8057_v0 }
 0x13f   : > { %v6634_v35 = vpop.f32.mrf.mxu0  ;;  %v899_v36 = vrot.slane %v796_v14, 2  ;;  %6941 = vmatmul.mubr.bf16.gmra.mxu1 %v8294_v17 }
 0x140   : > { %v6694_v37 = vpop.f32.mrf.mxu1  ;;  %6944 = vmatprep.mubr.msk.bf16.mxu1 %vm8059_vm0, %v8057_v0 }
 0x141   : > { %v8494_v38 = vsel %vm887_vm4, %v897_v31, %v899_v36  ;;  %v601_v39 = vpop.f32.mrf.mxu0 }
 0x142   : > { %663 = vst [vmem:[#allocation3 + $0x37] sm:$0xff] %v601_v39  ;;  %v799_v40 = vpop.f32.mrf.mxu1 }
 0x143   : > { %v6635_v41 = vpop.f32.mrf.mxu0  ;;  %v901_v42 = vrot.slane %v799_v40, 2 }
 0x144   : > { %v6695_v43 = vpop.f32.mrf.mxu1 }
 0x145   : > { %v8497_v44 = vsel %vm887_vm4, %v899_v36, %v901_v42  ;;  %v606_v45 = vpop.f32.mrf.mxu0  ;;  %6885 = vmatmul.mubr.bf16.gmra.mxu0 %v8302_v18 }
 0x146   : > { %664 = vst [vmem:[#allocation3 + $0x3f] sm:$0xff] %v606_v45  ;;  %v804_v17 = vpop.f32.mrf.mxu1  ;;  %6888 = vmatprep.mubr.msk.bf16.mxu0 %vm8059_vm0, %v8057_v0 }
 0x147   : > { %v6638_v46 = vpop.f32.mrf.mxu0  ;;  %v903_v47 = vrot.slane %v804_v17, 2  ;;  %6945 = vmatmul.mubr.bf16.gmra.mxu1 %v8302_v18  ;;  %v7811_v17 = vld [vmem:[#allocation4 + $0x238] sm:$0xff]  }
 0x148   : > { %v6698_v48 = vpop.f32.mrf.mxu1  ;;  %6948 = vmatprep.mubr.msk.bf16.mxu1 %vm8059_vm0, %v8057_v0 }
 0x149   : > { %v8506_v49 = vsel %vm887_vm4, %v901_v42, %v903_v47  ;;  %v609_v50 = vpop.f32.mrf.mxu0 }
 0x14a   : > { %665 = vst [vmem:[#allocation3 + $0x47] sm:$0xff] %v609_v50  ;;  %v807_v51 = vpop.f32.mrf.mxu1  ;;  %v8556_v50 = vld [vmem:[#allocation2] sm:$0xff]  }
 0x14b   : > { %v6639_v52 = vpop.f32.mrf.mxu0  ;;  %v905_v53 = vrot.slane %v807_v51, 2 }
 0x14c   : > { %v6699_v54 = vpop.f32.mrf.mxu1 }
 0x14d   : > { %v8509_v55 = vsel %vm887_vm4, %v903_v47, %v905_v53  ;;  %v614_v56 = vpop.f32.mrf.mxu0  ;;  %6889 = vmatmul.mubr.bf16.gmra.mxu0 %v8310_v19 }
 0x14e   : > { %666 = vst [vmem:[#allocation3 + $0x4f] sm:$0xff] %v614_v56  ;;  %v812_v18 = vpop.f32.mrf.mxu1  ;;  %6892 = vmatprep.mubr.msk.bf16.mxu0 %vm8059_vm0, %v8057_v0 }
 0x14f   : > { %v6642_v57 = vpop.f32.mrf.mxu0  ;;  %v907_v58 = vrot.slane %v812_v18, 2  ;;  %6949 = vmatmul.mubr.bf16.gmra.mxu1 %v8310_v19  ;;  %v7815_v18 = vld [vmem:[#allocation4 + $0x228] sm:$0xff]  }
 0x150   : > { %v6702_v59 = vpop.f32.mrf.mxu1  ;;  %6952 = vmatprep.mubr.msk.bf16.mxu1 %vm8059_vm0, %v8057_v0 }
 0x151   : > { %v8518_v60 = vsel %vm887_vm4, %v905_v53, %v907_v58  ;;  %v617_v61 = vpop.f32.mrf.mxu0 }
 0x152   : > { %667 = vst [vmem:[#allocation3 + $0x57] sm:$0xff] %v617_v61  ;;  %v815_v62 = vpop.f32.mrf.mxu1  ;;  %v8566_v61 = vld [vmem:[#allocation2 + $0x8] sm:$0xff]  }
 0x153   : > { %v6643_v1 = vpop.f32.mrf.mxu0  ;;  %v909_v2 = vrot.slane %v815_v62, 2 }
 0x154   : > { %v6703_v3 = vpop.f32.mrf.mxu1  ;;  %v7816_v1 = vld [vmem:[#allocation4 + $0x220] sm:$0xff]  }
 0x155   : > { %v8521_v4 = vsel %vm887_vm4, %v907_v58, %v909_v2  ;;  %v622_v5 = vpop.f32.mrf.mxu0  ;;  %6893 = vmatmul.mubr.bf16.gmra.mxu0 %v8318_v20 }
 0x156   : > { %668 = vst [vmem:[#allocation3 + $0x5f] sm:$0xff] %v622_v5  ;;  %v820_v19 = vpop.f32.mrf.mxu1  ;;  %6896 = vmatprep.mubr.msk.bf16.mxu0 %vm8059_vm0, %v8057_v0 }
 0x157   : > { %v6646_v6 = vpop.f32.mrf.mxu0  ;;  %v911_v7 = vrot.slane %v820_v19, 2  ;;  %6953 = vmatmul.mubr.bf16.gmra.mxu1 %v8318_v20 }
 0x158   : > { %v6706_v9 = vpop.f32.mrf.mxu1  ;;  %6956 = vmatprep.mubr.msk.bf16.mxu1 %vm8059_vm0, %v8057_v0  ;;  %v7817_v6 = vld [vmem:[#allocation4 + $0x218] sm:$0xff]  }
 0x159   : > { %v8530_v10 = vsel %vm887_vm4, %v909_v2, %v911_v7  ;;  %v625_v12 = vpop.f32.mrf.mxu0 }
 0x15a   : > { %669 = vst [vmem:[#allocation3 + $0x67] sm:$0xff] %v625_v12  ;;  %v823_v13 = vpop.f32.mrf.mxu1 }
 0x15b   : > { %v6647_v11 = vpop.f32.mrf.mxu0  ;;  %v913_v16 = vrot.slane %v823_v13, 2  ;;  %v8576_v13 = vld [vmem:[#allocation2 + $0x10] sm:$0xff]  }
 0x15c   : > { %v6707_v23 = vpop.f32.mrf.mxu1 }
 0x15d   : > { %v8533_v24 = vsel %vm887_vm4, %v911_v7, %v913_v16  ;;  %v630_v25 = vpop.f32.mrf.mxu0  ;;  %6897 = vmatmul.mubr.bf16.gmra.mxu0 %v8326_v21 }
 0x15e   : > { %670 = vst [vmem:[#allocation3 + $0x6f] sm:$0xff] %v630_v25  ;;  %v828_v20 = vpop.f32.mrf.mxu1  ;;  %6900 = vmatprep.mubr.msk.bf16.mxu0 %vm8059_vm0, %v8057_v0  ;;  %v854_v25 = vld [vmem:[#allocation3] sm:$0xff] }
 0x15f   : > { %v6650_v26 = vpop.f32.mrf.mxu0  ;;  %v915_v28 = vrot.slane %v828_v20, 2  ;;  %6957 = vmatmul.mubr.bf16.gmra.mxu1 %v8326_v21 }
 0x160   : > { %v6710_v29 = vpop.f32.mrf.mxu1  ;;  %6960 = vmatprep.mubr.msk.bf16.mxu1 %vm8059_vm0, %v8057_v0 }
 0x161   : > { %v8542_v30 = vsel %vm887_vm4, %v913_v16, %v915_v28  ;;  %v633_v31 = vpop.f32.mrf.mxu0  ;;  %v7818_v16 = vld [vmem:[#allocation4 + $0x210] sm:$0xff]  }
 0x162   : > { %671 = vst [vmem:[#allocation3 + $0x77] sm:$0xff] %v633_v31  ;;  %v831_v32 = vpop.f32.mrf.mxu1 }
 0x163   : > { %v6651_v34 = vpop.f32.mrf.mxu0  ;;  %v917_v14 = vrot.slane %v831_v32, 2  ;;  %v7819_v32 = vld [vmem:[#allocation4 + $0x208] sm:$0xff]  }
 0x164   : > { %v6711_v35 = vpop.f32.mrf.mxu1  ;;  %v937_v34 = vadd.f32 %v8456_v63, %v854_v25  ;;  %v7820_v63 = vld [vmem:[#allocation4 + $0x200] sm:$0xff]  }
 0x165   : > { %v8545_v36 = vsel %vm887_vm4, %v915_v28, %v917_v14  ;;  %v638_v37 = vpop.f32.mrf.mxu0  ;;  %6901 = vmatmul.mubr.bf16.gmra.mxu0 %v8336_v22  ;;  %v855_v35 = vld [vmem:[#allocation3 + $0x8] sm:$0xff] }
 0x166   : > { %672 = vst [vmem:[#allocation3 + $0x7f] sm:$0x1] %v638_v37  ;;  %v836_v21 = vpop.f32.mrf.mxu1  ;;  %6980 = vmatprep.mubr.msk.bf16.mxu0 %vm8059_vm0, %v8057_v0 }
 0x167   : > { %v6654_v39 = vpop.f32.mrf.mxu0  ;;  %v919_v40 = vrot.slane %v836_v21, 2  ;;  %6961 = vmatmul.mubr.bf16.gmra.mxu1 %v8336_v22  ;;  %v7814_v22 = vld [vmem:[#allocation4 + $0x230] sm:$0xff]  }
 0x168   : > { %v6714_v41 = vpop.f32.mrf.mxu1  ;;  %7040 = vmatprep.mubr.msk.bf16.mxu1 %vm8059_vm0, %v8057_v0 }
 0x169   : > { %v8554_v42 = vsel %vm887_vm4, %v917_v14, %v919_v40  ;;  %v641_v43 = vpop.f32.mrf.mxu0  ;;  %v8588_v41 = vld [vmem:[#allocation2 + $0x18] sm:$0xff]  }
 0x16a   : > { %v839_v45 = vpop.f32.mrf.mxu1 }
 0x16b   : > { %v6655_v46 = vpop.f32.mrf.mxu0 }
 0x16c   : > { %v6715_v47 = vpop.f32.mrf.mxu1 }
 0x16d   : > { %v645_v48 = vpop.f32.mrf.mxu0  ;;  %6981 = vmatmul.mubr.bf16.vlgmr.msra.gmra.mxu0 %v8556_v50  ;;  %v856_v47 = vld [vmem:[#allocation3 + $0x10] sm:$0xff] }
 0x16e   : > { %7085 = vmatpush3.bf16.msra.mxu0 %v7811_v17  ;;  %v843_v51 = vpop.f32.mrf.mxu1  ;;  %6984 = vmatprep.mubr.msk.bf16.mxu0 %vm8059_vm0, %v8057_v0  ;;  %v938_v17 = vadd.f32 %v8467_v8, %v855_v35  ;;  %v939_v8 = vadd.f32 %v8472_v15, %v856_v47 }
 0x16f   : > { %v6658_v52 = vpop.f32.mrf.mxu0  ;;  %7041 = vmatmul.mubr.bf16.vlgmr.msra.gmra.mxu1 %v8556_v50  ;;  %7086 = vmatprep.subr.bf16.mxu0 %v8057_v0 }
 0x170   : > { %v6718_v53 = vpop.f32.mrf.mxu1  ;;  %7044 = vmatprep.mubr.msk.bf16.mxu1 %vm8059_vm0, %v8057_v0 }
 0x171   : > { %v647_v54 = vpop.f32.mrf.mxu0 }
 0x172   : > { %v845_v56 = vpop.f32.mrf.mxu1  ;;  %7087 = vmatpush3.bf16.msra.mxu0 %v7814_v22 }
 0x173   : > { %v6659_v57 = vpop.f32.mrf.mxu0  ;;  %7088 = vmatprep.subr.bf16.mxu0 %v8057_v0 }
 0x174   : > { %v6719_v58 = vpop.f32.mrf.mxu1 }
 0x175   : > { %v651_v59 = vpop.f32.mrf.mxu0  ;;  %6985 = vmatmul.mubr.bf16.gmra.mxu0 %v8566_v61  ;;  %v857_v58 = vld [vmem:[#allocation3 + $0x18] sm:$0xff] }
 0x176   : > { %v849_v62 = vpop.f32.mrf.mxu1  ;;  %6988 = vmatprep.mubr.msk.bf16.mxu0 %vm8059_vm0, %v8057_v0  ;;  %7089 = vmatpush3.bf16.msra.mxu0 %v7815_v18 }
 0x177   : > { %v6662_v2 = vpop.f32.mrf.mxu0  ;;  %7045 = vmatmul.mubr.bf16.gmra.mxu1 %v8566_v61  ;;  %7090 = vmatprep.subr.bf16.mxu0 %v8057_v0 }
 0x178   : > { %v6722_v3 = vpop.f32.mrf.mxu1  ;;  %7048 = vmatprep.mubr.msk.bf16.mxu1 %vm8059_vm0, %v8057_v0 }
 0x179   : > { %v653_v5 = vpop.f32.mrf.mxu0 }
 0x17a   : > { %v851_v19 = vpop.f32.mrf.mxu1  ;;  %7091 = vmatpush3.bf16.msra.mxu0 %v7816_v1  ;;  %v8603_v5 = vld [vmem:[#allocation2 + $0x20] sm:$0xff]  }
 0x17b   : > { %v6663_v7 = vpop.f32.mrf.mxu0  ;;  %7092 = vmatprep.subr.bf16.mxu0 %v8057_v0 }
 0x17c   : > { %v6723_v9 = vpop.f32.mrf.mxu1  ;;  %v940_v7 = vadd.f32 %v8482_v27, %v857_v58 }
 0x17d   : > { %v1068_v12 = vpop.f32.mrf.mxu0  ;;  %6989 = vmatmul.mubr.bf16.gmra.mxu0 %v8576_v13 }
 0x17e   : > { %v1364_v11 = vpop.f32.mrf.mxu1  ;;  %6992 = vmatprep.mubr.msk.bf16.mxu0 %vm8059_vm0, %v8057_v0  ;;  %7093 = vmatpush3.bf16.msra.mxu0 %v7817_v6  ;;  %v1184_v28 = vrot.slane %v1068_v12, 3 }
 0x17f   : > { %v6742_v23 = vpop.f32.mrf.mxu0  ;;  %7049 = vmatmul.mubr.bf16.gmra.mxu1 %v8576_v13  ;;  %7094 = vmatprep.subr.bf16.mxu0 %v8057_v0  ;;  %v858_v11 = vld [vmem:[#allocation3 + $0x20] sm:$0xff] }
 0x180   : > { %v6802_v20 = vpop.f32.mrf.mxu1  ;;  %7052 = vmatprep.mubr.msk.bf16.mxu1 %vm8059_vm0, %v8057_v0  ;;  %v941_v27 = vadd.f32 %v8485_v33, %v858_v11 }
 0x181   : > { %v1071_v26 = vpop.f32.mrf.mxu0 }
 0x182   : > { %v1185_v29 = vrot.slane %v1071_v26, 3  ;;  %v1366_v31 = vpop.f32.mrf.mxu1  ;;  %7095 = vmatpush3.bf16.msra.mxu0 %v7818_v16 }
 0x183   : > { %v6743_v14 = vpop.f32.mrf.mxu0  ;;  %7096 = vmatprep.subr.bf16.mxu0 %v8057_v0 }
 0x184   : > { %v1186_v37 = vsel %vm1183_vm5, %v1184_v28, %v1185_v29  ;;  %v6803_v21 = vpop.f32.mrf.mxu1  ;;  %v859_v14 = vld [vmem:[#allocation3 + $0x28] sm:$0xff] }
 0x185   : > { %v1233_v39 = vadd.f32 %v1186_v37, %v937_v34  ;;  %v1076_v40 = vpop.f32.mrf.mxu0  ;;  %6993 = vmatmul.mubr.bf16.gmra.mxu0 %v8588_v41  ;;  %v942_v33 = vadd.f32 %v8494_v38, %v859_v14 }
 0x186   : > { %v1187_v43 = vrot.slane %v1076_v40, 3  ;;  %v1370_v45 = vpop.f32.mrf.mxu1  ;;  %6996 = vmatprep.mubr.msk.bf16.mxu0 %vm8059_vm0, %v8057_v0  ;;  %7097 = vmatpush3.bf16.msra.mxu0 %v7819_v32 }
 0x187   : > { %v6746_v46 = vpop.f32.mrf.mxu0  ;;  %7053 = vmatmul.mubr.bf16.gmra.mxu1 %v8588_v41  ;;  %7098 = vmatprep.subr.bf16.mxu0 %v8057_v0  ;;  %v1480_v52 = vrot.slane %v1370_v45, 1 }
 0x188   : > { %v1188_v48 = vsel %vm1183_vm5, %v1185_v29, %v1187_v43  ;;  %v6806_v51 = vpop.f32.mrf.mxu1  ;;  %7056 = vmatprep.mubr.msk.bf16.mxu1 %vm8059_vm0, %v8057_v0 }
 0x189   : > { %v1234_v22 = vadd.f32 %v1188_v48, %v938_v17  ;;  %v1079_v53 = vpop.f32.mrf.mxu0  ;;  %v860_v48 = vld [vmem:[#allocation3 + $0x30] sm:$0xff] }
 0x18a   : > { %v1189_v54 = vrot.slane %v1079_v53, 3  ;;  %v1373_v56 = vpop.f32.mrf.mxu1  ;;  %7099 = vmatpush3.bf16.msra.mxu0 %v7820_v63  ;;  %v943_v38 = vadd.f32 %v8497_v44, %v860_v48 }
 0x18b   : > { %v6747_v18 = vpop.f32.mrf.mxu0  ;;  %v1481_v57 = vrot.slane %v1373_v56, 1  ;;  %7204 = vmatprep.subr.bf16.mxu0 %v8057_v0 }
 0x18c   : > { %v1190_v59 = vsel %vm1183_vm5, %v1187_v43, %v1189_v54  ;;  %v6807_v62 = vpop.f32.mrf.mxu1  ;;  %v8621_v43 = vld [vmem:[#allocation2 + $0x28] sm:$0xff]  }
 0x18d   : > { %v1235_v1 = vadd.f32 %v1190_v59, %v939_v8  ;;  %v1482_v2 = vsel %vm1479_vm6, %v1480_v52, %v1481_v57  ;;  %v1084_v3 = vpop.f32.mrf.mxu0  ;;  %6997 = vmatmul.mubr.bf16.gmra.mxu0 %v8603_v5  ;;  %v861_v59 = vld [vmem:[#allocation3 + $0x38] sm:$0xff] }
 0x18e   : > { %v8606_v19 = vadd.f32 %v1482_v2, %v1233_v39  ;;  %v1191_v6 = vrot.slane %v1084_v3, 3  ;;  %v1378_v15 = vpop.f32.mrf.mxu1  ;;  %7000 = vmatprep.mubr.msk.bf16.mxu0 %vm8059_vm0, %v8057_v0  ;;  %v944_v44 = vadd.f32 %v8506_v49, %v861_v59 }
 0x18f   : > { %v6750_v9 = vpop.f32.mrf.mxu0  ;;  %v1483_v12 = vrot.slane %v1378_v15, 1  ;;  %7057 = vmatmul.mubr.bf16.gmra.mxu1 %v8603_v5  ;;  %v8639_v15 = vld [vmem:[#allocation2 + $0x30] sm:$0xff]  }
 0x190   : > { %v1192_v16 = vsel %vm1183_vm5, %v1189_v54, %v1191_v6  ;;  %v6810_v23 = vpop.f32.mrf.mxu1  ;;  %7060 = vmatprep.mubr.msk.bf16.mxu1 %vm8059_vm0, %v8057_v0 }
 0x191   : > { %v1236_v25 = vadd.f32 %v1192_v16, %v940_v7  ;;  %v1484_v20 = vsel %vm1479_vm6, %v1481_v57, %v1483_v12  ;;  %v1087_v26 = vpop.f32.mrf.mxu0  ;;  %v862_v23 = vld [vmem:[#allocation3 + $0x40] sm:$0xff] }
 0x192   : > { %v8616_v28 = vadd.f32 %v1484_v20, %v1234_v22  ;;  %v1193_v29 = vrot.slane %v1087_v26, 3  ;;  %v1381_v31 = vpop.f32.mrf.mxu1  ;;  %v945_v49 = vadd.f32 %v8509_v55, %v862_v23 }
 0x193   : > { %v6751_v32 = vpop.f32.mrf.mxu0  ;;  %v1485_v34 = vrot.slane %v1381_v31, 1 }
 0x194   : > { %v1194_v35 = vsel %vm1183_vm5, %v1191_v6, %v1193_v29  ;;  %v6811_v37 = vpop.f32.mrf.mxu1 }
 0x195   : > { %v1237_v21 = vadd.f32 %v1194_v35, %v941_v27  ;;  %v1486_v39 = vsel %vm1479_vm6, %v1483_v12, %v1485_v34  ;;  %v1092_v40 = vpop.f32.mrf.mxu0  ;;  %7001 = vmatmul.mubr.bf16.gmra.mxu0 %v8621_v43  ;;  %v863_v37 = vld [vmem:[#allocation3 + $0x48] sm:$0xff] }
 0x196   : > { %v8624_v45 = vadd.f32 %v1486_v39, %v1235_v1  ;;  %v1195_v63 = vrot.slane %v1092_v40, 3  ;;  %v1386_v17 = vpop.f32.mrf.mxu1  ;;  %7004 = vmatprep.mubr.msk.bf16.mxu0 %vm8059_vm0, %v8057_v0  ;;  %v946_v55 = vadd.f32 %v8518_v60, %v863_v37 }
 0x197   : > { %v6754_v46 = vpop.f32.mrf.mxu0  ;;  %v1487_v47 = vrot.slane %v1386_v17, 1  ;;  %7061 = vmatmul.mubr.bf16.gmra.mxu1 %v8621_v43 }
 0x198   : > { %v1196_v51 = vsel %vm1183_vm5, %v1193_v29, %v1195_v63  ;;  %v6814_v22 = vpop.f32.mrf.mxu1  ;;  %7064 = vmatprep.mubr.msk.bf16.mxu1 %vm8059_vm0, %v8057_v0 }
 0x199   : > { %v1238_v52 = vadd.f32 %v1196_v51, %v942_v33  ;;  %v1488_v53 = vsel %vm1479_vm6, %v1485_v34, %v1487_v47  ;;  %v1095_v54 = vpop.f32.mrf.mxu0  ;;  %v8657_v33 = vld [vmem:[#allocation2 + $0x38] sm:$0xff]  }
 0x19a   : > { %v8634_v56 = vadd.f32 %v1488_v53, %v1236_v25  ;;  %v1197_v8 = vrot.slane %v1095_v54, 3  ;;  %v1389_v18 = vpop.f32.mrf.mxu1 }
 0x19b   : > { %v6755_v57 = vpop.f32.mrf.mxu0  ;;  %v1489_v58 = vrot.slane %v1389_v18, 1 }
 0x19c   : > { %v1198_v62 = vsel %vm1183_vm5, %v1195_v63, %v1197_v8  ;;  %v6815_v1 = vpop.f32.mrf.mxu1 }
 0x19d   : > { %v1239_v2 = vadd.f32 %v1198_v62, %v943_v38  ;;  %v1490_v3 = vsel %vm1479_vm6, %v1487_v47, %v1489_v58  ;;  %v1100_v6 = vpop.f32.mrf.mxu0  ;;  %7005 = vmatmul.mubr.bf16.gmra.mxu0 %v8639_v15 }
 0x19e   : > { %v8642_v7 = vadd.f32 %v1490_v3, %v1237_v21  ;;  %v1199_v9 = vrot.slane %v1100_v6, 3  ;;  %v1394_v12 = vpop.f32.mrf.mxu1  ;;  %7008 = vmatprep.mubr.msk.bf16.mxu0 %vm8059_vm0, %v8057_v0 }
 0x19f   : > { %v6758_v11 = vpop.f32.mrf.mxu0  ;;  %v1491_v16 = vrot.slane %v1394_v12, 1  ;;  %7065 = vmatmul.mubr.bf16.gmra.mxu1 %v8639_v15 }
 0x1a0   : > { %v1200_v25 = vsel %vm1183_vm5, %v1197_v8, %v1199_v9  ;;  %v6818_v20 = vpop.f32.mrf.mxu1  ;;  %7068 = vmatprep.mubr.msk.bf16.mxu1 %vm8059_vm0, %v8057_v0  ;;  %v8675_v11 = vld [vmem:[#allocation2 + $0x40] sm:$0xff]  }
 0x1a1   : > { %v1240_v26 = vadd.f32 %v1200_v25, %v944_v44  ;;  %v1492_v29 = vsel %vm1479_vm6, %v1489_v58, %v1491_v16  ;;  %v1103_v31 = vpop.f32.mrf.mxu0 }
 0x1a2   : > { %v8652_v27 = vadd.f32 %v1492_v29, %v1238_v52  ;;  %v1201_v32 = vrot.slane %v1103_v31, 3  ;;  %v1397_v34 = vpop.f32.mrf.mxu1  ;;  %v864_v52 = vld [vmem:[#allocation3 + $0x50] sm:$0xff]  ;;  %v866_v29 = vld [vmem:[#allocation3 + $0x60] sm:$0xff] }
 0x1a3   : > { %v6759_v14 = vpop.f32.mrf.mxu0  ;;  %v1493_v35 = vrot.slane %v1397_v34, 1  ;;  %v947_v60 = vadd.f32 %v8521_v4, %v864_v52 }
 0x1a4   : > { %v1202_v21 = vsel %vm1183_vm5, %v1199_v9, %v1201_v32  ;;  %v6819_v39 = vpop.f32.mrf.mxu1 }
 0x1a5   : > { %v1241_v40 = vadd.f32 %v1202_v21, %v945_v49  ;;  %v1494_v63 = vsel %vm1479_vm6, %v1491_v16, %v1493_v35  ;;  %v1108_v17 = vpop.f32.mrf.mxu0  ;;  %7009 = vmatmul.mubr.bf16.gmra.mxu0 %v8657_v33 }
 0x1a6   : > { %v8660_v46 = vadd.f32 %v1494_v63, %v1239_v2  ;;  %v1203_v47 = vrot.slane %v1108_v17, 3  ;;  %v1402_v48 = vpop.f32.mrf.mxu1  ;;  %7012 = vmatprep.mubr.msk.bf16.mxu0 %vm8059_vm0, %v8057_v0  ;;  %v865_v2 = vld [vmem:[#allocation3 + $0x58] sm:$0xff]  ;;  %v867_v63 = vld [vmem:[#allocation3 + $0x68] sm:$0xff] }
 0x1a7   : > { %v6762_v51 = vpop.f32.mrf.mxu0  ;;  %v1495_v22 = vrot.slane %v1402_v48, 1  ;;  %7069 = vmatmul.mubr.bf16.gmra.mxu1 %v8657_v33  ;;  %v948_v4 = vadd.f32 %v8530_v10, %v865_v2  ;;  %v949_v10 = vadd.f32 %v8533_v24, %v866_v29  ;;  %v950_v24 = vadd.f32 %v8542_v30, %v867_v63  ;;  %v8711_v29 = vld [vmem:[#allocation2 + $0x50] sm:$0xff]  }
 0x1a8   : > { %v1204_v53 = vsel %vm1183_vm5, %v1201_v32, %v1203_v47  ;;  %v6822_v54 = vpop.f32.mrf.mxu1  ;;  %7072 = vmatprep.mubr.msk.bf16.mxu1 %vm8059_vm0, %v8057_v0 }
 0x1a9   : > { %v1242_v8 = vadd.f32 %v1204_v53, %v946_v55  ;;  %v1496_v18 = vsel %vm1479_vm6, %v1493_v35, %v1495_v22  ;;  %v1111_v38 = vpop.f32.mrf.mxu0 }
 0x1aa   : > { %v8670_v57 = vadd.f32 %v1496_v18, %v1240_v26  ;;  %v1205_v58 = vrot.slane %v1111_v38, 3  ;;  %v1405_v59 = vpop.f32.mrf.mxu1  ;;  %v868_v38 = vld [vmem:[#allocation3 + $0x70] sm:$0xff] }
 0x1ab   : > { %v6763_v62 = vpop.f32.mrf.mxu0  ;;  %v1497_v1 = vrot.slane %v1405_v59, 1  ;;  %v951_v30 = vadd.f32 %v8545_v36, %v868_v38 }
 0x1ac   : > { %v1206_v3 = vsel %vm1183_vm5, %v1203_v47, %v1205_v58  ;;  %v6823_v6 = vpop.f32.mrf.mxu1 }
 0x1ad   : > { %v1243_v9 = vadd.f32 %v1206_v3, %v947_v60  ;;  %v1498_v12 = vsel %vm1479_vm6, %v1495_v22, %v1497_v1  ;;  %v1116_v44 = vpop.f32.mrf.mxu0  ;;  %7013 = vmatmul.mubr.bf16.gmra.mxu0 %v8675_v11  ;;  %v8693_v22 = vld [vmem:[#allocation2 + $0x48] sm:$0xff]  }
 0x1ae   : > { %v8678_v16 = vadd.f32 %v1498_v12, %v1241_v40  ;;  %v1207_v23 = vrot.slane %v1116_v44, 3  ;;  %v1410_v25 = vpop.f32.mrf.mxu1  ;;  %7016 = vmatprep.mubr.msk.bf16.mxu0 %vm8059_vm0, %v8057_v0  ;;  %v869_v44 = vld [vmem:[#allocation3 + $0x78] sm:$0xff] }
 0x1af   : > { %v6766_v20 = vpop.f32.mrf.mxu0  ;;  %v1499_v26 = vrot.slane %v1410_v25, 1  ;;  %7073 = vmatmul.mubr.bf16.gmra.mxu1 %v8675_v11  ;;  %v952_v36 = vadd.f32 %v8554_v42, %v869_v44 }
 0x1b0   : > { %v1208_v31 = vsel %vm1183_vm5, %v1205_v58, %v1207_v23  ;;  %v6826_v32 = vpop.f32.mrf.mxu1  ;;  %7076 = vmatprep.mubr.msk.bf16.mxu1 %vm8059_vm0, %v8057_v0 }
 0x1b1   : > { %v1244_v34 = vadd.f32 %v1208_v31, %v948_v4  ;;  %v1500_v49 = vsel %vm1479_vm6, %v1497_v1, %v1499_v26  ;;  %v1119_v14 = vpop.f32.mrf.mxu0 }
 0x1b2   : > { %v8688_v35 = vadd.f32 %v1500_v49, %v1242_v8  ;;  %v1209_v37 = vrot.slane %v1119_v14, 3  ;;  %v1413_v21 = vpop.f32.mrf.mxu1 }
 0x1b3   : > { %v6767_v39 = vpop.f32.mrf.mxu0  ;;  %v1501_v40 = vrot.slane %v1413_v21, 1 }
 0x1b4   : > { %v1210_v17 = vsel %vm1183_vm5, %v1207_v23, %v1209_v37  ;;  %v6827_v47 = vpop.f32.mrf.mxu1 }
 0x1b5   : > { %v1245_v48 = vadd.f32 %v1210_v17, %v949_v10  ;;  %v1502_v55 = vsel %vm1479_vm6, %v1499_v26, %v1501_v40  ;;  %v1124_v51 = vpop.f32.mrf.mxu0  ;;  %7017 = vmatmul.mubr.bf16.gmra.mxu0 %v8693_v22 }
 0x1b6   : > { %v8696_v52 = vadd.f32 %v1502_v55, %v1243_v9  ;;  %v1211_v53 = vrot.slane %v1124_v51, 3  ;;  %v1418_v54 = vpop.f32.mrf.mxu1  ;;  %7020 = vmatprep.mubr.msk.bf16.mxu0 %vm8059_vm0, %v8057_v0 }
 0x1b7   : > { %v6770_v8 = vpop.f32.mrf.mxu0  ;;  %v1503_v18 = vrot.slane %v1418_v54, 1  ;;  %7077 = vmatmul.mubr.bf16.gmra.mxu1 %v8693_v22 }
 0x1b8   : > { %v1212_v58 = vsel %vm1183_vm5, %v1209_v37, %v1211_v53  ;;  %v6830_v59 = vpop.f32.mrf.mxu1  ;;  %7080 = vmatprep.mubr.msk.bf16.mxu1 %vm8059_vm0, %v8057_v0 }
 0x1b9   : > { %v1246_v60 = vadd.f32 %v1212_v58, %v950_v24  ;;  %v1504_v62 = vsel %vm1479_vm6, %v1501_v40, %v1503_v18  ;;  %v1127_v1 = vpop.f32.mrf.mxu0 }
 0x1ba   : > { %v8706_v2 = vadd.f32 %v1504_v62, %v1244_v34  ;;  %v1213_v3 = vrot.slane %v1127_v1, 3  ;;  %v1421_v6 = vpop.f32.mrf.mxu1 }
 0x1bb   : > { %v6771_v9 = vpop.f32.mrf.mxu0  ;;  %v1505_v12 = vrot.slane %v1421_v6, 1 }
 0x1bc   : > { %v1214_v23 = vsel %vm1183_vm5, %v1211_v53, %v1213_v3  ;;  %v6831_v25 = vpop.f32.mrf.mxu1 }
 0x1bd   : > { %v1247_v4 = vadd.f32 %v1214_v23, %v951_v30  ;;  %v1506_v20 = vsel %vm1479_vm6, %v1503_v18, %v1505_v12  ;;  %v1132_v26 = vpop.f32.mrf.mxu0  ;;  %7021 = vmatmul.mubr.bf16.gmra.mxu0 %v8711_v29 }
 0x1be   : > { %v8714_v31 = vadd.f32 %v1506_v20, %v1245_v48  ;;  %v1215_v32 = vrot.slane %v1132_v26, 3  ;;  %v1426_v34 = vpop.f32.mrf.mxu1  ;;  %7100 = vmatprep.mubr.msk.bf16.mxu0 %vm8059_vm0, %v8057_v0 }
 0x1bf   : > { %v6774_v49 = vpop.f32.mrf.mxu0  ;;  %v1507_v14 = vrot.slane %v1426_v34, 1  ;;  %7081 = vmatmul.mubr.bf16.gmra.mxu1 %v8711_v29 }
 0x1c0   : > { %v1216_v37 = vsel %vm1183_vm5, %v1213_v3, %v1215_v32  ;;  %v6834_v21 = vpop.f32.mrf.mxu1  ;;  %7160 = vmatprep.mubr.msk.bf16.mxu1 %vm8059_vm0, %v8057_v0 }
 0x1c1   : > { %v1248_v10 = vadd.f32 %v1216_v37, %v952_v36  ;;  %v1508_v39 = vsel %vm1479_vm6, %v1505_v12, %v1507_v14  ;;  %v1135_v40 = vpop.f32.mrf.mxu0 }
 0x1c2   : > { %v8724_v63 = vadd.f32 %v1508_v39, %v1246_v60  ;;  %v1429_v17 = vpop.f32.mrf.mxu1 }
 0x1c3   : > { %v6775_v47 = vpop.f32.mrf.mxu0  ;;  %v1509_v48 = vrot.slane %v1429_v17, 1 }
 0x1c4   : > { %v6835_v42 = vpop.f32.mrf.mxu1 }
 0x1c5   : > { %v1510_v55 = vsel %vm1479_vm6, %v1507_v14, %v1509_v48  ;;  %v1139_v51 = vpop.f32.mrf.mxu0  ;;  %7101 = vmatmul.mubr.bf16.vlgmr.msra.gmra.mxu0 %v8556_v50 }
 0x1c6   : > { %v8728_v53 = vadd.f32 %v1510_v55, %v1247_v4  ;;  %v1434_v54 = vpop.f32.mrf.mxu1  ;;  %7104 = vmatprep.mubr.msk.bf16.mxu0 %vm8059_vm0, %v8057_v0 }
 0x1c7   : > { %v6778_v24 = vpop.f32.mrf.mxu0  ;;  %v1511_v8 = vrot.slane %v1434_v54, 1 }
 0x1c8   : > { %v6838_v18 = vpop.f32.mrf.mxu1 }
 0x1c9   : > { %v1512_v38 = vsel %vm1479_vm6, %v1509_v48, %v1511_v8  ;;  %v1141_v58 = vpop.f32.mrf.mxu0 }
 0x1ca   : > { %v8733_v59 = vadd.f32 %v1512_v38, %v1248_v10  ;;  %v1437_v60 = vpop.f32.mrf.mxu1  ;;  %v7821_v10 = vld [vmem:[#allocation8 + $0x38] sm:$0xff]  }
 0x1cb   : > { %v6779_v62 = vpop.f32.mrf.mxu0  ;;  %7145 = vmatpush3.bf16.msra.mxu1 %v7821_v10 }
 0x1cc   : > { %v6839_v1 = vpop.f32.mrf.mxu1  ;;  %7146 = vmatprep.subr.bf16.mxu1 %v8057_v0 }
 0x1cd   : > { %v1145_v3 = vpop.f32.mrf.mxu0  ;;  %7105 = vmatmul.mubr.bf16.gmra.mxu0 %v8566_v61 }
 0x1ce   : > { %7108 = vmatprep.mubr.msk.bf16.mxu0 %vm8059_vm0, %v8057_v0  ;;  %v1441_v50 = vpop.f32.mrf.mxu1 }
 0x1cf   : > { %v6782_v6 = vpop.f32.mrf.mxu0 }
 0x1d0   : > { %v6842_v30 = vpop.f32.mrf.mxu1 }
 0x1d1   : > { %v1147_v9 = vpop.f32.mrf.mxu0 }
 0x1d2   : > { %v1443_v12 = vpop.f32.mrf.mxu1 }
 0x1d3   : > { %v6783_v44 = vpop.f32.mrf.mxu0 }
 0x1d4   : > { %v6843_v23 = vpop.f32.mrf.mxu1 }
 0x1d5   : > { %v1660_v25 = vpop.f32.mrf.mxu0  ;;  %7109 = vmatmul.mubr.bf16.gmra.mxu0 %v8576_v13 }
 0x1d6   : > { %7112 = vmatprep.mubr.msk.bf16.mxu0 %vm8059_vm0, %v8057_v0 }
 0x1d7   : > { %v6862_v4 = vpop.f32.mrf.mxu0  ;;  %v1955_v20 = vpop.f32.mrf.mxu1 }
 0x1d8   : > { %v7822_v20 = vld [vmem:[#allocation8 + $0x30] sm:$0xff]  }
 0x1d9   : > { %v1662_v26 = vpop.f32.mrf.mxu0  ;;  %v6922_v61 = vpop.f32.mrf.mxu1  ;;  %7147 = vmatpush3.bf16.msra.mxu1 %v7822_v20 }
 0x1da   : > { %7148 = vmatprep.subr.bf16.mxu1 %v8057_v0 }
 0x1db   : > { %v6863_v32 = vpop.f32.mrf.mxu0  ;;  %v1957_v34 = vpop.f32.mrf.mxu1 }
 0x1dd   : > { %v1666_v36 = vpop.f32.mrf.mxu0  ;;  %7113 = vmatmul.mubr.bf16.gmra.mxu0 %v8588_v41  ;;  %v6923_v49 = vpop.f32.mrf.mxu1 }
 0x1de   : > { %7116 = vmatprep.mubr.msk.bf16.mxu0 %vm8059_vm0, %v8057_v0  ;;  %v1775_v39 = vrot.slane %v1666_v36, 2 }
 0x1df   : > { %v6866_v14 = vpop.f32.mrf.mxu0  ;;  %v1961_v37 = vpop.f32.mrf.mxu1 }
 0x1e0   : > { %v2070_v17 = vrot.slane %v1961_v37, 3 }
 0x1e1   : > { %v1669_v21 = vpop.f32.mrf.mxu0  ;;  %v6926_v13 = vpop.f32.mrf.mxu1 }
 0x1e2   : > { %v1776_v40 = vrot.slane %v1669_v21, 2 }
 0x1e3   : > { %v6867_v47 = vpop.f32.mrf.mxu0  ;;  %v1964_v48 = vpop.f32.mrf.mxu1 }
 0x1e4   : > { %v1777_v42 = vsel %vm887_vm4, %v1775_v39, %v1776_v40  ;;  %v2071_v55 = vrot.slane %v1964_v48, 3 }
 0x1e5   : > { %v1824_v41 = vadd.f32 %v1777_v42, %v8606_v19  ;;  %v1674_v51 = vpop.f32.mrf.mxu0  ;;  %7117 = vmatmul.mubr.bf16.gmra.mxu0 %v8603_v5  ;;  %v6927_v54 = vpop.f32.mrf.mxu1 }
 0x1e6   : > { %v1778_v24 = vrot.slane %v1674_v51, 2  ;;  %v2072_v8 = vsel %vm1183_vm5, %v2070_v17, %v2071_v55  ;;  %7120 = vmatprep.mubr.msk.bf16.mxu0 %vm8059_vm0, %v8057_v0 }
 0x1e7   : > { %v6870_v18 = vpop.f32.mrf.mxu0  ;;  %v8751_v38 = vadd.f32 %v2072_v8, %v1824_v41  ;;  %v1969_v58 = vpop.f32.mrf.mxu1 }
 0x1e8   : > { %v1779_v60 = vsel %vm887_vm4, %v1776_v40, %v1778_v24  ;;  %v2073_v62 = vrot.slane %v1969_v58, 3 }
 0x1e9   : > { %v1825_v1 = vadd.f32 %v1779_v60, %v8616_v28  ;;  %v1677_v19 = vpop.f32.mrf.mxu0  ;;  %v6930_v3 = vpop.f32.mrf.mxu1  ;;  %v7823_v60 = vld [vmem:[#allocation8 + $0x28] sm:$0xff]  }
 0x1ea   : > { %v1780_v50 = vrot.slane %v1677_v19, 2  ;;  %v2074_v5 = vsel %vm1183_vm5, %v2071_v55, %v2073_v62  ;;  %7149 = vmatpush3.bf16.msra.mxu1 %v7823_v60 }
 0x1eb   : > { %v6871_v6 = vpop.f32.mrf.mxu0  ;;  %v8756_v30 = vadd.f32 %v2074_v5, %v1825_v1  ;;  %v1972_v9 = vpop.f32.mrf.mxu1  ;;  %7150 = vmatprep.subr.bf16.mxu1 %v8057_v0 }
 0x1ec   : > { %v1781_v12 = vsel %vm887_vm4, %v1778_v24, %v1780_v50  ;;  %v2075_v44 = vrot.slane %v1972_v9, 3 }
 0x1ed   : > { %v1826_v23 = vadd.f32 %v1781_v12, %v8624_v45  ;;  %v1682_v25 = vpop.f32.mrf.mxu0  ;;  %7121 = vmatmul.mubr.bf16.gmra.mxu0 %v8621_v43  ;;  %v6931_v4 = vpop.f32.mrf.mxu1 }
 0x1ee   : > { %v1782_v28 = vrot.slane %v1682_v25, 2  ;;  %v2076_v26 = vsel %vm1183_vm5, %v2073_v62, %v2075_v44  ;;  %7124 = vmatprep.mubr.msk.bf16.mxu0 %vm8059_vm0, %v8057_v0 }
 0x1ef   : > { %v6874_v61 = vpop.f32.mrf.mxu0  ;;  %v8764_v32 = vadd.f32 %v2076_v26, %v1826_v23  ;;  %v1977_v34 = vpop.f32.mrf.mxu1 }
 0x1f0   : > { %v1783_v36 = vsel %vm887_vm4, %v1780_v50, %v1782_v28  ;;  %v2077_v49 = vrot.slane %v1977_v34, 3  ;;  %v7824_v34 = vld [vmem:[#allocation8 + $0x20] sm:$0xff]  }
 0x1f1   : > { %v1827_v43 = vadd.f32 %v1783_v36, %v8634_v56  ;;  %v1685_v45 = vpop.f32.mrf.mxu0  ;;  %v6934_v14 = vpop.f32.mrf.mxu1  ;;  %7151 = vmatpush3.bf16.msra.mxu1 %v7824_v34 }
 0x1f2   : > { %v1784_v37 = vrot.slane %v1685_v45, 2  ;;  %v2078_v21 = vsel %vm1183_vm5, %v2075_v44, %v2077_v49  ;;  %7152 = vmatprep.subr.bf16.mxu1 %v8057_v0 }
 0x1f3   : > { %v6875_v13 = vpop.f32.mrf.mxu0  ;;  %v8770_v10 = vadd.f32 %v2078_v21, %v1827_v43  ;;  %v1980_v39 = vpop.f32.mrf.mxu1 }
 0x1f4   : > { %v1785_v40 = vsel %vm887_vm4, %v1782_v28, %v1784_v37  ;;  %v2079_v17 = vrot.slane %v1980_v39, 3 }
 0x1f5   : > { %v1828_v47 = vadd.f32 %v1785_v40, %v8642_v7  ;;  %v1690_v48 = vpop.f32.mrf.mxu0  ;;  %7125 = vmatmul.mubr.bf16.gmra.mxu0 %v8639_v15  ;;  %v6935_v42 = vpop.f32.mrf.mxu1 }
 0x1f6   : > { %v1786_v55 = vrot.slane %v1690_v48, 2  ;;  %v2080_v56 = vsel %vm1183_vm5, %v2077_v49, %v2079_v17  ;;  %7128 = vmatprep.mubr.msk.bf16.mxu0 %vm8059_vm0, %v8057_v0 }
 0x1f7   : > { %v6878_v41 = vpop.f32.mrf.mxu0  ;;  %v8778_v51 = vadd.f32 %v2080_v56, %v1828_v47  ;;  %v1985_v54 = vpop.f32.mrf.mxu1 }
 0x1f8   : > { %v1787_v24 = vsel %vm887_vm4, %v1784_v37, %v1786_v55  ;;  %v2081_v8 = vrot.slane %v1985_v54, 3 }
 0x1f9   : > { %v1829_v18 = vadd.f32 %v1787_v24, %v8652_v27  ;;  %v1693_v7 = vpop.f32.mrf.mxu0  ;;  %v6938_v58 = vpop.f32.mrf.mxu1 }
 0x1fa   : > { %v1788_v15 = vrot.slane %v1693_v7, 2  ;;  %v2082_v62 = vsel %vm1183_vm5, %v2079_v17, %v2081_v8  ;;  %v7825_v7 = vld [vmem:[#allocation8 + $0x18] sm:$0xff]  }
 0x1fb   : > { %v6879_v1 = vpop.f32.mrf.mxu0  ;;  %v8783_v19 = vadd.f32 %v2082_v62, %v1829_v18  ;;  %v1988_v3 = vpop.f32.mrf.mxu1  ;;  %7153 = vmatpush3.bf16.msra.mxu1 %v7825_v7  ;;  %v7832_v7 = vld [vmem:[#allocation8 + $0x58] sm:$0xff]  }
 0x1fc   : > { %v1789_v50 = vsel %vm887_vm4, %v1786_v55, %v1788_v15  ;;  %v2083_v5 = vrot.slane %v1988_v3, 3  ;;  %7154 = vmatprep.subr.bf16.mxu1 %v8057_v0 }
 0x1fd   : > { %v1830_v6 = vadd.f32 %v1789_v50, %v8660_v46  ;;  %v1698_v9 = vpop.f32.mrf.mxu0  ;;  %7129 = vmatmul.mubr.bf16.gmra.mxu0 %v8657_v33  ;;  %v6939_v27 = vpop.f32.mrf.mxu1 }
 0x1fe   : > { %v1790_v12 = vrot.slane %v1698_v9, 2  ;;  %v2084_v44 = vsel %vm1183_vm5, %v2081_v8, %v2083_v5  ;;  %7132 = vmatprep.mubr.msk.bf16.mxu0 %vm8059_vm0, %v8057_v0 }
 0x1ff   : > { %v6882_v23 = vpop.f32.mrf.mxu0  ;;  %v8792_v25 = vadd.f32 %v2084_v44, %v1830_v6  ;;  %v1993_v4 = vpop.f32.mrf.mxu1 }
 0x200   : > { %v1791_v20 = vsel %vm887_vm4, %v1788_v15, %v1790_v12  ;;  %v2085_v28 = vrot.slane %v1993_v4, 3  ;;  %v7828_v23 = vld [vmem:[#allocation8 + $0x70] sm:$0xff]  }
 0x201   : > { %v1831_v26 = vadd.f32 %v1791_v20, %v8670_v57  ;;  %v1701_v46 = vpop.f32.mrf.mxu0  ;;  %v6942_v61 = vpop.f32.mrf.mxu1 }
 0x202   : > { %v1792_v33 = vrot.slane %v1701_v46, 2  ;;  %v2086_v36 = vsel %vm1183_vm5, %v2083_v5, %v2085_v28 }
 0x203   : > { %v6883_v49 = vpop.f32.mrf.mxu0  ;;  %v8797_v43 = vadd.f32 %v2086_v36, %v1831_v26  ;;  %v1996_v45 = vpop.f32.mrf.mxu1 }
 0x204   : > { %v1793_v14 = vsel %vm887_vm4, %v1790_v12, %v1792_v33  ;;  %v2087_v37 = vrot.slane %v1996_v45, 3  ;;  %v7829_v49 = vld [vmem:[#allocation8 + $0x68] sm:$0xff]  }
 0x205   : > { %v1832_v21 = vadd.f32 %v1793_v14, %v8678_v16  ;;  %v1706_v13 = vpop.f32.mrf.mxu0  ;;  %7133 = vmatmul.mubr.bf16.gmra.mxu0 %v8675_v11  ;;  %v6943_v57 = vpop.f32.mrf.mxu1 }
 0x206   : > { %v1794_v39 = vrot.slane %v1706_v13, 2  ;;  %v2088_v40 = vsel %vm1183_vm5, %v2085_v28, %v2087_v37  ;;  %7136 = vmatprep.mubr.msk.bf16.mxu0 %vm8059_vm0, %v8057_v0 }
 0x207   : > { %v6886_v17 = vpop.f32.mrf.mxu0  ;;  %v8806_v47 = vadd.f32 %v2088_v40, %v1832_v21  ;;  %v2001_v48 = vpop.f32.mrf.mxu1 }
 0x208   : > { %v1795_v42 = vsel %vm887_vm4, %v1792_v33, %v1794_v39  ;;  %v2089_v55 = vrot.slane %v2001_v48, 3  ;;  %v7831_v48 = vld [vmem:[#allocation8 + $0x60] sm:$0xff]  }
 0x209   : > { %v1833_v56 = vadd.f32 %v1795_v42, %v8688_v35  ;;  %v1709_v16 = vpop.f32.mrf.mxu0  ;;  %v6946_v41 = vpop.f32.mrf.mxu1  ;;  %v7827_v35 = vld [vmem:[#allocation8 + $0x78] sm:$0xff]  }
 0x20a   : > { %v1796_v54 = vrot.slane %v1709_v16, 2  ;;  %v2090_v11 = vsel %vm1183_vm5, %v2087_v37, %v2089_v55  ;;  %7205 = vmatpush3.bf16.msra.mxu0 %v7827_v35  ;;  %v7826_v37 = vld [vmem:[#allocation8 + $0x10] sm:$0xff]   ;;  %v7830_v35 = vld [vmem:[#allocation8 + $0x8] sm:$0xff]  }
 0x20b   : > { %v6887_v24 = vpop.f32.mrf.mxu0  ;;  %v8811_v8 = vadd.f32 %v2090_v11, %v1833_v56  ;;  %v2004_v18 = vpop.f32.mrf.mxu1  ;;  %7206 = vmatprep.subr.bf16.mxu0 %v8057_v0  ;;  %7155 = vmatpush3.bf16.msra.mxu1 %v7826_v37 }
 0x20c   : > { %v1797_v58 = vsel %vm887_vm4, %v1794_v39, %v1796_v54  ;;  %v2091_v60 = vrot.slane %v2004_v18, 3  ;;  %7156 = vmatprep.subr.bf16.mxu1 %v8057_v0 }
 0x20d   : > { %v1834_v15 = vadd.f32 %v1797_v58, %v8696_v52  ;;  %v1714_v62 = vpop.f32.mrf.mxu0  ;;  %7137 = vmatmul.mubr.bf16.gmra.mxu0 %v8693_v22  ;;  %v6947_v1 = vpop.f32.mrf.mxu1 }
 0x20e   : > { %v1798_v3 = vrot.slane %v1714_v62, 2  ;;  %v2092_v50 = vsel %vm1183_vm5, %v2089_v55, %v2091_v60  ;;  %7140 = vmatprep.mubr.msk.bf16.mxu0 %vm8059_vm0, %v8057_v0  ;;  %7207 = vmatpush3.bf16.msra.mxu0 %v7828_v23  ;;  %v7834_v23 = vld [vmem:[#allocation8] sm:$0xff]  }
 0x20f   : > { %v6890_v5 = vpop.f32.mrf.mxu0  ;;  %v8820_v6 = vadd.f32 %v2092_v50, %v1834_v15  ;;  %v2009_v9 = vpop.f32.mrf.mxu1  ;;  %7208 = vmatprep.subr.bf16.mxu0 %v8057_v0  ;;  %7157 = vmatpush3.bf16.msra.mxu1 %v7830_v35 }
 0x210   : > { %v1799_v52 = vsel %vm887_vm4, %v1796_v54, %v1798_v3  ;;  %v2093_v27 = vrot.slane %v2009_v9, 3  ;;  %7158 = vmatprep.subr.bf16.mxu1 %v8057_v0 }
 0x211   : > { %v1835_v22 = vadd.f32 %v1799_v52, %v8706_v2  ;;  %v1717_v12 = vpop.f32.mrf.mxu0  ;;  %v6950_v44 = vpop.f32.mrf.mxu1  ;;  %v7833_v52 = vld [vmem:[#allocation8 + $0x50] sm:$0xff]  }
 0x212   : > { %v1800_v4 = vrot.slane %v1717_v12, 2  ;;  %v2094_v20 = vsel %vm1183_vm5, %v2091_v60, %v2093_v27  ;;  %7209 = vmatpush3.bf16.msra.mxu0 %v7829_v49 }
 0x213   : > { %v6891_v28 = vpop.f32.mrf.mxu0  ;;  %v8826_v26 = vadd.f32 %v2094_v20, %v1835_v22  ;;  %v2012_v46 = vpop.f32.mrf.mxu1  ;;  %7210 = vmatprep.subr.bf16.mxu0 %v8057_v0  ;;  %7159 = vmatpush3.bf16.msra.mxu1 %v7834_v23 }
 0x214   : > { %v1801_v61 = vsel %vm887_vm4, %v1798_v3, %v1800_v4  ;;  %v2095_v34 = vrot.slane %v2012_v46, 3  ;;  %v7836_v28 = vld [vmem:[#allocation2] sm:$0xff]   ;;  %7264 = vmatprep.subr.bf16.mxu1 %v8057_v0 }
 0x215   : > { %v1836_v33 = vadd.f32 %v1801_v61, %v8714_v31  ;;  %v1722_v36 = vpop.f32.mrf.mxu0  ;;  %7141 = vmatmul.mubr.bf16.gmra.mxu0 %v8711_v29  ;;  %v6951_v2 = vpop.f32.mrf.mxu1 }
 0x216   : > { %v1802_v45 = vrot.slane %v1722_v36, 2  ;;  %v2096_v14 = vsel %vm1183_vm5, %v2093_v27, %v2095_v34  ;;  %7220 = vmatprep.mubr.msk.bf16.mxu0 %vm8059_vm0, %v8057_v0  ;;  %7211 = vmatpush3.bf16.msra.mxu0 %v7831_v48  ;;  %v7837_v36 = vld [vmem:[#allocation8 + $0x40] sm:$0xff]  }
 0x217   : > { %v6894_v21 = vpop.f32.mrf.mxu0  ;;  %v8835_v13 = vadd.f32 %v2096_v14, %v1836_v33  ;;  %v2017_v57 = vpop.f32.mrf.mxu1  ;;  %7212 = vmatprep.subr.bf16.mxu0 %v8057_v0  ;;  %7161 = vmatmul.mubr.bf16.vlgmr.msra.gmra.mxu1 %v7836_v28 }
 0x218   : > { %v1803_v39 = vsel %vm887_vm4, %v1800_v4, %v1802_v45  ;;  %v2097_v31 = vrot.slane %v2017_v57, 3  ;;  %7164 = vmatprep.mubr.msk.bf16.mxu1 %vm8059_vm0, %v8057_v0 }
 0x219   : > { %v1837_v29 = vadd.f32 %v1803_v39, %v8724_v63  ;;  %v1725_v40 = vpop.f32.mrf.mxu0  ;;  %v6954_v17 = vpop.f32.mrf.mxu1 }
 0x21a   : > { %v1804_v42 = vrot.slane %v1725_v40, 2  ;;  %v2098_v55 = vsel %vm1183_vm5, %v2095_v34, %v2097_v31  ;;  %7213 = vmatpush3.bf16.msra.mxu0 %v7832_v7 }
 0x21b   : > { %v6895_v56 = vpop.f32.mrf.mxu0  ;;  %v8842_v16 = vadd.f32 %v2098_v55, %v1837_v29  ;;  %v2020_v41 = vpop.f32.mrf.mxu1  ;;  %7214 = vmatprep.subr.bf16.mxu0 %v8057_v0 }
 0x21c   : > { %v1805_v54 = vsel %vm887_vm4, %v1802_v45, %v1804_v42  ;;  %v2099_v11 = vrot.slane %v2020_v41, 3 }
 0x21d   : > { %v1838_v63 = vadd.f32 %v1805_v54, %v8728_v53  ;;  %v1730_v24 = vpop.f32.mrf.mxu0  ;;  %v6955_v18 = vpop.f32.mrf.mxu1 }
 0x21e   : > { %v1806_v58 = vrot.slane %v1730_v24, 2  ;;  %v2100_v60 = vsel %vm1183_vm5, %v2097_v31, %v2099_v11  ;;  %7215 = vmatpush3.bf16.msra.mxu0 %v7833_v52 }
 0x21f   : > { %v6898_v15 = vpop.f32.mrf.mxu0  ;;  %v8848_v62 = vadd.f32 %v2100_v60, %v1838_v63  ;;  %v2025_v1 = vpop.f32.mrf.mxu1  ;;  %7216 = vmatprep.subr.bf16.mxu0 %v8057_v0 }
 0x220   : > { %v1807_v3 = vsel %vm887_vm4, %v1804_v42, %v1806_v58  ;;  %v2101_v50 = vrot.slane %v2025_v1, 3 }
 0x221   : > { %v1839_v5 = vadd.f32 %v1807_v3, %v8733_v59  ;;  %v1733_v53 = vpop.f32.mrf.mxu0  ;;  %v6958_v9 = vpop.f32.mrf.mxu1  ;;  %v7835_v59 = vld [vmem:[#allocation8 + $0x48] sm:$0xff]  }
 0x222   : > { %v2102_v27 = vsel %vm1183_vm5, %v2099_v11, %v2101_v50  ;;  %7217 = vmatpush3.bf16.msra.mxu0 %v7835_v59  ;;  %v7838_v53 = vld [vmem:[#allocation8 + $0xb8] sm:$0xff]  }
 0x223   : > { %v6899_v22 = vpop.f32.mrf.mxu0  ;;  %v8855_v12 = vadd.f32 %v2102_v27, %v1839_v5  ;;  %v2028_v44 = vpop.f32.mrf.mxu1  ;;  %7218 = vmatprep.subr.bf16.mxu0 %v8057_v0  ;;  %7265 = vmatpush3.bf16.msra.mxu1 %v7838_v53 }
 0x224   : > { %7266 = vmatprep.subr.bf16.mxu1 %v8057_v0 }
 0x225   : > { %v1737_v4 = vpop.f32.mrf.mxu0  ;;  %v6959_v20 = vpop.f32.mrf.mxu1 }
 0x226   : > { %7219 = vmatpush3.bf16.msra.mxu0 %v7837_v36 }
 0x227   : > { %v6902_v46 = vpop.f32.mrf.mxu0  ;;  %v2032_v61 = vpop.f32.mrf.mxu1  ;;  %7324 = vmatprep.subr.bf16.mxu0 %v8057_v0 }
 0x229   : > { %v1739_v34 = vpop.f32.mrf.mxu0  ;;  %v6962_v33 = vpop.f32.mrf.mxu1  ;;  %7221 = vmatmul.mubr.bf16.vlgmr.msra.gmra.mxu0 %v7836_v28 }
 0x22a   : > { %7224 = vmatprep.mubr.msk.bf16.mxu0 %vm8059_vm0, %v8057_v0 }
 0x22b   : > { %v6903_v2 = vpop.f32.mrf.mxu0  ;;  %v2034_v49 = vpop.f32.mrf.mxu1 }
 0x22d   : > { %v2250_v45 = vpop.f32.mrf.mxu0  ;;  %v6963_v14 = vpop.f32.mrf.mxu1 }
 0x22f   : > { %v6982_v37 = vpop.f32.mrf.mxu0  ;;  %v2545_v21 = vpop.f32.mrf.mxu1 }
 0x231   : > { %v2252_v57 = vpop.f32.mrf.mxu0  ;;  %v7042_v39 = vpop.f32.mrf.mxu1 }
 0x233   : > { %v6983_v31 = vpop.f32.mrf.mxu0  ;;  %v2547_v29 = vpop.f32.mrf.mxu1 }
 0x235   : > { %v2256_v40 = vpop.f32.mrf.mxu0  ;;  %v7043_v17 = vpop.f32.mrf.mxu1 }
 0x237   : > { %v6986_v48 = vpop.f32.mrf.mxu0  ;;  %v2551_v42 = vpop.f32.mrf.mxu1 }
 0x239   : > { %v2258_v55 = vpop.f32.mrf.mxu0  ;;  %v7046_v56 = vpop.f32.mrf.mxu1 }
 0x23b   : > { %v6987_v41 = vpop.f32.mrf.mxu0  ;;  %v2553_v54 = vpop.f32.mrf.mxu1 }
 0x23d   : > { %v2262_v11 = vpop.f32.mrf.mxu0  ;;  %v7047_v63 = vpop.f32.mrf.mxu1 }
 0x23e   : > { %v2365_v60 = vrot.slane %v2262_v11, 1 }
 0x23f   : > { %v6990_v24 = vpop.f32.mrf.mxu0  ;;  %v2557_v18 = vpop.f32.mrf.mxu1 }
 0x240   : > { %v2660_v1 = vrot.slane %v2557_v18, 2 }
 0x241   : > { %v2265_v7 = vpop.f32.mrf.mxu0  ;;  %v7050_v58 = vpop.f32.mrf.mxu1 }
 0x242   : > { %v2366_v15 = vrot.slane %v2265_v7, 1  ;;  %v7840_v7 = vld [vmem:[#allocation8 + $0xb0] sm:$0xff]  }
 0x243   : > { %v6991_v35 = vpop.f32.mrf.mxu0  ;;  %v2560_v3 = vpop.f32.mrf.mxu1  ;;  %7267 = vmatpush3.bf16.msra.mxu1 %v7840_v7 }
 0x244   : > { %v2367_v50 = vsel %vm1479_vm6, %v2365_v60, %v2366_v15  ;;  %v2661_v5 = vrot.slane %v2560_v3, 2  ;;  %7268 = vmatprep.subr.bf16.mxu1 %v8057_v0 }
 0x245   : > { %v2414_v9 = vadd.f32 %v2367_v50, %v8751_v38  ;;  %v2270_v52 = vpop.f32.mrf.mxu0  ;;  %v7051_v27 = vpop.f32.mrf.mxu1 }
 0x246   : > { %v2368_v22 = vrot.slane %v2270_v52, 1  ;;  %v2662_v44 = vsel %vm887_vm4, %v2660_v1, %v2661_v5 }
 0x247   : > { %v6994_v23 = vpop.f32.mrf.mxu0  ;;  %v8868_v4 = vadd.f32 %v2662_v44, %v2414_v9  ;;  %v2565_v20 = vpop.f32.mrf.mxu1 }
 0x248   : > { %v2369_v59 = vsel %vm1479_vm6, %v2366_v15, %v2368_v22  ;;  %v2663_v28 = vrot.slane %v2565_v20, 2 }
 0x249   : > { %v2415_v46 = vadd.f32 %v2369_v59, %v8756_v30  ;;  %v2273_v61 = vpop.f32.mrf.mxu0  ;;  %v7054_v34 = vpop.f32.mrf.mxu1 }
 0x24a   : > { %v2370_v38 = vrot.slane %v2273_v61, 1  ;;  %v2664_v33 = vsel %vm887_vm4, %v2661_v5, %v2663_v28 }
 0x24b   : > { %v6995_v36 = vpop.f32.mrf.mxu0  ;;  %v8874_v2 = vadd.f32 %v2664_v33, %v2415_v46  ;;  %v2568_v49 = vpop.f32.mrf.mxu1  ;;  %v7842_v46 = vld [vmem:[#allocation8 + $0xa8] sm:$0xff]  }
 0x24c   : > { %v2371_v45 = vsel %vm1479_vm6, %v2368_v22, %v2370_v38  ;;  %v2665_v14 = vrot.slane %v2568_v49, 2  ;;  %7269 = vmatpush3.bf16.msra.mxu1 %v7842_v46 }
 0x24d   : > { %v2416_v37 = vadd.f32 %v2371_v45, %v8764_v32  ;;  %v2278_v21 = vpop.f32.mrf.mxu0  ;;  %v7055_v57 = vpop.f32.mrf.mxu1  ;;  %7270 = vmatprep.subr.bf16.mxu1 %v8057_v0 }
 0x24e   : > { %v2372_v39 = vrot.slane %v2278_v21, 1  ;;  %v2666_v31 = vsel %vm887_vm4, %v2663_v28, %v2665_v14 }
 0x24f   : > { %v6998_v30 = vpop.f32.mrf.mxu0  ;;  %v8879_v29 = vadd.f32 %v2666_v31, %v2416_v37  ;;  %v2573_v40 = vpop.f32.mrf.mxu1 }
 0x250   : > { %v2373_v17 = vsel %vm1479_vm6, %v2370_v38, %v2372_v39  ;;  %v2667_v48 = vrot.slane %v2573_v40, 2 }
 0x251   : > { %v2417_v42 = vadd.f32 %v2373_v17, %v8770_v10  ;;  %v2281_v55 = vpop.f32.mrf.mxu0  ;;  %v7058_v56 = vpop.f32.mrf.mxu1 }
 0x252   : > { %v2374_v41 = vrot.slane %v2281_v55, 1  ;;  %v2668_v54 = vsel %vm887_vm4, %v2665_v14, %v2667_v48  ;;  %v7845_v55 = vld [vmem:[#allocation8 + $0xa0] sm:$0xff]  }
 0x253   : > { %v6999_v32 = vpop.f32.mrf.mxu0  ;;  %v8884_v11 = vadd.f32 %v2668_v54, %v2417_v42  ;;  %v2576_v63 = vpop.f32.mrf.mxu1  ;;  %7271 = vmatpush3.bf16.msra.mxu1 %v7845_v55  ;;  %v7858_v55 = vld [vmem:[#allocation8 + $0xd8] sm:$0xff]  }
 0x254   : > { %v2375_v24 = vsel %vm1479_vm6, %v2372_v39, %v2374_v41  ;;  %v2669_v18 = vrot.slane %v2576_v63, 2  ;;  %v7851_v32 = vld [vmem:[#allocation8 + $0xf8] sm:$0xff]   ;;  %7272 = vmatprep.subr.bf16.mxu1 %v8057_v0 }
 0x255   : > { %v2418_v58 = vadd.f32 %v2375_v24, %v8778_v51  ;;  %v2286_v60 = vpop.f32.mrf.mxu0  ;;  %v7059_v15 = vpop.f32.mrf.mxu1  ;;  %v7847_v24 = vld [vmem:[#allocation8 + $0x98] sm:$0xff]   ;;  %7325 = vmatpush3.bf16.msra.mxu0 %v7851_v32 }
 0x256   : > { %v2376_v1 = vrot.slane %v2286_v60, 1  ;;  %v2670_v10 = vsel %vm887_vm4, %v2667_v48, %v2669_v18  ;;  %v7852_v60 = vld [vmem:[#allocation8 + $0xf0] sm:$0xff]   ;;  %7326 = vmatprep.subr.bf16.mxu0 %v8057_v0 }
 0x257   : > { %v7002_v35 = vpop.f32.mrf.mxu0  ;;  %v8889_v3 = vadd.f32 %v2670_v10, %v2418_v58  ;;  %v2581_v50 = vpop.f32.mrf.mxu1  ;;  %7273 = vmatpush3.bf16.msra.mxu1 %v7847_v24  ;;  %v7859_v24 = vld [vmem:[#allocation8 + $0xd0] sm:$0xff]  }
 0x258   : > { %v2377_v5 = vsel %vm1479_vm6, %v2374_v41, %v2376_v1  ;;  %v2671_v53 = vrot.slane %v2581_v50, 2  ;;  %7274 = vmatprep.subr.bf16.mxu1 %v8057_v0 }
 0x259   : > { %v2419_v9 = vadd.f32 %v2377_v5, %v8783_v19  ;;  %v2289_v52 = vpop.f32.mrf.mxu0  ;;  %v7062_v27 = vpop.f32.mrf.mxu1  ;;  %7327 = vmatpush3.bf16.msra.mxu0 %v7852_v60 }
 0x25a   : > { %v2378_v51 = vrot.slane %v2289_v52, 1  ;;  %v2672_v22 = vsel %vm887_vm4, %v2669_v18, %v2671_v53  ;;  %7328 = vmatprep.subr.bf16.mxu0 %v8057_v0 }
 0x25b   : > { %v7003_v44 = vpop.f32.mrf.mxu0  ;;  %v8895_v23 = vadd.f32 %v2672_v22, %v2419_v9  ;;  %v2584_v20 = vpop.f32.mrf.mxu1 }
 0x25c   : > { %v2379_v59 = vsel %vm1479_vm6, %v2376_v1, %v2378_v51  ;;  %v2673_v28 = vrot.slane %v2584_v20, 2 }
 0x25d   : > { %v2420_v61 = vadd.f32 %v2379_v59, %v8792_v25  ;;  %v2294_v34 = vpop.f32.mrf.mxu0  ;;  %v7063_v38 = vpop.f32.mrf.mxu1  ;;  %v7854_v59 = vld [vmem:[#allocation8 + $0xe8] sm:$0xff]  }
 0x25e   : > { %v2380_v33 = vrot.slane %v2294_v34, 1  ;;  %v2674_v19 = vsel %vm887_vm4, %v2671_v53, %v2673_v28  ;;  %v7850_v53 = vld [vmem:[#allocation8 + $0x90] sm:$0xff]   ;;  %7329 = vmatpush3.bf16.msra.mxu0 %v7854_v59 }
 0x25f   : > { %v7006_v36 = vpop.f32.mrf.mxu0  ;;  %v8900_v49 = vadd.f32 %v2674_v19, %v2420_v61  ;;  %v2589_v45 = vpop.f32.mrf.mxu1  ;;  %7275 = vmatpush3.bf16.msra.mxu1 %v7850_v53  ;;  %v7855_v61 = vld [vmem:[#allocation8 + $0x88] sm:$0xff]   ;;  %v7856_v19 = vld [vmem:[#allocation8 + $0xe0] sm:$0xff]   ;;  %7330 = vmatprep.subr.bf16.mxu0 %v8057_v0 }
 0x260   : > { %v2381_v14 = vsel %vm1479_vm6, %v2378_v51, %v2380_v33  ;;  %v2675_v37 = vrot.slane %v2589_v45, 2  ;;  %7276 = vmatprep.subr.bf16.mxu1 %v8057_v0 }
 0x261   : > { %v2421_v21 = vadd.f32 %v2381_v14, %v8797_v43  ;;  %v2297_v57 = vpop.f32.mrf.mxu0  ;;  %v7066_v39 = vpop.f32.mrf.mxu1 }
 0x262   : > { %v2382_v25 = vrot.slane %v2297_v57, 1  ;;  %v2676_v31 = vsel %vm887_vm4, %v2673_v28, %v2675_v37  ;;  %7331 = vmatpush3.bf16.msra.mxu0 %v7856_v19 }
 0x263   : > { %v7007_v30 = vpop.f32.mrf.mxu0  ;;  %v8906_v40 = vadd.f32 %v2676_v31, %v2421_v21  ;;  %v2592_v17 = vpop.f32.mrf.mxu1  ;;  %7277 = vmatpush3.bf16.msra.mxu1 %v7855_v61  ;;  %7332 = vmatprep.subr.bf16.mxu0 %v8057_v0 }
 0x264   : > { %v2383_v48 = vsel %vm1479_vm6, %v2380_v33, %v2382_v25  ;;  %v2677_v42 = vrot.slane %v2592_v17, 2  ;;  %7278 = vmatprep.subr.bf16.mxu1 %v8057_v0 }
 0x265   : > { %v2422_v56 = vadd.f32 %v2383_v48, %v8806_v47  ;;  %v2302_v41 = vpop.f32.mrf.mxu0  ;;  %v7067_v54 = vpop.f32.mrf.mxu1 }
 0x266   : > { %v2384_v63 = vrot.slane %v2302_v41, 1  ;;  %v2678_v43 = vsel %vm887_vm4, %v2675_v37, %v2677_v42  ;;  %7333 = vmatpush3.bf16.msra.mxu0 %v7858_v55 }
 0x267   : > { %v7010_v18 = vpop.f32.mrf.mxu0  ;;  %v8911_v7 = vadd.f32 %v2678_v43, %v2422_v56  ;;  %v2597_v58 = vpop.f32.mrf.mxu1  ;;  %v7860_v56 = vld [vmem:[#allocation8 + $0x80] sm:$0xff]   ;;  %7334 = vmatprep.subr.bf16.mxu0 %v8057_v0 }
 0x268   : > { %v2385_v15 = vsel %vm1479_vm6, %v2382_v25, %v2384_v63  ;;  %v2679_v1 = vrot.slane %v2597_v58, 2  ;;  %7279 = vmatpush3.bf16.msra.mxu1 %v7860_v56 }
 0x269   : > { %v2423_v47 = vadd.f32 %v2385_v15, %v8811_v8  ;;  %v2305_v10 = vpop.f32.mrf.mxu0  ;;  %v7070_v35 = vpop.f32.mrf.mxu1  ;;  %7384 = vmatprep.subr.bf16.mxu1 %v8057_v0 }
 0x26a   : > { %v2386_v50 = vrot.slane %v2305_v10, 1  ;;  %v2680_v5 = vsel %vm887_vm4, %v2677_v42, %v2679_v1  ;;  %7335 = vmatpush3.bf16.msra.mxu0 %v7859_v24 }
 0x26b   : > { %v7011_v9 = vpop.f32.mrf.mxu0  ;;  %v8918_v52 = vadd.f32 %v2680_v5, %v2423_v47  ;;  %v2600_v27 = vpop.f32.mrf.mxu1  ;;  %7336 = vmatprep.subr.bf16.mxu0 %v8057_v0 }
 0x26c   : > { %v2387_v51 = vsel %vm1479_vm6, %v2384_v63, %v2386_v50  ;;  %v2681_v22 = vrot.slane %v2600_v27, 2 }
 0x26d   : > { %v2424_v8 = vadd.f32 %v2387_v51, %v8820_v6  ;;  %v2310_v44 = vpop.f32.mrf.mxu0  ;;  %v7071_v20 = vpop.f32.mrf.mxu1 }
 0x26e   : > { %v2388_v28 = vrot.slane %v2310_v44, 1  ;;  %v2682_v46 = vsel %vm887_vm4, %v2679_v1, %v2681_v22 }
 0x26f   : > { %v7014_v34 = vpop.f32.mrf.mxu0  ;;  %v8925_v38 = vadd.f32 %v2682_v46, %v2424_v8  ;;  %v2605_v33 = vpop.f32.mrf.mxu1 }
 0x270   : > { %v2389_v36 = vsel %vm1479_vm6, %v2386_v50, %v2388_v28  ;;  %v2683_v45 = vrot.slane %v2605_v33, 2 }
 0x271   : > { %v2425_v6 = vadd.f32 %v2389_v36, %v8826_v26  ;;  %v2313_v14 = vpop.f32.mrf.mxu0  ;;  %v7074_v37 = vpop.f32.mrf.mxu1 }
 0x272   : > { %v2390_v21 = vrot.slane %v2313_v14, 1  ;;  %v2684_v57 = vsel %vm887_vm4, %v2681_v22, %v2683_v45 }
 0x273   : > { %v7015_v39 = vpop.f32.mrf.mxu0  ;;  %v8932_v25 = vadd.f32 %v2684_v57, %v2425_v6  ;;  %v2608_v31 = vpop.f32.mrf.mxu1 }
 0x274   : > { %v2391_v30 = vsel %vm1479_vm6, %v2388_v28, %v2390_v21  ;;  %v2685_v17 = vrot.slane %v2608_v31, 2  ;;  %v7863_v28 = vld [vmem:[#allocation8 + $0xc0] sm:$0xff]  }
 0x275   : > { %v2426_v26 = vadd.f32 %v2391_v30, %v8835_v13  ;;  %v2318_v48 = vpop.f32.mrf.mxu0  ;;  %v7075_v42 = vpop.f32.mrf.mxu1 }
 0x276   : > { %v2392_v41 = vrot.slane %v2318_v48, 1  ;;  %v2686_v54 = vsel %vm887_vm4, %v2683_v45, %v2685_v17 }
 0x277   : > { %v7018_v32 = vpop.f32.mrf.mxu0  ;;  %v8939_v63 = vadd.f32 %v2686_v54, %v2426_v26  ;;  %v2613_v43 = vpop.f32.mrf.mxu1 }
 0x278   : > { %v2393_v18 = vsel %vm1479_vm6, %v2390_v21, %v2392_v41  ;;  %v2687_v58 = vrot.slane %v2613_v43, 2  ;;  %v8962_v32 = vld [vmem:[#allocation6] ss:$0 sm:$0xff] }
 0x279   : > { %v2427_v13 = vadd.f32 %v2393_v18, %v8842_v16  ;;  %v2321_v60 = vpop.f32.mrf.mxu0  ;;  %v7078_v15 = vpop.f32.mrf.mxu1  ;;  %v7862_v16 = vld [vmem:[#allocation8 + $0xc8] sm:$0xff]  }
 0x27a   : > { %v2394_v1 = vrot.slane %v2321_v60, 1  ;;  %v2688_v47 = vsel %vm887_vm4, %v2685_v17, %v2687_v58  ;;  %7337 = vmatpush3.bf16.msra.mxu0 %v7862_v16 }
 0x27b   : > { %v7019_v10 = vpop.f32.mrf.mxu0  ;;  %v8946_v35 = vadd.f32 %v2688_v47, %v2427_v13  ;;  %v2616_v50 = vpop.f32.mrf.mxu1  ;;  %7338 = vmatprep.subr.bf16.mxu0 %v8057_v0 }
 0x27c   : > { %v2395_v5 = vsel %vm1479_vm6, %v2392_v41, %v2394_v1  ;;  %v2689_v53 = vrot.slane %v2616_v50, 2 }
 0x27d   : > { %v2428_v9 = vadd.f32 %v2395_v5, %v8848_v62  ;;  %v2326_v27 = vpop.f32.mrf.mxu0  ;;  %v7079_v51 = vpop.f32.mrf.mxu1 }
 0x27e   : > { %v2396_v22 = vrot.slane %v2326_v27, 1  ;;  %v2690_v8 = vsel %vm887_vm4, %v2687_v58, %v2689_v53  ;;  %7339 = vmatpush3.bf16.msra.mxu0 %v7863_v28 }
 0x27f   : > { %v7022_v44 = vpop.f32.mrf.mxu0  ;;  %v8952_v20 = vadd.f32 %v2690_v8, %v2428_v9  ;;  %v2621_v59 = vpop.f32.mrf.mxu1  ;;  %7444 = vmatprep.subr.bf16.mxu0 %v8057_v0 }
 0x280   : > { %v2397_v46 = vsel %vm1479_vm6, %v2394_v1, %v2396_v22  ;;  %v2691_v61 = vrot.slane %v2621_v59, 2 }
 0x281   : > { %v2429_v34 = vadd.f32 %v2397_v46, %v8855_v12  ;;  %v2329_v62 = vpop.f32.mrf.mxu0  ;;  %v7082_v33 = vpop.f32.mrf.mxu1 }
 0x282   : > { %v2692_v19 = vsel %vm887_vm4, %v2689_v53, %v2691_v61 }
 0x283   : > { %v7023_v36 = vpop.f32.mrf.mxu0  ;;  %v8958_v45 = vadd.f32 %v2692_v19, %v2429_v34  ;;  %v2624_v6 = vpop.f32.mrf.mxu1 }
 0x285   : > { %v2840_v14 = vpop.f32.mrf.mxu0  ;;  %v7083_v37 = vpop.f32.mrf.mxu1 }
 0x287   : > { %v7102_v21 = vpop.f32.mrf.mxu0 }
 0x289   : > { %v2842_v57 = vpop.f32.mrf.mxu0 }
 0x28b   : > { %v7103_v39 = vpop.f32.mrf.mxu0 }
 0x28d   : > { %v2846_v31 = vpop.f32.mrf.mxu0 }
 0x28f   : > { %v7106_v30 = vpop.f32.mrf.mxu0 }
 0x291   : > { %v2848_v17 = vpop.f32.mrf.mxu0 }
 0x293   : > { %v7107_v12 = vpop.f32.mrf.mxu0 }
 0x295   : > { %v2852_v26 = vpop.f32.mrf.mxu0 }
 0x296   : > { %v2955_v55 = vrot.slane %v2852_v26, 3 }
 0x297   : > { %v7110_v48 = vpop.f32.mrf.mxu0 }
 0x299   : > { %v2855_v42 = vpop.f32.mrf.mxu0 }
 0x29a   : > { %v2956_v56 = vrot.slane %v2855_v42, 3 }
 0x29b   : > { %v7111_v41 = vpop.f32.mrf.mxu0 }
 0x29c   : > { %v2957_v54 = vsel %vm1183_vm5, %v2955_v55, %v2956_v56 }
 0x29d   : > { %v3004_v43 = vadd.f32 %v2957_v54, %v8868_v4  ;;  %v2860_v24 = vpop.f32.mrf.mxu0 }
 0x29e   : > { %v2958_v18 = vrot.slane %v2860_v24, 3 }
 0x29f   : > { %3020 = vst [vmem:[#allocation3] sm:$0xff] %v3004_v43  ;;  %v3051_v58 = vadd.f32 %v8962_v32, %v3004_v43  ;;  %v7114_v13 = vpop.f32.mrf.mxu0 }
 0x2a0   : > { %v2959_v60 = vsel %vm1183_vm5, %v2956_v56, %v2958_v18 }
 0x2a1   : > { %vm3059_vm7 = vcmp.ge.f32.partialorder %v3051_v58, 0.0  ;;  %v3067_v15 = vmul.f32 0.2, %v3051_v58  ;;  %v3005_v1 = vadd.f32 %v2959_v60, %v8874_v2  ;;  %v2863_v47 = vpop.f32.mrf.mxu0 }
 0x2a2   : > { %v2960_v10 = vrot.slane %v2863_v47, 3 }
 0x2a3   : > { %v3075_v50 = vsel %vm3059_vm7, %v3051_v58, %v3067_v15  ;;  %3021 = vst [vmem:[#allocation3 + $0x8] sm:$0xff] %v3005_v1  ;;  %v7115_v5 = vpop.f32.mrf.mxu0 }
 0x2a4   : > { %v3083_v53 = vmul.f32 1.4142135, %v3075_v50  ;;  %v2961_v4 = vsel %vm1183_vm5, %v2958_v18, %v2960_v10 }
 0x2a5   : > { %v3006_v9 = vadd.f32 %v2961_v4, %v8879_v29  ;;  %v2868_v27 = vpop.f32.mrf.mxu0 }
 0x2a6   : > { %v6212_v51 = vpack.c.bf16 %v3083_v53, %v3083_v53  ;;  %v2962_v16 = vrot.slane %v2868_v27, 3 }
 0x2a7   : > { %3022 = vst [vmem:[#allocation3 + $0x10] sm:$0xff] %v3006_v9  ;;  %v3052_v22 = vadd.f32 %v8962_v32, %v3006_v9  ;;  %v7118_v8 = vpop.f32.mrf.mxu0 }
 0x2a8   : > { %v3123_v44 = vrot.slane %v6212_v51, 7  ;;  %v2963_v2 = vsel %vm1183_vm5, %v2960_v10, %v2962_v16 }
 0x2a9   : > { %vm3060_vm8 = vcmp.ge.f32.partialorder %v3052_v22, 0.0  ;;  %v3068_v59 = vmul.f32 0.2, %v3052_v22  ;;  %v3007_v28 = vadd.f32 %v2963_v2, %v8884_v11  ;;  %v2871_v46 = vpop.f32.mrf.mxu0 }
 0x2aa   : > { %v3124_v61 = vrot.slane %v3123_v44, 4  ;;  %3155 = vst [vmem:[#allocation2 + $0x8] sm:$0xe] %v3123_v44  ;;  %v2964_v34 = vrot.slane %v2871_v46, 3 }
 0x2ab   : > { %v3076_v62 = vsel %vm3060_vm8, %v3052_v22, %v3068_v59  ;;  %3023 = vst [vmem:[#allocation3 + $0x18] sm:$0xff] %v3007_v28  ;;  %v7119_v29 = vpop.f32.mrf.mxu0 }
 0x2ac   : > { %3156 = vst [vmem:[#allocation2 + $0xc] sm:$0x1] %v3124_v61  ;;  %v3084_v33 = vmul.f32 1.4142135, %v3076_v62  ;;  %v2965_v19 = vsel %vm1183_vm5, %v2962_v16, %v2964_v34 }
 0x2ad   : > { %v3008_v36 = vadd.f32 %v2965_v19, %v8889_v3  ;;  %v2876_v6 = vpop.f32.mrf.mxu0 }
 0x2ae   : > { %v6213_v14 = vpack.c.bf16 %v3084_v33, %v3084_v33  ;;  %v2966_v37 = vrot.slane %v2876_v6, 3 }
 0x2af   : > { %3024 = vst [vmem:[#allocation3 + $0x20] sm:$0xff] %v3008_v36  ;;  %v3053_v21 = vadd.f32 %v8962_v32, %v3008_v36  ;;  %v7122_v11 = vpop.f32.mrf.mxu0 }
 0x2b0   : > { %v3125_v57 = vrot.slane %v6213_v14, 7  ;;  %v2967_v39 = vsel %vm1183_vm5, %v2964_v34, %v2966_v37 }
 0x2b1   : > { %vm3061_vm9 = vcmp.ge.f32.partialorder %v3053_v21, 0.0  ;;  %v3069_v31 = vmul.f32 0.2, %v3053_v21  ;;  %v3009_v30 = vadd.f32 %v2967_v39, %v8895_v23  ;;  %v2879_v17 = vpop.f32.mrf.mxu0 }
 0x2b2   : > { %v3126_v12 = vrot.slane %v3125_v57, 4  ;;  %3157 = vst [vmem:[#allocation2 + $0x10] sm:$0xe] %v3125_v57  ;;  %v2968_v26 = vrot.slane %v2879_v17, 3 }
 0x2b3   : > { %v3077_v48 = vsel %vm3061_vm9, %v3053_v21, %v3069_v31  ;;  %3025 = vst [vmem:[#allocation3 + $0x28] sm:$0xff] %v3009_v30  ;;  %v7123_v3 = vpop.f32.mrf.mxu0  ;;  %v8978_v42 = vld [vmem:[#allocation2 + $0x8] sm:$0xff]  }
 0x2b4   : > { %3158 = vst [vmem:[#allocation2 + $0x14] sm:$0x1] %v3126_v12  ;;  %v3085_v55 = vmul.f32 1.4142135, %v3077_v48  ;;  %v2969_v56 = vsel %vm1183_vm5, %v2966_v37, %v2968_v26  ;;  %7165 = vmatmul.mubr.bf16.gmra.mxu1 %v8978_v42  ;;  %7225 = vmatmul.mubr.bf16.gmra.mxu0 %v8978_v42 }
 0x2b5   : > { %v3010_v41 = vadd.f32 %v2969_v56, %v8900_v49  ;;  %v2884_v54 = vpop.f32.mrf.mxu0  ;;  %7168 = vmatprep.mubr.msk.bf16.mxu1 %vm8059_vm0, %v8057_v0  ;;  %7228 = vmatprep.mubr.msk.bf16.mxu0 %vm8059_vm0, %v8057_v0 }
 0x2b6   : > { %v6214_v23 = vpack.c.bf16 %v3085_v55, %v3085_v55  ;;  %v2970_v43 = vrot.slane %v2884_v54, 3 }
 0x2b7   : > { %3026 = vst [vmem:[#allocation3 + $0x30] sm:$0xff] %v3010_v41  ;;  %v3054_v24 = vadd.f32 %v8962_v32, %v3010_v41  ;;  %v7126_v18 = vpop.f32.mrf.mxu0 }
 0x2b8   : > { %v3127_v58 = vrot.slane %v6214_v23, 7  ;;  %v2971_v49 = vsel %vm1183_vm5, %v2968_v26, %v2970_v43 }
 0x2b9   : > { %vm3062_vm10 = vcmp.ge.f32.partialorder %v3054_v24, 0.0  ;;  %v3070_v13 = vmul.f32 0.2, %v3054_v24  ;;  %v3011_v60 = vadd.f32 %v2971_v49, %v8906_v40  ;;  %v2887_v15 = vpop.f32.mrf.mxu0 }
 0x2ba   : > { %v3128_v1 = vrot.slane %v3127_v58, 4  ;;  %3159 = vst [vmem:[#allocation2 + $0x18] sm:$0xe] %v3127_v58  ;;  %v2972_v47 = vrot.slane %v2887_v15, 3 }
 0x2bb   : > { %v3078_v10 = vsel %vm3062_vm10, %v3054_v24, %v3070_v13  ;;  %3027 = vst [vmem:[#allocation3 + $0x38] sm:$0xff] %v3011_v60  ;;  %v7127_v50 = vpop.f32.mrf.mxu0  ;;  %v8991_v5 = vld [vmem:[#allocation2 + $0x10] sm:$0xff]  }
 0x2bc   : > { %3160 = vst [vmem:[#allocation2 + $0x1c] sm:$0x1] %v3128_v1  ;;  %v3086_v53 = vmul.f32 1.4142135, %v3078_v10  ;;  %v2973_v4 = vsel %vm1183_vm5, %v2970_v43, %v2972_v47  ;;  %7169 = vmatmul.mubr.bf16.gmra.mxu1 %v8991_v5  ;;  %7229 = vmatmul.mubr.bf16.gmra.mxu0 %v8991_v5 }
 0x2bd   : > { %v3012_v9 = vadd.f32 %v2973_v4, %v8911_v7  ;;  %v2892_v27 = vpop.f32.mrf.mxu0  ;;  %7172 = vmatprep.mubr.msk.bf16.mxu1 %vm8059_vm0, %v8057_v0  ;;  %7232 = vmatprep.mubr.msk.bf16.mxu0 %vm8059_vm0, %v8057_v0 }
 0x2be   : > { %v6215_v40 = vpack.c.bf16 %v3086_v53, %v3086_v53  ;;  %v2974_v51 = vrot.slane %v2892_v27, 3 }
 0x2bf   : > { %3028 = vst [vmem:[#allocation3 + $0x40] sm:$0xff] %v3012_v9  ;;  %v3055_v16 = vadd.f32 %v8962_v32, %v3012_v9  ;;  %v7130_v22 = vpop.f32.mrf.mxu0 }
 0x2c0   : > { %v3129_v8 = vrot.slane %v6215_v40, 7  ;;  %v2975_v7 = vsel %vm1183_vm5, %v2972_v47, %v2974_v51 }
 0x2c1   : > { %vm3063_vm11 = vcmp.ge.f32.partialorder %v3055_v16, 0.0  ;;  %v3071_v44 = vmul.f32 0.2, %v3055_v16  ;;  %v3013_v2 = vadd.f32 %v2975_v7, %v8918_v52  ;;  %v2895_v59 = vpop.f32.mrf.mxu0 }
 0x2c2   : > { %v3130_v28 = vrot.slane %v3129_v8, 4  ;;  %3161 = vst [vmem:[#allocation2 + $0x20] sm:$0xe] %v3129_v8  ;;  %v2976_v46 = vrot.slane %v2895_v59, 3 }
 0x2c3   : > { %v3079_v61 = vsel %vm3063_vm11, %v3055_v16, %v3071_v44  ;;  %3029 = vst [vmem:[#allocation3 + $0x48] sm:$0xff] %v3013_v2  ;;  %v7131_v34 = vpop.f32.mrf.mxu0  ;;  %v9004_v62 = vld [vmem:[#allocation2 + $0x18] sm:$0xff]  }
 0x2c4   : > { %3162 = vst [vmem:[#allocation2 + $0x24] sm:$0x1] %v3130_v28  ;;  %v3087_v29 = vmul.f32 1.4142135, %v3079_v61  ;;  %v2977_v33 = vsel %vm1183_vm5, %v2974_v51, %v2976_v46  ;;  %7173 = vmatmul.mubr.bf16.gmra.mxu1 %v9004_v62  ;;  %7233 = vmatmul.mubr.bf16.gmra.mxu0 %v9004_v62 }
 0x2c5   : > { %v3014_v19 = vadd.f32 %v2977_v33, %v8925_v38  ;;  %v2900_v36 = vpop.f32.mrf.mxu0  ;;  %7176 = vmatprep.mubr.msk.bf16.mxu1 %vm8059_vm0, %v8057_v0  ;;  %7236 = vmatprep.mubr.msk.bf16.mxu0 %vm8059_vm0, %v8057_v0 }
 0x2c6   : > { %v6216_v52 = vpack.c.bf16 %v3087_v29, %v3087_v29  ;;  %v2978_v6 = vrot.slane %v2900_v36, 3 }
 0x2c7   : > { %3030 = vst [vmem:[#allocation3 + $0x50] sm:$0xff] %v3014_v19  ;;  %v3056_v14 = vadd.f32 %v8962_v32, %v3014_v19  ;;  %v7134_v37 = vpop.f32.mrf.mxu0 }
 0x2c8   : > { %v3131_v21 = vrot.slane %v6216_v52, 7  ;;  %v2979_v38 = vsel %vm1183_vm5, %v2976_v46, %v2978_v6 }
 0x2c9   : > { %vm3064_vm12 = vcmp.ge.f32.partialorder %v3056_v14, 0.0  ;;  %v3072_v11 = vmul.f32 0.2, %v3056_v14  ;;  %v3015_v57 = vadd.f32 %v2979_v38, %v8932_v25  ;;  %v2903_v39 = vpop.f32.mrf.mxu0 }
 0x2ca   : > { %v3132_v31 = vrot.slane %v3131_v21, 4  ;;  %3163 = vst [vmem:[#allocation2 + $0x28] sm:$0xe] %v3131_v21  ;;  %v2980_v30 = vrot.slane %v2903_v39, 3  ;;  %v7864_v39 = vld [vmem:[#allocation8 + $0x138] sm:$0xff]  }
 0x2cb   : > { %v3080_v17 = vsel %vm3064_vm12, %v3056_v14, %v3072_v11  ;;  %3031 = vst [vmem:[#allocation3 + $0x58] sm:$0xff] %v3015_v57  ;;  %v7135_v12 = vpop.f32.mrf.mxu0  ;;  %v9017_v26 = vld [vmem:[#allocation2 + $0x20] sm:$0xff]   ;;  %v9083_v57 = vld [vmem:[#allocation2 + $0x50] sm:$0xff]  }
 0x2cc   : > { %3164 = vst [vmem:[#allocation2 + $0x2c] sm:$0x1] %v3132_v31  ;;  %v3088_v48 = vmul.f32 1.4142135, %v3080_v17  ;;  %v2981_v3 = vsel %vm1183_vm5, %v2978_v6, %v2980_v30  ;;  %7177 = vmatmul.mubr.bf16.gmra.mxu1 %v9017_v26  ;;  %7237 = vmatmul.mubr.bf16.gmra.mxu0 %v9017_v26  ;;  %v9067_v6 = vld [vmem:[#allocation2 + $0x48] sm:$0xff]   ;;  %v7870_v31 = vld [vmem:[#allocation8 + $0x178] sm:$0xff]  }
 0x2cd   : > { %v3016_v55 = vadd.f32 %v2981_v3, %v8939_v63  ;;  %v2908_v56 = vpop.f32.mrf.mxu0  ;;  %7180 = vmatprep.mubr.msk.bf16.mxu1 %vm8059_vm0, %v8057_v0  ;;  %7240 = vmatprep.mubr.msk.bf16.mxu0 %vm8059_vm0, %v8057_v0  ;;  %v7865_v17 = vld [vmem:[#allocation8 + $0x130] sm:$0xff]   ;;  %v7872_v3 = vld [vmem:[#allocation8 + $0x168] sm:$0xff]  }
 0x2ce   : > { %v6217_v25 = vpack.c.bf16 %v3088_v48, %v3088_v48  ;;  %v2982_v41 = vrot.slane %v2908_v56, 3  ;;  %v7871_v12 = vld [vmem:[#allocation8 + $0x170] sm:$0xff]   ;;  %v7866_v48 = vld [vmem:[#allocation8 + $0x128] sm:$0xff]   ;;  %v7874_v56 = vld [vmem:[#allocation8 + $0x160] sm:$0xff]  }
 0x2cf   : > { %3032 = vst [vmem:[#allocation3 + $0x60] sm:$0xff] %v3016_v55  ;;  %v3057_v54 = vadd.f32 %v8962_v32, %v3016_v55  ;;  %v7138_v23 = vpop.f32.mrf.mxu0  ;;  %v7867_v55 = vld [vmem:[#allocation8 + $0x120] sm:$0xff]  }
 0x2d0   : > { %v3133_v43 = vrot.slane %v6217_v25, 7  ;;  %v2983_v63 = vsel %vm1183_vm5, %v2980_v30, %v2982_v41  ;;  %v9091_v30 = vld [vmem:[#allocation2] sm:$0xff]   ;;  %v7868_v25 = vld [vmem:[#allocation8 + $0x118] sm:$0xff]   ;;  %v7876_v23 = vld [vmem:[#allocation8 + $0x150] sm:$0xff]  }
 0x2d1   : > { %vm3065_vm13 = vcmp.ge.f32.partialorder %v3057_v54, 0.0  ;;  %v3073_v24 = vmul.f32 0.2, %v3057_v54  ;;  %v3017_v18 = vadd.f32 %v2983_v63, %v8946_v35  ;;  %v2911_v58 = vpop.f32.mrf.mxu0  ;;  %v7878_v63 = vld [vmem:[#allocation8 + $0x148] sm:$0xff]  }
 0x2d2   : > { %v3134_v49 = vrot.slane %v3133_v43, 4  ;;  %3165 = vst [vmem:[#allocation2 + $0x30] sm:$0xe] %v3133_v43  ;;  %v2984_v13 = vrot.slane %v2911_v58, 3  ;;  %v7873_v43 = vld [vmem:[#allocation8 + $0x108] sm:$0xff]   ;;  %v7880_v58 = vld [vmem:[#allocation8 + $0x1b8] sm:$0xff]  }
 0x2d3   : > { %v3081_v60 = vsel %vm3065_vm13, %v3057_v54, %v3073_v24  ;;  %3033 = vst [vmem:[#allocation3 + $0x68] sm:$0xff] %v3017_v18  ;;  %v7139_v15 = vpop.f32.mrf.mxu0  ;;  %v9030_v1 = vld [vmem:[#allocation2 + $0x28] sm:$0xff]   ;;  %v7877_v24 = vld [vmem:[#allocation8 + $0x100] sm:$0xff]  }
 0x2d4   : > { %3166 = vst [vmem:[#allocation2 + $0x34] sm:$0x1] %v3134_v49  ;;  %v3089_v47 = vmul.f32 1.4142135, %v3081_v60  ;;  %v2985_v10 = vsel %vm1183_vm5, %v2982_v41, %v2984_v13  ;;  %7181 = vmatmul.mubr.bf16.gmra.mxu1 %v9030_v1  ;;  %7241 = vmatmul.mubr.bf16.gmra.mxu0 %v9030_v1  ;;  %v7875_v41 = vld [vmem:[#allocation8 + $0x158] sm:$0xff]   ;;  %v7869_v54 = vld [vmem:[#allocation8 + $0x110] sm:$0xff]  }
 0x2d5   : > { %v3018_v50 = vadd.f32 %v2985_v10, %v8952_v20  ;;  %v2916_v53 = vpop.f32.mrf.mxu0  ;;  %7184 = vmatprep.mubr.msk.bf16.mxu1 %vm8059_vm0, %v8057_v0  ;;  %7244 = vmatprep.mubr.msk.bf16.mxu0 %vm8059_vm0, %v8057_v0  ;;  %v7879_v18 = vld [vmem:[#allocation8 + $0x140] sm:$0xff]   ;;  %v7886_v49 = vld [vmem:[#allocation8 + $0x1f8] sm:$0xff]   ;;  %v7887_v60 = vld [vmem:[#allocation8 + $0x1f0] sm:$0xff]  }
 0x2d6   : > { %v6218_v35 = vpack.c.bf16 %v3089_v47, %v3089_v47  ;;  %v2986_v4 = vrot.slane %v2916_v53, 3  ;;  %v7882_v15 = vld [vmem:[#allocation8 + $0x1a8] sm:$0xff]   ;;  %v7883_v10 = vld [vmem:[#allocation8 + $0x1a0] sm:$0xff]   ;;  %v7884_v53 = vld [vmem:[#allocation8 + $0x198] sm:$0xff]  }
 0x2d7   : > { %3034 = vst [vmem:[#allocation3 + $0x70] sm:$0xff] %v3018_v50  ;;  %v3058_v9 = vadd.f32 %v8962_v32, %v3018_v50  ;;  %v7142_v27 = vpop.f32.mrf.mxu0  ;;  %v3357_v61 = vpop.f32.mrf.mxu1  ;;  %v7888_v47 = vld [vmem:[#allocation8 + $0x1e8] sm:$0xff]   ;;  %v7890_v50 = vld [vmem:[#allocation8 + $0x1e0] sm:$0xff]  }
 0x2d8   : > { %v3135_v40 = vrot.slane %v6218_v35, 7  ;;  %v2987_v20 = vsel %vm1183_vm5, %v2984_v13, %v2986_v4  ;;  %3439 = vst [vmem:[#allocation3 - $0x1] sm:$0xfe] %v3357_v61  ;;  %v7881_v13 = vld [vmem:[#allocation8 + $0x1b0] sm:$0xff]   ;;  %v7891_v35 = vld [vmem:[#allocation8 + $0x1d8] sm:$0xff]   ;;  %v7889_v27 = vld [vmem:[#allocation8 + $0x188] sm:$0xff]  }
 0x2d9   : > { %vm3066_vm14 = vcmp.ge.f32.partialorder %v3058_v9, 0.0  ;;  %v3074_v51 = vmul.f32 0.2, %v3058_v9  ;;  %v3019_v16 = vadd.f32 %v2987_v20, %v8958_v45  ;;  %v2919_v22 = vpop.f32.mrf.mxu0  ;;  %v7162_v34 = vpop.f32.mrf.mxu1  ;;  %v7885_v4 = vld [vmem:[#allocation8 + $0x190] sm:$0xff]  }
 0x2da   : > { %v3136_v8 = vrot.slane %v3135_v40, 4  ;;  %3167 = vst [vmem:[#allocation2 + $0x38] sm:$0xe] %v3135_v40  ;;  %v7894_v40 = vld [vmem:[#allocation8 + $0x1c8] sm:$0xff]  }
 0x2db   : > { %v3082_v7 = vsel %vm3066_vm14, %v3058_v9, %v3074_v51  ;;  %3035 = vst [vmem:[#allocation3 + $0x78] sm:$0xff] %v3019_v16  ;;  %v9043_v44 = vld [vmem:[#allocation2 + $0x30] sm:$0xff]   ;;  %v7143_v2 = vpop.f32.mrf.mxu0  ;;  %v3360_v33 = vpop.f32.mrf.mxu1 }
 0x2dc   : > { %3168 = vst [vmem:[#allocation2 + $0x3c] sm:$0x1] %v3136_v8  ;;  %v3090_v59 = vmul.f32 1.4142135, %v3082_v7  ;;  %7185 = vmatmul.mubr.bf16.gmra.mxu1 %v9043_v44  ;;  %7245 = vmatmul.mubr.bf16.gmra.mxu0 %v9043_v44  ;;  %3440 = vst [vmem:[#allocation3 + $0x7] sm:$0xff] %v3360_v33  ;;  %v7892_v9 = vld [vmem:[#allocation8 + $0x1d0] sm:$0xff]  }
 0x2dd   : > { %7188 = vmatprep.mubr.msk.bf16.mxu1 %vm8059_vm0, %v8057_v0  ;;  %7248 = vmatprep.mubr.msk.bf16.mxu0 %vm8059_vm0, %v8057_v0  ;;  %v7163_v36 = vpop.f32.mrf.mxu1  ;;  %v7893_v7 = vld [vmem:[#allocation8 + $0x180] sm:$0xff]  }
 0x2de   : > { %v6219_v32 = vpack.c.bf16 %v3090_v59, %v3090_v59  ;;  %v7895_v59 = vld [vmem:[#allocation8 + $0x1c0] sm:$0xff]  }
 0x2e0   : > { %v3137_v45 = vrot.slane %v6219_v32, 7 }
 0x2e2   : > { %v3138_v28 = vrot.slane %v3137_v45, 4  ;;  %3169 = vst [vmem:[#allocation2 + $0x40] sm:$0xe] %v3137_v45 }
 0x2e3   : > { %v9051_v46 = vld [vmem:[#allocation2 + $0x38] sm:$0xff]  }
 0x2e4   : > { %3170 = vst [vmem:[#allocation2 + $0x44] sm:$0x1] %v3138_v28  ;;  %7189 = vmatmul.mubr.bf16.gmra.mxu1 %v9051_v46  ;;  %7249 = vmatmul.mubr.bf16.gmra.mxu0 %v9051_v46 }
 0x2e5   : > { %7192 = vmatprep.mubr.msk.bf16.mxu1 %vm8059_vm0, %v8057_v0  ;;  %7252 = vmatprep.mubr.msk.bf16.mxu0 %vm8059_vm0, %v8057_v0 }
 0x2e9   : > { %v3555_v19 = vpop.f32.mrf.mxu0 }
 0x2ea   : > { %v3670_v14 = vrot.slane %v3555_v19, 2 }
 0x2eb   : > { %v9059_v29 = vld [vmem:[#allocation2 + $0x40] sm:$0xff]   ;;  %v7222_v52 = vpop.f32.mrf.mxu0 }
 0x2ec   : > { %7193 = vmatmul.mubr.bf16.gmra.mxu1 %v9059_v29  ;;  %7253 = vmatmul.mubr.bf16.gmra.mxu0 %v9059_v29 }
 0x2ed   : > { %7196 = vmatprep.mubr.msk.bf16.mxu1 %vm8059_vm0, %v8057_v0  ;;  %7256 = vmatprep.mubr.msk.bf16.mxu0 %vm8059_vm0, %v8057_v0  ;;  %v9069_v37 = vpop.f32.mrf.mxu0 }
 0x2ee   : > { %v3671_v21 = vrot.slane %v9069_v37, 2 }
 0x2ef   : > { %v7223_v38 = vpop.f32.mrf.mxu0 }
 0x2f0   : > { %v9077_v11 = vsel %vm887_vm4, %v3670_v14, %v3671_v21 }
 0x2f4   : > { %7197 = vmatmul.mubr.bf16.gmra.mxu1 %v9067_v6  ;;  %7257 = vmatmul.mubr.bf16.gmra.mxu0 %v9067_v6 }
 0x2f5   : > { %7200 = vmatprep.mubr.msk.bf16.mxu1 %vm8059_vm0, %v8057_v0  ;;  %7260 = vmatprep.mubr.msk.bf16.mxu0 %vm8059_vm0, %v8057_v0 }
 0x2fc   : > { %7201 = vmatmul.mubr.bf16.gmra.mxu1 %v9083_v57  ;;  %7261 = vmatmul.mubr.bf16.gmra.mxu0 %v9083_v57 }
 0x2fd   : > { %7280 = vmatprep.mubr.msk.bf16.mxu1 %vm8059_vm0, %v8057_v0  ;;  %7340 = vmatprep.mubr.msk.bf16.mxu0 %vm8059_vm0, %v8057_v0 }
 0x304   : > { %7281 = vmatmul.mubr.bf16.vlgmr.msra.gmra.mxu1 %v9091_v30  ;;  %7341 = vmatmul.mubr.bf16.vlgmr.msra.gmra.mxu0 %v9091_v30 }
 0x305   : > { %7385 = vmatpush3.bf16.msra.mxu1 %v7864_v39  ;;  %7284 = vmatprep.mubr.msk.bf16.mxu1 %vm8059_vm0, %v8057_v0 }
 0x306   : > { %7344 = vmatprep.mubr.msk.bf16.mxu0 %vm8059_vm0, %v8057_v0  ;;  %7386 = vmatprep.subr.bf16.mxu1 %v8057_v0 }
 0x307   : > { %7445 = vmatpush3.bf16.msra.mxu0 %v7870_v31 }
 0x308   : > { %7446 = vmatprep.subr.bf16.mxu0 %v8057_v0 }
 0x309   : > { %7387 = vmatpush3.bf16.msra.mxu1 %v7865_v17 }
 0x30a   : > { %7388 = vmatprep.subr.bf16.mxu1 %v8057_v0 }
 0x30b   : > { %7447 = vmatpush3.bf16.msra.mxu0 %v7871_v12 }
 0x30c   : > { %7285 = vmatmul.mubr.bf16.gmra.mxu1 %v8978_v42  ;;  %7345 = vmatmul.mubr.bf16.gmra.mxu0 %v8978_v42 }
 0x30d   : > { %7288 = vmatprep.mubr.msk.bf16.mxu1 %vm8059_vm0, %v8057_v0  ;;  %7348 = vmatprep.mubr.msk.bf16.mxu0 %vm8059_vm0, %v8057_v0 }
 0x30e   : > { %7389 = vmatpush3.bf16.msra.mxu1 %v7866_v48  ;;  %7448 = vmatprep.subr.bf16.mxu0 %v8057_v0 }
 0x30f   : > { %7390 = vmatprep.subr.bf16.mxu1 %v8057_v0  ;;  %7449 = vmatpush3.bf16.msra.mxu0 %v7872_v3 }
 0x310   : > { %7450 = vmatprep.subr.bf16.mxu0 %v8057_v0 }
 0x312   : > { %7391 = vmatpush3.bf16.msra.mxu1 %v7867_v55 }
 0x313   : > { %7392 = vmatprep.subr.bf16.mxu1 %v8057_v0  ;;  %7451 = vmatpush3.bf16.msra.mxu0 %v7874_v56 }
 0x314   : > { %7289 = vmatmul.mubr.bf16.gmra.mxu1 %v8991_v5  ;;  %7349 = vmatmul.mubr.bf16.gmra.mxu0 %v8991_v5 }
 0x315   : > { %7292 = vmatprep.mubr.msk.bf16.mxu1 %vm8059_vm0, %v8057_v0  ;;  %7352 = vmatprep.mubr.msk.bf16.mxu0 %vm8059_vm0, %v8057_v0 }
 0x316   : > { %7393 = vmatpush3.bf16.msra.mxu1 %v7868_v25  ;;  %7452 = vmatprep.subr.bf16.mxu0 %v8057_v0 }
 0x317   : > { %7394 = vmatprep.subr.bf16.mxu1 %v8057_v0  ;;  %7453 = vmatpush3.bf16.msra.mxu0 %v7875_v41 }
 0x318   : > { %7454 = vmatprep.subr.bf16.mxu0 %v8057_v0 }
 0x31a   : > { %7395 = vmatpush3.bf16.msra.mxu1 %v7869_v54 }
 0x31b   : > { %7396 = vmatprep.subr.bf16.mxu1 %v8057_v0  ;;  %7455 = vmatpush3.bf16.msra.mxu0 %v7876_v23 }
 0x31c   : > { %7293 = vmatmul.mubr.bf16.gmra.mxu1 %v9004_v62  ;;  %7353 = vmatmul.mubr.bf16.gmra.mxu0 %v9004_v62 }
 0x31d   : > { %7296 = vmatprep.mubr.msk.bf16.mxu1 %vm8059_vm0, %v8057_v0  ;;  %7356 = vmatprep.mubr.msk.bf16.mxu0 %vm8059_vm0, %v8057_v0 }
 0x31e   : > { %7397 = vmatpush3.bf16.msra.mxu1 %v7873_v43  ;;  %7456 = vmatprep.subr.bf16.mxu0 %v8057_v0 }
 0x31f   : > { %7398 = vmatprep.subr.bf16.mxu1 %v8057_v0  ;;  %7457 = vmatpush3.bf16.msra.mxu0 %v7878_v63 }
 0x320   : > { %7458 = vmatprep.subr.bf16.mxu0 %v8057_v0 }
 0x322   : > { %7399 = vmatpush3.bf16.msra.mxu1 %v7877_v24 }
 0x323   : > { %7459 = vmatpush3.bf16.msra.mxu0 %v7879_v18  ;;  %7504 = vmatprep.subr.bf16.mxu1 %v8057_v0 }
 0x324   : > { %7297 = vmatmul.mubr.bf16.gmra.mxu1 %v9017_v26  ;;  %7357 = vmatmul.mubr.bf16.gmra.mxu0 %v9017_v26 }
 0x325   : > { %7300 = vmatprep.mubr.msk.bf16.mxu1 %vm8059_vm0, %v8057_v0  ;;  %7360 = vmatprep.mubr.msk.bf16.mxu0 %vm8059_vm0, %v8057_v0 }
 0x326   : > { %7564 = vmatprep.subr.bf16.mxu0 %v8057_v0 }
 0x32c   : > { %7301 = vmatmul.mubr.bf16.gmra.mxu1 %v9030_v1  ;;  %7361 = vmatmul.mubr.bf16.gmra.mxu0 %v9030_v1 }
 0x32d   : > { %7304 = vmatprep.mubr.msk.bf16.mxu1 %vm8059_vm0, %v8057_v0  ;;  %7364 = vmatprep.mubr.msk.bf16.mxu0 %vm8059_vm0, %v8057_v0 }
 0x334   : > { %7305 = vmatmul.mubr.bf16.gmra.mxu1 %v9043_v44  ;;  %7365 = vmatmul.mubr.bf16.gmra.mxu0 %v9043_v44 }
 0x335   : > { %7308 = vmatprep.mubr.msk.bf16.mxu1 %vm8059_vm0, %v8057_v0  ;;  %7368 = vmatprep.mubr.msk.bf16.mxu0 %vm8059_vm0, %v8057_v0 }
 0x33c   : > { %7309 = vmatmul.mubr.bf16.gmra.mxu1 %v9051_v46  ;;  %7369 = vmatmul.mubr.bf16.gmra.mxu0 %v9051_v46 }
 0x33d   : > { %7312 = vmatprep.mubr.msk.bf16.mxu1 %vm8059_vm0, %v8057_v0  ;;  %7372 = vmatprep.mubr.msk.bf16.mxu0 %vm8059_vm0, %v8057_v0 }
 0x344   : > { %7313 = vmatmul.mubr.bf16.gmra.mxu1 %v9059_v29  ;;  %7373 = vmatmul.mubr.bf16.gmra.mxu0 %v9059_v29 }
 0x345   : > { %7316 = vmatprep.mubr.msk.bf16.mxu1 %vm8059_vm0, %v8057_v0  ;;  %7376 = vmatprep.mubr.msk.bf16.mxu0 %vm8059_vm0, %v8057_v0 }
 0x34c   : > { %7317 = vmatmul.mubr.bf16.gmra.mxu1 %v9067_v6  ;;  %7377 = vmatmul.mubr.bf16.gmra.mxu0 %v9067_v6 }
 0x34d   : > { %7320 = vmatprep.mubr.msk.bf16.mxu1 %vm8059_vm0, %v8057_v0  ;;  %7380 = vmatprep.mubr.msk.bf16.mxu0 %vm8059_vm0, %v8057_v0 }
 0x354   : > { %7321 = vmatmul.mubr.bf16.gmra.mxu1 %v9083_v57  ;;  %7381 = vmatmul.mubr.bf16.gmra.mxu0 %v9083_v57 }
 0x355   : > { %7400 = vmatprep.mubr.msk.bf16.mxu1 %vm8059_vm0, %v8057_v0  ;;  %7460 = vmatprep.mubr.msk.bf16.mxu0 %vm8059_vm0, %v8057_v0 }
 0x35c   : > { %7401 = vmatmul.mubr.bf16.vlgmr.msra.gmra.mxu1 %v9091_v30  ;;  %7461 = vmatmul.mubr.bf16.vlgmr.msra.gmra.mxu0 %v9091_v30 }
 0x35d   : > { %7505 = vmatpush3.bf16.msra.mxu1 %v7880_v58  ;;  %7404 = vmatprep.mubr.msk.bf16.mxu1 %vm8059_vm0, %v8057_v0 }
 0x35e   : > { %7464 = vmatprep.mubr.msk.bf16.mxu0 %vm8059_vm0, %v8057_v0  ;;  %7506 = vmatprep.subr.bf16.mxu1 %v8057_v0 }
 0x35f   : > { %7565 = vmatpush3.bf16.msra.mxu0 %v7886_v49 }
 0x360   : > { %7566 = vmatprep.subr.bf16.mxu0 %v8057_v0 }
 0x361   : > { %7507 = vmatpush3.bf16.msra.mxu1 %v7881_v13 }
 0x362   : > { %7508 = vmatprep.subr.bf16.mxu1 %v8057_v0 }
 0x363   : > { %7567 = vmatpush3.bf16.msra.mxu0 %v7887_v60 }
 0x364   : > { %7405 = vmatmul.mubr.bf16.gmra.mxu1 %v8978_v42  ;;  %7465 = vmatmul.mubr.bf16.gmra.mxu0 %v8978_v42 }
 0x365   : > { %7408 = vmatprep.mubr.msk.bf16.mxu1 %vm8059_vm0, %v8057_v0  ;;  %7468 = vmatprep.mubr.msk.bf16.mxu0 %vm8059_vm0, %v8057_v0 }
 0x366   : > { %7509 = vmatpush3.bf16.msra.mxu1 %v7882_v15  ;;  %7568 = vmatprep.subr.bf16.mxu0 %v8057_v0 }
 0x367   : > { %7510 = vmatprep.subr.bf16.mxu1 %v8057_v0  ;;  %7569 = vmatpush3.bf16.msra.mxu0 %v7888_v47 }
 0x368   : > { %7570 = vmatprep.subr.bf16.mxu0 %v8057_v0 }
 0x36a   : > { %7511 = vmatpush3.bf16.msra.mxu1 %v7883_v10 }
 0x36b   : > { %7512 = vmatprep.subr.bf16.mxu1 %v8057_v0  ;;  %7571 = vmatpush3.bf16.msra.mxu0 %v7890_v50 }
 0x36c   : > { %7409 = vmatmul.mubr.bf16.gmra.mxu1 %v8991_v5  ;;  %7469 = vmatmul.mubr.bf16.gmra.mxu0 %v8991_v5 }
 0x36d   : > { %7412 = vmatprep.mubr.msk.bf16.mxu1 %vm8059_vm0, %v8057_v0  ;;  %7472 = vmatprep.mubr.msk.bf16.mxu0 %vm8059_vm0, %v8057_v0 }
 0x36e   : > { %7513 = vmatpush3.bf16.msra.mxu1 %v7884_v53  ;;  %7572 = vmatprep.subr.bf16.mxu0 %v8057_v0 }
 0x36f   : > { %7514 = vmatprep.subr.bf16.mxu1 %v8057_v0  ;;  %7573 = vmatpush3.bf16.msra.mxu0 %v7891_v35 }
 0x370   : > { %7574 = vmatprep.subr.bf16.mxu0 %v8057_v0 }
 0x372   : > { %7515 = vmatpush3.bf16.msra.mxu1 %v7885_v4 }
 0x373   : > { %7516 = vmatprep.subr.bf16.mxu1 %v8057_v0  ;;  %7575 = vmatpush3.bf16.msra.mxu0 %v7892_v9 }
 0x374   : > { %v3365_v20 = vpop.f32.mrf.mxu1  ;;  %v3563_v51 = vpop.f32.mrf.mxu0  ;;  %7413 = vmatmul.mubr.bf16.gmra.mxu1 %v9004_v62  ;;  %7473 = vmatmul.mubr.bf16.gmra.mxu0 %v9004_v62 }
 0x375   : > { %3441 = vst [vmem:[#allocation3 + $0xf] sm:$0xff] %v3365_v20  ;;  %v3673_v16 = vrot.slane %v3563_v51, 2  ;;  %7416 = vmatprep.mubr.msk.bf16.mxu1 %vm8059_vm0, %v8057_v0  ;;  %7476 = vmatprep.mubr.msk.bf16.mxu0 %vm8059_vm0, %v8057_v0 }
 0x376   : > { %v7166_v22 = vpop.f32.mrf.mxu1  ;;  %v7226_v8 = vpop.f32.mrf.mxu0  ;;  %7517 = vmatpush3.bf16.msra.mxu1 %v7889_v27  ;;  %7576 = vmatprep.subr.bf16.mxu0 %v8057_v0 }
 0x377   : > { %v9214_v2 = vsel %vm887_vm4, %v3671_v21, %v3673_v16  ;;  %7518 = vmatprep.subr.bf16.mxu1 %v8057_v0  ;;  %7577 = vmatpush3.bf16.msra.mxu0 %v7894_v40 }
 0x378   : > { %v3368_v32 = vpop.f32.mrf.mxu1  ;;  %v3566_v45 = vpop.f32.mrf.mxu0  ;;  %7578 = vmatprep.subr.bf16.mxu0 %v8057_v0 }
 0x379   : > { %3442 = vst [vmem:[#allocation3 + $0x17] sm:$0xff] %v3368_v32  ;;  %v3675_v28 = vrot.slane %v3566_v45, 2 }
 0x37a   : > { %v7167_v61 = vpop.f32.mrf.mxu1  ;;  %v7227_v34 = vpop.f32.mrf.mxu0  ;;  %7519 = vmatpush3.bf16.msra.mxu1 %v7893_v7 }
 0x37b   : > { %v9219_v33 = vsel %vm887_vm4, %v3673_v16, %v3675_v28  ;;  %7579 = vmatpush3.bf16.msra.mxu0 %v7895_v59  ;;  %7624 = vmatprep.subr.bf16.mxu1 %v8057_v0 }
 0x37c   : > { %v3373_v19 = vpop.f32.mrf.mxu1  ;;  %v3571_v36 = vpop.f32.mrf.mxu0  ;;  %7417 = vmatmul.mubr.bf16.gmra.mxu1 %v9017_v26  ;;  %7477 = vmatmul.mubr.bf16.gmra.mxu0 %v9017_v26 }
 0x37d   : > { %3443 = vst [vmem:[#allocation3 + $0x1f] sm:$0xff] %v3373_v19  ;;  %v3677_v52 = vrot.slane %v3571_v36, 2  ;;  %7420 = vmatprep.mubr.msk.bf16.mxu1 %vm8059_vm0, %v8057_v0  ;;  %7480 = vmatprep.mubr.msk.bf16.mxu0 %vm8059_vm0, %v8057_v0 }
 0x37e   : > { %v7170_v14 = vpop.f32.mrf.mxu1  ;;  %v7230_v37 = vpop.f32.mrf.mxu0 }
 0x37f   : > { %v9229_v21 = vsel %vm887_vm4, %v3675_v28, %v3677_v52 }
 0x380   : > { %v3376_v38 = vpop.f32.mrf.mxu1  ;;  %v3574_v39 = vpop.f32.mrf.mxu0 }
 0x381   : > { %3444 = vst [vmem:[#allocation3 + $0x27] sm:$0xff] %v3376_v38  ;;  %v3679_v31 = vrot.slane %v3574_v39, 2 }
 0x382   : > { %v7171_v17 = vpop.f32.mrf.mxu1  ;;  %v7231_v12 = vpop.f32.mrf.mxu0 }
 0x383   : > { %v9232_v48 = vsel %vm887_vm4, %v3677_v52, %v3679_v31 }
 0x384   : > { %v3381_v3 = vpop.f32.mrf.mxu1  ;;  %v3579_v55 = vpop.f32.mrf.mxu0  ;;  %7421 = vmatmul.mubr.bf16.gmra.mxu1 %v9030_v1  ;;  %7481 = vmatmul.mubr.bf16.gmra.mxu0 %v9030_v1 }
 0x385   : > { %3445 = vst [vmem:[#allocation3 + $0x2f] sm:$0xff] %v3381_v3  ;;  %v3681_v56 = vrot.slane %v3579_v55, 2  ;;  %7424 = vmatprep.mubr.msk.bf16.mxu1 %vm8059_vm0, %v8057_v0  ;;  %7484 = vmatprep.mubr.msk.bf16.mxu0 %vm8059_vm0, %v8057_v0 }
 0x386   : > { %v7174_v25 = vpop.f32.mrf.mxu1  ;;  %v7234_v41 = vpop.f32.mrf.mxu0 }
 0x387   : > { %v9241_v54 = vsel %vm887_vm4, %v3679_v31, %v3681_v56 }
 0x388   : > { %v3384_v23 = vpop.f32.mrf.mxu1  ;;  %v3582_v43 = vpop.f32.mrf.mxu0 }
 0x389   : > { %3446 = vst [vmem:[#allocation3 + $0x37] sm:$0xff] %v3384_v23  ;;  %v3683_v63 = vrot.slane %v3582_v43, 2 }
 0x38a   : > { %v7175_v24 = vpop.f32.mrf.mxu1  ;;  %v7235_v18 = vpop.f32.mrf.mxu0 }
 0x38b   : > { %v9244_v58 = vsel %vm887_vm4, %v3681_v56, %v3683_v63 }
 0x38c   : > { %v3389_v49 = vpop.f32.mrf.mxu1  ;;  %v3587_v13 = vpop.f32.mrf.mxu0  ;;  %7425 = vmatmul.mubr.bf16.gmra.mxu1 %v9043_v44  ;;  %7485 = vmatmul.mubr.bf16.gmra.mxu0 %v9043_v44 }
 0x38d   : > { %3447 = vst [vmem:[#allocation3 + $0x3f] sm:$0xff] %v3389_v49  ;;  %v3685_v60 = vrot.slane %v3587_v13, 2  ;;  %7428 = vmatprep.mubr.msk.bf16.mxu1 %vm8059_vm0, %v8057_v0  ;;  %7488 = vmatprep.mubr.msk.bf16.mxu0 %vm8059_vm0, %v8057_v0 }
 0x38e   : > { %v7178_v15 = vpop.f32.mrf.mxu1  ;;  %v7238_v47 = vpop.f32.mrf.mxu0 }
 0x38f   : > { %v9253_v10 = vsel %vm887_vm4, %v3683_v63, %v3685_v60 }
 0x390   : > { %v3392_v50 = vpop.f32.mrf.mxu1  ;;  %v3590_v53 = vpop.f32.mrf.mxu0 }
 0x391   : > { %3448 = vst [vmem:[#allocation3 + $0x47] sm:$0xff] %v3392_v50  ;;  %v3687_v35 = vrot.slane %v3590_v53, 2 }
 0x392   : > { %v7179_v4 = vpop.f32.mrf.mxu1  ;;  %v7239_v9 = vpop.f32.mrf.mxu0 }
 0x393   : > { %v9256_v27 = vsel %vm887_vm4, %v3685_v60, %v3687_v35  ;;  %v7896_v9 = vld [vmem:[#allocation8 + $0x238] sm:$0xff]  }
 0x394   : > { %v3397_v40 = vpop.f32.mrf.mxu1  ;;  %v3595_v20 = vpop.f32.mrf.mxu0  ;;  %7429 = vmatmul.mubr.bf16.gmra.mxu1 %v9051_v46  ;;  %7489 = vmatmul.mubr.bf16.gmra.mxu0 %v9051_v46 }
 0x395   : > { %3449 = vst [vmem:[#allocation3 + $0x4f] sm:$0xff] %v3397_v40  ;;  %v3689_v51 = vrot.slane %v3595_v20, 2  ;;  %7432 = vmatprep.mubr.msk.bf16.mxu1 %vm8059_vm0, %v8057_v0  ;;  %7492 = vmatprep.mubr.msk.bf16.mxu0 %vm8059_vm0, %v8057_v0 }
 0x396   : > { %v7182_v16 = vpop.f32.mrf.mxu1  ;;  %v7242_v22 = vpop.f32.mrf.mxu0 }
 0x397   : > { %v9265_v8 = vsel %vm887_vm4, %v3687_v35, %v3689_v51  ;;  %v7897_v16 = vld [vmem:[#allocation8 + $0x230] sm:$0xff]  }
 0x398   : > { %v3400_v7 = vpop.f32.mrf.mxu1  ;;  %v3598_v59 = vpop.f32.mrf.mxu0 }
 0x399   : > { %3450 = vst [vmem:[#allocation3 + $0x57] sm:$0xff] %v3400_v7  ;;  %v3691_v32 = vrot.slane %v3598_v59, 2 }
 0x39a   : > { %v7183_v45 = vpop.f32.mrf.mxu1  ;;  %v7243_v28 = vpop.f32.mrf.mxu0 }
 0x39b   : > { %v9268_v61 = vsel %vm887_vm4, %v3689_v51, %v3691_v32 }
 0x39c   : > { %v3405_v34 = vpop.f32.mrf.mxu1  ;;  %v3603_v19 = vpop.f32.mrf.mxu0  ;;  %7433 = vmatmul.mubr.bf16.gmra.mxu1 %v9059_v29  ;;  %7493 = vmatmul.mubr.bf16.gmra.mxu0 %v9059_v29 }
 0x39d   : > { %3451 = vst [vmem:[#allocation3 + $0x5f] sm:$0xff] %v3405_v34  ;;  %v3693_v36 = vrot.slane %v3603_v19, 2  ;;  %7436 = vmatprep.mubr.msk.bf16.mxu1 %vm8059_vm0, %v8057_v0  ;;  %7496 = vmatprep.mubr.msk.bf16.mxu0 %vm8059_vm0, %v8057_v0 }
 0x39e   : > { %v7186_v52 = vpop.f32.mrf.mxu1  ;;  %v7246_v14 = vpop.f32.mrf.mxu0 }
 0x39f   : > { %v9277_v37 = vsel %vm887_vm4, %v3691_v32, %v3693_v36  ;;  %v7899_v14 = vld [vmem:[#allocation8 + $0x220] sm:$0xff]  }
 0x3a0   : > { %v3408_v38 = vpop.f32.mrf.mxu1  ;;  %v3606_v39 = vpop.f32.mrf.mxu0 }
 0x3a1   : > { %3452 = vst [vmem:[#allocation3 + $0x67] sm:$0xff] %v3408_v38  ;;  %v3695_v31 = vrot.slane %v3606_v39, 2 }
 0x3a2   : > { %v7187_v17 = vpop.f32.mrf.mxu1  ;;  %v7247_v12 = vpop.f32.mrf.mxu0 }
 0x3a3   : > { %v9280_v29 = vsel %vm887_vm4, %v3693_v36, %v3695_v31  ;;  %v7900_v12 = vld [vmem:[#allocation8 + $0x218] sm:$0xff]  }
 0x3a4   : > { %v3413_v3 = vpop.f32.mrf.mxu1  ;;  %v3611_v55 = vpop.f32.mrf.mxu0  ;;  %7437 = vmatmul.mubr.bf16.gmra.mxu1 %v9067_v6  ;;  %7497 = vmatmul.mubr.bf16.gmra.mxu0 %v9067_v6 }
 0x3a5   : > { %3453 = vst [vmem:[#allocation3 + $0x6f] sm:$0xff] %v3413_v3  ;;  %v3697_v56 = vrot.slane %v3611_v55, 2  ;;  %7440 = vmatprep.mubr.msk.bf16.mxu1 %vm8059_vm0, %v8057_v0  ;;  %7500 = vmatprep.mubr.msk.bf16.mxu0 %vm8059_vm0, %v8057_v0 }
 0x3a6   : > { %v7190_v25 = vpop.f32.mrf.mxu1  ;;  %v7250_v41 = vpop.f32.mrf.mxu0 }
 0x3a7   : > { %v9289_v23 = vsel %vm887_vm4, %v3695_v31, %v3697_v56  ;;  %v7901_v25 = vld [vmem:[#allocation8 + $0x210] sm:$0xff]   ;;  %v3637_v41 = vld [vmem:[#allocation3] sm:$0xff] }
 0x3a8   : > { %v3416_v43 = vpop.f32.mrf.mxu1  ;;  %v3614_v63 = vpop.f32.mrf.mxu0 }
 0x3a9   : > { %3454 = vst [vmem:[#allocation3 + $0x77] sm:$0xff] %v3416_v43  ;;  %v3699_v24 = vrot.slane %v3614_v63, 2 }
 0x3aa   : > { %v7191_v18 = vpop.f32.mrf.mxu1  ;;  %v7251_v49 = vpop.f32.mrf.mxu0 }
 0x3ab   : > { %v9292_v6 = vsel %vm887_vm4, %v3697_v56, %v3699_v24  ;;  %v3719_v49 = vadd.f32 %v9077_v11, %v3637_v41 }
 0x3ac   : > { %v3421_v13 = vpop.f32.mrf.mxu1  ;;  %v3619_v60 = vpop.f32.mrf.mxu0  ;;  %7441 = vmatmul.mubr.bf16.gmra.mxu1 %v9083_v57  ;;  %7501 = vmatmul.mubr.bf16.gmra.mxu0 %v9083_v57 }
 0x3ad   : > { %3455 = vst [vmem:[#allocation3 + $0x7f] sm:$0x1] %v3421_v13  ;;  %v3701_v15 = vrot.slane %v3619_v60, 2  ;;  %7520 = vmatprep.mubr.msk.bf16.mxu1 %vm8059_vm0, %v8057_v0  ;;  %7580 = vmatprep.mubr.msk.bf16.mxu0 %vm8059_vm0, %v8057_v0  ;;  %v7902_v60 = vld [vmem:[#allocation8 + $0x208] sm:$0xff]  }
 0x3ae   : > { %v7194_v47 = vpop.f32.mrf.mxu1  ;;  %v7254_v50 = vpop.f32.mrf.mxu0 }
 0x3af   : > { %v9301_v53 = vsel %vm887_vm4, %v3699_v24, %v3701_v15  ;;  %v3638_v15 = vld [vmem:[#allocation3 + $0x8] sm:$0xff] }
 0x3b0   : > { %v3424_v35 = vpop.f32.mrf.mxu1  ;;  %v3622_v4 = vpop.f32.mrf.mxu0  ;;  %v3720_v11 = vadd.f32 %v9214_v2, %v3638_v15  ;;  %v3640_v2 = vld [vmem:[#allocation3 + $0x18] sm:$0xff] }
 0x3b2   : > { %v7195_v40 = vpop.f32.mrf.mxu1  ;;  %v7255_v20 = vpop.f32.mrf.mxu0 }
 0x3b4   : > { %v3428_v51 = vpop.f32.mrf.mxu1  ;;  %v3626_v57 = vpop.f32.mrf.mxu0  ;;  %7521 = vmatmul.mubr.bf16.vlgmr.msra.gmra.mxu1 %v9091_v30  ;;  %7581 = vmatmul.mubr.bf16.vlgmr.msra.gmra.mxu0 %v9091_v30  ;;  %v7898_v30 = vld [vmem:[#allocation8 + $0x228] sm:$0xff]  }
 0x3b5   : > { %7625 = vmatpush3.bf16.msra.mxu1 %v7896_v9  ;;  %7524 = vmatprep.mubr.msk.bf16.mxu1 %vm8059_vm0, %v8057_v0  ;;  %v7903_v51 = vld [vmem:[#allocation8 + $0x200] sm:$0xff]   ;;  %v3639_v57 = vld [vmem:[#allocation3 + $0x10] sm:$0xff] }
 0x3b6   : > { %v7198_v22 = vpop.f32.mrf.mxu1  ;;  %v7258_v7 = vpop.f32.mrf.mxu0  ;;  %7584 = vmatprep.mubr.msk.bf16.mxu0 %vm8059_vm0, %v8057_v0  ;;  %7626 = vmatprep.subr.bf16.mxu1 %v8057_v0 }
 0x3b8   : > { %v3430_v59 = vpop.f32.mrf.mxu1  ;;  %v3628_v32 = vpop.f32.mrf.mxu0 }
 0x3b9   : > { %7627 = vmatpush3.bf16.msra.mxu1 %v7897_v16 }
 0x3ba   : > { %v7199_v45 = vpop.f32.mrf.mxu1  ;;  %v7259_v28 = vpop.f32.mrf.mxu0  ;;  %7628 = vmatprep.subr.bf16.mxu1 %v8057_v0 }
 0x3bb   : > { %v3721_v28 = vadd.f32 %v9219_v33, %v3639_v57  ;;  %v3722_v33 = vadd.f32 %v9229_v21, %v3640_v2 }
 0x3bc   : > { %v3434_v34 = vpop.f32.mrf.mxu1  ;;  %v3632_v19 = vpop.f32.mrf.mxu0  ;;  %7525 = vmatmul.mubr.bf16.gmra.mxu1 %v8978_v42  ;;  %7585 = vmatmul.mubr.bf16.gmra.mxu0 %v8978_v42 }
 0x3bd   : > { %7528 = vmatprep.mubr.msk.bf16.mxu1 %vm8059_vm0, %v8057_v0  ;;  %7588 = vmatprep.mubr.msk.bf16.mxu0 %vm8059_vm0, %v8057_v0 }
 0x3be   : > { %v7202_v36 = vpop.f32.mrf.mxu1  ;;  %v7262_v52 = vpop.f32.mrf.mxu0  ;;  %7629 = vmatpush3.bf16.msra.mxu1 %v7898_v30 }
 0x3bf   : > { %7630 = vmatprep.subr.bf16.mxu1 %v8057_v0 }
 0x3c0   : > { %v3436_v38 = vpop.f32.mrf.mxu1  ;;  %v3634_v39 = vpop.f32.mrf.mxu0 }
 0x3c2   : > { %v7203_v31 = vpop.f32.mrf.mxu1  ;;  %v7263_v17 = vpop.f32.mrf.mxu0  ;;  %7631 = vmatpush3.bf16.msra.mxu1 %v7899_v14 }
 0x3c3   : > { %7632 = vmatprep.subr.bf16.mxu1 %v8057_v0 }
 0x3c4   : > { %v3850_v42 = vpop.f32.mrf.mxu1  ;;  %v4145_v3 = vpop.f32.mrf.mxu0  ;;  %7529 = vmatmul.mubr.bf16.gmra.mxu1 %v8991_v5  ;;  %7589 = vmatmul.mubr.bf16.gmra.mxu0 %v8991_v5 }
 0x3c5   : > { %7532 = vmatprep.mubr.msk.bf16.mxu1 %vm8059_vm0, %v8057_v0  ;;  %7592 = vmatprep.mubr.msk.bf16.mxu0 %vm8059_vm0, %v8057_v0  ;;  %v3965_v24 = vrot.slane %v3850_v42, 3  ;;  %v3641_v3 = vld [vmem:[#allocation3 + $0x20] sm:$0xff] }
 0x3c6   : > { %v7282_v55 = vpop.f32.mrf.mxu1  ;;  %v7342_v56 = vpop.f32.mrf.mxu0  ;;  %7633 = vmatpush3.bf16.msra.mxu1 %v7900_v12 }
 0x3c7   : > { %7634 = vmatprep.subr.bf16.mxu1 %v8057_v0 }
 0x3c8   : > { %v3853_v43 = vpop.f32.mrf.mxu1  ;;  %v4147_v63 = vpop.f32.mrf.mxu0 }
 0x3c9   : > { %v3966_v18 = vrot.slane %v3853_v43, 3 }
 0x3ca   : > { %v7283_v5 = vpop.f32.mrf.mxu1  ;;  %v7343_v13 = vpop.f32.mrf.mxu0  ;;  %7635 = vmatpush3.bf16.msra.mxu1 %v7901_v25 }
 0x3cb   : > { %v3967_v47 = vsel %vm1183_vm5, %v3965_v24, %v3966_v18  ;;  %7636 = vmatprep.subr.bf16.mxu1 %v8057_v0  ;;  %v3642_v13 = vld [vmem:[#allocation3 + $0x28] sm:$0xff] }
 0x3cc   : > { %v4014_v50 = vadd.f32 %v3967_v47, %v3719_v49  ;;  %v3858_v35 = vpop.f32.mrf.mxu1  ;;  %v4151_v4 = vpop.f32.mrf.mxu0  ;;  %7533 = vmatmul.mubr.bf16.gmra.mxu1 %v9004_v62  ;;  %7593 = vmatmul.mubr.bf16.gmra.mxu0 %v9004_v62 }
 0x3cd   : > { %v3968_v9 = vrot.slane %v3858_v35, 3  ;;  %7536 = vmatprep.mubr.msk.bf16.mxu1 %vm8059_vm0, %v8057_v0  ;;  %7596 = vmatprep.mubr.msk.bf16.mxu0 %vm8059_vm0, %v8057_v0  ;;  %v4260_v59 = vrot.slane %v4151_v4, 1 }
 0x3ce   : > { %v7286_v40 = vpop.f32.mrf.mxu1  ;;  %v7346_v20 = vpop.f32.mrf.mxu0  ;;  %7637 = vmatpush3.bf16.msra.mxu1 %v7902_v60 }
 0x3cf   : > { %v3969_v16 = vsel %vm1183_vm5, %v3966_v18, %v3968_v9  ;;  %7638 = vmatprep.subr.bf16.mxu1 %v8057_v0  ;;  %v3723_v18 = vadd.f32 %v9232_v48, %v3641_v3  ;;  %v3724_v48 = vadd.f32 %v9241_v54, %v3642_v13  ;;  %v3643_v20 = vld [vmem:[#allocation3 + $0x30] sm:$0xff] }
 0x3d0   : > { %v4015_v22 = vadd.f32 %v3969_v16, %v3720_v11  ;;  %v3861_v62 = vpop.f32.mrf.mxu1  ;;  %v4154_v7 = vpop.f32.mrf.mxu0 }
 0x3d1   : > { %v3970_v32 = vrot.slane %v3861_v62, 3  ;;  %v4261_v45 = vrot.slane %v4154_v7, 1 }
 0x3d2   : > { %v7287_v30 = vpop.f32.mrf.mxu1  ;;  %v7347_v34 = vpop.f32.mrf.mxu0  ;;  %7639 = vmatpush3.bf16.msra.mxu1 %v7903_v51 }
 0x3d3   : > { %v3971_v19 = vsel %vm1183_vm5, %v3968_v9, %v3970_v32  ;;  %v4262_v36 = vsel %vm1479_vm6, %v4260_v59, %v4261_v45  ;;  %v3644_v30 = vld [vmem:[#allocation3 + $0x38] sm:$0xff] }
 0x3d4   : > { %v4016_v52 = vadd.f32 %v3971_v19, %v3721_v28  ;;  %v9341_v14 = vadd.f32 %v4262_v36, %v4014_v50  ;;  %v3866_v38 = vpop.f32.mrf.mxu1  ;;  %v4159_v39 = vpop.f32.mrf.mxu0  ;;  %7537 = vmatmul.mubr.bf16.gmra.mxu1 %v9017_v26  ;;  %7597 = vmatmul.mubr.bf16.gmra.mxu0 %v9017_v26 }
 0x3d5   : > { %v3972_v31 = vrot.slane %v3866_v38, 3  ;;  %v4263_v17 = vrot.slane %v4159_v39, 1  ;;  %7540 = vmatprep.mubr.msk.bf16.mxu1 %vm8059_vm0, %v8057_v0  ;;  %7600 = vmatprep.mubr.msk.bf16.mxu0 %vm8059_vm0, %v8057_v0 }
 0x3d6   : > { %v7290_v12 = vpop.f32.mrf.mxu1  ;;  %v7350_v42 = vpop.f32.mrf.mxu0 }
 0x3d7   : > { %v3973_v55 = vsel %vm1183_vm5, %v3970_v32, %v3972_v31  ;;  %v4264_v56 = vsel %vm1479_vm6, %v4261_v45, %v4263_v17  ;;  %v3725_v32 = vadd.f32 %v9244_v58, %v3643_v20  ;;  %v3726_v58 = vadd.f32 %v9253_v10, %v3644_v30 }
 0x3d8   : > { %v4017_v25 = vadd.f32 %v3973_v55, %v3722_v33  ;;  %v9352_v41 = vadd.f32 %v4264_v56, %v4015_v22  ;;  %v3869_v26 = vpop.f32.mrf.mxu1  ;;  %v4162_v43 = vpop.f32.mrf.mxu0  ;;  %v3645_v33 = vld [vmem:[#allocation3 + $0x40] sm:$0xff] }
 0x3d9   : > { %v3974_v63 = vrot.slane %v3869_v26, 3  ;;  %v4265_v24 = vrot.slane %v4162_v43, 1  ;;  %v3727_v43 = vadd.f32 %v9256_v27, %v3645_v33 }
 0x3da   : > { %v7291_v49 = vpop.f32.mrf.mxu1  ;;  %v7351_v5 = vpop.f32.mrf.mxu0 }
 0x3db   : > { %v3975_v21 = vsel %vm1183_vm5, %v3972_v31, %v3974_v63  ;;  %v4266_v60 = vsel %vm1479_vm6, %v4263_v17, %v4265_v24 }
 0x3dc   : > { %v4018_v15 = vadd.f32 %v3975_v21, %v3723_v18  ;;  %v9357_v47 = vadd.f32 %v4266_v60, %v4016_v52  ;;  %v3874_v50 = vpop.f32.mrf.mxu1  ;;  %v4167_v35 = vpop.f32.mrf.mxu0  ;;  %7541 = vmatmul.mubr.bf16.gmra.mxu1 %v9030_v1  ;;  %7601 = vmatmul.mubr.bf16.gmra.mxu0 %v9030_v1  ;;  %v3646_v18 = vld [vmem:[#allocation3 + $0x48] sm:$0xff] }
 0x3dd   : > { %v3976_v4 = vrot.slane %v3874_v50, 3  ;;  %v4267_v9 = vrot.slane %v4167_v35, 1  ;;  %7544 = vmatprep.mubr.msk.bf16.mxu1 %vm8059_vm0, %v8057_v0  ;;  %7604 = vmatprep.mubr.msk.bf16.mxu0 %vm8059_vm0, %v8057_v0  ;;  %v3728_v27 = vadd.f32 %v9265_v8, %v3646_v18 }
 0x3de   : > { %v7294_v11 = vpop.f32.mrf.mxu1  ;;  %v7354_v40 = vpop.f32.mrf.mxu0 }
 0x3df   : > { %v3977_v51 = vsel %vm1183_vm5, %v3974_v63, %v3976_v4  ;;  %v4268_v57 = vsel %vm1479_vm6, %v4265_v24, %v4267_v9 }
 0x3e0   : > { %v4019_v16 = vadd.f32 %v3977_v51, %v3724_v48  ;;  %v9368_v22 = vadd.f32 %v4268_v57, %v4017_v25  ;;  %v3877_v1 = vpop.f32.mrf.mxu1  ;;  %v4170_v62 = vpop.f32.mrf.mxu0 }
 0x3e1   : > { %v3978_v7 = vrot.slane %v3877_v1, 3  ;;  %v4269_v59 = vrot.slane %v4170_v62, 1 }
 0x3e2   : > { %v7295_v45 = vpop.f32.mrf.mxu1  ;;  %v7355_v28 = vpop.f32.mrf.mxu0 }
 0x3e3   : > { %v3979_v54 = vsel %vm1183_vm5, %v3976_v4, %v3978_v7  ;;  %v4270_v34 = vsel %vm1479_vm6, %v4267_v9, %v4269_v59  ;;  %v3647_v9 = vld [vmem:[#allocation3 + $0x50] sm:$0xff] }
 0x3e4   : > { %v4020_v2 = vadd.f32 %v3979_v54, %v3725_v32  ;;  %v9373_v19 = vadd.f32 %v4270_v34, %v4018_v15  ;;  %v3882_v36 = vpop.f32.mrf.mxu1  ;;  %v4175_v52 = vpop.f32.mrf.mxu0  ;;  %7545 = vmatmul.mubr.bf16.gmra.mxu1 %v9043_v44  ;;  %7605 = vmatmul.mubr.bf16.gmra.mxu0 %v9043_v44  ;;  %v3729_v1 = vadd.f32 %v9268_v61, %v3647_v9  ;;  %v9407_v34 = vld [vmem:[#allocation2 + $0x40] sm:$0xff]  }
 0x3e5   : > { %v3980_v38 = vrot.slane %v3882_v36, 3  ;;  %v4271_v39 = vrot.slane %v4175_v52, 1  ;;  %7548 = vmatprep.mubr.msk.bf16.mxu1 %vm8059_vm0, %v8057_v0  ;;  %7608 = vmatprep.mubr.msk.bf16.mxu0 %vm8059_vm0, %v8057_v0 }
 0x3e6   : > { %v7298_v31 = vpop.f32.mrf.mxu1  ;;  %v7358_v17 = vpop.f32.mrf.mxu0 }
 0x3e7   : > { %v3981_v12 = vsel %vm1183_vm5, %v3978_v7, %v3980_v38  ;;  %v4272_v42 = vsel %vm1479_vm6, %v4269_v59, %v4271_v39  ;;  %v3648_v59 = vld [vmem:[#allocation3 + $0x58] sm:$0xff] }
 0x3e8   : > { %v4021_v3 = vadd.f32 %v3981_v12, %v3726_v58  ;;  %v9384_v55 = vadd.f32 %v4272_v42, %v4019_v16  ;;  %v3885_v44 = vpop.f32.mrf.mxu1  ;;  %v4178_v56 = vpop.f32.mrf.mxu0  ;;  %v3730_v36 = vadd.f32 %v9277_v37, %v3648_v59 }
 0x3e9   : > { %v3982_v25 = vrot.slane %v3885_v44, 3  ;;  %v4273_v26 = vrot.slane %v4178_v56, 1 }
 0x3ea   : > { %v7299_v63 = vpop.f32.mrf.mxu1  ;;  %v7359_v24 = vpop.f32.mrf.mxu0 }
 0x3eb   : > { %v3983_v10 = vsel %vm1183_vm5, %v3980_v38, %v3982_v25  ;;  %v4274_v49 = vsel %vm1479_vm6, %v4271_v39, %v4273_v26  ;;  %v3649_v39 = vld [vmem:[#allocation3 + $0x60] sm:$0xff] }
 0x3ec   : > { %v4022_v5 = vadd.f32 %v3983_v10, %v3727_v43  ;;  %v9389_v13 = vadd.f32 %v4274_v49, %v4020_v2  ;;  %v3890_v21 = vpop.f32.mrf.mxu1  ;;  %v4183_v60 = vpop.f32.mrf.mxu0  ;;  %7549 = vmatmul.mubr.bf16.gmra.mxu1 %v9051_v46  ;;  %7609 = vmatmul.mubr.bf16.gmra.mxu0 %v9051_v46  ;;  %v3731_v56 = vadd.f32 %v9280_v29, %v3649_v39  ;;  %v3650_v43 = vld [vmem:[#allocation3 + $0x68] sm:$0xff] }
 0x3ed   : > { %v3984_v15 = vrot.slane %v3890_v21, 3  ;;  %v4275_v50 = vrot.slane %v4183_v60, 1  ;;  %7552 = vmatprep.mubr.msk.bf16.mxu1 %vm8059_vm0, %v8057_v0  ;;  %7612 = vmatprep.mubr.msk.bf16.mxu0 %vm8059_vm0, %v8057_v0  ;;  %v3732_v60 = vadd.f32 %v9289_v23, %v3650_v43 }
 0x3ee   : > { %v7302_v35 = vpop.f32.mrf.mxu1  ;;  %v7362_v4 = vpop.f32.mrf.mxu0 }
 0x3ef   : > { %v3985_v48 = vsel %vm1183_vm5, %v3982_v25, %v3984_v15  ;;  %v4276_v11 = vsel %vm1479_vm6, %v4273_v26, %v4275_v50 }
 0x3f0   : > { %v4023_v40 = vadd.f32 %v3985_v48, %v3728_v27  ;;  %v9400_v20 = vadd.f32 %v4276_v11, %v4021_v3  ;;  %v3893_v46 = vpop.f32.mrf.mxu1  ;;  %v4186_v51 = vpop.f32.mrf.mxu0  ;;  %v3651_v27 = vld [vmem:[#allocation3 + $0x70] sm:$0xff] }
 0x3f1   : > { %v3986_v57 = vrot.slane %v3893_v46, 3  ;;  %v4277_v16 = vrot.slane %v4186_v51, 1 }
 0x3f2   : > { %v7303_v62 = vpop.f32.mrf.mxu1  ;;  %v7363_v7 = vpop.f32.mrf.mxu0 }
 0x3f3   : > { %v3987_v8 = vsel %vm1183_vm5, %v3984_v15, %v3986_v57  ;;  %v4278_v32 = vsel %vm1479_vm6, %v4275_v50, %v4277_v16  ;;  %v3652_v62 = vld [vmem:[#allocation3 + $0x78] sm:$0xff] }
 0x3f4   : > { %v4024_v45 = vadd.f32 %v3987_v8, %v3729_v1  ;;  %v9405_v28 = vadd.f32 %v4278_v32, %v4022_v5  ;;  %v3898_v30 = vpop.f32.mrf.mxu1  ;;  %v4191_v54 = vpop.f32.mrf.mxu0  ;;  %7553 = vmatmul.mubr.bf16.gmra.mxu1 %v9407_v34  ;;  %7613 = vmatmul.mubr.bf16.gmra.mxu0 %v9407_v34  ;;  %v9425_v5 = vld [vmem:[#allocation2 + $0x48] sm:$0xff]  }
 0x3f5   : > { %v3988_v2 = vrot.slane %v3898_v30, 3  ;;  %v4279_v61 = vrot.slane %v4191_v54, 1  ;;  %7556 = vmatprep.mubr.msk.bf16.mxu1 %vm8059_vm0, %v8057_v0  ;;  %7616 = vmatprep.mubr.msk.bf16.mxu0 %vm8059_vm0, %v8057_v0  ;;  %v9443_v30 = vld [vmem:[#allocation2 + $0x50] sm:$0xff]  }
 0x3f6   : > { %v7306_v52 = vpop.f32.mrf.mxu1  ;;  %v7366_v38 = vpop.f32.mrf.mxu0 }
 0x3f7   : > { %v3989_v58 = vsel %vm1183_vm5, %v3986_v57, %v3988_v2  ;;  %v4280_v31 = vsel %vm1479_vm6, %v4277_v16, %v4279_v61  ;;  %v3733_v57 = vadd.f32 %v9292_v6, %v3651_v27  ;;  %v7920_v27 = vld [vmem:[#allocation2 + $0x8] sm:$0xff]  }
 0x3f8   : > { %v4025_v17 = vadd.f32 %v3989_v58, %v3730_v36  ;;  %v9418_v33 = vadd.f32 %v4280_v31, %v4023_v40  ;;  %v3901_v12 = vpop.f32.mrf.mxu1  ;;  %v4194_v42 = vpop.f32.mrf.mxu0 }
 0x3f9   : > { %v3990_v3 = vrot.slane %v3901_v12, 3  ;;  %v4281_v44 = vrot.slane %v4194_v42, 1 }
 0x3fa   : > { %v7307_v25 = vpop.f32.mrf.mxu1  ;;  %v7367_v26 = vpop.f32.mrf.mxu0 }
 0x3fb   : > { %v3991_v37 = vsel %vm1183_vm5, %v3988_v2, %v3990_v3  ;;  %v4282_v63 = vsel %vm1479_vm6, %v4279_v61, %v4281_v44  ;;  %v3734_v2 = vadd.f32 %v9301_v53, %v3652_v62  ;;  %v7919_v26 = vld [vmem:[#allocation2] sm:$0xff]  }
 0x3fc   : > { %v4026_v24 = vadd.f32 %v3991_v37, %v3731_v56  ;;  %v9423_v18 = vadd.f32 %v4282_v63, %v4024_v45  ;;  %v3906_v10 = vpop.f32.mrf.mxu1  ;;  %v4199_v49 = vpop.f32.mrf.mxu0  ;;  %7557 = vmatmul.mubr.bf16.gmra.mxu1 %v9425_v5  ;;  %7617 = vmatmul.mubr.bf16.gmra.mxu0 %v9425_v5 }
 0x3fd   : > { %v3992_v21 = vrot.slane %v3906_v10, 3  ;;  %v4283_v29 = vrot.slane %v4199_v49, 1  ;;  %7560 = vmatprep.mubr.msk.bf16.mxu1 %vm8059_vm0, %v8057_v0  ;;  %7620 = vmatprep.mubr.msk.bf16.mxu0 %vm8059_vm0, %v8057_v0 }
 0x3fe   : > { %v7310_v15 = vpop.f32.mrf.mxu1  ;;  %v7370_v50 = vpop.f32.mrf.mxu0 }
 0x3ff   : > { %v3993_v35 = vsel %vm1183_vm5, %v3990_v3, %v3992_v21  ;;  %v4284_v4 = vsel %vm1479_vm6, %v4281_v44, %v4283_v29 }
 0x400   : > { %v4027_v9 = vadd.f32 %v3993_v35, %v3732_v60  ;;  %v9436_v48 = vadd.f32 %v4284_v4, %v4025_v17  ;;  %v3909_v11 = vpop.f32.mrf.mxu1  ;;  %v4202_v40 = vpop.f32.mrf.mxu0 }
 0x401   : > { %v3994_v46 = vrot.slane %v3909_v11, 3  ;;  %v4285_v51 = vrot.slane %v4202_v40, 1 }
 0x402   : > { %v7311_v16 = vpop.f32.mrf.mxu1  ;;  %v7371_v1 = vpop.f32.mrf.mxu0 }
 0x403   : > { %v3995_v23 = vsel %vm1183_vm5, %v3992_v21, %v3994_v46  ;;  %v4286_v7 = vsel %vm1479_vm6, %v4283_v29, %v4285_v51  ;;  %v7921_v16 = vld [vmem:[#allocation2 + $0x10] sm:$0xff]  }
 0x404   : > { %v4028_v59 = vadd.f32 %v3995_v23, %v3733_v57  ;;  %v9441_v8 = vadd.f32 %v4286_v7, %v4026_v24  ;;  %v3914_v32 = vpop.f32.mrf.mxu1  ;;  %v4207_v45 = vpop.f32.mrf.mxu0  ;;  %7561 = vmatmul.mubr.bf16.gmra.mxu1 %v9443_v30  ;;  %7621 = vmatmul.mubr.bf16.gmra.mxu0 %v9443_v30 }
 0x405   : > { %v3996_v54 = vrot.slane %v3914_v32, 3  ;;  %v4287_v6 = vrot.slane %v4207_v45, 1  ;;  %7640 = vmatprep.mubr.msk.bf16.mxu1 %vm8059_vm0, %v8057_v0 }
 0x406   : > { %v7314_v61 = vpop.f32.mrf.mxu1  ;;  %v7374_v36 = vpop.f32.mrf.mxu0 }
 0x407   : > { %v3997_v52 = vsel %vm1183_vm5, %v3994_v46, %v3996_v54  ;;  %v4288_v38 = vsel %vm1479_vm6, %v4285_v51, %v4287_v6 }
 0x408   : > { %v4029_v39 = vadd.f32 %v3997_v52, %v3734_v2  ;;  %v9452_v58 = vadd.f32 %v4288_v38, %v4027_v9  ;;  %v3917_v31 = vpop.f32.mrf.mxu1  ;;  %v4210_v17 = vpop.f32.mrf.mxu0 }
 0x409   : > { %v4289_v12 = vrot.slane %v4210_v17, 1 }
 0x40a   : > { %v7315_v42 = vpop.f32.mrf.mxu1  ;;  %v7375_v3 = vpop.f32.mrf.mxu0 }
 0x40b   : > { %v4290_v44 = vsel %vm1479_vm6, %v4287_v6, %v4289_v12  ;;  %v7922_v6 = vld [vmem:[#allocation2 + $0x18] sm:$0xff]  }
 0x40c   : > { %v9455_v56 = vadd.f32 %v4290_v44, %v4028_v59  ;;  %v3921_v25 = vpop.f32.mrf.mxu1  ;;  %v4215_v53 = vpop.f32.mrf.mxu0  ;;  %7641 = vmatmul.mubr.bf16.vlgmr.msra.gmra.mxu1 %v7919_v26 }
 0x40d   : > { %v4291_v43 = vrot.slane %v4215_v53, 1  ;;  %7644 = vmatprep.mubr.msk.bf16.mxu1 %vm8059_vm0, %v8057_v0 }
 0x40e   : > { %v7318_v37 = vpop.f32.mrf.mxu1  ;;  %v7378_v63 = vpop.f32.mrf.mxu0 }
 0x40f   : > { %v4292_v24 = vsel %vm1479_vm6, %v4289_v12, %v4291_v43  ;;  %v7923_v43 = vld [vmem:[#allocation2 + $0x20] sm:$0xff]  }
 0x410   : > { %v9460_v10 = vadd.f32 %v4292_v24, %v4029_v39  ;;  %v3923_v49 = vpop.f32.mrf.mxu1  ;;  %v4218_v21 = vpop.f32.mrf.mxu0 }
 0x412   : > { %v7319_v29 = vpop.f32.mrf.mxu1  ;;  %v7379_v60 = vpop.f32.mrf.mxu0 }
 0x414   : > { %v3927_v15 = vpop.f32.mrf.mxu1  ;;  %v4222_v50 = vpop.f32.mrf.mxu0  ;;  %7645 = vmatmul.mubr.bf16.gmra.mxu1 %v7920_v27 }
 0x415   : > { %7648 = vmatprep.mubr.msk.bf16.mxu1 %vm8059_vm0, %v8057_v0 }
 0x416   : > { %v7322_v35 = vpop.f32.mrf.mxu1  ;;  %v7382_v4 = vpop.f32.mrf.mxu0 }
 0x418   : > { %v3929_v9 = vpop.f32.mrf.mxu1  ;;  %v4224_v11 = vpop.f32.mrf.mxu0 }
 0x41a   : > { %v7323_v40 = vpop.f32.mrf.mxu1  ;;  %v7383_v46 = vpop.f32.mrf.mxu0 }
 0x41c   : > { %v4440_v51 = vpop.f32.mrf.mxu1  ;;  %v4735_v57 = vpop.f32.mrf.mxu0  ;;  %7649 = vmatmul.mubr.bf16.gmra.mxu1 %v7921_v16 }
 0x41d   : > { %7652 = vmatprep.mubr.msk.bf16.mxu1 %vm8059_vm0, %v8057_v0 }
 0x41e   : > { %v7402_v1 = vpop.f32.mrf.mxu1  ;;  %v7462_v62 = vpop.f32.mrf.mxu0 }
 0x41f   : > { %v7924_v1 = vld [vmem:[#allocation2 + $0x28] sm:$0xff]  }
 0x420   : > { %v4442_v23 = vpop.f32.mrf.mxu1  ;;  %v4737_v7 = vpop.f32.mrf.mxu0 }
 0x422   : > { %v7403_v59 = vpop.f32.mrf.mxu1  ;;  %v7463_v32 = vpop.f32.mrf.mxu0 }
 0x424   : > { %v4446_v45 = vpop.f32.mrf.mxu1  ;;  %v4741_v54 = vpop.f32.mrf.mxu0  ;;  %7653 = vmatmul.mubr.bf16.gmra.mxu1 %v7922_v6 }
 0x425   : > { %7656 = vmatprep.mubr.msk.bf16.mxu1 %vm8059_vm0, %v8057_v0  ;;  %v4555_v38 = vrot.slane %v4446_v45, 2  ;;  %v4850_v39 = vrot.slane %v4741_v54, 3 }
 0x426   : > { %v7406_v2 = vpop.f32.mrf.mxu1  ;;  %v7466_v61 = vpop.f32.mrf.mxu0 }
 0x428   : > { %v4449_v36 = vpop.f32.mrf.mxu1  ;;  %v4744_v52 = vpop.f32.mrf.mxu0 }
 0x429   : > { %v4556_v31 = vrot.slane %v4449_v36, 2  ;;  %v4851_v17 = vrot.slane %v4744_v52, 3 }
 0x42a   : > { %v7407_v12 = vpop.f32.mrf.mxu1  ;;  %v7467_v42 = vpop.f32.mrf.mxu0 }
 0x42b   : > { %v4557_v3 = vsel %vm887_vm4, %v4555_v38, %v4556_v31  ;;  %v4852_v44 = vsel %vm1183_vm5, %v4850_v39, %v4851_v17 }
 0x42c   : > { %v4604_v25 = vadd.f32 %v4557_v3, %v9341_v14  ;;  %v4454_v53 = vpop.f32.mrf.mxu1  ;;  %v4749_v26 = vpop.f32.mrf.mxu0  ;;  %7657 = vmatmul.mubr.bf16.gmra.mxu1 %v7923_v43  ;;  %v7925_v3 = vld [vmem:[#allocation2 + $0x30] sm:$0xff]  }
 0x42d   : > { %v4558_v37 = vrot.slane %v4454_v53, 2  ;;  %v4853_v63 = vrot.slane %v4749_v26, 3  ;;  %7660 = vmatprep.mubr.msk.bf16.mxu1 %vm8059_vm0, %v8057_v0 }
 0x42e   : > { %v9473_v24 = vadd.f32 %v4852_v44, %v4604_v25  ;;  %v7410_v49 = vpop.f32.mrf.mxu1  ;;  %v7470_v21 = vpop.f32.mrf.mxu0 }
 0x42f   : > { %v4559_v29 = vsel %vm887_vm4, %v4556_v31, %v4558_v37  ;;  %v4854_v60 = vsel %vm1183_vm5, %v4851_v17, %v4853_v63 }
 0x430   : > { %v4605_v15 = vadd.f32 %v4559_v29, %v9352_v41  ;;  %v4457_v14 = vpop.f32.mrf.mxu1  ;;  %v4752_v50 = vpop.f32.mrf.mxu0 }
 0x431   : > { %v4560_v27 = vrot.slane %v4457_v14, 2  ;;  %v4855_v35 = vrot.slane %v4752_v50, 3 }
 0x432   : > { %v9478_v4 = vadd.f32 %v4854_v60, %v4605_v15  ;;  %v7411_v9 = vpop.f32.mrf.mxu1  ;;  %v7471_v11 = vpop.f32.mrf.mxu0 }
 0x433   : > { %v4561_v40 = vsel %vm887_vm4, %v4558_v37, %v4560_v27  ;;  %v4856_v46 = vsel %vm1183_vm5, %v4853_v63, %v4855_v35 }
 0x434   : > { %v4606_v51 = vadd.f32 %v4561_v40, %v9357_v47  ;;  %v4462_v57 = vpop.f32.mrf.mxu1  ;;  %v4757_v16 = vpop.f32.mrf.mxu0  ;;  %7661 = vmatmul.mubr.bf16.gmra.mxu1 %v7924_v1  ;;  %v7926_v40 = vld [vmem:[#allocation2 + $0x38] sm:$0xff]  }
 0x435   : > { %v4562_v62 = vrot.slane %v4462_v57, 2  ;;  %v4857_v41 = vrot.slane %v4757_v16, 3  ;;  %7664 = vmatprep.mubr.msk.bf16.mxu1 %vm8059_vm0, %v8057_v0 }
 0x436   : > { %v9485_v23 = vadd.f32 %v4856_v46, %v4606_v51  ;;  %v7414_v7 = vpop.f32.mrf.mxu1  ;;  %v7474_v59 = vpop.f32.mrf.mxu0 }
 0x437   : > { %v4563_v32 = vsel %vm887_vm4, %v4560_v27, %v4562_v62  ;;  %v4858_v45 = vsel %vm1183_vm5, %v4855_v35, %v4857_v41 }
 0x438   : > { %v4607_v54 = vadd.f32 %v4563_v32, %v9368_v22  ;;  %v4465_v47 = vpop.f32.mrf.mxu1  ;;  %v4760_v6 = vpop.f32.mrf.mxu0 }
 0x439   : > { %v4564_v2 = vrot.slane %v4465_v47, 2  ;;  %v4859_v61 = vrot.slane %v4760_v6, 3 }
 0x43a   : > { %v9490_v36 = vadd.f32 %v4858_v45, %v4607_v54  ;;  %v7415_v52 = vpop.f32.mrf.mxu1  ;;  %v7475_v38 = vpop.f32.mrf.mxu0 }
 0x43b   : > { %v4565_v39 = vsel %vm887_vm4, %v4562_v62, %v4564_v2  ;;  %v4860_v31 = vsel %vm1183_vm5, %v4857_v41, %v4859_v61 }
 0x43c   : > { %v4608_v17 = vadd.f32 %v4565_v39, %v9373_v19  ;;  %v4470_v12 = vpop.f32.mrf.mxu1  ;;  %v4765_v42 = vpop.f32.mrf.mxu0  ;;  %7665 = vmatmul.mubr.bf16.gmra.mxu1 %v7925_v3 }
 0x43d   : > { %v4566_v44 = vrot.slane %v4470_v12, 2  ;;  %v4861_v22 = vrot.slane %v4765_v42, 3  ;;  %7668 = vmatprep.mubr.msk.bf16.mxu1 %vm8059_vm0, %v8057_v0 }
 0x43e   : > { %v9497_v25 = vadd.f32 %v4860_v31, %v4608_v17  ;;  %v7418_v53 = vpop.f32.mrf.mxu1  ;;  %v7478_v26 = vpop.f32.mrf.mxu0 }
 0x43f   : > { %v4567_v43 = vsel %vm887_vm4, %v4564_v2, %v4566_v44  ;;  %v4862_v37 = vsel %vm1183_vm5, %v4859_v61, %v4861_v22 }
 0x440   : > { %v4609_v63 = vadd.f32 %v4567_v43, %v9384_v55  ;;  %v4473_v19 = vpop.f32.mrf.mxu1  ;;  %v4768_v49 = vpop.f32.mrf.mxu0 }
 0x441   : > { %v4568_v21 = vrot.slane %v4473_v19, 2  ;;  %v4863_v29 = vrot.slane %v4768_v49, 3 }
 0x442   : > { %v9502_v60 = vadd.f32 %v4862_v37, %v4609_v63  ;;  %v7419_v15 = vpop.f32.mrf.mxu1  ;;  %v7479_v14 = vpop.f32.mrf.mxu0 }
 0x443   : > { %v4569_v50 = vsel %vm887_vm4, %v4566_v44, %v4568_v21  ;;  %v4864_v27 = vsel %vm1183_vm5, %v4861_v22, %v4863_v29 }
 0x444   : > { %v4610_v35 = vadd.f32 %v4569_v50, %v9389_v13  ;;  %v4478_v9 = vpop.f32.mrf.mxu1  ;;  %v4773_v11 = vpop.f32.mrf.mxu0  ;;  %7669 = vmatmul.mubr.bf16.gmra.mxu1 %v7926_v40 }
 0x445   : > { %v4570_v46 = vrot.slane %v4478_v9, 2  ;;  %v4865_v55 = vrot.slane %v4773_v11, 3  ;;  %7672 = vmatprep.mubr.msk.bf16.mxu1 %vm8059_vm0, %v8057_v0 }
 0x446   : > { %v9509_v51 = vadd.f32 %v4864_v27, %v4610_v35  ;;  %v7422_v57 = vpop.f32.mrf.mxu1  ;;  %v7482_v16 = vpop.f32.mrf.mxu0 }
 0x447   : > { %v4571_v1 = vsel %vm887_vm4, %v4568_v21, %v4570_v46  ;;  %v4866_v62 = vsel %vm1183_vm5, %v4863_v29, %v4865_v55 }
 0x448   : > { %v4611_v41 = vadd.f32 %v4571_v1, %v9400_v20  ;;  %v4481_v13 = vpop.f32.mrf.mxu1  ;;  %v4776_v7 = vpop.f32.mrf.mxu0 }
 0x449   : > { %v4572_v59 = vrot.slane %v4481_v13, 2  ;;  %v4867_v32 = vrot.slane %v4776_v7, 3 }
 0x44a   : > { %v9514_v45 = vadd.f32 %v4866_v62, %v4611_v41  ;;  %v7423_v54 = vpop.f32.mrf.mxu1  ;;  %v7483_v47 = vpop.f32.mrf.mxu0 }
 0x44b   : > { %v4573_v6 = vsel %vm887_vm4, %v4570_v46, %v4572_v59  ;;  %v4868_v2 = vsel %vm1183_vm5, %v4865_v55, %v4867_v32 }
 0x44c   : > { %v4612_v61 = vadd.f32 %v4573_v6, %v9405_v28  ;;  %v4486_v52 = vpop.f32.mrf.mxu1  ;;  %v4781_v38 = vpop.f32.mrf.mxu0  ;;  %7673 = vmatmul.mubr.bf16.gmra.mxu1 %v9407_v34 }
 0x44d   : > { %v4574_v39 = vrot.slane %v4486_v52, 2  ;;  %v4869_v20 = vrot.slane %v4781_v38, 3  ;;  %7676 = vmatprep.mubr.msk.bf16.mxu1 %vm8059_vm0, %v8057_v0 }
 0x44e   : > { %v9522_v31 = vadd.f32 %v4868_v2, %v4612_v61  ;;  %v7426_v17 = vpop.f32.mrf.mxu1  ;;  %v7486_v12 = vpop.f32.mrf.mxu0 }
 0x44f   : > { %v4575_v42 = vsel %vm887_vm4, %v4572_v59, %v4574_v39  ;;  %v4870_v3 = vsel %vm1183_vm5, %v4867_v32, %v4869_v20 }
 0x450   : > { %v4613_v44 = vadd.f32 %v4575_v42, %v9418_v33  ;;  %v4489_v28 = vpop.f32.mrf.mxu1  ;;  %v4784_v22 = vpop.f32.mrf.mxu0 }
 0x451   : > { %v4576_v53 = vrot.slane %v4489_v28, 2  ;;  %v4871_v26 = vrot.slane %v4784_v22, 3 }
 0x452   : > { %v9527_v34 = vadd.f32 %v4870_v3, %v4613_v44  ;;  %v7427_v43 = vpop.f32.mrf.mxu1  ;;  %v7487_v37 = vpop.f32.mrf.mxu0 }
 0x453   : > { %v4577_v63 = vsel %vm887_vm4, %v4574_v39, %v4576_v53  ;;  %v4872_v19 = vsel %vm1183_vm5, %v4869_v20, %v4871_v26 }
 0x454   : > { %v4614_v49 = vadd.f32 %v4577_v63, %v9423_v18  ;;  %v4494_v21 = vpop.f32.mrf.mxu1  ;;  %v4789_v29 = vpop.f32.mrf.mxu0  ;;  %7677 = vmatmul.mubr.bf16.gmra.mxu1 %v9425_v5 }
 0x455   : > { %v4578_v15 = vrot.slane %v4494_v21, 2  ;;  %v4873_v33 = vrot.slane %v4789_v29, 3  ;;  %7680 = vmatprep.mubr.msk.bf16.mxu1 %vm8059_vm0, %v8057_v0 }
 0x456   : > { %v9535_v14 = vadd.f32 %v4872_v19, %v4614_v49  ;;  %v7430_v50 = vpop.f32.mrf.mxu1  ;;  %v7490_v27 = vpop.f32.mrf.mxu0 }
 0x457   : > { %v4579_v35 = vsel %vm887_vm4, %v4576_v53, %v4578_v15  ;;  %v4874_v9 = vsel %vm1183_vm5, %v4871_v26, %v4873_v33 }
 0x458   : > { %v4615_v11 = vadd.f32 %v4579_v35, %v9436_v48  ;;  %v4497_v18 = vpop.f32.mrf.mxu1  ;;  %v4792_v40 = vpop.f32.mrf.mxu0 }
 0x459   : > { %v4580_v46 = vrot.slane %v4497_v18, 2  ;;  %v4875_v55 = vrot.slane %v4792_v40, 3 }
 0x45a   : > { %v9540_v5 = vadd.f32 %v4874_v9, %v4615_v11  ;;  %v7431_v57 = vpop.f32.mrf.mxu1  ;;  %v7491_v16 = vpop.f32.mrf.mxu0 }
 0x45b   : > { %v4581_v0 = vsel %vm887_vm4, %v4578_v15, %v4580_v46  ;;  %v4876_v1 = vsel %vm1183_vm5, %v4873_v33, %v4875_v55 }
 0x45c   : > { %v4616_v62 = vadd.f32 %v4581_v0, %v9441_v8  ;;  %v4502_v41 = vpop.f32.mrf.mxu1  ;;  %v4797_v13 = vpop.f32.mrf.mxu0  ;;  %7681 = vmatmul.mubr.bf16.gmra.mxu1 %v9443_v30 }
 0x45d   : > { %v4582_v7 = vrot.slane %v4502_v41, 2  ;;  %v4877_v48 = vrot.slane %v4797_v13, 3 }
 0x45e   : > { %v9546_v59 = vadd.f32 %v4876_v1, %v4616_v62  ;;  %v7434_v32 = vpop.f32.mrf.mxu1  ;;  %v7494_v54 = vpop.f32.mrf.mxu0 }
 0x45f   : > { %v4583_v47 = vsel %vm887_vm4, %v4580_v46, %v4582_v7  ;;  %v4878_v6 = vsel %vm1183_vm5, %v4875_v55, %v4877_v48 }
 0x460   : > { %v4617_v2 = vadd.f32 %v4583_v47, %v9452_v58  ;;  %v4505_v61 = vpop.f32.mrf.mxu1  ;;  %v4800_v52 = vpop.f32.mrf.mxu0 }
 0x461   : > { %v4584_v38 = vrot.slane %v4505_v61, 2  ;;  %v4879_v8 = vrot.slane %v4800_v52, 3 }
 0x462   : > { %v9551_v39 = vadd.f32 %v4878_v6, %v4617_v2  ;;  %v7435_v20 = vpop.f32.mrf.mxu1  ;;  %v7495_v30 = vpop.f32.mrf.mxu0 }
 0x463   : > { %v4585_v17 = vsel %vm887_vm4, %v4582_v7, %v4584_v38  ;;  %v4880_v12 = vsel %vm1183_vm5, %v4877_v48, %v4879_v8 }
 0x464   : > { %v4618_v42 = vadd.f32 %v4585_v17, %v9455_v56  ;;  %v4510_v3 = vpop.f32.mrf.mxu1  ;;  %v4805_v44 = vpop.f32.mrf.mxu0 }
 0x465   : > { %v4586_v28 = vrot.slane %v4510_v3, 2  ;;  %v4881_v22 = vrot.slane %v4805_v44, 3 }
 0x466   : > { %v9556_v53 = vadd.f32 %v4880_v12, %v4618_v42  ;;  %v7438_v58 = vpop.f32.mrf.mxu1  ;;  %v7498_v26 = vpop.f32.mrf.mxu0 }
 0x467   : > { %v4587_v43 = vsel %vm887_vm4, %v4584_v38, %v4586_v28  ;;  %v4882_v37 = vsel %vm1183_vm5, %v4879_v8, %v4881_v22 }
 0x468   : > { %v4619_v63 = vadd.f32 %v4587_v43, %v9460_v10  ;;  %v4513_v19 = vpop.f32.mrf.mxu1  ;;  %v4808_v49 = vpop.f32.mrf.mxu0 }
 0x46a   : > { %v9561_v21 = vadd.f32 %v4882_v37, %v4619_v63  ;;  %v7439_v29 = vpop.f32.mrf.mxu1  ;;  %v7499_v56 = vpop.f32.mrf.mxu0 }
 0x46c   : > { %v4517_v15 = vpop.f32.mrf.mxu1  ;;  %v4812_v33 = vpop.f32.mrf.mxu0 }
 0x46e   : > { %v7442_v50 = vpop.f32.mrf.mxu1  ;;  %v7502_v27 = vpop.f32.mrf.mxu0 }
 0x470   : > { %v4519_v35 = vpop.f32.mrf.mxu1  ;;  %v4814_v9 = vpop.f32.mrf.mxu0 }
 0x472   : > { %v7443_v11 = vpop.f32.mrf.mxu1  ;;  %v7503_v18 = vpop.f32.mrf.mxu0 }
 0x474   : > { %v5030_v40 = vpop.f32.mrf.mxu1  ;;  %v5325_v46 = vpop.f32.mrf.mxu0 }
 0x476   : > { %v7522_v55 = vpop.f32.mrf.mxu1  ;;  %v7582_v57 = vpop.f32.mrf.mxu0 }
 0x478   : > { %v5032_v16 = vpop.f32.mrf.mxu1  ;;  %v5327_v10 = vpop.f32.mrf.mxu0 }
 0x47a   : > { %v7523_v0 = vpop.f32.mrf.mxu1  ;;  %v7583_v1 = vpop.f32.mrf.mxu0 }
 0x47c   : > { %v5036_v62 = vpop.f32.mrf.mxu1  ;;  %v5331_v41 = vpop.f32.mrf.mxu0 }
 0x47e   : > { %v7526_v13 = vpop.f32.mrf.mxu1  ;;  %v7586_v7 = vpop.f32.mrf.mxu0 }
 0x480   : > { %v5038_v48 = vpop.f32.mrf.mxu1  ;;  %v5333_v32 = vpop.f32.mrf.mxu0 }
 0x482   : > { %v7527_v54 = vpop.f32.mrf.mxu1  ;;  %v7587_v47 = vpop.f32.mrf.mxu0 }
 0x484   : > { %v5042_v6 = vpop.f32.mrf.mxu1  ;;  %v5337_v2 = vpop.f32.mrf.mxu0 }
 0x485   : > { %v5145_v20 = vrot.slane %v5042_v6, 1  ;;  %v5440_v30 = vrot.slane %v5337_v2, 2 }
 0x486   : > { %v7530_v61 = vpop.f32.mrf.mxu1  ;;  %v7590_v52 = vpop.f32.mrf.mxu0 }
 0x488   : > { %v5045_v38 = vpop.f32.mrf.mxu1  ;;  %v5340_v8 = vpop.f32.mrf.mxu0 }
 0x489   : > { %v5146_v17 = vrot.slane %v5045_v38, 1  ;;  %v5441_v12 = vrot.slane %v5340_v8, 2 }
 0x48a   : > { %v7531_v42 = vpop.f32.mrf.mxu1  ;;  %v7591_v3 = vpop.f32.mrf.mxu0 }
 0x48b   : > { %v5147_v44 = vsel %vm1479_vm6, %v5145_v20, %v5146_v17  ;;  %v5442_v28 = vsel %vm887_vm4, %v5440_v30, %v5441_v12 }
 0x48c   : > { %v5194_v22 = vadd.f32 %v5147_v44, %v9473_v24  ;;  %v5050_v58 = vpop.f32.mrf.mxu1  ;;  %v5345_v26 = vpop.f32.mrf.mxu0 }
 0x48d   : > { %v5148_v43 = vrot.slane %v5050_v58, 1  ;;  %v5443_v37 = vrot.slane %v5345_v26, 2 }
 0x48e   : > { %v9566_v63 = vadd.f32 %v5442_v28, %v5194_v22  ;;  %v7534_v19 = vpop.f32.mrf.mxu1  ;;  %v7594_v49 = vpop.f32.mrf.mxu0 }
 0x48f   : > { %v5149_v29 = vsel %vm1479_vm6, %v5146_v17, %v5148_v43  ;;  %v5444_v56 = vsel %vm887_vm4, %v5441_v12, %v5443_v37 }
 0x490   : > { %v5195_v15 = vadd.f32 %v5149_v29, %v9478_v4  ;;  %v5053_v33 = vpop.f32.mrf.mxu1  ;;  %v5348_v50 = vpop.f32.mrf.mxu0 }
 0x491   : > { %v5150_v27 = vrot.slane %v5053_v33, 1  ;;  %v5445_v35 = vrot.slane %v5348_v50, 2 }
 0x492   : > { %v9571_v9 = vadd.f32 %v5444_v56, %v5195_v15  ;;  %v7535_v24 = vpop.f32.mrf.mxu1  ;;  %v7595_v11 = vpop.f32.mrf.mxu0 }
 0x493   : > { %v5151_v18 = vsel %vm1479_vm6, %v5148_v43, %v5150_v27  ;;  %v5446_v40 = vsel %vm887_vm4, %v5443_v37, %v5445_v35 }
 0x494   : > { %v5196_v46 = vadd.f32 %v5151_v18, %v9485_v23  ;;  %v5058_v55 = vpop.f32.mrf.mxu1  ;;  %v5353_v57 = vpop.f32.mrf.mxu0 }
 0x495   : > { %v5152_v16 = vrot.slane %v5058_v55, 1  ;;  %v5447_v10 = vrot.slane %v5353_v57, 2 }
 0x496   : > { %v9576_v0 = vadd.f32 %v5446_v40, %v5196_v46  ;;  %v7538_v4 = vpop.f32.mrf.mxu1  ;;  %v7598_v1 = vpop.f32.mrf.mxu0 }
 0x497   : > { %v5153_v62 = vsel %vm1479_vm6, %v5150_v27, %v5152_v16  ;;  %v5448_v41 = vsel %vm887_vm4, %v5445_v35, %v5447_v10 }
 0x498   : > { %v5197_v13 = vadd.f32 %v5153_v62, %v9490_v36  ;;  %v5061_v7 = vpop.f32.mrf.mxu1  ;;  %v5356_v48 = vpop.f32.mrf.mxu0 }
 0x499   : > { %v5154_v32 = vrot.slane %v5061_v7, 1  ;;  %v5449_v54 = vrot.slane %v5356_v48, 2 }
 0x49a   : > { %v9581_v47 = vadd.f32 %v5448_v41, %v5197_v13  ;;  %v7539_v23 = vpop.f32.mrf.mxu1  ;;  %v7599_v6 = vpop.f32.mrf.mxu0 }
 0x49b   : > { %v5155_v2 = vsel %vm1479_vm6, %v5152_v16, %v5154_v32  ;;  %v5450_v61 = vsel %vm887_vm4, %v5447_v10, %v5449_v54 }
 0x49c   : > { %v5198_v52 = vadd.f32 %v5155_v2, %v9497_v25  ;;  %v5066_v38 = vpop.f32.mrf.mxu1  ;;  %v5361_v8 = vpop.f32.mrf.mxu0 }
 0x49d   : > { %v5156_v20 = vrot.slane %v5066_v38, 1  ;;  %v5451_v30 = vrot.slane %v5361_v8, 2 }
 0x49e   : > { %v9586_v17 = vadd.f32 %v5450_v61, %v5198_v52  ;;  %v7542_v36 = vpop.f32.mrf.mxu1  ;;  %v7602_v12 = vpop.f32.mrf.mxu0 }
 0x49f   : > { %v5157_v42 = vsel %vm1479_vm6, %v5154_v32, %v5156_v20  ;;  %v5452_v3 = vsel %vm887_vm4, %v5449_v54, %v5451_v30 }
 0x4a0   : > { %v5199_v44 = vadd.f32 %v5157_v42, %v9502_v60  ;;  %v5069_v28 = vpop.f32.mrf.mxu1  ;;  %v5364_v22 = vpop.f32.mrf.mxu0 }
 0x4a1   : > { %v5158_v58 = vrot.slane %v5069_v28, 1  ;;  %v5453_v26 = vrot.slane %v5364_v22, 2 }
 0x4a2   : > { %v9591_v43 = vadd.f32 %v5452_v3, %v5199_v44  ;;  %v7543_v25 = vpop.f32.mrf.mxu1  ;;  %v7603_v37 = vpop.f32.mrf.mxu0 }
 0x4a3   : > { %v5159_v19 = vsel %vm1479_vm6, %v5156_v20, %v5158_v58  ;;  %v5454_v49 = vsel %vm887_vm4, %v5451_v30, %v5453_v26 }
 0x4a4   : > { %v5200_v29 = vadd.f32 %v5159_v19, %v9509_v51  ;;  %v5074_v56 = vpop.f32.mrf.mxu1  ;;  %v5369_v15 = vpop.f32.mrf.mxu0 }
 0x4a5   : > { %v5160_v33 = vrot.slane %v5074_v56, 1  ;;  %v5455_v50 = vrot.slane %v5369_v15, 2 }
 0x4a6   : > { %v9596_v27 = vadd.f32 %v5454_v49, %v5200_v29  ;;  %v7546_v60 = vpop.f32.mrf.mxu1  ;;  %v7606_v35 = vpop.f32.mrf.mxu0 }
 0x4a7   : > { %v5161_v24 = vsel %vm1479_vm6, %v5158_v58, %v5160_v33  ;;  %v5456_v11 = vsel %vm887_vm4, %v5453_v26, %v5455_v50 }
 0x4a8   : > { %v5201_v18 = vadd.f32 %v5161_v24, %v9514_v45  ;;  %v5077_v40 = vpop.f32.mrf.mxu1  ;;  %v5372_v46 = vpop.f32.mrf.mxu0 }
 0x4a9   : > { %v5162_v55 = vrot.slane %v5077_v40, 1  ;;  %v5457_v57 = vrot.slane %v5372_v46, 2 }
 0x4aa   : > { %v9601_v16 = vadd.f32 %v5456_v11, %v5201_v18  ;;  %v7547_v51 = vpop.f32.mrf.mxu1  ;;  %v7607_v10 = vpop.f32.mrf.mxu0 }
 0x4ab   : > { %v5163_v4 = vsel %vm1479_vm6, %v5160_v33, %v5162_v55  ;;  %v5458_v1 = vsel %vm887_vm4, %v5455_v50, %v5457_v57 }
 0x4ac   : > { %v5202_v62 = vadd.f32 %v5163_v4, %v9522_v31  ;;  %v5082_v41 = vpop.f32.mrf.mxu1  ;;  %v5377_v13 = vpop.f32.mrf.mxu0 }
 0x4ad   : > { %v5164_v7 = vrot.slane %v5082_v41, 1  ;;  %v5459_v48 = vrot.slane %v5377_v13, 2 }
 0x4ae   : > { %v9606_v32 = vadd.f32 %v5458_v1, %v5202_v62  ;;  %v7550_v45 = vpop.f32.mrf.mxu1  ;;  %v7610_v54 = vpop.f32.mrf.mxu0 }
 0x4af   : > { %v5165_v23 = vsel %vm1479_vm6, %v5162_v55, %v5164_v7  ;;  %v5460_v6 = vsel %vm887_vm4, %v5457_v57, %v5459_v48 }
 0x4b0   : > { %v5203_v2 = vadd.f32 %v5165_v23, %v9527_v34  ;;  %v5085_v61 = vpop.f32.mrf.mxu1  ;;  %v5380_v52 = vpop.f32.mrf.mxu0 }
 0x4b1   : > { %v5166_v38 = vrot.slane %v5085_v61, 1  ;;  %v5461_v8 = vrot.slane %v5380_v52, 2 }
 0x4b2   : > { %v9611_v20 = vadd.f32 %v5460_v6, %v5203_v2  ;;  %v7551_v31 = vpop.f32.mrf.mxu1  ;;  %v7611_v30 = vpop.f32.mrf.mxu0 }
 0x4b3   : > { %v5167_v36 = vsel %vm1479_vm6, %v5164_v7, %v5166_v38  ;;  %v5462_v12 = vsel %vm887_vm4, %v5459_v48, %v5461_v8 }
 0x4b4   : > { %v5204_v42 = vadd.f32 %v5167_v36, %v9535_v14  ;;  %v5090_v3 = vpop.f32.mrf.mxu1  ;;  %v5385_v44 = vpop.f32.mrf.mxu0 }
 0x4b5   : > { %v5168_v28 = vrot.slane %v5090_v3, 1  ;;  %v5463_v22 = vrot.slane %v5385_v44, 2 }
 0x4b6   : > { %v9616_v58 = vadd.f32 %v5462_v12, %v5204_v42  ;;  %v7554_v34 = vpop.f32.mrf.mxu1  ;;  %v7614_v26 = vpop.f32.mrf.mxu0 }
 0x4b7   : > { %v5169_v25 = vsel %vm1479_vm6, %v5166_v38, %v5168_v28  ;;  %v5464_v37 = vsel %vm887_vm4, %v5461_v8, %v5463_v22 }
 0x4b8   : > { %v5205_v19 = vadd.f32 %v5169_v25, %v9540_v5  ;;  %v5093_v49 = vpop.f32.mrf.mxu1  ;;  %v5388_v29 = vpop.f32.mrf.mxu0 }
 0x4b9   : > { %v5170_v56 = vrot.slane %v5093_v49, 1  ;;  %v5465_v15 = vrot.slane %v5388_v29, 2 }
 0x4ba   : > { %v9621_v33 = vadd.f32 %v5464_v37, %v5205_v19  ;;  %v7555_v14 = vpop.f32.mrf.mxu1  ;;  %v7615_v50 = vpop.f32.mrf.mxu0 }
 0x4bb   : > { %v5171_v60 = vsel %vm1479_vm6, %v5168_v28, %v5170_v56  ;;  %v5466_v35 = vsel %vm887_vm4, %v5463_v22, %v5465_v15 }
 0x4bc   : > { %v5206_v24 = vadd.f32 %v5171_v60, %v9546_v59  ;;  %v5098_v11 = vpop.f32.mrf.mxu1  ;;  %v5393_v18 = vpop.f32.mrf.mxu0 }
 0x4bd   : > { %v5172_v40 = vrot.slane %v5098_v11, 1  ;;  %v5467_v46 = vrot.slane %v5393_v18, 2 }
 0x4be   : > { %v9626_v55 = vadd.f32 %v5466_v35, %v5206_v24  ;;  %v7558_v5 = vpop.f32.mrf.mxu1  ;;  %v7618_v57 = vpop.f32.mrf.mxu0  ;;  %v9644_v35 = vld [vmem:[#allocation9] ss:$0 sm:$0xff] }
 0x4bf   : > { %v5173_v51 = vsel %vm1479_vm6, %v5170_v56, %v5172_v40  ;;  %v5468_v10 = vsel %vm887_vm4, %v5465_v15, %v5467_v46 }
 0x4c0   : > { %v5207_v4 = vadd.f32 %v5173_v51, %v9551_v39  ;;  %v5101_v1 = vpop.f32.mrf.mxu1  ;;  %v5396_v62 = vpop.f32.mrf.mxu0 }
 0x4c1   : > { %v5174_v41 = vrot.slane %v5101_v1, 1  ;;  %v5469_v13 = vrot.slane %v5396_v62, 2 }
 0x4c2   : > { %v9631_v7 = vadd.f32 %v5468_v10, %v5207_v4  ;;  %v7559_v59 = vpop.f32.mrf.mxu1  ;;  %v7619_v48 = vpop.f32.mrf.mxu0 }
 0x4c3   : > { %v5175_v45 = vsel %vm1479_vm6, %v5172_v40, %v5174_v41  ;;  %v5470_v54 = vsel %vm887_vm4, %v5467_v46, %v5469_v13 }
 0x4c4   : > { %v5208_v23 = vadd.f32 %v5175_v45, %v9556_v53  ;;  %v5106_v6 = vpop.f32.mrf.mxu1  ;;  %v5401_v2 = vpop.f32.mrf.mxu0 }
 0x4c5   : > { %v5176_v61 = vrot.slane %v5106_v6, 1  ;;  %v5471_v52 = vrot.slane %v5401_v2, 2 }
 0x4c6   : > { %v7562_v38 = vpop.f32.mrf.mxu1  ;;  %v9636_v39 = vadd.f32 %v5470_v54, %v5208_v23  ;;  %v7622_v8 = vpop.f32.mrf.mxu0 }
 0x4c7   : > { %v5177_v31 = vsel %vm1479_vm6, %v5174_v41, %v5176_v61  ;;  %v5472_v30 = vsel %vm887_vm4, %v5469_v13, %v5471_v52  ;;  %v6221_v41 = vld [vmem:[%s8201_s26] sm:$0xff]  }
 0x4c8   : > { %v5209_v36 = vadd.f32 %v5177_v31, %v9561_v21  ;;  %v5109_v12 = vpop.f32.mrf.mxu1  ;;  %v5404_v42 = vpop.f32.mrf.mxu0  ;;  %v6222_v6 = vunpack.c.l.bf16 %v6221_v41  ;;  %v6223_v38 = vunpack.c.h.bf16 %v6221_v41 }
 0x4ca   : > { %v7563_v3 = vpop.f32.mrf.mxu1  ;;  %v9641_v44 = vadd.f32 %v5472_v30, %v5209_v36  ;;  %v7623_v53 = vpop.f32.mrf.mxu0 }
 0x4cc   : > { %v5620_v28 = vpop.f32.mrf.mxu1 }
 0x4ce   : > { %v7642_v22 = vpop.f32.mrf.mxu1 }
 0x4d0   : > { %v5622_v34 = vpop.f32.mrf.mxu1 }
 0x4d2   : > { %v7643_v26 = vpop.f32.mrf.mxu1 }
 0x4d4   : > { %v5626_v25 = vpop.f32.mrf.mxu1 }
 0x4d6   : > { %v7646_v37 = vpop.f32.mrf.mxu1 }
 0x4d8   : > { %v5628_v19 = vpop.f32.mrf.mxu1 }
 0x4da   : > { %v7647_v49 = vpop.f32.mrf.mxu1 }
 0x4dc   : > { %v5632_v29 = vpop.f32.mrf.mxu1 }
 0x4dd   : > { %v5735_v14 = vrot.slane %v5632_v29, 3 }
 0x4de   : > { %v7650_v56 = vpop.f32.mrf.mxu1 }
 0x4e0   : > { %v5635_v15 = vpop.f32.mrf.mxu1 }
 0x4e1   : > { %v5736_v50 = vrot.slane %v5635_v15, 3 }
 0x4e2   : > { %v7651_v21 = vpop.f32.mrf.mxu1 }
 0x4e3   : > { %v5737_v60 = vsel %vm1183_vm5, %v5735_v14, %v5736_v50 }
 0x4e4   : > { %v5784_v24 = vadd.f32 %v5737_v60, %v9566_v63  ;;  %v5640_v11 = vpop.f32.mrf.mxu1 }
 0x4e5   : > { %v5738_v18 = vrot.slane %v5640_v11, 3 }
 0x4e6   : > { %5800 = vst [vmem:[#allocation3] sm:$0xff] %v5784_v24  ;;  %v5831_v40 = vadd.f32 %v9644_v35, %v5784_v24  ;;  %v7654_v46 = vpop.f32.mrf.mxu1 }
 0x4e7   : > { %v5739_v5 = vsel %vm1183_vm5, %v5736_v50, %v5738_v18  ;;  %v6256_v50 = vld [vmem:[%s8201_s26 + $0x8] sm:$0xff]  }
 0x4e8   : > { %v5847_v57 = vmul.f32 0.2, %v5831_v40  ;;  %v5785_v51 = vadd.f32 %v5739_v5, %v9571_v9  ;;  %v5643_v10 = vpop.f32.mrf.mxu1  ;;  %vm5839_vm15 = vcmp.ge.f32.partialorder %v5831_v40, 0.0 }
 0x4e9   : > { %v5740_v4 = vrot.slane %v5643_v10, 3  ;;  %v6227_v10 = vunpack.c.h.bf16 %v6256_v50 }
 0x4ea   : > { %5801 = vst [vmem:[#allocation3 + $0x8] sm:$0xff] %v5785_v51  ;;  %v7655_v1 = vpop.f32.mrf.mxu1  ;;  %v5855_v63 = vsel %vm5839_vm15, %v5831_v40, %v5847_v57  ;;  %v6226_v40 = vunpack.c.l.bf16 %v6256_v50 }
 0x4eb   : > { %v5741_v62 = vsel %vm1183_vm5, %v5738_v18, %v5740_v4  ;;  %v5863_v23 = vmul.f32 1.4142135, %v5855_v63 }
 0x4ec   : > { %v5786_v13 = vadd.f32 %v5741_v62, %v9576_v0  ;;  %v5648_v59 = vpop.f32.mrf.mxu1 }
 0x4ed   : > { %v5742_v48 = vrot.slane %v5648_v59, 3  ;;  %v5887_v30 = vadd.f32 %v6222_v6, %v5863_v23 }
 0x4ee   : > { %5802 = vst [vmem:[#allocation3 + $0x10] sm:$0xff] %v5786_v13  ;;  %v5832_v45 = vadd.f32 %v9644_v35, %v5786_v13  ;;  %v7658_v54 = vpop.f32.mrf.mxu1 }
 0x4ef   : > { %v5743_v9 = vsel %vm1183_vm5, %v5740_v4, %v5742_v48  ;;  %v5895_v34 = vmul.f32 0.70710677, %v5887_v30  ;;  %v6257_v30 = vld [vmem:[%s8201_s26 + $0x10] sm:$0xff]  }
 0x4f0   : > { %vm5840_vm0 = vcmp.ge.f32.partialorder %v5832_v45, 0.0  ;;  %v5848_v2 = vmul.f32 0.2, %v5832_v45  ;;  %v5787_v61 = vadd.f32 %v5743_v9, %v9581_v47  ;;  %v5651_v52 = vpop.f32.mrf.mxu1 }
 0x4f1   : > { %v5744_v8 = vrot.slane %v5651_v52, 3 }
 0x4f2   : > { %v5856_v31 = vsel %vm5840_vm0, %v5832_v45, %v5848_v2  ;;  %5803 = vst [vmem:[#allocation3 + $0x18] sm:$0xff] %v5787_v61  ;;  %v7659_v0 = vpop.f32.mrf.mxu1 }
 0x4f3   : > { %v5864_v36 = vmul.f32 1.4142135, %v5856_v31  ;;  %v5745_v12 = vsel %vm1183_vm5, %v5742_v48, %v5744_v8 }
 0x4f4   : > { %v5788_v42 = vadd.f32 %v5745_v12, %v9586_v17  ;;  %v5656_v3 = vpop.f32.mrf.mxu1 }
 0x4f5   : > { %v5888_v53 = vadd.f32 %v6223_v38, %v5864_v36  ;;  %v5746_v28 = vrot.slane %v5656_v3, 3 }
 0x4f6   : > { %5804 = vst [vmem:[#allocation3 + $0x20] sm:$0xff] %v5788_v42  ;;  %v5833_v22 = vadd.f32 %v9644_v35, %v5788_v42  ;;  %v7662_v47 = vpop.f32.mrf.mxu1 }
 0x4f7   : > { %v5896_v26 = vmul.f32 0.70710677, %v5888_v53  ;;  %v5747_v25 = vsel %vm1183_vm5, %v5744_v8, %v5746_v28 }
 0x4f8   : > { %v5849_v17 = vmul.f32 0.2, %v5833_v22  ;;  %v5789_v37 = vadd.f32 %v5747_v25, %v9591_v43  ;;  %v5659_v19 = vpop.f32.mrf.mxu1  ;;  %vm5841_vm1 = vcmp.ge.f32.partialorder %v5833_v22, 0.0  ;;  %v6231_v25 = vunpack.c.h.bf16 %v6257_v30 }
 0x4f9   : > { %v6239_v49 = vpack.c.bf16 %v5896_v26, %v5895_v34  ;;  %v5748_v29 = vrot.slane %v5659_v19, 3 }
 0x4fa   : > { %5805 = vst [vmem:[#allocation3 + $0x28] sm:$0xff] %v5789_v37  ;;  %v7663_v56 = vpop.f32.mrf.mxu1  ;;  %v5857_v14 = vsel %vm5841_vm1, %v5833_v22, %v5849_v17 }
 0x4fb   : > { %6240 = vst [vmem:[%s9665_s29] sm:$0xff] %v6239_v49   ;;  %v5749_v15 = vsel %vm1183_vm5, %v5746_v28, %v5748_v29  ;;  %v5865_v43 = vmul.f32 1.4142135, %v5857_v14  ;;  %v6230_v28 = vunpack.c.l.bf16 %v6257_v30 }
 0x4fc   : > { %v5790_v21 = vadd.f32 %v5749_v15, %v9596_v27  ;;  %v5664_v60 = vpop.f32.mrf.mxu1 }
 0x4fd   : > { %v5750_v24 = vrot.slane %v5664_v60, 3  ;;  %v5889_v62 = vadd.f32 %v6226_v40, %v5865_v43 }
 0x4fe   : > { %5806 = vst [vmem:[#allocation3 + $0x30] sm:$0xff] %v5790_v21  ;;  %v5834_v11 = vadd.f32 %v9644_v35, %v5790_v21  ;;  %v7666_v18 = vpop.f32.mrf.mxu1 }
 0x4ff   : > { %v5751_v46 = vsel %vm1183_vm5, %v5748_v29, %v5750_v24  ;;  %v5897_v23 = vmul.f32 0.70710677, %v5889_v62 }
 0x500   : > { %vm5842_vm2 = vcmp.ge.f32.partialorder %v5834_v11, 0.0  ;;  %v5850_v5 = vmul.f32 0.2, %v5834_v11  ;;  %v5791_v57 = vadd.f32 %v5751_v46, %v9601_v16  ;;  %v5667_v51 = vpop.f32.mrf.mxu1 }
 0x501   : > { %v5752_v4 = vrot.slane %v5667_v51, 3 }
 0x502   : > { %v5858_v1 = vsel %vm5842_vm2, %v5834_v11, %v5850_v5  ;;  %5807 = vst [vmem:[#allocation3 + $0x38] sm:$0xff] %v5791_v57  ;;  %v7667_v27 = vpop.f32.mrf.mxu1 }
 0x503   : > { %v5866_v63 = vmul.f32 1.4142135, %v5858_v1  ;;  %v5753_v41 = vsel %vm1183_vm5, %v5750_v24, %v5752_v4 }
 0x504   : > { %v5792_v13 = vadd.f32 %v5753_v41, %v9606_v32  ;;  %v5672_v59 = vpop.f32.mrf.mxu1 }
 0x505   : > { %v5890_v48 = vadd.f32 %v6227_v10, %v5866_v63  ;;  %v5754_v45 = vrot.slane %v5672_v59, 3  ;;  %v6258_v10 = vld [vmem:[%s8201_s26 + $0x18] sm:$0xff]  }
 0x506   : > { %5808 = vst [vmem:[#allocation3 + $0x40] sm:$0xff] %v5792_v13  ;;  %v5835_v54 = vadd.f32 %v9644_v35, %v5792_v13  ;;  %v7670_v16 = vpop.f32.mrf.mxu1  ;;  %v6234_v41 = vunpack.c.l.bf16 %v6258_v10 }
 0x507   : > { %v5898_v6 = vmul.f32 0.70710677, %v5890_v48  ;;  %v5755_v9 = vsel %vm1183_vm5, %v5752_v4, %v5754_v45 }
 0x508   : > { %v5851_v2 = vmul.f32 0.2, %v5835_v54  ;;  %v5793_v61 = vadd.f32 %v5755_v9, %v9611_v20  ;;  %v5675_v52 = vpop.f32.mrf.mxu1  ;;  %vm5843_vm3 = vcmp.ge.f32.partialorder %v5835_v54, 0.0 }
 0x509   : > { %v6244_v38 = vpack.c.bf16 %v5898_v6, %v5897_v23  ;;  %v5756_v32 = vrot.slane %v5675_v52, 3 }
 0x50a   : > { %5809 = vst [vmem:[#allocation3 + $0x48] sm:$0xff] %v5793_v61  ;;  %v7671_v8 = vpop.f32.mrf.mxu1  ;;  %v5859_v0 = vsel %vm5843_vm3, %v5835_v54, %v5851_v2  ;;  %v6235_v54 = vunpack.c.h.bf16 %v6258_v10 }
 0x50b   : > { %6259 = vst [vmem:[%s9665_s29 + $0x8] sm:$0xff] %v6244_v38   ;;  %v5757_v31 = vsel %vm1183_vm5, %v5754_v45, %v5756_v32  ;;  %v5867_v20 = vmul.f32 1.4142135, %v5859_v0 }
 0x50c   : > { %v5794_v36 = vadd.f32 %v5757_v31, %v9616_v58  ;;  %v5680_v12 = vpop.f32.mrf.mxu1 }
 0x50d   : > { %v5758_v42 = vrot.slane %v5680_v12, 3  ;;  %v5891_v19 = vadd.f32 %v6230_v28, %v5867_v20 }
 0x50e   : > { %5810 = vst [vmem:[#allocation3 + $0x50] sm:$0xff] %v5794_v36  ;;  %v5836_v3 = vadd.f32 %v9644_v35, %v5794_v36  ;;  %v7674_v53 = vpop.f32.mrf.mxu1 }
 0x50f   : > { %v5759_v22 = vsel %vm1183_vm5, %v5756_v32, %v5758_v42  ;;  %v5899_v60 = vmul.f32 0.70710677, %v5891_v19 }
 0x510   : > { %vm5844_vm4 = vcmp.ge.f32.partialorder %v5836_v3, 0.0  ;;  %v5852_v47 = vmul.f32 0.2, %v5836_v3  ;;  %v5795_v34 = vadd.f32 %v5759_v22, %v9621_v33  ;;  %v5683_v26 = vpop.f32.mrf.mxu1 }
 0x511   : > { %v5760_v17 = vrot.slane %v5683_v26, 3 }
 0x512   : > { %v5860_v37 = vsel %vm5844_vm4, %v5836_v3, %v5852_v47  ;;  %5811 = vst [vmem:[#allocation3 + $0x58] sm:$0xff] %v5795_v34  ;;  %v7675_v58 = vpop.f32.mrf.mxu1 }
 0x513   : > { %v5868_v49 = vmul.f32 1.4142135, %v5860_v37  ;;  %v5761_v29 = vsel %vm1183_vm5, %v5758_v42, %v5760_v17 }
 0x514   : > { %v5796_v56 = vadd.f32 %v5761_v29, %v9626_v55  ;;  %v5688_v15 = vpop.f32.mrf.mxu1 }
 0x515   : > { %v5892_v14 = vadd.f32 %v6231_v25, %v5868_v49  ;;  %v5762_v50 = vrot.slane %v5688_v15, 3 }
 0x516   : > { %5812 = vst [vmem:[#allocation3 + $0x60] sm:$0xff] %v5796_v56  ;;  %v5837_v21 = vadd.f32 %v9644_v35, %v5796_v56  ;;  %v7678_v33 = vpop.f32.mrf.mxu1 }
 0x517   : > { %v5900_v24 = vmul.f32 0.70710677, %v5892_v14  ;;  %v5763_v11 = vsel %vm1183_vm5, %v5760_v17, %v5762_v50 }
 0x518   : > { %v5853_v18 = vmul.f32 0.2, %v5837_v21  ;;  %v5797_v43 = vadd.f32 %v5763_v11, %v9631_v7  ;;  %v5691_v40 = vpop.f32.mrf.mxu1  ;;  %vm5845_vm6 = vcmp.ge.f32.partialorder %v5837_v21, 0.0 }
 0x519   : > { %v6249_v46 = vpack.c.bf16 %v5900_v24, %v5899_v60  ;;  %v5764_v55 = vrot.slane %v5691_v40, 3 }
 0x51a   : > { %5813 = vst [vmem:[#allocation3 + $0x68] sm:$0xff] %v5797_v43  ;;  %v7679_v5 = vpop.f32.mrf.mxu1  ;;  %v5861_v51 = vsel %vm5845_vm6, %v5837_v21, %v5853_v18 }
 0x51b   : > { %6260 = vst [vmem:[%s9665_s29 + $0x10] sm:$0xff] %v6249_v46   ;;  %v5765_v57 = vsel %vm1183_vm5, %v5762_v50, %v5764_v55  ;;  %v5869_v7 = vmul.f32 1.4142135, %v5861_v51 }
 0x51c   : > { %v5798_v4 = vadd.f32 %v5765_v57, %v9636_v39  ;;  %v5696_v1 = vpop.f32.mrf.mxu1 }
 0x51d   : > { %v5766_v27 = vrot.slane %v5696_v1, 3  ;;  %v5893_v23 = vadd.f32 %v6234_v41, %v5869_v7 }
 0x51e   : > { %5814 = vst [vmem:[#allocation3 + $0x70] sm:$0xff] %v5798_v4  ;;  %v5838_v62 = vadd.f32 %v9644_v35, %v5798_v4  ;;  %v7682_v63 = vpop.f32.mrf.mxu1 }
 0x51f   : > { %v5767_v13 = vsel %vm1183_vm5, %v5764_v55, %v5766_v27  ;;  %v5901_v2 = vmul.f32 0.70710677, %v5893_v23 }
 0x520   : > { %vm5846_vm7 = vcmp.ge.f32.partialorder %v5838_v62, 0.0  ;;  %v5854_v59 = vmul.f32 0.2, %v5838_v62  ;;  %v5799_v48 = vadd.f32 %v5767_v13, %v9641_v44  ;;  %v5699_v45 = vpop.f32.mrf.mxu1 }
 0x522   : > { %v5862_v16 = vsel %vm5846_vm7, %v5838_v62, %v5854_v59  ;;  %5815 = vst [vmem:[#allocation3 + $0x78] sm:$0xff] %v5799_v48  ;;  %v7683_v39 = vpop.f32.mrf.mxu1 }
 0x523   : > { %v5870_v6 = vmul.f32 1.4142135, %v5862_v16 }
 0x525   : > { %v5894_v9 = vadd.f32 %v6235_v54, %v5870_v6 }
 0x527   : > { %v5902_v35 = vmul.f32 0.70710677, %v5894_v9 }
 0x529   : > { %v6254_v61 = vpack.c.bf16 %v5902_v35, %v5901_v2 }
 0x52b   : > { %6261 = vst [vmem:[%s9665_s29 + $0x18] sm:$0xff] %v6254_v61  }
 0x52c PF: > { %s18_s18 = sadd.s32 1, %s8049_s18  }
 0x52d   : > { %p15_p3 = scmp.ge.s32.totalorder %s18_s18, 4  }
 0x52f   :  { %17 = sbr.rel (!%p15_p3) target bundleno = 3 (0x3), region = 105 }
 0x534   :  { %5940 = vsyncpa [#allocation5], 1 }
 0x535   :  { %5942 = vsyncpa [#allocation5 + $0x1], 1 }
 0x536   :  { %5943 = vsyncpa [#allocation7], 1 }
 0x537   :  { %5944 = vsyncpa [#allocation10], 1 }

</bundles_post_ra>
